<compile_context>
chip_gen: v7x
topology: tpu7x:2x2x1
jax: 0.10.0
libtpu: 0.0.40
codegen_flags: <defaults>
</compile_context>

<pallas_src>
import jax
import jax.numpy as jnp
from jax import lax
from jax.experimental import pallas as pl
from jax.experimental.pallas import tpu as pltpu


def _round_up(x, m):
    return ((x + m - 1) // m) * m


def _sigmoid_via_tanh(x):
    # sigmoid(x) == 0.5 * (tanh(0.5*x) + 1): a single EUP tanh per gate instead
    # of an exp + divide lowering.
    return 0.5 * jnp.tanh(0.5 * x) + 0.5


# ----------------------------------------------------------------------------
# Fused Pallas kernel
# ----------------------------------------------------------------------------
def _tagger_kernel(
    x_ref,          # (T, Bp, Ep)       bf16  time-major padded embeddings
    wih_fb_ref,     # (Ep, 8*H1p)       bf16  fused [fwd | bwd] input projection
    b_fb_ref,       # (1, 8*H1p)        f32   fused [fwd | bwd] gate bias (b_ih+b_hh)
    whh_blk_ref,    # (2*H1p, 8*H1p)    bf16  block_diag(whh_f, whh_b)
    wih_of_ref,     # (H1p, 4*H2p)      bf16  2nd-LSTM input proj, fwd half
    wih_ob_ref,     # (H1p, 4*H2p)      bf16  2nd-LSTM input proj, bwd half
    whh_o_ref,      # (H2p, 4*H2p)      bf16
    b_o_ref,        # (1, 4*H2p)        f32
    lin_w_ref,      # (H2p, Kp)         bf16
    lin_b_ref,      # (1, Kp)           f32   (-1e30 on padded tag lanes)
    out_ref,        # (T, Bp, Kp)       f32
    gx_ref,         # (T, Bp, 8*H1p)    bf16  scratch: hoisted x@W_ih, [fwd|bwd] lanes
    gxo_ref,        # (T, Bp, 4*H2p)    f32   scratch: 2nd-LSTM gates (accumulated)
    ho_ref,         # (T, Bp, H2p)      bf16  scratch: 2nd-LSTM hidden history
):
    T, B, Ep = x_ref.shape
    H1p = whh_blk_ref.shape[0] // 2
    G1 = 4 * H1p
    H2p = whh_o_ref.shape[0]
    G2 = 4 * H2p
    Kp = lin_w_ref.shape[1]
    f32, bf16 = jnp.float32, jnp.bfloat16

    def cell(gates, c, H):
        # PyTorch gate order [i, f, g, o]; each block is whole 128-lane vregs.
        i = _sigmoid_via_tanh(gates[:, 0 * H:1 * H])
        f = _sigmoid_via_tanh(gates[:, 1 * H:2 * H])
        g = jnp.tanh(gates[:, 2 * H:3 * H])
        o = _sigmoid_via_tanh(gates[:, 3 * H:4 * H])
        c_new = f * c + i * g
        h_new = o * jnp.tanh(c_new)
        return h_new, c_new

    # ---- Stage 1: ONE fused hoisted input projection for both directions
    # (bf16 operands, f32 accumulation).
    x_flat = x_ref[...].reshape(T * B, Ep)
    gx = jnp.dot(x_flat, wih_fb_ref[...], preferred_element_type=f32) + b_fb_ref[...]
    gx_ref[...] = gx.astype(bf16).reshape(T, B, 8 * H1p)

    # Pre-fill the 2nd-LSTM gate accumulator with its bias; the fwd/bwd hidden
    # projections are accumulated into it inside the Stage-2 loop so that MXU
    # work fills the bubbles of the serial h -> gates -> h recurrence chain.
    gxo_ref[...] = jnp.broadcast_to(b_o_ref[...].reshape(1, 1, G2), (T, B, G2))

    # Hoist weights out of the time loops (no per-step reloads).
    whh_blk = whh_blk_ref[...]
    wih_of = wih_of_ref[...]
    wih_ob = wih_ob_ref[...]

    # ---- Stage 2: fused bidirectional recurrence.
    # One (Bp, 2*H1p) x (2*H1p, 8*H1p) bf16 matmul per step (block-diag W_hh);
    # backward direction handled by indexing time T-1-t (no reversed copies).
    # T is a trace-time constant (small) so a static Python loop fully unrolls.
    # TODO(synk): for long sequences, switch to a time-blocked grid + fori_loop
    # and (on v7x) split fwd/bwd across the two TensorCores via core_map +
    # VMEM_SHARED, with a core barrier before the second LSTM.
    h_cat = jnp.zeros((B, 2 * H1p), bf16)      # [h_fwd | h_bwd] MXU operand
    c_f = jnp.zeros((B, H1p), f32)
    c_b = jnp.zeros((B, H1p), f32)
    for t in range(T):
        tb = T - 1 - t
        g = jnp.dot(h_cat, whh_blk, preferred_element_type=f32)        # (B, 8*H1p)
        g_f = g[:, :G1] + gx_ref[t].astype(f32)[:, :G1]
        g_b = g[:, G1:] + gx_ref[tb].astype(f32)[:, G1:]
        h_f, c_f = cell(g_f, c_f, H1p)
        h_b, c_b = cell(g_b, c_b, H1p)
        h_f_bf = h_f.astype(bf16)
        h_b_bf = h_b.astype(bf16)
        # Fold the 2nd-LSTM input projection under the recurrence (off the
        # critical h->h path, fills otherwise-dead MXU cycles).
        gxo_ref[t] = gxo_ref[t] + jnp.dot(h_f_bf, wih_of, preferred_element_type=f32)
        gxo_ref[tb] = gxo_ref[tb] + jnp.dot(h_b_bf, wih_ob, preferred_element_type=f32)
        h_cat = jnp.concatenate([h_f_bf, h_b_bf], axis=-1)

    # ---- Stage 3: second (unidirectional) LSTM over the accumulated gates.
    # TODO(synk): explicit MXU weight residency (matmul_push_rhs once per W_hh,
    # matmul_acc_lhs per step) left out; revisit on v6e if the per-step weight
    # re-push shows up in the bundle dump.
    whh_o = whh_o_ref[...]
    h_o = jnp.zeros((B, H2p), f32)
    c_o = jnp.zeros((B, H2p), f32)
    for t in range(T):
        g_o = gxo_ref[t] + jnp.dot(h_o.astype(bf16), whh_o, preferred_element_type=f32)
        h_o, c_o = cell(g_o, c_o, H2p)
        ho_ref[t] = h_o.astype(bf16)

    # ---- Stage 4: linear + softmax on the flattened (T*B, H2p) slab.
    # Padded tag lanes carry a -1e30 bias, so exp() kills them under softmax.
    logits = (
        jnp.dot(ho_ref[...].reshape(T * B, H2p), lin_w_ref[...],
                preferred_element_type=f32)
        + lin_b_ref[...]
    )
    m = jnp.max(logits, axis=-1, keepdims=True)
    e = jnp.exp(logits - m)
    denom = jnp.sum(e, axis=-1, keepdims=True)
    # Exact reciprocal keeps row sums at 1 to f32 rounding; switch to
    # approx=True if ~1e-3 row-sum error is acceptable downstream.
    inv = pl.reciprocal(denom, approx=False)
    out_ref[...] = (e * inv).reshape(T, B, Kp)


# ----------------------------------------------------------------------------
# Weight repacking helpers (PyTorch layout -> padded, transposed kernel layout)
# ----------------------------------------------------------------------------
def _pad_gate_matrix(w, H, H_pad):
    """Gate-stacked (4H, in) PyTorch weight -> (in, 4*H_pad), each gate block at a
    128-aligned lane offset, padded lanes zero."""
    w = jnp.asarray(w, jnp.float32)
    out = jnp.zeros((w.shape[1], 4 * H_pad), jnp.float32)
    for g in range(4):
        out = out.at[:, g * H_pad:g * H_pad + H].set(w[g * H:(g + 1) * H, :].T)
    return out


def _pad_rows(m, rows_pad):
    return jnp.zeros((rows_pad, m.shape[1]), m.dtype).at[: m.shape[0], :].set(m)


def _pad_gate_bias(b_ih, b_hh, H, H_pad):
    b = jnp.asarray(b_ih, jnp.float32) + jnp.asarray(b_hh, jnp.float32)
    out = jnp.zeros((1, 4 * H_pad), jnp.float32)
    for g in range(4):
        out = out.at[0, g * H_pad:g * H_pad + H].set(b[g * H:(g + 1) * H])
    return out


# ----------------------------------------------------------------------------
# Model wrapper
# ----------------------------------------------------------------------------
class LSTMTaggerPallas:
    def __init__(self, embedding_dim, hidden_dim, vocab_size, tagset_size, key):
        self.E, self.H, self.V, self.K = embedding_dim, hidden_dim, vocab_size, tagset_size
        H1, H2 = hidden_dim, 2 * hidden_dim
        ks = jax.random.split(key, 16)
        u = lambda k, shape, s: jax.random.uniform(k, shape, jnp.float32, -s, s)
        sH = 1.0 / (H1 ** 0.5)
        s2H = 1.0 / (H2 ** 0.5)

        # Embedding table (stands in for word_embed_weight).
        self.embed = jax.random.normal(ks[0], (vocab_size, embedding_dim), jnp.float32)

        # Raw PyTorch-layout parameters (also used by the pure-JAX reference check).
        self.p_fwd = dict(w_ih=u(ks[1], (4 * H1, embedding_dim), sH),
                          w_hh=u(ks[2], (4 * H1, H1), sH),
                          b_ih=u(ks[3], (4 * H1,), sH),
                          b_hh=u(ks[4], (4 * H1,), sH))
        self.p_bwd = dict(w_ih=u(ks[5], (4 * H1, embedding_dim), sH),
                          w_hh=u(ks[6], (4 * H1, H1), sH),
                          b_ih=u(ks[7], (4 * H1,), sH),
                          b_hh=u(ks[8], (4 * H1,), sH))
        self.p_out = dict(w_ih=u(ks[9], (4 * H2, H2), s2H),
                          w_hh=u(ks[10], (4 * H2, H2), s2H),
                          b_ih=u(ks[11], (4 * H2,), s2H),
                          b_hh=u(ks[12], (4 * H2,), s2H))
        self.lin_w = u(ks[13], (tagset_size, H2), s2H)
        self.lin_b = u(ks[14], (tagset_size,), s2H)

        # ---- padded / repacked kernel parameters (computed once) ----
        self.Ep = _round_up(embedding_dim, 128)
        self.H1p = _round_up(H1, 128)
        self.H2p = _round_up(H2, 128)
        self.Kp = _round_up(tagset_size, 128)
        bf16 = jnp.bfloat16

        # Fused fwd|bwd input projection (one Stage-1 matmul), bf16 MXU operands.
        wih_f = _pad_rows(_pad_gate_matrix(self.p_fwd["w_ih"], H1, self.H1p), self.Ep)
        wih_b = _pad_rows(_pad_gate_matrix(self.p_bwd["w_ih"], H1, self.H1p), self.Ep)
        self.k_wih_fb = jnp.concatenate([wih_f, wih_b], axis=1).astype(bf16)
        b_f = _pad_gate_bias(self.p_fwd["b_ih"], self.p_fwd["b_hh"], H1, self.H1p)
        b_b = _pad_gate_bias(self.p_bwd["b_ih"], self.p_bwd["b_hh"], H1, self.H1p)
        self.k_b_fb = jnp.concatenate([b_f, b_b], axis=1)               # f32

        # Block-diagonal recurrent weight: one K=2*H1p matmul per step.
        whh_f = _pad_rows(_pad_gate_matrix(self.p_fwd["w_hh"], H1, self.H1p), self.H1p)
        whh_b = _pad_rows(_pad_gate_matrix(self.p_bwd["w_hh"], H1, self.H1p), self.H1p)
        blk = jnp.zeros((2 * self.H1p, 8 * self.H1p), jnp.float32)
        blk = blk.at[:self.H1p, :4 * self.H1p].set(whh_f)
        blk = blk.at[self.H1p:, 4 * self.H1p:].set(whh_b)
        self.k_whh_blk = blk.astype(bf16)

        # Second LSTM (input split into fwd/bwd halves; accumulated in-kernel).
        w_ih_o = jnp.asarray(self.p_out["w_ih"], jnp.float32)
        self.k_wih_of = _pad_rows(_pad_gate_matrix(w_ih_o[:, :H1], H2, self.H2p),
                                  self.H1p).astype(bf16)
        self.k_wih_ob = _pad_rows(_pad_gate_matrix(w_ih_o[:, H1:], H2, self.H2p),
                                  self.H1p).astype(bf16)
        self.k_whh_o = _pad_rows(_pad_gate_matrix(self.p_out["w_hh"], H2, self.H2p),
                                 self.H2p).astype(bf16)
        self.k_b_o = _pad_gate_bias(self.p_out["b_ih"], self.p_out["b_hh"], H2, self.H2p)

        self.k_lin_w = (jnp.zeros((self.H2p, self.Kp), jnp.float32)
                        .at[:H2, :tagset_size]
                        .set(jnp.asarray(self.lin_w, jnp.float32).T)).astype(bf16)
        self.k_lin_b = (jnp.full((1, self.Kp), -1e30, jnp.float32)
                        .at[0, :tagset_size].set(jnp.asarray(self.lin_b, jnp.float32)))

    def __call__(self, sentence, lengths=None):
        # sentence: (B, T) int32 token ids.  `lengths` is unused by the PyTorch
        # forward (no pack_padded_sequence), so it is unused here too.
        B, T = sentence.shape
        Bp = _round_up(B, 8)

        embeds = jnp.take(self.embed, sentence, axis=0)             # (B, T, E)
        # TODO(synk): training-mode Dropout(0.5) omitted; forward treated as eval (identity).
        # TODO(synk): at real sizes move the gather/transpose/pad in-kernel
        # (PrefetchScalarGridSpec token ids + in-kernel embedding row gather) to
        # drop the extra HBM passes / XLA launches before the fused kernel.
        x = jnp.transpose(embeds, (1, 0, 2)).astype(jnp.float32)    # (T, B, E) time-major
        x = jnp.pad(x, ((0, 0), (0, Bp - B), (0, self.Ep - self.E)))
        x = x.astype(jnp.bfloat16)                                  # bf16 MXU operand

        operands = (x,
                    self.k_wih_fb, self.k_b_fb, self.k_whh_blk,
                    self.k_wih_of, self.k_wih_ob, self.k_whh_o, self.k_b_o,
                    self.k_lin_w, self.k_lin_b)
        scratch = [
            pltpu.VMEM((T, Bp, 8 * self.H1p), jnp.bfloat16),   # hoisted gates [fwd|bwd]
            pltpu.VMEM((T, Bp, 4 * self.H2p), jnp.float32),    # 2nd-LSTM gate accumulator
            pltpu.VMEM((T, Bp, self.H2p), jnp.bfloat16),       # 2nd-LSTM hidden history
        ]

        # VMEM budget derived from the actual footprint (2x headroom for
        # compiler temporaries), capped at 48 MiB for v7x's 64 MiB per-core VMEM.
        # TODO(synk): for long T, time-block the hoisted-gate scratch (grid over
        # T chunks) so scratch no longer scales with full sequence length.
        scratch_bytes = (T * Bp * 8 * self.H1p * 2
                         + T * Bp * 4 * self.H2p * 4
                         + T * Bp * self.H2p * 2)
        operand_bytes = sum(int(a.size) * a.dtype.itemsize for a in operands)
        out_bytes = T * Bp * self.Kp * 4
        vmem_limit = int(min(48 * 2 ** 20,
                             max(8 * 2 ** 20,
                                 2 * (scratch_bytes + operand_bytes + out_bytes))))

        vmem = pl.BlockSpec(memory_space=pltpu.MemorySpace.VMEM)
        out = pl.pallas_call(
            _tagger_kernel,
            out_shape=jax.ShapeDtypeStruct((T, Bp, self.Kp), jnp.float32),
            in_specs=[vmem] * len(operands),
            out_specs=vmem,
            scratch_shapes=scratch,
            compiler_params=pltpu.CompilerParams(vmem_limit_bytes=vmem_limit),
        )(*operands)
        # (T, Bp, Kp) -> (B, T, K)
        return jnp.transpose(out, (1, 0, 2))[:B, :, : self.K]


# ----------------------------------------------------------------------------
# Pure-JAX reference (for correctness check only)
# ----------------------------------------------------------------------------
def _ref_lstm(x_tbe, w_ih, w_hh, b_ih, b_hh):
    H = w_hh.shape[1]
    B = x_tbe.shape[1]

    def step(carry, x_t):
        h, c = carry
        gates = x_t @ w_ih.T + h @ w_hh.T + b_ih + b_hh
        i = jax.nn.sigmoid(gates[:, 0 * H:1 * H])
        f = jax.nn.sigmoid(gates[:, 1 * H:2 * H])
        g = jnp.tanh(gates[:, 2 * H:3 * H])
        o = jax.nn.sigmoid(gates[:, 3 * H:4 * H])
        c = f * c + i * g
        h = o * jnp.tanh(c)
        return (h, c), h

    init = (jnp.zeros((B, H), jnp.float32), jnp.zeros((B, H), jnp.float32))
    _, hs = lax.scan(step, init, x_tbe)
    return hs


def _ref_forward(model, sentence):
    emb = jnp.take(model.embed, sentence, axis=0)
    x = jnp.transpose(emb, (1, 0, 2)).astype(jnp.float32)
    hf = _ref_lstm(x, **model.p_fwd)
    hb = _ref_lstm(x[::-1], **model.p_bwd)[::-1]
    ho = _ref_lstm(jnp.concatenate([hf, hb], axis=-1), **model.p_out)
    logits = jnp.einsum("tbh,kh->tbk", ho, model.lin_w) + model.lin_b
    return jnp.transpose(jax.nn.softmax(logits, axis=-1), (1, 0, 2))


if __name__ == "__main__":
    key = jax.random.PRNGKey(0)
    k_tok, k_model = jax.random.split(key)

    B, T = 2, 8
    embedding_dim, hidden_dim, vocab_size, tagset_size = 32, 32, 50, 8

    model = LSTMTaggerPallas(embedding_dim, hidden_dim, vocab_size, tagset_size, k_model)
    sentence = jax.random.randint(k_tok, (B, T), 0, vocab_size, dtype=jnp.int32)
    lengths = [T] * B

    tag_scores = jax.block_until_ready(model(sentence, lengths))

    assert tag_scores.shape == (B, T, tagset_size)
    # softmax rows must sum to 1
    assert jnp.allclose(jnp.sum(tag_scores, axis=-1), 1.0, atol=1e-5)

    # Cross-check against a pure-JAX f32 reference (tolerance covers bf16 MXU
    # operands with f32 accumulation).
    ref = jax.block_until_ready(_ref_forward(model, sentence))
    max_err = float(jnp.max(jnp.abs(tag_scores - ref)))
    assert max_err < 3e-2, f"mismatch vs reference: {max_err}"

    print("KERNEL_OK")
</pallas_src>

<mosaic_0001>
module attributes {stable_mosaic.version = 11 : i64} {
  func.func @_tagger_kernel(%arg0: memref<8x8x128xbf16, #tpu.memory_space<vmem>>, %arg1: memref<128x1024xbf16, #tpu.memory_space<vmem>>, %arg2: memref<1x1024xf32, #tpu.memory_space<vmem>>, %arg3: memref<256x1024xbf16, #tpu.memory_space<vmem>>, %arg4: memref<128x512xbf16, #tpu.memory_space<vmem>>, %arg5: memref<128x512xbf16, #tpu.memory_space<vmem>>, %arg6: memref<128x512xbf16, #tpu.memory_space<vmem>>, %arg7: memref<1x512xf32, #tpu.memory_space<vmem>>, %arg8: memref<128x128xbf16, #tpu.memory_space<vmem>>, %arg9: memref<1x128xf32, #tpu.memory_space<vmem>>, %arg10: memref<8x8x128xf32, #tpu.memory_space<vmem>>, %arg11: memref<8x8x1024xbf16, #tpu.memory_space<vmem>>, %arg12: memref<8x8x512xf32, #tpu.memory_space<vmem>>, %arg13: memref<8x8x128xbf16, #tpu.memory_space<vmem>>) attributes {dimension_semantics = [], scalar_prefetch = 0 : i64, scratch_operands = 3 : i64, tpu.core_type = #tpu.core_type<tc>} {
    %c0 = arith.constant 0 : index
    %c0_0 = arith.constant 0 : index
    %c0_1 = arith.constant 0 : index
    %0 = vector.load %arg0[%c0, %c0_0, %c0_1] : memref<8x8x128xbf16, #tpu.memory_space<vmem>>, vector<8x8x128xbf16>
    %1 = vector.shape_cast %0 : vector<8x8x128xbf16> to vector<64x128xbf16>
    %c0_2 = arith.constant 0 : index
    %c0_3 = arith.constant 0 : index
    %2 = vector.load %arg1[%c0_2, %c0_3] : memref<128x1024xbf16, #tpu.memory_space<vmem>>, vector<128x1024xbf16>
    %cst = arith.constant dense<0.000000e+00> : vector<64x1024xf32>
    %3 = tpu.matmul %1, %2, %cst {dimension_numbers = #tpu.dot_dimension_numbers<[1], [0], [0], [1], [0, 0, 1, 1], [], []>} : vector<64x128xbf16>, vector<128x1024xbf16>, vector<64x1024xf32> -> vector<64x1024xf32>
    %c0_4 = arith.constant 0 : index
    %c0_5 = arith.constant 0 : index
    %4 = vector.load %arg2[%c0_4, %c0_5] : memref<1x1024xf32, #tpu.memory_space<vmem>>, vector<1x1024xf32>
    %5 = vector.broadcast %4 : vector<1x1024xf32> to vector<64x1024xf32>
    %6 = arith.addf %3, %5 : vector<64x1024xf32>
    %7 = arith.truncf %6 : vector<64x1024xf32> to vector<64x1024xbf16>
    %8 = vector.shape_cast %7 : vector<64x1024xbf16> to vector<8x8x1024xbf16>
    %c0_6 = arith.constant 0 : index
    %c0_7 = arith.constant 0 : index
    %c0_8 = arith.constant 0 : index
    %9 = vector.load %arg11[%c0_6, %c0_7, %c0_8] : memref<8x8x1024xbf16, #tpu.memory_space<vmem>>, vector<8x8x1024xbf16>
    tpu.vector_store %arg11[%c0_6, %c0_7, %c0_8], %8 {strides = array<i32>} : memref<8x8x1024xbf16, #tpu.memory_space<vmem>>, vector<8x8x1024xbf16>,
    %c0_9 = arith.constant 0 : index
    %c0_10 = arith.constant 0 : index
    %10 = vector.load %arg7[%c0_9, %c0_10] : memref<1x512xf32, #tpu.memory_space<vmem>>, vector<1x512xf32>
    %11 = vector.shape_cast %10 : vector<1x512xf32> to vector<1x1x512xf32>
    %12 = vector.shape_cast %11 : vector<1x1x512xf32> to vector<1x1x512xf32>
    %13 = vector.broadcast %12 : vector<1x1x512xf32> to vector<8x8x512xf32>
    %c0_11 = arith.constant 0 : index
    %c0_12 = arith.constant 0 : index
    %c0_13 = arith.constant 0 : index
    %14 = vector.load %arg12[%c0_11, %c0_12, %c0_13] : memref<8x8x512xf32, #tpu.memory_space<vmem>>, vector<8x8x512xf32>
    tpu.vector_store %arg12[%c0_11, %c0_12, %c0_13], %13 {strides = array<i32>} : memref<8x8x512xf32, #tpu.memory_space<vmem>>, vector<8x8x512xf32>,
    %c0_14 = arith.constant 0 : index
    %c0_15 = arith.constant 0 : index
    %15 = vector.load %arg3[%c0_14, %c0_15] : memref<256x1024xbf16, #tpu.memory_space<vmem>>, vector<256x1024xbf16>
    %c0_16 = arith.constant 0 : index
    %c0_17 = arith.constant 0 : index
    %16 = vector.load %arg4[%c0_16, %c0_17] : memref<128x512xbf16, #tpu.memory_space<vmem>>, vector<128x512xbf16>
    %c0_18 = arith.constant 0 : index
    %c0_19 = arith.constant 0 : index
    %17 = vector.load %arg5[%c0_18, %c0_19] : memref<128x512xbf16, #tpu.memory_space<vmem>>, vector<128x512xbf16>
    %cst_20 = arith.constant 0.000000e+00 : bf16
    %18 = vector.broadcast %cst_20 : bf16 to vector<8x256xbf16>
    %cst_21 = arith.constant 0.000000e+00 : f32
    %19 = vector.broadcast %cst_21 : f32 to vector<8x128xf32>
    %cst_22 = arith.constant 0.000000e+00 : f32
    %20 = vector.broadcast %cst_22 : f32 to vector<8x128xf32>
    %cst_23 = arith.constant dense<0.000000e+00> : vector<8x1024xf32>
    %21 = tpu.matmul %18, %15, %cst_23 {dimension_numbers = #tpu.dot_dimension_numbers<[1], [0], [0], [1], [0, 0, 1, 1], [], []>} : vector<8x256xbf16>, vector<256x1024xbf16>, vector<8x1024xf32> -> vector<8x1024xf32>
    %22 = vector.extract_strided_slice %21 {offsets = [0, 0], sizes = [8, 512], strides = [1, 1]} : vector<8x1024xf32> to vector<8x512xf32>
    %c0_24 = arith.constant 0 : index
    %c0_25 = arith.constant 0 : index
    %c0_26 = arith.constant 0 : index
    %23 = vector.load %arg11[%c0_24, %c0_25, %c0_26] : memref<8x8x1024xbf16, #tpu.memory_space<vmem>>, vector<1x8x1024xbf16>
    %24 = vector.shape_cast %23 : vector<1x8x1024xbf16> to vector<8x1024xbf16>
    %25 = arith.extf %24 : vector<8x1024xbf16> to vector<8x1024xf32>
    %26 = vector.extract_strided_slice %25 {offsets = [0, 0], sizes = [8, 512], strides = [1, 1]} : vector<8x1024xf32> to vector<8x512xf32>
    %27 = arith.addf %22, %26 : vector<8x512xf32>
    %28 = vector.extract_strided_slice %21 {offsets = [0, 512], sizes = [8, 512], strides = [1, 1]} : vector<8x1024xf32> to vector<8x512xf32>
    %c7 = arith.constant 7 : index
    %c0_27 = arith.constant 0 : index
    %c0_28 = arith.constant 0 : index
    %29 = vector.load %arg11[%c7, %c0_27, %c0_28] : memref<8x8x1024xbf16, #tpu.memory_space<vmem>>, vector<1x8x1024xbf16>
    %30 = vector.shape_cast %29 : vector<1x8x1024xbf16> to vector<8x1024xbf16>
    %31 = arith.extf %30 : vector<8x1024xbf16> to vector<8x1024xf32>
    %32 = vector.extract_strided_slice %31 {offsets = [0, 512], sizes = [8, 512], strides = [1, 1]} : vector<8x1024xf32> to vector<8x512xf32>
    %33 = arith.addf %28, %32 : vector<8x512xf32>
    %34 = vector.extract_strided_slice %27 {offsets = [0, 0], sizes = [8, 128], strides = [1, 1]} : vector<8x512xf32> to vector<8x128xf32>
    %cst_29 = arith.constant 5.000000e-01 : f32
    %35 = vector.broadcast %cst_29 : f32 to vector<8x128xf32>
    %36 = arith.mulf %35, %34 : vector<8x128xf32>
    %37 = math.tanh %36 : vector<8x128xf32>
    %cst_30 = arith.constant 5.000000e-01 : f32
    %38 = vector.broadcast %cst_30 : f32 to vector<8x128xf32>
    %39 = arith.mulf %38, %37 : vector<8x128xf32>
    %cst_31 = arith.constant 5.000000e-01 : f32
    %40 = vector.broadcast %cst_31 : f32 to vector<8x128xf32>
    %41 = arith.addf %39, %40 : vector<8x128xf32>
    %42 = vector.extract_strided_slice %27 {offsets = [0, 128], sizes = [8, 128], strides = [1, 1]} : vector<8x512xf32> to vector<8x128xf32>
    %cst_32 = arith.constant 5.000000e-01 : f32
    %43 = vector.broadcast %cst_32 : f32 to vector<8x128xf32>
    %44 = arith.mulf %43, %42 : vector<8x128xf32>
    %45 = math.tanh %44 : vector<8x128xf32>
    %cst_33 = arith.constant 5.000000e-01 : f32
    %46 = vector.broadcast %cst_33 : f32 to vector<8x128xf32>
    %47 = arith.mulf %46, %45 : vector<8x128xf32>
    %cst_34 = arith.constant 5.000000e-01 : f32
    %48 = vector.broadcast %cst_34 : f32 to vector<8x128xf32>
    %49 = arith.addf %47, %48 : vector<8x128xf32>
    %50 = vector.extract_strided_slice %27 {offsets = [0, 256], sizes = [8, 128], strides = [1, 1]} : vector<8x512xf32> to vector<8x128xf32>
    %51 = math.tanh %50 : vector<8x128xf32>
    %52 = vector.extract_strided_slice %27 {offsets = [0, 384], sizes = [8, 128], strides = [1, 1]} : vector<8x512xf32> to vector<8x128xf32>
    %cst_35 = arith.constant 5.000000e-01 : f32
    %53 = vector.broadcast %cst_35 : f32 to vector<8x128xf32>
    %54 = arith.mulf %53, %52 : vector<8x128xf32>
    %55 = math.tanh %54 : vector<8x128xf32>
    %cst_36 = arith.constant 5.000000e-01 : f32
    %56 = vector.broadcast %cst_36 : f32 to vector<8x128xf32>
    %57 = arith.mulf %56, %55 : vector<8x128xf32>
    %cst_37 = arith.constant 5.000000e-01 : f32
    %58 = vector.broadcast %cst_37 : f32 to vector<8x128xf32>
    %59 = arith.addf %57, %58 : vector<8x128xf32>
    %60 = arith.mulf %49, %19 : vector<8x128xf32>
    %61 = arith.mulf %41, %51 : vector<8x128xf32>
    %62 = arith.addf %60, %61 : vector<8x128xf32>
    %63 = math.tanh %62 : vector<8x128xf32>
    %64 = arith.mulf %59, %63 : vector<8x128xf32>
    %65 = vector.extract_strided_slice %33 {offsets = [0, 0], sizes = [8, 128], strides = [1, 1]} : vector<8x512xf32> to vector<8x128xf32>
    %cst_38 = arith.constant 5.000000e-01 : f32
    %66 = vector.broadcast %cst_38 : f32 to vector<8x128xf32>
    %67 = arith.mulf %66, %65 : vector<8x128xf32>
    %68 = math.tanh %67 : vector<8x128xf32>
    %cst_39 = arith.constant 5.000000e-01 : f32
    %69 = vector.broadcast %cst_39 : f32 to vector<8x128xf32>
    %70 = arith.mulf %69, %68 : vector<8x128xf32>
    %cst_40 = arith.constant 5.000000e-01 : f32
    %71 = vector.broadcast %cst_40 : f32 to vector<8x128xf32>
    %72 = arith.addf %70, %71 : vector<8x128xf32>
    %73 = vector.extract_strided_slice %33 {offsets = [0, 128], sizes = [8, 128], strides = [1, 1]} : vector<8x512xf32> to vector<8x128xf32>
    %cst_41 = arith.constant 5.000000e-01 : f32
    %74 = vector.broadcast %cst_41 : f32 to vector<8x128xf32>
    %75 = arith.mulf %74, %73 : vector<8x128xf32>
    %76 = math.tanh %75 : vector<8x128xf32>
    %cst_42 = arith.constant 5.000000e-01 : f32
    %77 = vector.broadcast %cst_42 : f32 to vector<8x128xf32>
    %78 = arith.mulf %77, %76 : vector<8x128xf32>
    %cst_43 = arith.constant 5.000000e-01 : f32
    %79 = vector.broadcast %cst_43 : f32 to vector<8x128xf32>
    %80 = arith.addf %78, %79 : vector<8x128xf32>
    %81 = vector.extract_strided_slice %33 {offsets = [0, 256], sizes = [8, 128], strides = [1, 1]} : vector<8x512xf32> to vector<8x128xf32>
    %82 = math.tanh %81 : vector<8x128xf32>
    %83 = vector.extract_strided_slice %33 {offsets = [0, 384], sizes = [8, 128], strides = [1, 1]} : vector<8x512xf32> to vector<8x128xf32>
    %cst_44 = arith.constant 5.000000e-01 : f32
    %84 = vector.broadcast %cst_44 : f32 to vector<8x128xf32>
    %85 = arith.mulf %84, %83 : vector<8x128xf32>
    %86 = math.tanh %85 : vector<8x128xf32>
    %cst_45 = arith.constant 5.000000e-01 : f32
    %87 = vector.broadcast %cst_45 : f32 to vector<8x128xf32>
    %88 = arith.mulf %87, %86 : vector<8x128xf32>
    %cst_46 = arith.constant 5.000000e-01 : f32
    %89 = vector.broadcast %cst_46 : f32 to vector<8x128xf32>
    %90 = arith.addf %88, %89 : vector<8x128xf32>
    %91 = arith.mulf %80, %20 : vector<8x128xf32>
    %92 = arith.mulf %72, %82 : vector<8x128xf32>
    %93 = arith.addf %91, %92 : vector<8x128xf32>
    %94 = math.tanh %93 : vector<8x128xf32>
    %95 = arith.mulf %90, %94 : vector<8x128xf32>
    %96 = arith.truncf %64 : vector<8x128xf32> to vector<8x128xbf16>
    %97 = arith.truncf %95 : vector<8x128xf32> to vector<8x128xbf16>
    %c0_47 = arith.constant 0 : index
    %c0_48 = arith.constant 0 : index
    %c0_49 = arith.constant 0 : index
    %98 = vector.load %arg12[%c0_47, %c0_48, %c0_49] : memref<8x8x512xf32, #tpu.memory_space<vmem>>, vector<1x8x512xf32>
    %99 = vector.shape_cast %98 : vector<1x8x512xf32> to vector<8x512xf32>
    %cst_50 = arith.constant dense<0.000000e+00> : vector<8x512xf32>
    %100 = tpu.matmul %96, %16, %cst_50 {dimension_numbers = #tpu.dot_dimension_numbers<[1], [0], [0], [1], [0, 0, 1, 1], [], []>} : vector<8x128xbf16>, vector<128x512xbf16>, vector<8x512xf32> -> vector<8x512xf32>
    %101 = arith.addf %99, %100 : vector<8x512xf32>
    %c0_51 = arith.constant 0 : index
    %c0_52 = arith.constant 0 : index
    %c0_53 = arith.constant 0 : index
    %102 = vector.load %arg12[%c0_51, %c0_52, %c0_53] : memref<8x8x512xf32, #tpu.memory_space<vmem>>, vector<1x8x512xf32>
    %103 = vector.shape_cast %102 : vector<1x8x512xf32> to vector<8x512xf32>
    %104 = vector.shape_cast %101 : vector<8x512xf32> to vector<1x8x512xf32>
    tpu.vector_store %arg12[%c0_51, %c0_52, %c0_53], %104 {strides = array<i32>} : memref<8x8x512xf32, #tpu.memory_space<vmem>>, vector<1x8x512xf32>,
    %c7_54 = arith.constant 7 : index
    %c0_55 = arith.constant 0 : index
    %c0_56 = arith.constant 0 : index
    %105 = vector.load %arg12[%c7_54, %c0_55, %c0_56] : memref<8x8x512xf32, #tpu.memory_space<vmem>>, vector<1x8x512xf32>
    %106 = vector.shape_cast %105 : vector<1x8x512xf32> to vector<8x512xf32>
    %cst_57 = arith.constant dense<0.000000e+00> : vector<8x512xf32>
    %107 = tpu.matmul %97, %17, %cst_57 {dimension_numbers = #tpu.dot_dimension_numbers<[1], [0], [0], [1], [0, 0, 1, 1], [], []>} : vector<8x128xbf16>, vector<128x512xbf16>, vector<8x512xf32> -> vector<8x512xf32>
    %108 = arith.addf %106, %107 : vector<8x512xf32>
    %c7_58 = arith.constant 7 : index
    %c0_59 = arith.constant 0 : index
    %c0_60 = arith.constant 0 : index
    %109 = vector.load %arg12[%c7_58, %c0_59, %c0_60] : memref<8x8x512xf32, #tpu.memory_space<vmem>>, vector<1x8x512xf32>
    %110 = vector.shape_cast %109 : vector<1x8x512xf32> to vector<8x512xf32>
    %111 = vector.shape_cast %108 : vector<8x512xf32> to vector<1x8x512xf32>
    tpu.vector_store %arg12[%c7_58, %c0_59, %c0_60], %111 {strides = array<i32>} : memref<8x8x512xf32, #tpu.memory_space<vmem>>, vector<1x8x512xf32>,
    %112 = tpu.concatenate %96, %97 in 1 : vector<8x128xbf16>, vector<8x128xbf16> -> vector<8x256xbf16>
    %cst_61 = arith.constant dense<0.000000e+00> : vector<8x1024xf32>
    %113 = tpu.matmul %112, %15, %cst_61 {dimension_numbers = #tpu.dot_dimension_numbers<[1], [0], [0], [1], [0, 0, 1, 1], [], []>} : vector<8x256xbf16>, vector<256x1024xbf16>, vector<8x1024xf32> -> vector<8x1024xf32>
    %114 = vector.extract_strided_slice %113 {offsets = [0, 0], sizes = [8, 512], strides = [1, 1]} : vector<8x1024xf32> to vector<8x512xf32>
    %c1 = arith.constant 1 : index
    %c0_62 = arith.constant 0 : index
    %c0_63 = arith.constant 0 : index
    %115 = vector.load %arg11[%c1, %c0_62, %c0_63] : memref<8x8x1024xbf16, #tpu.memory_space<vmem>>, vector<1x8x1024xbf16>
    %116 = vector.shape_cast %115 : vector<1x8x1024xbf16> to vector<8x1024xbf16>
    %117 = arith.extf %116 : vector<8x1024xbf16> to vector<8x1024xf32>
    %118 = vector.extract_strided_slice %117 {offsets = [0, 0], sizes = [8, 512], strides = [1, 1]} : vector<8x1024xf32> to vector<8x512xf32>
    %119 = arith.addf %114, %118 : vector<8x512xf32>
    %120 = vector.extract_strided_slice %113 {offsets = [0, 512], sizes = [8, 512], strides = [1, 1]} : vector<8x1024xf32> to vector<8x512xf32>
    %c6 = arith.constant 6 : index
    %c0_64 = arith.constant 0 : index
    %c0_65 = arith.constant 0 : index
    %121 = vector.load %arg11[%c6, %c0_64, %c0_65] : memref<8x8x1024xbf16, #tpu.memory_space<vmem>>, vector<1x8x1024xbf16>
    %122 = vector.shape_cast %121 : vector<1x8x1024xbf16> to vector<8x1024xbf16>
    %123 = arith.extf %122 : vector<8x1024xbf16> to vector<8x1024xf32>
    %124 = vector.extract_strided_slice %123 {offsets = [0, 512], sizes = [8, 512], strides = [1, 1]} : vector<8x1024xf32> to vector<8x512xf32>
    %125 = arith.addf %120, %124 : vector<8x512xf32>
    %126 = vector.extract_strided_slice %119 {offsets = [0, 0], sizes = [8, 128], strides = [1, 1]} : vector<8x512xf32> to vector<8x128xf32>
    %cst_66 = arith.constant 5.000000e-01 : f32
    %127 = vector.broadcast %cst_66 : f32 to vector<8x128xf32>
    %128 = arith.mulf %127, %126 : vector<8x128xf32>
    %129 = math.tanh %128 : vector<8x128xf32>
    %cst_67 = arith.constant 5.000000e-01 : f32
    %130 = vector.broadcast %cst_67 : f32 to vector<8x128xf32>
    %131 = arith.mulf %130, %129 : vector<8x128xf32>
    %cst_68 = arith.constant 5.000000e-01 : f32
    %132 = vector.broadcast %cst_68 : f32 to vector<8x128xf32>
    %133 = arith.addf %131, %132 : vector<8x128xf32>
    %134 = vector.extract_strided_slice %119 {offsets = [0, 128], sizes = [8, 128], strides = [1, 1]} : vector<8x512xf32> to vector<8x128xf32>
    %cst_69 = arith.constant 5.000000e-01 : f32
    %135 = vector.broadcast %cst_69 : f32 to vector<8x128xf32>
    %136 = arith.mulf %135, %134 : vector<8x128xf32>
    %137 = math.tanh %136 : vector<8x128xf32>
    %cst_70 = arith.constant 5.000000e-01 : f32
    %138 = vector.broadcast %cst_70 : f32 to vector<8x128xf32>
    %139 = arith.mulf %138, %137 : vector<8x128xf32>
    %cst_71 = arith.constant 5.000000e-01 : f32
    %140 = vector.broadcast %cst_71 : f32 to vector<8x128xf32>
    %141 = arith.addf %139, %140 : vector<8x128xf32>
    %142 = vector.extract_strided_slice %119 {offsets = [0, 256], sizes = [8, 128], strides = [1, 1]} : vector<8x512xf32> to vector<8x128xf32>
    %143 = math.tanh %142 : vector<8x128xf32>
    %144 = vector.extract_strided_slice %119 {offsets = [0, 384], sizes = [8, 128], strides = [1, 1]} : vector<8x512xf32> to vector<8x128xf32>
    %cst_72 = arith.constant 5.000000e-01 : f32
    %145 = vector.broadcast %cst_72 : f32 to vector<8x128xf32>
    %146 = arith.mulf %145, %144 : vector<8x128xf32>
    %147 = math.tanh %146 : vector<8x128xf32>
    %cst_73 = arith.constant 5.000000e-01 : f32
    %148 = vector.broadcast %cst_73 : f32 to vector<8x128xf32>
    %149 = arith.mulf %148, %147 : vector<8x128xf32>
    %cst_74 = arith.constant 5.000000e-01 : f32
    %150 = vector.broadcast %cst_74 : f32 to vector<8x128xf32>
    %151 = arith.addf %149, %150 : vector<8x128xf32>
    %152 = arith.mulf %141, %62 : vector<8x128xf32>
    %153 = arith.mulf %133, %143 : vector<8x128xf32>
    %154 = arith.addf %152, %153 : vector<8x128xf32>
    %155 = math.tanh %154 : vector<8x128xf32>
    %156 = arith.mulf %151, %155 : vector<8x128xf32>
    %157 = vector.extract_strided_slice %125 {offsets = [0, 0], sizes = [8, 128], strides = [1, 1]} : vector<8x512xf32> to vector<8x128xf32>
    %cst_75 = arith.constant 5.000000e-01 : f32
    %158 = vector.broadcast %cst_75 : f32 to vector<8x128xf32>
    %159 = arith.mulf %158, %157 : vector<8x128xf32>
    %160 = math.tanh %159 : vector<8x128xf32>
    %cst_76 = arith.constant 5.000000e-01 : f32
    %161 = vector.broadcast %cst_76 : f32 to vector<8x128xf32>
    %162 = arith.mulf %161, %160 : vector<8x128xf32>
    %cst_77 = arith.constant 5.000000e-01 : f32
    %163 = vector.broadcast %cst_77 : f32 to vector<8x128xf32>
    %164 = arith.addf %162, %163 : vector<8x128xf32>
    %165 = vector.extract_strided_slice %125 {offsets = [0, 128], sizes = [8, 128], strides = [1, 1]} : vector<8x512xf32> to vector<8x128xf32>
    %cst_78 = arith.constant 5.000000e-01 : f32
    %166 = vector.broadcast %cst_78 : f32 to vector<8x128xf32>
    %167 = arith.mulf %166, %165 : vector<8x128xf32>
    %168 = math.tanh %167 : vector<8x128xf32>
    %cst_79 = arith.constant 5.000000e-01 : f32
    %169 = vector.broadcast %cst_79 : f32 to vector<8x128xf32>
    %170 = arith.mulf %169, %168 : vector<8x128xf32>
    %cst_80 = arith.constant 5.000000e-01 : f32
    %171 = vector.broadcast %cst_80 : f32 to vector<8x128xf32>
    %172 = arith.addf %170, %171 : vector<8x128xf32>
    %173 = vector.extract_strided_slice %125 {offsets = [0, 256], sizes = [8, 128], strides = [1, 1]} : vector<8x512xf32> to vector<8x128xf32>
    %174 = math.tanh %173 : vector<8x128xf32>
    %175 = vector.extract_strided_slice %125 {offsets = [0, 384], sizes = [8, 128], strides = [1, 1]} : vector<8x512xf32> to vector<8x128xf32>
    %cst_81 = arith.constant 5.000000e-01 : f32
    %176 = vector.broadcast %cst_81 : f32 to vector<8x128xf32>
    %177 = arith.mulf %176, %175 : vector<8x128xf32>
    %178 = math.tanh %177 : vector<8x128xf32>
    %cst_82 = arith.constant 5.000000e-01 : f32
    %179 = vector.broadcast %cst_82 : f32 to vector<8x128xf32>
    %180 = arith.mulf %179, %178 : vector<8x128xf32>
    %cst_83 = arith.constant 5.000000e-01 : f32
    %181 = vector.broadcast %cst_83 : f32 to vector<8x128xf32>
    %182 = arith.addf %180, %181 : vector<8x128xf32>
    %183 = arith.mulf %172, %93 : vector<8x128xf32>
    %184 = arith.mulf %164, %174 : vector<8x128xf32>
    %185 = arith.addf %183, %184 : vector<8x128xf32>
    %186 = math.tanh %185 : vector<8x128xf32>
    %187 = arith.mulf %182, %186 : vector<8x128xf32>
    %188 = arith.truncf %156 : vector<8x128xf32> to vector<8x128xbf16>
    %189 = arith.truncf %187 : vector<8x128xf32> to vector<8x128xbf16>
    %c1_84 = arith.constant 1 : index
    %c0_85 = arith.constant 0 : index
    %c0_86 = arith.constant 0 : index
    %190 = vector.load %arg12[%c1_84, %c0_85, %c0_86] : memref<8x8x512xf32, #tpu.memory_space<vmem>>, vector<1x8x512xf32>
    %191 = vector.shape_cast %190 : vector<1x8x512xf32> to vector<8x512xf32>
    %cst_87 = arith.constant dense<0.000000e+00> : vector<8x512xf32>
    %192 = tpu.matmul %188, %16, %cst_87 {dimension_numbers = #tpu.dot_dimension_numbers<[1], [0], [0], [1], [0, 0, 1, 1], [], []>} : vector<8x128xbf16>, vector<128x512xbf16>, vector<8x512xf32> -> vector<8x512xf32>
    %193 = arith.addf %191, %192 : vector<8x512xf32>
    %c1_88 = arith.constant 1 : index
    %c0_89 = arith.constant 0 : index
    %c0_90 = arith.constant 0 : index
    %194 = vector.load %arg12[%c1_88, %c0_89, %c0_90] : memref<8x8x512xf32, #tpu.memory_space<vmem>>, vector<1x8x512xf32>
    %195 = vector.shape_cast %194 : vector<1x8x512xf32> to vector<8x512xf32>
    %196 = vector.shape_cast %193 : vector<8x512xf32> to vector<1x8x512xf32>
    tpu.vector_store %arg12[%c1_88, %c0_89, %c0_90], %196 {strides = array<i32>} : memref<8x8x512xf32, #tpu.memory_space<vmem>>, vector<1x8x512xf32>,
    %c6_91 = arith.constant 6 : index
    %c0_92 = arith.constant 0 : index
    %c0_93 = arith.constant 0 : index
    %197 = vector.load %arg12[%c6_91, %c0_92, %c0_93] : memref<8x8x512xf32, #tpu.memory_space<vmem>>, vector<1x8x512xf32>
    %198 = vector.shape_cast %197 : vector<1x8x512xf32> to vector<8x512xf32>
    %cst_94 = arith.constant dense<0.000000e+00> : vector<8x512xf32>
    %199 = tpu.matmul %189, %17, %cst_94 {dimension_numbers = #tpu.dot_dimension_numbers<[1], [0], [0], [1], [0, 0, 1, 1], [], []>} : vector<8x128xbf16>, vector<128x512xbf16>, vector<8x512xf32> -> vector<8x512xf32>
    %200 = arith.addf %198, %199 : vector<8x512xf32>
    %c6_95 = arith.constant 6 : index
    %c0_96 = arith.constant 0 : index
    %c0_97 = arith.constant 0 : index
    %201 = vector.load %arg12[%c6_95, %c0_96, %c0_97] : memref<8x8x512xf32, #tpu.memory_space<vmem>>, vector<1x8x512xf32>
    %202 = vector.shape_cast %201 : vector<1x8x512xf32> to vector<8x512xf32>
    %203 = vector.shape_cast %200 : vector<8x512xf32> to vector<1x8x512xf32>
    tpu.vector_store %arg12[%c6_95, %c0_96, %c0_97], %203 {strides = array<i32>} : memref<8x8x512xf32, #tpu.memory_space<vmem>>, vector<1x8x512xf32>,
    %204 = tpu.concatenate %188, %189 in 1 : vector<8x128xbf16>, vector<8x128xbf16> -> vector<8x256xbf16>
    %cst_98 = arith.constant dense<0.000000e+00> : vector<8x1024xf32>
    %205 = tpu.matmul %204, %15, %cst_98 {dimension_numbers = #tpu.dot_dimension_numbers<[1], [0], [0], [1], [0, 0, 1, 1], [], []>} : vector<8x256xbf16>, vector<256x1024xbf16>, vector<8x1024xf32> -> vector<8x1024xf32>
    %206 = vector.extract_strided_slice %205 {offsets = [0, 0], sizes = [8, 512], strides = [1, 1]} : vector<8x1024xf32> to vector<8x512xf32>
    %c2 = arith.constant 2 : index
    %c0_99 = arith.constant 0 : index
    %c0_100 = arith.constant 0 : index
    %207 = vector.load %arg11[%c2, %c0_99, %c0_100] : memref<8x8x1024xbf16, #tpu.memory_space<vmem>>, vector<1x8x1024xbf16>
    %208 = vector.shape_cast %207 : vector<1x8x1024xbf16> to vector<8x1024xbf16>
    %209 = arith.extf %208 : vector<8x1024xbf16> to vector<8x1024xf32>
    %210 = vector.extract_strided_slice %209 {offsets = [0, 0], sizes = [8, 512], strides = [1, 1]} : vector<8x1024xf32> to vector<8x512xf32>
    %211 = arith.addf %206, %210 : vector<8x512xf32>
    %212 = vector.extract_strided_slice %205 {offsets = [0, 512], sizes = [8, 512], strides = [1, 1]} : vector<8x1024xf32> to vector<8x512xf32>
    %c5 = arith.constant 5 : index
    %c0_101 = arith.constant 0 : index
    %c0_102 = arith.constant 0 : index
    %213 = vector.load %arg11[%c5, %c0_101, %c0_102] : memref<8x8x1024xbf16, #tpu.memory_space<vmem>>, vector<1x8x1024xbf16>
    %214 = vector.shape_cast %213 : vector<1x8x1024xbf16> to vector<8x1024xbf16>
    %215 = arith.extf %214 : vector<8x1024xbf16> to vector<8x1024xf32>
    %216 = vector.extract_strided_slice %215 {offsets = [0, 512], sizes = [8, 512], strides = [1, 1]} : vector<8x1024xf32> to vector<8x512xf32>
    %217 = arith.addf %212, %216 : vector<8x512xf32>
    %218 = vector.extract_strided_slice %211 {offsets = [0, 0], sizes = [8, 128], strides = [1, 1]} : vector<8x512xf32> to vector<8x128xf32>
    %cst_103 = arith.constant 5.000000e-01 : f32
    %219 = vector.broadcast %cst_103 : f32 to vector<8x128xf32>
    %220 = arith.mulf %219, %218 : vector<8x128xf32>
    %221 = math.tanh %220 : vector<8x128xf32>
    %cst_104 = arith.constant 5.000000e-01 : f32
    %222 = vector.broadcast %cst_104 : f32 to vector<8x128xf32>
    %223 = arith.mulf %222, %221 : vector<8x128xf32>
    %cst_105 = arith.constant 5.000000e-01 : f32
    %224 = vector.broadcast %cst_105 : f32 to vector<8x128xf32>
    %225 = arith.addf %223, %224 : vector<8x128xf32>
    %226 = vector.extract_strided_slice %211 {offsets = [0, 128], sizes = [8, 128], strides = [1, 1]} : vector<8x512xf32> to vector<8x128xf32>
    %cst_106 = arith.constant 5.000000e-01 : f32
    %227 = vector.broadcast %cst_106 : f32 to vector<8x128xf32>
    %228 = arith.mulf %227, %226 : vector<8x128xf32>
    %229 = math.tanh %228 : vector<8x128xf32>
    %cst_107 = arith.constant 5.000000e-01 : f32
    %230 = vector.broadcast %cst_107 : f32 to vector<8x128xf32>
    %231 = arith.mulf %230, %229 : vector<8x128xf32>
    %cst_108 = arith.constant 5.000000e-01 : f32
    %232 = vector.broadcast %cst_108 : f32 to vector<8x128xf32>
    %233 = arith.addf %231, %232 : vector<8x128xf32>
    %234 = vector.extract_strided_slice %211 {offsets = [0, 256], sizes = [8, 128], strides = [1, 1]} : vector<8x512xf32> to vector<8x128xf32>
    %235 = math.tanh %234 : vector<8x128xf32>
    %236 = vector.extract_strided_slice %211 {offsets = [0, 384], sizes = [8, 128], strides = [1, 1]} : vector<8x512xf32> to vector<8x128xf32>
    %cst_109 = arith.constant 5.000000e-01 : f32
    %237 = vector.broadcast %cst_109 : f32 to vector<8x128xf32>
    %238 = arith.mulf %237, %236 : vector<8x128xf32>
    %239 = math.tanh %238 : vector<8x128xf32>
    %cst_110 = arith.constant 5.000000e-01 : f32
    %240 = vector.broadcast %cst_110 : f32 to vector<8x128xf32>
    %241 = arith.mulf %240, %239 : vector<8x128xf32>
    %cst_111 = arith.constant 5.000000e-01 : f32
    %242 = vector.broadcast %cst_111 : f32 to vector<8x128xf32>
    %243 = arith.addf %241, %242 : vector<8x128xf32>
    %244 = arith.mulf %233, %154 : vector<8x128xf32>
    %245 = arith.mulf %225, %235 : vector<8x128xf32>
    %246 = arith.addf %244, %245 : vector<8x128xf32>
    %247 = math.tanh %246 : vector<8x128xf32>
    %248 = arith.mulf %243, %247 : vector<8x128xf32>
    %249 = vector.extract_strided_slice %217 {offsets = [0, 0], sizes = [8, 128], strides = [1, 1]} : vector<8x512xf32> to vector<8x128xf32>
    %cst_112 = arith.constant 5.000000e-01 : f32
    %250 = vector.broadcast %cst_112 : f32 to vector<8x128xf32>
    %251 = arith.mulf %250, %249 : vector<8x128xf32>
    %252 = math.tanh %251 : vector<8x128xf32>
    %cst_113 = arith.constant 5.000000e-01 : f32
    %253 = vector.broadcast %cst_113 : f32 to vector<8x128xf32>
    %254 = arith.mulf %253, %252 : vector<8x128xf32>
    %cst_114 = arith.constant 5.000000e-01 : f32
    %255 = vector.broadcast %cst_114 : f32 to vector<8x128xf32>
    %256 = arith.addf %254, %255 : vector<8x128xf32>
    %257 = vector.extract_strided_slice %217 {offsets = [0, 128], sizes = [8, 128], strides = [1, 1]} : vector<8x512xf32> to vector<8x128xf32>
    %cst_115 = arith.constant 5.000000e-01 : f32
    %258 = vector.broadcast %cst_115 : f32 to vector<8x128xf32>
    %259 = arith.mulf %258, %257 : vector<8x128xf32>
    %260 = math.tanh %259 : vector<8x128xf32>
    %cst_116 = arith.constant 5.000000e-01 : f32
    %261 = vector.broadcast %cst_116 : f32 to vector<8x128xf32>
    %262 = arith.mulf %261, %260 : vector<8x128xf32>
    %cst_117 = arith.constant 5.000000e-01 : f32
    %263 = vector.broadcast %cst_117 : f32 to vector<8x128xf32>
    %264 = arith.addf %262, %263 : vector<8x128xf32>
    %265 = vector.extract_strided_slice %217 {offsets = [0, 256], sizes = [8, 128], strides = [1, 1]} : vector<8x512xf32> to vector<8x128xf32>
    %266 = math.tanh %265 : vector<8x128xf32>
    %267 = vector.extract_strided_slice %217 {offsets = [0, 384], sizes = [8, 128], strides = [1, 1]} : vector<8x512xf32> to vector<8x128xf32>
    %cst_118 = arith.constant 5.000000e-01 : f32
    %268 = vector.broadcast %cst_118 : f32 to vector<8x128xf32>
    %269 = arith.mulf %268, %267 : vector<8x128xf32>
    %270 = math.tanh %269 : vector<8x128xf32>
    %cst_119 = arith.constant 5.000000e-01 : f32
    %271 = vector.broadcast %cst_119 : f32 to vector<8x128xf32>
    %272 = arith.mulf %271, %270 : vector<8x128xf32>
    %cst_120 = arith.constant 5.000000e-01 : f32
    %273 = vector.broadcast %cst_120 : f32 to vector<8x128xf32>
    %274 = arith.addf %272, %273 : vector<8x128xf32>
    %275 = arith.mulf %264, %185 : vector<8x128xf32>
    %276 = arith.mulf %256, %266 : vector<8x128xf32>
    %277 = arith.addf %275, %276 : vector<8x128xf32>
    %278 = math.tanh %277 : vector<8x128xf32>
    %279 = arith.mulf %274, %278 : vector<8x128xf32>
    %280 = arith.truncf %248 : vector<8x128xf32> to vector<8x128xbf16>
    %281 = arith.truncf %279 : vector<8x128xf32> to vector<8x128xbf16>
    %c2_121 = arith.constant 2 : index
    %c0_122 = arith.constant 0 : index
    %c0_123 = arith.constant 0 : index
    %282 = vector.load %arg12[%c2_121, %c0_122, %c0_123] : memref<8x8x512xf32, #tpu.memory_space<vmem>>, vector<1x8x512xf32>
    %283 = vector.shape_cast %282 : vector<1x8x512xf32> to vector<8x512xf32>
    %cst_124 = arith.constant dense<0.000000e+00> : vector<8x512xf32>
    %284 = tpu.matmul %280, %16, %cst_124 {dimension_numbers = #tpu.dot_dimension_numbers<[1], [0], [0], [1], [0, 0, 1, 1], [], []>} : vector<8x128xbf16>, vector<128x512xbf16>, vector<8x512xf32> -> vector<8x512xf32>
    %285 = arith.addf %283, %284 : vector<8x512xf32>
    %c2_125 = arith.constant 2 : index
    %c0_126 = arith.constant 0 : index
    %c0_127 = arith.constant 0 : index
    %286 = vector.load %arg12[%c2_125, %c0_126, %c0_127] : memref<8x8x512xf32, #tpu.memory_space<vmem>>, vector<1x8x512xf32>
    %287 = vector.shape_cast %286 : vector<1x8x512xf32> to vector<8x512xf32>
    %288 = vector.shape_cast %285 : vector<8x512xf32> to vector<1x8x512xf32>
    tpu.vector_store %arg12[%c2_125, %c0_126, %c0_127], %288 {strides = array<i32>} : memref<8x8x512xf32, #tpu.memory_space<vmem>>, vector<1x8x512xf32>,
    %c5_128 = arith.constant 5 : index
    %c0_129 = arith.constant 0 : index
    %c0_130 = arith.constant 0 : index
    %289 = vector.load %arg12[%c5_128, %c0_129, %c0_130] : memref<8x8x512xf32, #tpu.memory_space<vmem>>, vector<1x8x512xf32>
    %290 = vector.shape_cast %289 : vector<1x8x512xf32> to vector<8x512xf32>
    %cst_131 = arith.constant dense<0.000000e+00> : vector<8x512xf32>
    %291 = tpu.matmul %281, %17, %cst_131 {dimension_numbers = #tpu.dot_dimension_numbers<[1], [0], [0], [1], [0, 0, 1, 1], [], []>} : vector<8x128xbf16>, vector<128x512xbf16>, vector<8x512xf32> -> vector<8x512xf32>
    %292 = arith.addf %290, %291 : vector<8x512xf32>
    %c5_132 = arith.constant 5 : index
    %c0_133 = arith.constant 0 : index
    %c0_134 = arith.constant 0 : index
    %293 = vector.load %arg12[%c5_132, %c0_133, %c0_134] : memref<8x8x512xf32, #tpu.memory_space<vmem>>, vector<1x8x512xf32>
    %294 = vector.shape_cast %293 : vector<1x8x512xf32> to vector<8x512xf32>
    %295 = vector.shape_cast %292 : vector<8x512xf32> to vector<1x8x512xf32>
    tpu.vector_store %arg12[%c5_132, %c0_133, %c0_134], %295 {strides = array<i32>} : memref<8x8x512xf32, #tpu.memory_space<vmem>>, vector<1x8x512xf32>,
    %296 = tpu.concatenate %280, %281 in 1 : vector<8x128xbf16>, vector<8x128xbf16> -> vector<8x256xbf16>
    %cst_135 = arith.constant dense<0.000000e+00> : vector<8x1024xf32>
    %297 = tpu.matmul %296, %15, %cst_135 {dimension_numbers = #tpu.dot_dimension_numbers<[1], [0], [0], [1], [0, 0, 1, 1], [], []>} : vector<8x256xbf16>, vector<256x1024xbf16>, vector<8x1024xf32> -> vector<8x1024xf32>
    %298 = vector.extract_strided_slice %297 {offsets = [0, 0], sizes = [8, 512], strides = [1, 1]} : vector<8x1024xf32> to vector<8x512xf32>
    %c3 = arith.constant 3 : index
    %c0_136 = arith.constant 0 : index
    %c0_137 = arith.constant 0 : index
    %299 = vector.load %arg11[%c3, %c0_136, %c0_137] : memref<8x8x1024xbf16, #tpu.memory_space<vmem>>, vector<1x8x1024xbf16>
    %300 = vector.shape_cast %299 : vector<1x8x1024xbf16> to vector<8x1024xbf16>
    %301 = arith.extf %300 : vector<8x1024xbf16> to vector<8x1024xf32>
    %302 = vector.extract_strided_slice %301 {offsets = [0, 0], sizes = [8, 512], strides = [1, 1]} : vector<8x1024xf32> to vector<8x512xf32>
    %303 = arith.addf %298, %302 : vector<8x512xf32>
    %304 = vector.extract_strided_slice %297 {offsets = [0, 512], sizes = [8, 512], strides = [1, 1]} : vector<8x1024xf32> to vector<8x512xf32>
    %c4 = arith.constant 4 : index
    %c0_138 = arith.constant 0 : index
    %c0_139 = arith.constant 0 : index
    %305 = vector.load %arg11[%c4, %c0_138, %c0_139] : memref<8x8x1024xbf16, #tpu.memory_space<vmem>>, vector<1x8x1024xbf16>
    %306 = vector.shape_cast %305 : vector<1x8x1024xbf16> to vector<8x1024xbf16>
    %307 = arith.extf %306 : vector<8x1024xbf16> to vector<8x1024xf32>
    %308 = vector.extract_strided_slice %307 {offsets = [0, 512], sizes = [8, 512], strides = [1, 1]} : vector<8x1024xf32> to vector<8x512xf32>
    %309 = arith.addf %304, %308 : vector<8x512xf32>
    %310 = vector.extract_strided_slice %303 {offsets = [0, 0], sizes = [8, 128], strides = [1, 1]} : vector<8x512xf32> to vector<8x128xf32>
    %cst_140 = arith.constant 5.000000e-01 : f32
    %311 = vector.broadcast %cst_140 : f32 to vector<8x128xf32>
    %312 = arith.mulf %311, %310 : vector<8x128xf32>
    %313 = math.tanh %312 : vector<8x128xf32>
    %cst_141 = arith.constant 5.000000e-01 : f32
    %314 = vector.broadcast %cst_141 : f32 to vector<8x128xf32>
    %315 = arith.mulf %314, %313 : vector<8x128xf32>
    %cst_142 = arith.constant 5.000000e-01 : f32
    %316 = vector.broadcast %cst_142 : f32 to vector<8x128xf32>
    %317 = arith.addf %315, %316 : vector<8x128xf32>
    %318 = vector.extract_strided_slice %303 {offsets = [0, 128], sizes = [8, 128], strides = [1, 1]} : vector<8x512xf32> to vector<8x128xf32>
    %cst_143 = arith.constant 5.000000e-01 : f32
    %319 = vector.broadcast %cst_143 : f32 to vector<8x128xf32>
    %320 = arith.mulf %319, %318 : vector<8x128xf32>
    %321 = math.tanh %320 : vector<8x128xf32>
    %cst_144 = arith.constant 5.000000e-01 : f32
    %322 = vector.broadcast %cst_144 : f32 to vector<8x128xf32>
    %323 = arith.mulf %322, %321 : vector<8x128xf32>
    %cst_145 = arith.constant 5.000000e-01 : f32
    %324 = vector.broadcast %cst_145 : f32 to vector<8x128xf32>
    %325 = arith.addf %323, %324 : vector<8x128xf32>
    %326 = vector.extract_strided_slice %303 {offsets = [0, 256], sizes = [8, 128], strides = [1, 1]} : vector<8x512xf32> to vector<8x128xf32>
    %327 = math.tanh %326 : vector<8x128xf32>
    %328 = vector.extract_strided_slice %303 {offsets = [0, 384], sizes = [8, 128], strides = [1, 1]} : vector<8x512xf32> to vector<8x128xf32>
    %cst_146 = arith.constant 5.000000e-01 : f32
    %329 = vector.broadcast %cst_146 : f32 to vector<8x128xf32>
    %330 = arith.mulf %329, %328 : vector<8x128xf32>
    %331 = math.tanh %330 : vector<8x128xf32>
    %cst_147 = arith.constant 5.000000e-01 : f32
    %332 = vector.broadcast %cst_147 : f32 to vector<8x128xf32>
    %333 = arith.mulf %332, %331 : vector<8x128xf32>
    %cst_148 = arith.constant 5.000000e-01 : f32
    %334 = vector.broadcast %cst_148 : f32 to vector<8x128xf32>
    %335 = arith.addf %333, %334 : vector<8x128xf32>
    %336 = arith.mulf %325, %246 : vector<8x128xf32>
    %337 = arith.mulf %317, %327 : vector<8x128xf32>
    %338 = arith.addf %336, %337 : vector<8x128xf32>
    %339 = math.tanh %338 : vector<8x128xf32>
    %340 = arith.mulf %335, %339 : vector<8x128xf32>
    %341 = vector.extract_strided_slice %309 {offsets = [0, 0], sizes = [8, 128], strides = [1, 1]} : vector<8x512xf32> to vector<8x128xf32>
    %cst_149 = arith.constant 5.000000e-01 : f32
    %342 = vector.broadcast %cst_149 : f32 to vector<8x128xf32>
    %343 = arith.mulf %342, %341 : vector<8x128xf32>
    %344 = math.tanh %343 : vector<8x128xf32>
    %cst_150 = arith.constant 5.000000e-01 : f32
    %345 = vector.broadcast %cst_150 : f32 to vector<8x128xf32>
    %346 = arith.mulf %345, %344 : vector<8x128xf32>
    %cst_151 = arith.constant 5.000000e-01 : f32
    %347 = vector.broadcast %cst_151 : f32 to vector<8x128xf32>
    %348 = arith.addf %346, %347 : vector<8x128xf32>
    %349 = vector.extract_strided_slice %309 {offsets = [0, 128], sizes = [8, 128], strides = [1, 1]} : vector<8x512xf32> to vector<8x128xf32>
    %cst_152 = arith.constant 5.000000e-01 : f32
    %350 = vector.broadcast %cst_152 : f32 to vector<8x128xf32>
    %351 = arith.mulf %350, %349 : vector<8x128xf32>
    %352 = math.tanh %351 : vector<8x128xf32>
    %cst_153 = arith.constant 5.000000e-01 : f32
    %353 = vector.broadcast %cst_153 : f32 to vector<8x128xf32>
    %354 = arith.mulf %353, %352 : vector<8x128xf32>
    %cst_154 = arith.constant 5.000000e-01 : f32
    %355 = vector.broadcast %cst_154 : f32 to vector<8x128xf32>
    %356 = arith.addf %354, %355 : vector<8x128xf32>
    %357 = vector.extract_strided_slice %309 {offsets = [0, 256], sizes = [8, 128], strides = [1, 1]} : vector<8x512xf32> to vector<8x128xf32>
    %358 = math.tanh %357 : vector<8x128xf32>
    %359 = vector.extract_strided_slice %309 {offsets = [0, 384], sizes = [8, 128], strides = [1, 1]} : vector<8x512xf32> to vector<8x128xf32>
    %cst_155 = arith.constant 5.000000e-01 : f32
    %360 = vector.broadcast %cst_155 : f32 to vector<8x128xf32>
    %361 = arith.mulf %360, %359 : vector<8x128xf32>
    %362 = math.tanh %361 : vector<8x128xf32>
    %cst_156 = arith.constant 5.000000e-01 : f32
    %363 = vector.broadcast %cst_156 : f32 to vector<8x128xf32>
    %364 = arith.mulf %363, %362 : vector<8x128xf32>
    %cst_157 = arith.constant 5.000000e-01 : f32
    %365 = vector.broadcast %cst_157 : f32 to vector<8x128xf32>
    %366 = arith.addf %364, %365 : vector<8x128xf32>
    %367 = arith.mulf %356, %277 : vector<8x128xf32>
    %368 = arith.mulf %348, %358 : vector<8x128xf32>
    %369 = arith.addf %367, %368 : vector<8x128xf32>
    %370 = math.tanh %369 : vector<8x128xf32>
    %371 = arith.mulf %366, %370 : vector<8x128xf32>
    %372 = arith.truncf %340 : vector<8x128xf32> to vector<8x128xbf16>
    %373 = arith.truncf %371 : vector<8x128xf32> to vector<8x128xbf16>
    %c3_158 = arith.constant 3 : index
    %c0_159 = arith.constant 0 : index
    %c0_160 = arith.constant 0 : index
    %374 = vector.load %arg12[%c3_158, %c0_159, %c0_160] : memref<8x8x512xf32, #tpu.memory_space<vmem>>, vector<1x8x512xf32>
    %375 = vector.shape_cast %374 : vector<1x8x512xf32> to vector<8x512xf32>
    %cst_161 = arith.constant dense<0.000000e+00> : vector<8x512xf32>
    %376 = tpu.matmul %372, %16, %cst_161 {dimension_numbers = #tpu.dot_dimension_numbers<[1], [0], [0], [1], [0, 0, 1, 1], [], []>} : vector<8x128xbf16>, vector<128x512xbf16>, vector<8x512xf32> -> vector<8x512xf32>
    %377 = arith.addf %375, %376 : vector<8x512xf32>
    %c3_162 = arith.constant 3 : index
    %c0_163 = arith.constant 0 : index
    %c0_164 = arith.constant 0 : index
    %378 = vector.load %arg12[%c3_162, %c0_163, %c0_164] : memref<8x8x512xf32, #tpu.memory_space<vmem>>, vector<1x8x512xf32>
    %379 = vector.shape_cast %378 : vector<1x8x512xf32> to vector<8x512xf32>
    %380 = vector.shape_cast %377 : vector<8x512xf32> to vector<1x8x512xf32>
    tpu.vector_store %arg12[%c3_162, %c0_163, %c0_164], %380 {strides = array<i32>} : memref<8x8x512xf32, #tpu.memory_space<vmem>>, vector<1x8x512xf32>,
    %c4_165 = arith.constant 4 : index
    %c0_166 = arith.constant 0 : index
    %c0_167 = arith.constant 0 : index
    %381 = vector.load %arg12[%c4_165, %c0_166, %c0_167] : memref<8x8x512xf32, #tpu.memory_space<vmem>>, vector<1x8x512xf32>
    %382 = vector.shape_cast %381 : vector<1x8x512xf32> to vector<8x512xf32>
    %cst_168 = arith.constant dense<0.000000e+00> : vector<8x512xf32>
    %383 = tpu.matmul %373, %17, %cst_168 {dimension_numbers = #tpu.dot_dimension_numbers<[1], [0], [0], [1], [0, 0, 1, 1], [], []>} : vector<8x128xbf16>, vector<128x512xbf16>, vector<8x512xf32> -> vector<8x512xf32>
    %384 = arith.addf %382, %383 : vector<8x512xf32>
    %c4_169 = arith.constant 4 : index
    %c0_170 = arith.constant 0 : index
    %c0_171 = arith.constant 0 : index
    %385 = vector.load %arg12[%c4_169, %c0_170, %c0_171] : memref<8x8x512xf32, #tpu.memory_space<vmem>>, vector<1x8x512xf32>
    %386 = vector.shape_cast %385 : vector<1x8x512xf32> to vector<8x512xf32>
    %387 = vector.shape_cast %384 : vector<8x512xf32> to vector<1x8x512xf32>
    tpu.vector_store %arg12[%c4_169, %c0_170, %c0_171], %387 {strides = array<i32>} : memref<8x8x512xf32, #tpu.memory_space<vmem>>, vector<1x8x512xf32>,
    %388 = tpu.concatenate %372, %373 in 1 : vector<8x128xbf16>, vector<8x128xbf16> -> vector<8x256xbf16>
    %cst_172 = arith.constant dense<0.000000e+00> : vector<8x1024xf32>
    %389 = tpu.matmul %388, %15, %cst_172 {dimension_numbers = #tpu.dot_dimension_numbers<[1], [0], [0], [1], [0, 0, 1, 1], [], []>} : vector<8x256xbf16>, vector<256x1024xbf16>, vector<8x1024xf32> -> vector<8x1024xf32>
    %390 = vector.extract_strided_slice %389 {offsets = [0, 0], sizes = [8, 512], strides = [1, 1]} : vector<8x1024xf32> to vector<8x512xf32>
    %c4_173 = arith.constant 4 : index
    %c0_174 = arith.constant 0 : index
    %c0_175 = arith.constant 0 : index
    %391 = vector.load %arg11[%c4_173, %c0_174, %c0_175] : memref<8x8x1024xbf16, #tpu.memory_space<vmem>>, vector<1x8x1024xbf16>
    %392 = vector.shape_cast %391 : vector<1x8x1024xbf16> to vector<8x1024xbf16>
    %393 = arith.extf %392 : vector<8x1024xbf16> to vector<8x1024xf32>
    %394 = vector.extract_strided_slice %393 {offsets = [0, 0], sizes = [8, 512], strides = [1, 1]} : vector<8x1024xf32> to vector<8x512xf32>
    %395 = arith.addf %390, %394 : vector<8x512xf32>
    %396 = vector.extract_strided_slice %389 {offsets = [0, 512], sizes = [8, 512], strides = [1, 1]} : vector<8x1024xf32> to vector<8x512xf32>
    %c3_176 = arith.constant 3 : index
    %c0_177 = arith.constant 0 : index
    %c0_178 = arith.constant 0 : index
    %397 = vector.load %arg11[%c3_176, %c0_177, %c0_178] : memref<8x8x1024xbf16, #tpu.memory_space<vmem>>, vector<1x8x1024xbf16>
    %398 = vector.shape_cast %397 : vector<1x8x1024xbf16> to vector<8x1024xbf16>
    %399 = arith.extf %398 : vector<8x1024xbf16> to vector<8x1024xf32>
    %400 = vector.extract_strided_slice %399 {offsets = [0, 512], sizes = [8, 512], strides = [1, 1]} : vector<8x1024xf32> to vector<8x512xf32>
    %401 = arith.addf %396, %400 : vector<8x512xf32>
    %402 = vector.extract_strided_slice %395 {offsets = [0, 0], sizes = [8, 128], strides = [1, 1]} : vector<8x512xf32> to vector<8x128xf32>
    %cst_179 = arith.constant 5.000000e-01 : f32
    %403 = vector.broadcast %cst_179 : f32 to vector<8x128xf32>
    %404 = arith.mulf %403, %402 : vector<8x128xf32>
    %405 = math.tanh %404 : vector<8x128xf32>
    %cst_180 = arith.constant 5.000000e-01 : f32
    %406 = vector.broadcast %cst_180 : f32 to vector<8x128xf32>
    %407 = arith.mulf %406, %405 : vector<8x128xf32>
    %cst_181 = arith.constant 5.000000e-01 : f32
    %408 = vector.broadcast %cst_181 : f32 to vector<8x128xf32>
    %409 = arith.addf %407, %408 : vector<8x128xf32>
    %410 = vector.extract_strided_slice %395 {offsets = [0, 128], sizes = [8, 128], strides = [1, 1]} : vector<8x512xf32> to vector<8x128xf32>
    %cst_182 = arith.constant 5.000000e-01 : f32
    %411 = vector.broadcast %cst_182 : f32 to vector<8x128xf32>
    %412 = arith.mulf %411, %410 : vector<8x128xf32>
    %413 = math.tanh %412 : vector<8x128xf32>
    %cst_183 = arith.constant 5.000000e-01 : f32
    %414 = vector.broadcast %cst_183 : f32 to vector<8x128xf32>
    %415 = arith.mulf %414, %413 : vector<8x128xf32>
    %cst_184 = arith.constant 5.000000e-01 : f32
    %416 = vector.broadcast %cst_184 : f32 to vector<8x128xf32>
    %417 = arith.addf %415, %416 : vector<8x128xf32>
    %418 = vector.extract_strided_slice %395 {offsets = [0, 256], sizes = [8, 128], strides = [1, 1]} : vector<8x512xf32> to vector<8x128xf32>
    %419 = math.tanh %418 : vector<8x128xf32>
    %420 = vector.extract_strided_slice %395 {offsets = [0, 384], sizes = [8, 128], strides = [1, 1]} : vector<8x512xf32> to vector<8x128xf32>
    %cst_185 = arith.constant 5.000000e-01 : f32
    %421 = vector.broadcast %cst_185 : f32 to vector<8x128xf32>
    %422 = arith.mulf %421, %420 : vector<8x128xf32>
    %423 = math.tanh %422 : vector<8x128xf32>
    %cst_186 = arith.constant 5.000000e-01 : f32
    %424 = vector.broadcast %cst_186 : f32 to vector<8x128xf32>
    %425 = arith.mulf %424, %423 : vector<8x128xf32>
    %cst_187 = arith.constant 5.000000e-01 : f32
    %426 = vector.broadcast %cst_187 : f32 to vector<8x128xf32>
    %427 = arith.addf %425, %426 : vector<8x128xf32>
    %428 = arith.mulf %417, %338 : vector<8x128xf32>
    %429 = arith.mulf %409, %419 : vector<8x128xf32>
    %430 = arith.addf %428, %429 : vector<8x128xf32>
    %431 = math.tanh %430 : vector<8x128xf32>
    %432 = arith.mulf %427, %431 : vector<8x128xf32>
    %433 = vector.extract_strided_slice %401 {offsets = [0, 0], sizes = [8, 128], strides = [1, 1]} : vector<8x512xf32> to vector<8x128xf32>
    %cst_188 = arith.constant 5.000000e-01 : f32
    %434 = vector.broadcast %cst_188 : f32 to vector<8x128xf32>
    %435 = arith.mulf %434, %433 : vector<8x128xf32>
    %436 = math.tanh %435 : vector<8x128xf32>
    %cst_189 = arith.constant 5.000000e-01 : f32
    %437 = vector.broadcast %cst_189 : f32 to vector<8x128xf32>
    %438 = arith.mulf %437, %436 : vector<8x128xf32>
    %cst_190 = arith.constant 5.000000e-01 : f32
    %439 = vector.broadcast %cst_190 : f32 to vector<8x128xf32>
    %440 = arith.addf %438, %439 : vector<8x128xf32>
    %441 = vector.extract_strided_slice %401 {offsets = [0, 128], sizes = [8, 128], strides = [1, 1]} : vector<8x512xf32> to vector<8x128xf32>
    %cst_191 = arith.constant 5.000000e-01 : f32
    %442 = vector.broadcast %cst_191 : f32 to vector<8x128xf32>
    %443 = arith.mulf %442, %441 : vector<8x128xf32>
    %444 = math.tanh %443 : vector<8x128xf32>
    %cst_192 = arith.constant 5.000000e-01 : f32
    %445 = vector.broadcast %cst_192 : f32 to vector<8x128xf32>
    %446 = arith.mulf %445, %444 : vector<8x128xf32>
    %cst_193 = arith.constant 5.000000e-01 : f32
    %447 = vector.broadcast %cst_193 : f32 to vector<8x128xf32>
    %448 = arith.addf %446, %447 : vector<8x128xf32>
    %449 = vector.extract_strided_slice %401 {offsets = [0, 256], sizes = [8, 128], strides = [1, 1]} : vector<8x512xf32> to vector<8x128xf32>
    %450 = math.tanh %449 : vector<8x128xf32>
    %451 = vector.extract_strided_slice %401 {offsets = [0, 384], sizes = [8, 128], strides = [1, 1]} : vector<8x512xf32> to vector<8x128xf32>
    %cst_194 = arith.constant 5.000000e-01 : f32
    %452 = vector.broadcast %cst_194 : f32 to vector<8x128xf32>
    %453 = arith.mulf %452, %451 : vector<8x128xf32>
    %454 = math.tanh %453 : vector<8x128xf32>
    %cst_195 = arith.constant 5.000000e-01 : f32
    %455 = vector.broadcast %cst_195 : f32 to vector<8x128xf32>
    %456 = arith.mulf %455, %454 : vector<8x128xf32>
    %cst_196 = arith.constant 5.000000e-01 : f32
    %457 = vector.broadcast %cst_196 : f32 to vector<8x128xf32>
    %458 = arith.addf %456, %457 : vector<8x128xf32>
    %459 = arith.mulf %448, %369 : vector<8x128xf32>
    %460 = arith.mulf %440, %450 : vector<8x128xf32>
    %461 = arith.addf %459, %460 : vector<8x128xf32>
    %462 = math.tanh %461 : vector<8x128xf32>
    %463 = arith.mulf %458, %462 : vector<8x128xf32>
    %464 = arith.truncf %432 : vector<8x128xf32> to vector<8x128xbf16>
    %465 = arith.truncf %463 : vector<8x128xf32> to vector<8x128xbf16>
    %c4_197 = arith.constant 4 : index
    %c0_198 = arith.constant 0 : index
    %c0_199 = arith.constant 0 : index
    %466 = vector.load %arg12[%c4_197, %c0_198, %c0_199] : memref<8x8x512xf32, #tpu.memory_space<vmem>>, vector<1x8x512xf32>
    %467 = vector.shape_cast %466 : vector<1x8x512xf32> to vector<8x512xf32>
    %cst_200 = arith.constant dense<0.000000e+00> : vector<8x512xf32>
    %468 = tpu.matmul %464, %16, %cst_200 {dimension_numbers = #tpu.dot_dimension_numbers<[1], [0], [0], [1], [0, 0, 1, 1], [], []>} : vector<8x128xbf16>, vector<128x512xbf16>, vector<8x512xf32> -> vector<8x512xf32>
    %469 = arith.addf %467, %468 : vector<8x512xf32>
    %c4_201 = arith.constant 4 : index
    %c0_202 = arith.constant 0 : index
    %c0_203 = arith.constant 0 : index
    %470 = vector.load %arg12[%c4_201, %c0_202, %c0_203] : memref<8x8x512xf32, #tpu.memory_space<vmem>>, vector<1x8x512xf32>
    %471 = vector.shape_cast %470 : vector<1x8x512xf32> to vector<8x512xf32>
    %472 = vector.shape_cast %469 : vector<8x512xf32> to vector<1x8x512xf32>
    tpu.vector_store %arg12[%c4_201, %c0_202, %c0_203], %472 {strides = array<i32>} : memref<8x8x512xf32, #tpu.memory_space<vmem>>, vector<1x8x512xf32>,
    %c3_204 = arith.constant 3 : index
    %c0_205 = arith.constant 0 : index
    %c0_206 = arith.constant 0 : index
    %473 = vector.load %arg12[%c3_204, %c0_205, %c0_206] : memref<8x8x512xf32, #tpu.memory_space<vmem>>, vector<1x8x512xf32>
    %474 = vector.shape_cast %473 : vector<1x8x512xf32> to vector<8x512xf32>
    %cst_207 = arith.constant dense<0.000000e+00> : vector<8x512xf32>
    %475 = tpu.matmul %465, %17, %cst_207 {dimension_numbers = #tpu.dot_dimension_numbers<[1], [0], [0], [1], [0, 0, 1, 1], [], []>} : vector<8x128xbf16>, vector<128x512xbf16>, vector<8x512xf32> -> vector<8x512xf32>
    %476 = arith.addf %474, %475 : vector<8x512xf32>
    %c3_208 = arith.constant 3 : index
    %c0_209 = arith.constant 0 : index
    %c0_210 = arith.constant 0 : index
    %477 = vector.load %arg12[%c3_208, %c0_209, %c0_210] : memref<8x8x512xf32, #tpu.memory_space<vmem>>, vector<1x8x512xf32>
    %478 = vector.shape_cast %477 : vector<1x8x512xf32> to vector<8x512xf32>
    %479 = vector.shape_cast %476 : vector<8x512xf32> to vector<1x8x512xf32>
    tpu.vector_store %arg12[%c3_208, %c0_209, %c0_210], %479 {strides = array<i32>} : memref<8x8x512xf32, #tpu.memory_space<vmem>>, vector<1x8x512xf32>,
    %480 = tpu.concatenate %464, %465 in 1 : vector<8x128xbf16>, vector<8x128xbf16> -> vector<8x256xbf16>
    %cst_211 = arith.constant dense<0.000000e+00> : vector<8x1024xf32>
    %481 = tpu.matmul %480, %15, %cst_211 {dimension_numbers = #tpu.dot_dimension_numbers<[1], [0], [0], [1], [0, 0, 1, 1], [], []>} : vector<8x256xbf16>, vector<256x1024xbf16>, vector<8x1024xf32> -> vector<8x1024xf32>
    %482 = vector.extract_strided_slice %481 {offsets = [0, 0], sizes = [8, 512], strides = [1, 1]} : vector<8x1024xf32> to vector<8x512xf32>
    %c5_212 = arith.constant 5 : index
    %c0_213 = arith.constant 0 : index
    %c0_214 = arith.constant 0 : index
    %483 = vector.load %arg11[%c5_212, %c0_213, %c0_214] : memref<8x8x1024xbf16, #tpu.memory_space<vmem>>, vector<1x8x1024xbf16>
    %484 = vector.shape_cast %483 : vector<1x8x1024xbf16> to vector<8x1024xbf16>
    %485 = arith.extf %484 : vector<8x1024xbf16> to vector<8x1024xf32>
    %486 = vector.extract_strided_slice %485 {offsets = [0, 0], sizes = [8, 512], strides = [1, 1]} : vector<8x1024xf32> to vector<8x512xf32>
    %487 = arith.addf %482, %486 : vector<8x512xf32>
    %488 = vector.extract_strided_slice %481 {offsets = [0, 512], sizes = [8, 512], strides = [1, 1]} : vector<8x1024xf32> to vector<8x512xf32>
    %c2_215 = arith.constant 2 : index
    %c0_216 = arith.constant 0 : index
    %c0_217 = arith.constant 0 : index
    %489 = vector.load %arg11[%c2_215, %c0_216, %c0_217] : memref<8x8x1024xbf16, #tpu.memory_space<vmem>>, vector<1x8x1024xbf16>
    %490 = vector.shape_cast %489 : vector<1x8x1024xbf16> to vector<8x1024xbf16>
    %491 = arith.extf %490 : vector<8x1024xbf16> to vector<8x1024xf32>
    %492 = vector.extract_strided_slice %491 {offsets = [0, 512], sizes = [8, 512], strides = [1, 1]} : vector<8x1024xf32> to vector<8x512xf32>
    %493 = arith.addf %488, %492 : vector<8x512xf32>
    %494 = vector.extract_strided_slice %487 {offsets = [0, 0], sizes = [8, 128], strides = [1, 1]} : vector<8x512xf32> to vector<8x128xf32>
    %cst_218 = arith.constant 5.000000e-01 : f32
    %495 = vector.broadcast %cst_218 : f32 to vector<8x128xf32>
    %496 = arith.mulf %495, %494 : vector<8x128xf32>
    %497 = math.tanh %496 : vector<8x128xf32>
    %cst_219 = arith.constant 5.000000e-01 : f32
    %498 = vector.broadcast %cst_219 : f32 to vector<8x128xf32>
    %499 = arith.mulf %498, %497 : vector<8x128xf32>
    %cst_220 = arith.constant 5.000000e-01 : f32
    %500 = vector.broadcast %cst_220 : f32 to vector<8x128xf32>
    %501 = arith.addf %499, %500 : vector<8x128xf32>
    %502 = vector.extract_strided_slice %487 {offsets = [0, 128], sizes = [8, 128], strides = [1, 1]} : vector<8x512xf32> to vector<8x128xf32>
    %cst_221 = arith.constant 5.000000e-01 : f32
    %503 = vector.broadcast %cst_221 : f32 to vector<8x128xf32>
    %504 = arith.mulf %503, %502 : vector<8x128xf32>
    %505 = math.tanh %504 : vector<8x128xf32>
    %cst_222 = arith.constant 5.000000e-01 : f32
    %506 = vector.broadcast %cst_222 : f32 to vector<8x128xf32>
    %507 = arith.mulf %506, %505 : vector<8x128xf32>
    %cst_223 = arith.constant 5.000000e-01 : f32
    %508 = vector.broadcast %cst_223 : f32 to vector<8x128xf32>
    %509 = arith.addf %507, %508 : vector<8x128xf32>
    %510 = vector.extract_strided_slice %487 {offsets = [0, 256], sizes = [8, 128], strides = [1, 1]} : vector<8x512xf32> to vector<8x128xf32>
    %511 = math.tanh %510 : vector<8x128xf32>
    %512 = vector.extract_strided_slice %487 {offsets = [0, 384], sizes = [8, 128], strides = [1, 1]} : vector<8x512xf32> to vector<8x128xf32>
    %cst_224 = arith.constant 5.000000e-01 : f32
    %513 = vector.broadcast %cst_224 : f32 to vector<8x128xf32>
    %514 = arith.mulf %513, %512 : vector<8x128xf32>
    %515 = math.tanh %514 : vector<8x128xf32>
    %cst_225 = arith.constant 5.000000e-01 : f32
    %516 = vector.broadcast %cst_225 : f32 to vector<8x128xf32>
    %517 = arith.mulf %516, %515 : vector<8x128xf32>
    %cst_226 = arith.constant 5.000000e-01 : f32
    %518 = vector.broadcast %cst_226 : f32 to vector<8x128xf32>
    %519 = arith.addf %517, %518 : vector<8x128xf32>
    %520 = arith.mulf %509, %430 : vector<8x128xf32>
    %521 = arith.mulf %501, %511 : vector<8x128xf32>
    %522 = arith.addf %520, %521 : vector<8x128xf32>
    %523 = math.tanh %522 : vector<8x128xf32>
    %524 = arith.mulf %519, %523 : vector<8x128xf32>
    %525 = vector.extract_strided_slice %493 {offsets = [0, 0], sizes = [8, 128], strides = [1, 1]} : vector<8x512xf32> to vector<8x128xf32>
    %cst_227 = arith.constant 5.000000e-01 : f32
    %526 = vector.broadcast %cst_227 : f32 to vector<8x128xf32>
    %527 = arith.mulf %526, %525 : vector<8x128xf32>
    %528 = math.tanh %527 : vector<8x128xf32>
    %cst_228 = arith.constant 5.000000e-01 : f32
    %529 = vector.broadcast %cst_228 : f32 to vector<8x128xf32>
    %530 = arith.mulf %529, %528 : vector<8x128xf32>
    %cst_229 = arith.constant 5.000000e-01 : f32
    %531 = vector.broadcast %cst_229 : f32 to vector<8x128xf32>
    %532 = arith.addf %530, %531 : vector<8x128xf32>
    %533 = vector.extract_strided_slice %493 {offsets = [0, 128], sizes = [8, 128], strides = [1, 1]} : vector<8x512xf32> to vector<8x128xf32>
    %cst_230 = arith.constant 5.000000e-01 : f32
    %534 = vector.broadcast %cst_230 : f32 to vector<8x128xf32>
    %535 = arith.mulf %534, %533 : vector<8x128xf32>
    %536 = math.tanh %535 : vector<8x128xf32>
    %cst_231 = arith.constant 5.000000e-01 : f32
    %537 = vector.broadcast %cst_231 : f32 to vector<8x128xf32>
    %538 = arith.mulf %537, %536 : vector<8x128xf32>
    %cst_232 = arith.constant 5.000000e-01 : f32
    %539 = vector.broadcast %cst_232 : f32 to vector<8x128xf32>
    %540 = arith.addf %538, %539 : vector<8x128xf32>
    %541 = vector.extract_strided_slice %493 {offsets = [0, 256], sizes = [8, 128], strides = [1, 1]} : vector<8x512xf32> to vector<8x128xf32>
    %542 = math.tanh %541 : vector<8x128xf32>
    %543 = vector.extract_strided_slice %493 {offsets = [0, 384], sizes = [8, 128], strides = [1, 1]} : vector<8x512xf32> to vector<8x128xf32>
    %cst_233 = arith.constant 5.000000e-01 : f32
    %544 = vector.broadcast %cst_233 : f32 to vector<8x128xf32>
    %545 = arith.mulf %544, %543 : vector<8x128xf32>
    %546 = math.tanh %545 : vector<8x128xf32>
    %cst_234 = arith.constant 5.000000e-01 : f32
    %547 = vector.broadcast %cst_234 : f32 to vector<8x128xf32>
    %548 = arith.mulf %547, %546 : vector<8x128xf32>
    %cst_235 = arith.constant 5.000000e-01 : f32
    %549 = vector.broadcast %cst_235 : f32 to vector<8x128xf32>
    %550 = arith.addf %548, %549 : vector<8x128xf32>
    %551 = arith.mulf %540, %461 : vector<8x128xf32>
    %552 = arith.mulf %532, %542 : vector<8x128xf32>
    %553 = arith.addf %551, %552 : vector<8x128xf32>
    %554 = math.tanh %553 : vector<8x128xf32>
    %555 = arith.mulf %550, %554 : vector<8x128xf32>
    %556 = arith.truncf %524 : vector<8x128xf32> to vector<8x128xbf16>
    %557 = arith.truncf %555 : vector<8x128xf32> to vector<8x128xbf16>
    %c5_236 = arith.constant 5 : index
    %c0_237 = arith.constant 0 : index
    %c0_238 = arith.constant 0 : index
    %558 = vector.load %arg12[%c5_236, %c0_237, %c0_238] : memref<8x8x512xf32, #tpu.memory_space<vmem>>, vector<1x8x512xf32>
    %559 = vector.shape_cast %558 : vector<1x8x512xf32> to vector<8x512xf32>
    %cst_239 = arith.constant dense<0.000000e+00> : vector<8x512xf32>
    %560 = tpu.matmul %556, %16, %cst_239 {dimension_numbers = #tpu.dot_dimension_numbers<[1], [0], [0], [1], [0, 0, 1, 1], [], []>} : vector<8x128xbf16>, vector<128x512xbf16>, vector<8x512xf32> -> vector<8x512xf32>
    %561 = arith.addf %559, %560 : vector<8x512xf32>
    %c5_240 = arith.constant 5 : index
    %c0_241 = arith.constant 0 : index
    %c0_242 = arith.constant 0 : index
    %562 = vector.load %arg12[%c5_240, %c0_241, %c0_242] : memref<8x8x512xf32, #tpu.memory_space<vmem>>, vector<1x8x512xf32>
    %563 = vector.shape_cast %562 : vector<1x8x512xf32> to vector<8x512xf32>
    %564 = vector.shape_cast %561 : vector<8x512xf32> to vector<1x8x512xf32>
    tpu.vector_store %arg12[%c5_240, %c0_241, %c0_242], %564 {strides = array<i32>} : memref<8x8x512xf32, #tpu.memory_space<vmem>>, vector<1x8x512xf32>,
    %c2_243 = arith.constant 2 : index
    %c0_244 = arith.constant 0 : index
    %c0_245 = arith.constant 0 : index
    %565 = vector.load %arg12[%c2_243, %c0_244, %c0_245] : memref<8x8x512xf32, #tpu.memory_space<vmem>>, vector<1x8x512xf32>
    %566 = vector.shape_cast %565 : vector<1x8x512xf32> to vector<8x512xf32>
    %cst_246 = arith.constant dense<0.000000e+00> : vector<8x512xf32>
    %567 = tpu.matmul %557, %17, %cst_246 {dimension_numbers = #tpu.dot_dimension_numbers<[1], [0], [0], [1], [0, 0, 1, 1], [], []>} : vector<8x128xbf16>, vector<128x512xbf16>, vector<8x512xf32> -> vector<8x512xf32>
    %568 = arith.addf %566, %567 : vector<8x512xf32>
    %c2_247 = arith.constant 2 : index
    %c0_248 = arith.constant 0 : index
    %c0_249 = arith.constant 0 : index
    %569 = vector.load %arg12[%c2_247, %c0_248, %c0_249] : memref<8x8x512xf32, #tpu.memory_space<vmem>>, vector<1x8x512xf32>
    %570 = vector.shape_cast %569 : vector<1x8x512xf32> to vector<8x512xf32>
    %571 = vector.shape_cast %568 : vector<8x512xf32> to vector<1x8x512xf32>
    tpu.vector_store %arg12[%c2_247, %c0_248, %c0_249], %571 {strides = array<i32>} : memref<8x8x512xf32, #tpu.memory_space<vmem>>, vector<1x8x512xf32>,
    %572 = tpu.concatenate %556, %557 in 1 : vector<8x128xbf16>, vector<8x128xbf16> -> vector<8x256xbf16>
    %cst_250 = arith.constant dense<0.000000e+00> : vector<8x1024xf32>
    %573 = tpu.matmul %572, %15, %cst_250 {dimension_numbers = #tpu.dot_dimension_numbers<[1], [0], [0], [1], [0, 0, 1, 1], [], []>} : vector<8x256xbf16>, vector<256x1024xbf16>, vector<8x1024xf32> -> vector<8x1024xf32>
    %574 = vector.extract_strided_slice %573 {offsets = [0, 0], sizes = [8, 512], strides = [1, 1]} : vector<8x1024xf32> to vector<8x512xf32>
    %c6_251 = arith.constant 6 : index
    %c0_252 = arith.constant 0 : index
    %c0_253 = arith.constant 0 : index
    %575 = vector.load %arg11[%c6_251, %c0_252, %c0_253] : memref<8x8x1024xbf16, #tpu.memory_space<vmem>>, vector<1x8x1024xbf16>
    %576 = vector.shape_cast %575 : vector<1x8x1024xbf16> to vector<8x1024xbf16>
    %577 = arith.extf %576 : vector<8x1024xbf16> to vector<8x1024xf32>
    %578 = vector.extract_strided_slice %577 {offsets = [0, 0], sizes = [8, 512], strides = [1, 1]} : vector<8x1024xf32> to vector<8x512xf32>
    %579 = arith.addf %574, %578 : vector<8x512xf32>
    %580 = vector.extract_strided_slice %573 {offsets = [0, 512], sizes = [8, 512], strides = [1, 1]} : vector<8x1024xf32> to vector<8x512xf32>
    %c1_254 = arith.constant 1 : index
    %c0_255 = arith.constant 0 : index
    %c0_256 = arith.constant 0 : index
    %581 = vector.load %arg11[%c1_254, %c0_255, %c0_256] : memref<8x8x1024xbf16, #tpu.memory_space<vmem>>, vector<1x8x1024xbf16>
    %582 = vector.shape_cast %581 : vector<1x8x1024xbf16> to vector<8x1024xbf16>
    %583 = arith.extf %582 : vector<8x1024xbf16> to vector<8x1024xf32>
    %584 = vector.extract_strided_slice %583 {offsets = [0, 512], sizes = [8, 512], strides = [1, 1]} : vector<8x1024xf32> to vector<8x512xf32>
    %585 = arith.addf %580, %584 : vector<8x512xf32>
    %586 = vector.extract_strided_slice %579 {offsets = [0, 0], sizes = [8, 128], strides = [1, 1]} : vector<8x512xf32> to vector<8x128xf32>
    %cst_257 = arith.constant 5.000000e-01 : f32
    %587 = vector.broadcast %cst_257 : f32 to vector<8x128xf32>
    %588 = arith.mulf %587, %586 : vector<8x128xf32>
    %589 = math.tanh %588 : vector<8x128xf32>
    %cst_258 = arith.constant 5.000000e-01 : f32
    %590 = vector.broadcast %cst_258 : f32 to vector<8x128xf32>
    %591 = arith.mulf %590, %589 : vector<8x128xf32>
    %cst_259 = arith.constant 5.000000e-01 : f32
    %592 = vector.broadcast %cst_259 : f32 to vector<8x128xf32>
    %593 = arith.addf %591, %592 : vector<8x128xf32>
    %594 = vector.extract_strided_slice %579 {offsets = [0, 128], sizes = [8, 128], strides = [1, 1]} : vector<8x512xf32> to vector<8x128xf32>
    %cst_260 = arith.constant 5.000000e-01 : f32
    %595 = vector.broadcast %cst_260 : f32 to vector<8x128xf32>
    %596 = arith.mulf %595, %594 : vector<8x128xf32>
    %597 = math.tanh %596 : vector<8x128xf32>
    %cst_261 = arith.constant 5.000000e-01 : f32
    %598 = vector.broadcast %cst_261 : f32 to vector<8x128xf32>
    %599 = arith.mulf %598, %597 : vector<8x128xf32>
    %cst_262 = arith.constant 5.000000e-01 : f32
    %600 = vector.broadcast %cst_262 : f32 to vector<8x128xf32>
    %601 = arith.addf %599, %600 : vector<8x128xf32>
    %602 = vector.extract_strided_slice %579 {offsets = [0, 256], sizes = [8, 128], strides = [1, 1]} : vector<8x512xf32> to vector<8x128xf32>
    %603 = math.tanh %602 : vector<8x128xf32>
    %604 = vector.extract_strided_slice %579 {offsets = [0, 384], sizes = [8, 128], strides = [1, 1]} : vector<8x512xf32> to vector<8x128xf32>
    %cst_263 = arith.constant 5.000000e-01 : f32
    %605 = vector.broadcast %cst_263 : f32 to vector<8x128xf32>
    %606 = arith.mulf %605, %604 : vector<8x128xf32>
    %607 = math.tanh %606 : vector<8x128xf32>
    %cst_264 = arith.constant 5.000000e-01 : f32
    %608 = vector.broadcast %cst_264 : f32 to vector<8x128xf32>
    %609 = arith.mulf %608, %607 : vector<8x128xf32>
    %cst_265 = arith.constant 5.000000e-01 : f32
    %610 = vector.broadcast %cst_265 : f32 to vector<8x128xf32>
    %611 = arith.addf %609, %610 : vector<8x128xf32>
    %612 = arith.mulf %601, %522 : vector<8x128xf32>
    %613 = arith.mulf %593, %603 : vector<8x128xf32>
    %614 = arith.addf %612, %613 : vector<8x128xf32>
    %615 = math.tanh %614 : vector<8x128xf32>
    %616 = arith.mulf %611, %615 : vector<8x128xf32>
    %617 = vector.extract_strided_slice %585 {offsets = [0, 0], sizes = [8, 128], strides = [1, 1]} : vector<8x512xf32> to vector<8x128xf32>
    %cst_266 = arith.constant 5.000000e-01 : f32
    %618 = vector.broadcast %cst_266 : f32 to vector<8x128xf32>
    %619 = arith.mulf %618, %617 : vector<8x128xf32>
    %620 = math.tanh %619 : vector<8x128xf32>
    %cst_267 = arith.constant 5.000000e-01 : f32
    %621 = vector.broadcast %cst_267 : f32 to vector<8x128xf32>
    %622 = arith.mulf %621, %620 : vector<8x128xf32>
    %cst_268 = arith.constant 5.000000e-01 : f32
    %623 = vector.broadcast %cst_268 : f32 to vector<8x128xf32>
    %624 = arith.addf %622, %623 : vector<8x128xf32>
    %625 = vector.extract_strided_slice %585 {offsets = [0, 128], sizes = [8, 128], strides = [1, 1]} : vector<8x512xf32> to vector<8x128xf32>
    %cst_269 = arith.constant 5.000000e-01 : f32
    %626 = vector.broadcast %cst_269 : f32 to vector<8x128xf32>
    %627 = arith.mulf %626, %625 : vector<8x128xf32>
    %628 = math.tanh %627 : vector<8x128xf32>
    %cst_270 = arith.constant 5.000000e-01 : f32
    %629 = vector.broadcast %cst_270 : f32 to vector<8x128xf32>
    %630 = arith.mulf %629, %628 : vector<8x128xf32>
    %cst_271 = arith.constant 5.000000e-01 : f32
    %631 = vector.broadcast %cst_271 : f32 to vector<8x128xf32>
    %632 = arith.addf %630, %631 : vector<8x128xf32>
    %633 = vector.extract_strided_slice %585 {offsets = [0, 256], sizes = [8, 128], strides = [1, 1]} : vector<8x512xf32> to vector<8x128xf32>
    %634 = math.tanh %633 : vector<8x128xf32>
    %635 = vector.extract_strided_slice %585 {offsets = [0, 384], sizes = [8, 128], strides = [1, 1]} : vector<8x512xf32> to vector<8x128xf32>
    %cst_272 = arith.constant 5.000000e-01 : f32
    %636 = vector.broadcast %cst_272 : f32 to vector<8x128xf32>
    %637 = arith.mulf %636, %635 : vector<8x128xf32>
    %638 = math.tanh %637 : vector<8x128xf32>
    %cst_273 = arith.constant 5.000000e-01 : f32
    %639 = vector.broadcast %cst_273 : f32 to vector<8x128xf32>
    %640 = arith.mulf %639, %638 : vector<8x128xf32>
    %cst_274 = arith.constant 5.000000e-01 : f32
    %641 = vector.broadcast %cst_274 : f32 to vector<8x128xf32>
    %642 = arith.addf %640, %641 : vector<8x128xf32>
    %643 = arith.mulf %632, %553 : vector<8x128xf32>
    %644 = arith.mulf %624, %634 : vector<8x128xf32>
    %645 = arith.addf %643, %644 : vector<8x128xf32>
    %646 = math.tanh %645 : vector<8x128xf32>
    %647 = arith.mulf %642, %646 : vector<8x128xf32>
    %648 = arith.truncf %616 : vector<8x128xf32> to vector<8x128xbf16>
    %649 = arith.truncf %647 : vector<8x128xf32> to vector<8x128xbf16>
    %c6_275 = arith.constant 6 : index
    %c0_276 = arith.constant 0 : index
    %c0_277 = arith.constant 0 : index
    %650 = vector.load %arg12[%c6_275, %c0_276, %c0_277] : memref<8x8x512xf32, #tpu.memory_space<vmem>>, vector<1x8x512xf32>
    %651 = vector.shape_cast %650 : vector<1x8x512xf32> to vector<8x512xf32>
    %cst_278 = arith.constant dense<0.000000e+00> : vector<8x512xf32>
    %652 = tpu.matmul %648, %16, %cst_278 {dimension_numbers = #tpu.dot_dimension_numbers<[1], [0], [0], [1], [0, 0, 1, 1], [], []>} : vector<8x128xbf16>, vector<128x512xbf16>, vector<8x512xf32> -> vector<8x512xf32>
    %653 = arith.addf %651, %652 : vector<8x512xf32>
    %c6_279 = arith.constant 6 : index
    %c0_280 = arith.constant 0 : index
    %c0_281 = arith.constant 0 : index
    %654 = vector.load %arg12[%c6_279, %c0_280, %c0_281] : memref<8x8x512xf32, #tpu.memory_space<vmem>>, vector<1x8x512xf32>
    %655 = vector.shape_cast %654 : vector<1x8x512xf32> to vector<8x512xf32>
    %656 = vector.shape_cast %653 : vector<8x512xf32> to vector<1x8x512xf32>
    tpu.vector_store %arg12[%c6_279, %c0_280, %c0_281], %656 {strides = array<i32>} : memref<8x8x512xf32, #tpu.memory_space<vmem>>, vector<1x8x512xf32>,
    %c1_282 = arith.constant 1 : index
    %c0_283 = arith.constant 0 : index
    %c0_284 = arith.constant 0 : index
    %657 = vector.load %arg12[%c1_282, %c0_283, %c0_284] : memref<8x8x512xf32, #tpu.memory_space<vmem>>, vector<1x8x512xf32>
    %658 = vector.shape_cast %657 : vector<1x8x512xf32> to vector<8x512xf32>
    %cst_285 = arith.constant dense<0.000000e+00> : vector<8x512xf32>
    %659 = tpu.matmul %649, %17, %cst_285 {dimension_numbers = #tpu.dot_dimension_numbers<[1], [0], [0], [1], [0, 0, 1, 1], [], []>} : vector<8x128xbf16>, vector<128x512xbf16>, vector<8x512xf32> -> vector<8x512xf32>
    %660 = arith.addf %658, %659 : vector<8x512xf32>
    %c1_286 = arith.constant 1 : index
    %c0_287 = arith.constant 0 : index
    %c0_288 = arith.constant 0 : index
    %661 = vector.load %arg12[%c1_286, %c0_287, %c0_288] : memref<8x8x512xf32, #tpu.memory_space<vmem>>, vector<1x8x512xf32>
    %662 = vector.shape_cast %661 : vector<1x8x512xf32> to vector<8x512xf32>
    %663 = vector.shape_cast %660 : vector<8x512xf32> to vector<1x8x512xf32>
    tpu.vector_store %arg12[%c1_286, %c0_287, %c0_288], %663 {strides = array<i32>} : memref<8x8x512xf32, #tpu.memory_space<vmem>>, vector<1x8x512xf32>,
    %664 = tpu.concatenate %648, %649 in 1 : vector<8x128xbf16>, vector<8x128xbf16> -> vector<8x256xbf16>
    %cst_289 = arith.constant dense<0.000000e+00> : vector<8x1024xf32>
    %665 = tpu.matmul %664, %15, %cst_289 {dimension_numbers = #tpu.dot_dimension_numbers<[1], [0], [0], [1], [0, 0, 1, 1], [], []>} : vector<8x256xbf16>, vector<256x1024xbf16>, vector<8x1024xf32> -> vector<8x1024xf32>
    %666 = vector.extract_strided_slice %665 {offsets = [0, 0], sizes = [8, 512], strides = [1, 1]} : vector<8x1024xf32> to vector<8x512xf32>
    %c7_290 = arith.constant 7 : index
    %c0_291 = arith.constant 0 : index
    %c0_292 = arith.constant 0 : index
    %667 = vector.load %arg11[%c7_290, %c0_291, %c0_292] : memref<8x8x1024xbf16, #tpu.memory_space<vmem>>, vector<1x8x1024xbf16>
    %668 = vector.shape_cast %667 : vector<1x8x1024xbf16> to vector<8x1024xbf16>
    %669 = arith.extf %668 : vector<8x1024xbf16> to vector<8x1024xf32>
    %670 = vector.extract_strided_slice %669 {offsets = [0, 0], sizes = [8, 512], strides = [1, 1]} : vector<8x1024xf32> to vector<8x512xf32>
    %671 = arith.addf %666, %670 : vector<8x512xf32>
    %672 = vector.extract_strided_slice %665 {offsets = [0, 512], sizes = [8, 512], strides = [1, 1]} : vector<8x1024xf32> to vector<8x512xf32>
    %c0_293 = arith.constant 0 : index
    %c0_294 = arith.constant 0 : index
    %c0_295 = arith.constant 0 : index
    %673 = vector.load %arg11[%c0_293, %c0_294, %c0_295] : memref<8x8x1024xbf16, #tpu.memory_space<vmem>>, vector<1x8x1024xbf16>
    %674 = vector.shape_cast %673 : vector<1x8x1024xbf16> to vector<8x1024xbf16>
    %675 = arith.extf %674 : vector<8x1024xbf16> to vector<8x1024xf32>
    %676 = vector.extract_strided_slice %675 {offsets = [0, 512], sizes = [8, 512], strides = [1, 1]} : vector<8x1024xf32> to vector<8x512xf32>
    %677 = arith.addf %672, %676 : vector<8x512xf32>
    %678 = vector.extract_strided_slice %671 {offsets = [0, 0], sizes = [8, 128], strides = [1, 1]} : vector<8x512xf32> to vector<8x128xf32>
    %cst_296 = arith.constant 5.000000e-01 : f32
    %679 = vector.broadcast %cst_296 : f32 to vector<8x128xf32>
    %680 = arith.mulf %679, %678 : vector<8x128xf32>
    %681 = math.tanh %680 : vector<8x128xf32>
    %cst_297 = arith.constant 5.000000e-01 : f32
    %682 = vector.broadcast %cst_297 : f32 to vector<8x128xf32>
    %683 = arith.mulf %682, %681 : vector<8x128xf32>
    %cst_298 = arith.constant 5.000000e-01 : f32
    %684 = vector.broadcast %cst_298 : f32 to vector<8x128xf32>
    %685 = arith.addf %683, %684 : vector<8x128xf32>
    %686 = vector.extract_strided_slice %671 {offsets = [0, 128], sizes = [8, 128], strides = [1, 1]} : vector<8x512xf32> to vector<8x128xf32>
    %cst_299 = arith.constant 5.000000e-01 : f32
    %687 = vector.broadcast %cst_299 : f32 to vector<8x128xf32>
    %688 = arith.mulf %687, %686 : vector<8x128xf32>
    %689 = math.tanh %688 : vector<8x128xf32>
    %cst_300 = arith.constant 5.000000e-01 : f32
    %690 = vector.broadcast %cst_300 : f32 to vector<8x128xf32>
    %691 = arith.mulf %690, %689 : vector<8x128xf32>
    %cst_301 = arith.constant 5.000000e-01 : f32
    %692 = vector.broadcast %cst_301 : f32 to vector<8x128xf32>
    %693 = arith.addf %691, %692 : vector<8x128xf32>
    %694 = vector.extract_strided_slice %671 {offsets = [0, 256], sizes = [8, 128], strides = [1, 1]} : vector<8x512xf32> to vector<8x128xf32>
    %695 = math.tanh %694 : vector<8x128xf32>
    %696 = vector.extract_strided_slice %671 {offsets = [0, 384], sizes = [8, 128], strides = [1, 1]} : vector<8x512xf32> to vector<8x128xf32>
    %cst_302 = arith.constant 5.000000e-01 : f32
    %697 = vector.broadcast %cst_302 : f32 to vector<8x128xf32>
    %698 = arith.mulf %697, %696 : vector<8x128xf32>
    %699 = math.tanh %698 : vector<8x128xf32>
    %cst_303 = arith.constant 5.000000e-01 : f32
    %700 = vector.broadcast %cst_303 : f32 to vector<8x128xf32>
    %701 = arith.mulf %700, %699 : vector<8x128xf32>
    %cst_304 = arith.constant 5.000000e-01 : f32
    %702 = vector.broadcast %cst_304 : f32 to vector<8x128xf32>
    %703 = arith.addf %701, %702 : vector<8x128xf32>
    %704 = arith.mulf %693, %614 : vector<8x128xf32>
    %705 = arith.mulf %685, %695 : vector<8x128xf32>
    %706 = arith.addf %704, %705 : vector<8x128xf32>
    %707 = math.tanh %706 : vector<8x128xf32>
    %708 = arith.mulf %703, %707 : vector<8x128xf32>
    %709 = vector.extract_strided_slice %677 {offsets = [0, 0], sizes = [8, 128], strides = [1, 1]} : vector<8x512xf32> to vector<8x128xf32>
    %cst_305 = arith.constant 5.000000e-01 : f32
    %710 = vector.broadcast %cst_305 : f32 to vector<8x128xf32>
    %711 = arith.mulf %710, %709 : vector<8x128xf32>
    %712 = math.tanh %711 : vector<8x128xf32>
    %cst_306 = arith.constant 5.000000e-01 : f32
    %713 = vector.broadcast %cst_306 : f32 to vector<8x128xf32>
    %714 = arith.mulf %713, %712 : vector<8x128xf32>
    %cst_307 = arith.constant 5.000000e-01 : f32
    %715 = vector.broadcast %cst_307 : f32 to vector<8x128xf32>
    %716 = arith.addf %714, %715 : vector<8x128xf32>
    %717 = vector.extract_strided_slice %677 {offsets = [0, 128], sizes = [8, 128], strides = [1, 1]} : vector<8x512xf32> to vector<8x128xf32>
    %cst_308 = arith.constant 5.000000e-01 : f32
    %718 = vector.broadcast %cst_308 : f32 to vector<8x128xf32>
    %719 = arith.mulf %718, %717 : vector<8x128xf32>
    %720 = math.tanh %719 : vector<8x128xf32>
    %cst_309 = arith.constant 5.000000e-01 : f32
    %721 = vector.broadcast %cst_309 : f32 to vector<8x128xf32>
    %722 = arith.mulf %721, %720 : vector<8x128xf32>
    %cst_310 = arith.constant 5.000000e-01 : f32
    %723 = vector.broadcast %cst_310 : f32 to vector<8x128xf32>
    %724 = arith.addf %722, %723 : vector<8x128xf32>
    %725 = vector.extract_strided_slice %677 {offsets = [0, 256], sizes = [8, 128], strides = [1, 1]} : vector<8x512xf32> to vector<8x128xf32>
    %726 = math.tanh %725 : vector<8x128xf32>
    %727 = vector.extract_strided_slice %677 {offsets = [0, 384], sizes = [8, 128], strides = [1, 1]} : vector<8x512xf32> to vector<8x128xf32>
    %cst_311 = arith.constant 5.000000e-01 : f32
    %728 = vector.broadcast %cst_311 : f32 to vector<8x128xf32>
    %729 = arith.mulf %728, %727 : vector<8x128xf32>
    %730 = math.tanh %729 : vector<8x128xf32>
    %cst_312 = arith.constant 5.000000e-01 : f32
    %731 = vector.broadcast %cst_312 : f32 to vector<8x128xf32>
    %732 = arith.mulf %731, %730 : vector<8x128xf32>
    %cst_313 = arith.constant 5.000000e-01 : f32
    %733 = vector.broadcast %cst_313 : f32 to vector<8x128xf32>
    %734 = arith.addf %732, %733 : vector<8x128xf32>
    %735 = arith.mulf %724, %645 : vector<8x128xf32>
    %736 = arith.mulf %716, %726 : vector<8x128xf32>
    %737 = arith.addf %735, %736 : vector<8x128xf32>
    %738 = math.tanh %737 : vector<8x128xf32>
    %739 = arith.mulf %734, %738 : vector<8x128xf32>
    %740 = arith.truncf %708 : vector<8x128xf32> to vector<8x128xbf16>
    %741 = arith.truncf %739 : vector<8x128xf32> to vector<8x128xbf16>
    %c7_314 = arith.constant 7 : index
    %c0_315 = arith.constant 0 : index
    %c0_316 = arith.constant 0 : index
    %742 = vector.load %arg12[%c7_314, %c0_315, %c0_316] : memref<8x8x512xf32, #tpu.memory_space<vmem>>, vector<1x8x512xf32>
    %743 = vector.shape_cast %742 : vector<1x8x512xf32> to vector<8x512xf32>
    %cst_317 = arith.constant dense<0.000000e+00> : vector<8x512xf32>
    %744 = tpu.matmul %740, %16, %cst_317 {dimension_numbers = #tpu.dot_dimension_numbers<[1], [0], [0], [1], [0, 0, 1, 1], [], []>} : vector<8x128xbf16>, vector<128x512xbf16>, vector<8x512xf32> -> vector<8x512xf32>
    %745 = arith.addf %743, %744 : vector<8x512xf32>
    %c7_318 = arith.constant 7 : index
    %c0_319 = arith.constant 0 : index
    %c0_320 = arith.constant 0 : index
    %746 = vector.load %arg12[%c7_318, %c0_319, %c0_320] : memref<8x8x512xf32, #tpu.memory_space<vmem>>, vector<1x8x512xf32>
    %747 = vector.shape_cast %746 : vector<1x8x512xf32> to vector<8x512xf32>
    %748 = vector.shape_cast %745 : vector<8x512xf32> to vector<1x8x512xf32>
    tpu.vector_store %arg12[%c7_318, %c0_319, %c0_320], %748 {strides = array<i32>} : memref<8x8x512xf32, #tpu.memory_space<vmem>>, vector<1x8x512xf32>,
    %c0_321 = arith.constant 0 : index
    %c0_322 = arith.constant 0 : index
    %c0_323 = arith.constant 0 : index
    %749 = vector.load %arg12[%c0_321, %c0_322, %c0_323] : memref<8x8x512xf32, #tpu.memory_space<vmem>>, vector<1x8x512xf32>
    %750 = vector.shape_cast %749 : vector<1x8x512xf32> to vector<8x512xf32>
    %cst_324 = arith.constant dense<0.000000e+00> : vector<8x512xf32>
    %751 = tpu.matmul %741, %17, %cst_324 {dimension_numbers = #tpu.dot_dimension_numbers<[1], [0], [0], [1], [0, 0, 1, 1], [], []>} : vector<8x128xbf16>, vector<128x512xbf16>, vector<8x512xf32> -> vector<8x512xf32>
    %752 = arith.addf %750, %751 : vector<8x512xf32>
    %c0_325 = arith.constant 0 : index
    %c0_326 = arith.constant 0 : index
    %c0_327 = arith.constant 0 : index
    %753 = vector.load %arg12[%c0_325, %c0_326, %c0_327] : memref<8x8x512xf32, #tpu.memory_space<vmem>>, vector<1x8x512xf32>
    %754 = vector.shape_cast %753 : vector<1x8x512xf32> to vector<8x512xf32>
    %755 = vector.shape_cast %752 : vector<8x512xf32> to vector<1x8x512xf32>
    tpu.vector_store %arg12[%c0_325, %c0_326, %c0_327], %755 {strides = array<i32>} : memref<8x8x512xf32, #tpu.memory_space<vmem>>, vector<1x8x512xf32>,
    %c0_328 = arith.constant 0 : index
    %c0_329 = arith.constant 0 : index
    %756 = vector.load %arg6[%c0_328, %c0_329] : memref<128x512xbf16, #tpu.memory_space<vmem>>, vector<128x512xbf16>
    %cst_330 = arith.constant 0.000000e+00 : f32
    %757 = vector.broadcast %cst_330 : f32 to vector<8x128xf32>
    %cst_331 = arith.constant 0.000000e+00 : f32
    %758 = vector.broadcast %cst_331 : f32 to vector<8x128xf32>
    %c0_332 = arith.constant 0 : index
    %c0_333 = arith.constant 0 : index
    %c0_334 = arith.constant 0 : index
    %759 = vector.load %arg12[%c0_332, %c0_333, %c0_334] : memref<8x8x512xf32, #tpu.memory_space<vmem>>, vector<1x8x512xf32>
    %760 = vector.shape_cast %759 : vector<1x8x512xf32> to vector<8x512xf32>
    %761 = arith.truncf %757 : vector<8x128xf32> to vector<8x128xbf16>
    %cst_335 = arith.constant dense<0.000000e+00> : vector<8x512xf32>
    %762 = tpu.matmul %761, %756, %cst_335 {dimension_numbers = #tpu.dot_dimension_numbers<[1], [0], [0], [1], [0, 0, 1, 1], [], []>} : vector<8x128xbf16>, vector<128x512xbf16>, vector<8x512xf32> -> vector<8x512xf32>
    %763 = arith.addf %760, %762 : vector<8x512xf32>
    %764 = vector.extract_strided_slice %763 {offsets = [0, 0], sizes = [8, 128], strides = [1, 1]} : vector<8x512xf32> to vector<8x128xf32>
    %cst_336 = arith.constant 5.000000e-01 : f32
    %765 = vector.broadcast %cst_336 : f32 to vector<8x128xf32>
    %766 = arith.mulf %765, %764 : vector<8x128xf32>
    %767 = math.tanh %766 : vector<8x128xf32>
    %cst_337 = arith.constant 5.000000e-01 : f32
    %768 = vector.broadcast %cst_337 : f32 to vector<8x128xf32>
    %769 = arith.mulf %768, %767 : vector<8x128xf32>
    %cst_338 = arith.constant 5.000000e-01 : f32
    %770 = vector.broadcast %cst_338 : f32 to vector<8x128xf32>
    %771 = arith.addf %769, %770 : vector<8x128xf32>
    %772 = vector.extract_strided_slice %763 {offsets = [0, 128], sizes = [8, 128], strides = [1, 1]} : vector<8x512xf32> to vector<8x128xf32>
    %cst_339 = arith.constant 5.000000e-01 : f32
    %773 = vector.broadcast %cst_339 : f32 to vector<8x128xf32>
    %774 = arith.mulf %773, %772 : vector<8x128xf32>
    %775 = math.tanh %774 : vector<8x128xf32>
    %cst_340 = arith.constant 5.000000e-01 : f32
    %776 = vector.broadcast %cst_340 : f32 to vector<8x128xf32>
    %777 = arith.mulf %776, %775 : vector<8x128xf32>
    %cst_341 = arith.constant 5.000000e-01 : f32
    %778 = vector.broadcast %cst_341 : f32 to vector<8x128xf32>
    %779 = arith.addf %777, %778 : vector<8x128xf32>
    %780 = vector.extract_strided_slice %763 {offsets = [0, 256], sizes = [8, 128], strides = [1, 1]} : vector<8x512xf32> to vector<8x128xf32>
    %781 = math.tanh %780 : vector<8x128xf32>
    %782 = vector.extract_strided_slice %763 {offsets = [0, 384], sizes = [8, 128], strides = [1, 1]} : vector<8x512xf32> to vector<8x128xf32>
    %cst_342 = arith.constant 5.000000e-01 : f32
    %783 = vector.broadcast %cst_342 : f32 to vector<8x128xf32>
    %784 = arith.mulf %783, %782 : vector<8x128xf32>
    %785 = math.tanh %784 : vector<8x128xf32>
    %cst_343 = arith.constant 5.000000e-01 : f32
    %786 = vector.broadcast %cst_343 : f32 to vector<8x128xf32>
    %787 = arith.mulf %786, %785 : vector<8x128xf32>
    %cst_344 = arith.constant 5.000000e-01 : f32
    %788 = vector.broadcast %cst_344 : f32 to vector<8x128xf32>
    %789 = arith.addf %787, %788 : vector<8x128xf32>
    %790 = arith.mulf %779, %758 : vector<8x128xf32>
    %791 = arith.mulf %771, %781 : vector<8x128xf32>
    %792 = arith.addf %790, %791 : vector<8x128xf32>
    %793 = math.tanh %792 : vector<8x128xf32>
    %794 = arith.mulf %789, %793 : vector<8x128xf32>
    %795 = arith.truncf %794 : vector<8x128xf32> to vector<8x128xbf16>
    %c0_345 = arith.constant 0 : index
    %c0_346 = arith.constant 0 : index
    %c0_347 = arith.constant 0 : index
    %796 = vector.load %arg13[%c0_345, %c0_346, %c0_347] : memref<8x8x128xbf16, #tpu.memory_space<vmem>>, vector<1x8x128xbf16>
    %797 = vector.shape_cast %796 : vector<1x8x128xbf16> to vector<8x128xbf16>
    %798 = vector.shape_cast %795 : vector<8x128xbf16> to vector<1x8x128xbf16>
    tpu.vector_store %arg13[%c0_345, %c0_346, %c0_347], %798 {strides = array<i32>} : memref<8x8x128xbf16, #tpu.memory_space<vmem>>, vector<1x8x128xbf16>,
    %c1_348 = arith.constant 1 : index
    %c0_349 = arith.constant 0 : index
    %c0_350 = arith.constant 0 : index
    %799 = vector.load %arg12[%c1_348, %c0_349, %c0_350] : memref<8x8x512xf32, #tpu.memory_space<vmem>>, vector<1x8x512xf32>
    %800 = vector.shape_cast %799 : vector<1x8x512xf32> to vector<8x512xf32>
    %801 = arith.truncf %794 : vector<8x128xf32> to vector<8x128xbf16>
    %cst_351 = arith.constant dense<0.000000e+00> : vector<8x512xf32>
    %802 = tpu.matmul %801, %756, %cst_351 {dimension_numbers = #tpu.dot_dimension_numbers<[1], [0], [0], [1], [0, 0, 1, 1], [], []>} : vector<8x128xbf16>, vector<128x512xbf16>, vector<8x512xf32> -> vector<8x512xf32>
    %803 = arith.addf %800, %802 : vector<8x512xf32>
    %804 = vector.extract_strided_slice %803 {offsets = [0, 0], sizes = [8, 128], strides = [1, 1]} : vector<8x512xf32> to vector<8x128xf32>
    %cst_352 = arith.constant 5.000000e-01 : f32
    %805 = vector.broadcast %cst_352 : f32 to vector<8x128xf32>
    %806 = arith.mulf %805, %804 : vector<8x128xf32>
    %807 = math.tanh %806 : vector<8x128xf32>
    %cst_353 = arith.constant 5.000000e-01 : f32
    %808 = vector.broadcast %cst_353 : f32 to vector<8x128xf32>
    %809 = arith.mulf %808, %807 : vector<8x128xf32>
    %cst_354 = arith.constant 5.000000e-01 : f32
    %810 = vector.broadcast %cst_354 : f32 to vector<8x128xf32>
    %811 = arith.addf %809, %810 : vector<8x128xf32>
    %812 = vector.extract_strided_slice %803 {offsets = [0, 128], sizes = [8, 128], strides = [1, 1]} : vector<8x512xf32> to vector<8x128xf32>
    %cst_355 = arith.constant 5.000000e-01 : f32
    %813 = vector.broadcast %cst_355 : f32 to vector<8x128xf32>
    %814 = arith.mulf %813, %812 : vector<8x128xf32>
    %815 = math.tanh %814 : vector<8x128xf32>
    %cst_356 = arith.constant 5.000000e-01 : f32
    %816 = vector.broadcast %cst_356 : f32 to vector<8x128xf32>
    %817 = arith.mulf %816, %815 : vector<8x128xf32>
    %cst_357 = arith.constant 5.000000e-01 : f32
    %818 = vector.broadcast %cst_357 : f32 to vector<8x128xf32>
    %819 = arith.addf %817, %818 : vector<8x128xf32>
    %820 = vector.extract_strided_slice %803 {offsets = [0, 256], sizes = [8, 128], strides = [1, 1]} : vector<8x512xf32> to vector<8x128xf32>
    %821 = math.tanh %820 : vector<8x128xf32>
    %822 = vector.extract_strided_slice %803 {offsets = [0, 384], sizes = [8, 128], strides = [1, 1]} : vector<8x512xf32> to vector<8x128xf32>
    %cst_358 = arith.constant 5.000000e-01 : f32
    %823 = vector.broadcast %cst_358 : f32 to vector<8x128xf32>
    %824 = arith.mulf %823, %822 : vector<8x128xf32>
    %825 = math.tanh %824 : vector<8x128xf32>
    %cst_359 = arith.constant 5.000000e-01 : f32
    %826 = vector.broadcast %cst_359 : f32 to vector<8x128xf32>
    %827 = arith.mulf %826, %825 : vector<8x128xf32>
    %cst_360 = arith.constant 5.000000e-01 : f32
    %828 = vector.broadcast %cst_360 : f32 to vector<8x128xf32>
    %829 = arith.addf %827, %828 : vector<8x128xf32>
    %830 = arith.mulf %819, %792 : vector<8x128xf32>
    %831 = arith.mulf %811, %821 : vector<8x128xf32>
    %832 = arith.addf %830, %831 : vector<8x128xf32>
    %833 = math.tanh %832 : vector<8x128xf32>
    %834 = arith.mulf %829, %833 : vector<8x128xf32>
    %835 = arith.truncf %834 : vector<8x128xf32> to vector<8x128xbf16>
    %c1_361 = arith.constant 1 : index
    %c0_362 = arith.constant 0 : index
    %c0_363 = arith.constant 0 : index
    %836 = vector.load %arg13[%c1_361, %c0_362, %c0_363] : memref<8x8x128xbf16, #tpu.memory_space<vmem>>, vector<1x8x128xbf16>
    %837 = vector.shape_cast %836 : vector<1x8x128xbf16> to vector<8x128xbf16>
    %838 = vector.shape_cast %835 : vector<8x128xbf16> to vector<1x8x128xbf16>
    tpu.vector_store %arg13[%c1_361, %c0_362, %c0_363], %838 {strides = array<i32>} : memref<8x8x128xbf16, #tpu.memory_space<vmem>>, vector<1x8x128xbf16>,
    %c2_364 = arith.constant 2 : index
    %c0_365 = arith.constant 0 : index
    %c0_366 = arith.constant 0 : index
    %839 = vector.load %arg12[%c2_364, %c0_365, %c0_366] : memref<8x8x512xf32, #tpu.memory_space<vmem>>, vector<1x8x512xf32>
    %840 = vector.shape_cast %839 : vector<1x8x512xf32> to vector<8x512xf32>
    %841 = arith.truncf %834 : vector<8x128xf32> to vector<8x128xbf16>
    %cst_367 = arith.constant dense<0.000000e+00> : vector<8x512xf32>
    %842 = tpu.matmul %841, %756, %cst_367 {dimension_numbers = #tpu.dot_dimension_numbers<[1], [0], [0], [1], [0, 0, 1, 1], [], []>} : vector<8x128xbf16>, vector<128x512xbf16>, vector<8x512xf32> -> vector<8x512xf32>
    %843 = arith.addf %840, %842 : vector<8x512xf32>
    %844 = vector.extract_strided_slice %843 {offsets = [0, 0], sizes = [8, 128], strides = [1, 1]} : vector<8x512xf32> to vector<8x128xf32>
    %cst_368 = arith.constant 5.000000e-01 : f32
    %845 = vector.broadcast %cst_368 : f32 to vector<8x128xf32>
    %846 = arith.mulf %845, %844 : vector<8x128xf32>
    %847 = math.tanh %846 : vector<8x128xf32>
    %cst_369 = arith.constant 5.000000e-01 : f32
    %848 = vector.broadcast %cst_369 : f32 to vector<8x128xf32>
    %849 = arith.mulf %848, %847 : vector<8x128xf32>
    %cst_370 = arith.constant 5.000000e-01 : f32
    %850 = vector.broadcast %cst_370 : f32 to vector<8x128xf32>
    %851 = arith.addf %849, %850 : vector<8x128xf32>
    %852 = vector.extract_strided_slice %843 {offsets = [0, 128], sizes = [8, 128], strides = [1, 1]} : vector<8x512xf32> to vector<8x128xf32>
    %cst_371 = arith.constant 5.000000e-01 : f32
    %853 = vector.broadcast %cst_371 : f32 to vector<8x128xf32>
    %854 = arith.mulf %853, %852 : vector<8x128xf32>
    %855 = math.tanh %854 : vector<8x128xf32>
    %cst_372 = arith.constant 5.000000e-01 : f32
    %856 = vector.broadcast %cst_372 : f32 to vector<8x128xf32>
    %857 = arith.mulf %856, %855 : vector<8x128xf32>
    %cst_373 = arith.constant 5.000000e-01 : f32
    %858 = vector.broadcast %cst_373 : f32 to vector<8x128xf32>
    %859 = arith.addf %857, %858 : vector<8x128xf32>
    %860 = vector.extract_strided_slice %843 {offsets = [0, 256], sizes = [8, 128], strides = [1, 1]} : vector<8x512xf32> to vector<8x128xf32>
    %861 = math.tanh %860 : vector<8x128xf32>
    %862 = vector.extract_strided_slice %843 {offsets = [0, 384], sizes = [8, 128], strides = [1, 1]} : vector<8x512xf32> to vector<8x128xf32>
    %cst_374 = arith.constant 5.000000e-01 : f32
    %863 = vector.broadcast %cst_374 : f32 to vector<8x128xf32>
    %864 = arith.mulf %863, %862 : vector<8x128xf32>
    %865 = math.tanh %864 : vector<8x128xf32>
    %cst_375 = arith.constant 5.000000e-01 : f32
    %866 = vector.broadcast %cst_375 : f32 to vector<8x128xf32>
    %867 = arith.mulf %866, %865 : vector<8x128xf32>
    %cst_376 = arith.constant 5.000000e-01 : f32
    %868 = vector.broadcast %cst_376 : f32 to vector<8x128xf32>
    %869 = arith.addf %867, %868 : vector<8x128xf32>
    %870 = arith.mulf %859, %832 : vector<8x128xf32>
    %871 = arith.mulf %851, %861 : vector<8x128xf32>
    %872 = arith.addf %870, %871 : vector<8x128xf32>
    %873 = math.tanh %872 : vector<8x128xf32>
    %874 = arith.mulf %869, %873 : vector<8x128xf32>
    %875 = arith.truncf %874 : vector<8x128xf32> to vector<8x128xbf16>
    %c2_377 = arith.constant 2 : index
    %c0_378 = arith.constant 0 : index
    %c0_379 = arith.constant 0 : index
    %876 = vector.load %arg13[%c2_377, %c0_378, %c0_379] : memref<8x8x128xbf16, #tpu.memory_space<vmem>>, vector<1x8x128xbf16>
    %877 = vector.shape_cast %876 : vector<1x8x128xbf16> to vector<8x128xbf16>
    %878 = vector.shape_cast %875 : vector<8x128xbf16> to vector<1x8x128xbf16>
    tpu.vector_store %arg13[%c2_377, %c0_378, %c0_379], %878 {strides = array<i32>} : memref<8x8x128xbf16, #tpu.memory_space<vmem>>, vector<1x8x128xbf16>,
    %c3_380 = arith.constant 3 : index
    %c0_381 = arith.constant 0 : index
    %c0_382 = arith.constant 0 : index
    %879 = vector.load %arg12[%c3_380, %c0_381, %c0_382] : memref<8x8x512xf32, #tpu.memory_space<vmem>>, vector<1x8x512xf32>
    %880 = vector.shape_cast %879 : vector<1x8x512xf32> to vector<8x512xf32>
    %881 = arith.truncf %874 : vector<8x128xf32> to vector<8x128xbf16>
    %cst_383 = arith.constant dense<0.000000e+00> : vector<8x512xf32>
    %882 = tpu.matmul %881, %756, %cst_383 {dimension_numbers = #tpu.dot_dimension_numbers<[1], [0], [0], [1], [0, 0, 1, 1], [], []>} : vector<8x128xbf16>, vector<128x512xbf16>, vector<8x512xf32> -> vector<8x512xf32>
    %883 = arith.addf %880, %882 : vector<8x512xf32>
    %884 = vector.extract_strided_slice %883 {offsets = [0, 0], sizes = [8, 128], strides = [1, 1]} : vector<8x512xf32> to vector<8x128xf32>
    %cst_384 = arith.constant 5.000000e-01 : f32
    %885 = vector.broadcast %cst_384 : f32 to vector<8x128xf32>
    %886 = arith.mulf %885, %884 : vector<8x128xf32>
    %887 = math.tanh %886 : vector<8x128xf32>
    %cst_385 = arith.constant 5.000000e-01 : f32
    %888 = vector.broadcast %cst_385 : f32 to vector<8x128xf32>
    %889 = arith.mulf %888, %887 : vector<8x128xf32>
    %cst_386 = arith.constant 5.000000e-01 : f32
    %890 = vector.broadcast %cst_386 : f32 to vector<8x128xf32>
    %891 = arith.addf %889, %890 : vector<8x128xf32>
    %892 = vector.extract_strided_slice %883 {offsets = [0, 128], sizes = [8, 128], strides = [1, 1]} : vector<8x512xf32> to vector<8x128xf32>
    %cst_387 = arith.constant 5.000000e-01 : f32
    %893 = vector.broadcast %cst_387 : f32 to vector<8x128xf32>
    %894 = arith.mulf %893, %892 : vector<8x128xf32>
    %895 = math.tanh %894 : vector<8x128xf32>
    %cst_388 = arith.constant 5.000000e-01 : f32
    %896 = vector.broadcast %cst_388 : f32 to vector<8x128xf32>
    %897 = arith.mulf %896, %895 : vector<8x128xf32>
    %cst_389 = arith.constant 5.000000e-01 : f32
    %898 = vector.broadcast %cst_389 : f32 to vector<8x128xf32>
    %899 = arith.addf %897, %898 : vector<8x128xf32>
    %900 = vector.extract_strided_slice %883 {offsets = [0, 256], sizes = [8, 128], strides = [1, 1]} : vector<8x512xf32> to vector<8x128xf32>
    %901 = math.tanh %900 : vector<8x128xf32>
    %902 = vector.extract_strided_slice %883 {offsets = [0, 384], sizes = [8, 128], strides = [1, 1]} : vector<8x512xf32> to vector<8x128xf32>
    %cst_390 = arith.constant 5.000000e-01 : f32
    %903 = vector.broadcast %cst_390 : f32 to vector<8x128xf32>
    %904 = arith.mulf %903, %902 : vector<8x128xf32>
    %905 = math.tanh %904 : vector<8x128xf32>
    %cst_391 = arith.constant 5.000000e-01 : f32
    %906 = vector.broadcast %cst_391 : f32 to vector<8x128xf32>
    %907 = arith.mulf %906, %905 : vector<8x128xf32>
    %cst_392 = arith.constant 5.000000e-01 : f32
    %908 = vector.broadcast %cst_392 : f32 to vector<8x128xf32>
    %909 = arith.addf %907, %908 : vector<8x128xf32>
    %910 = arith.mulf %899, %872 : vector<8x128xf32>
    %911 = arith.mulf %891, %901 : vector<8x128xf32>
    %912 = arith.addf %910, %911 : vector<8x128xf32>
    %913 = math.tanh %912 : vector<8x128xf32>
    %914 = arith.mulf %909, %913 : vector<8x128xf32>
    %915 = arith.truncf %914 : vector<8x128xf32> to vector<8x128xbf16>
    %c3_393 = arith.constant 3 : index
    %c0_394 = arith.constant 0 : index
    %c0_395 = arith.constant 0 : index
    %916 = vector.load %arg13[%c3_393, %c0_394, %c0_395] : memref<8x8x128xbf16, #tpu.memory_space<vmem>>, vector<1x8x128xbf16>
    %917 = vector.shape_cast %916 : vector<1x8x128xbf16> to vector<8x128xbf16>
    %918 = vector.shape_cast %915 : vector<8x128xbf16> to vector<1x8x128xbf16>
    tpu.vector_store %arg13[%c3_393, %c0_394, %c0_395], %918 {strides = array<i32>} : memref<8x8x128xbf16, #tpu.memory_space<vmem>>, vector<1x8x128xbf16>,
    %c4_396 = arith.constant 4 : index
    %c0_397 = arith.constant 0 : index
    %c0_398 = arith.constant 0 : index
    %919 = vector.load %arg12[%c4_396, %c0_397, %c0_398] : memref<8x8x512xf32, #tpu.memory_space<vmem>>, vector<1x8x512xf32>
    %920 = vector.shape_cast %919 : vector<1x8x512xf32> to vector<8x512xf32>
    %921 = arith.truncf %914 : vector<8x128xf32> to vector<8x128xbf16>
    %cst_399 = arith.constant dense<0.000000e+00> : vector<8x512xf32>
    %922 = tpu.matmul %921, %756, %cst_399 {dimension_numbers = #tpu.dot_dimension_numbers<[1], [0], [0], [1], [0, 0, 1, 1], [], []>} : vector<8x128xbf16>, vector<128x512xbf16>, vector<8x512xf32> -> vector<8x512xf32>
    %923 = arith.addf %920, %922 : vector<8x512xf32>
    %924 = vector.extract_strided_slice %923 {offsets = [0, 0], sizes = [8, 128], strides = [1, 1]} : vector<8x512xf32> to vector<8x128xf32>
    %cst_400 = arith.constant 5.000000e-01 : f32
    %925 = vector.broadcast %cst_400 : f32 to vector<8x128xf32>
    %926 = arith.mulf %925, %924 : vector<8x128xf32>
    %927 = math.tanh %926 : vector<8x128xf32>
    %cst_401 = arith.constant 5.000000e-01 : f32
    %928 = vector.broadcast %cst_401 : f32 to vector<8x128xf32>
    %929 = arith.mulf %928, %927 : vector<8x128xf32>
    %cst_402 = arith.constant 5.000000e-01 : f32
    %930 = vector.broadcast %cst_402 : f32 to vector<8x128xf32>
    %931 = arith.addf %929, %930 : vector<8x128xf32>
    %932 = vector.extract_strided_slice %923 {offsets = [0, 128], sizes = [8, 128], strides = [1, 1]} : vector<8x512xf32> to vector<8x128xf32>
    %cst_403 = arith.constant 5.000000e-01 : f32
    %933 = vector.broadcast %cst_403 : f32 to vector<8x128xf32>
    %934 = arith.mulf %933, %932 : vector<8x128xf32>
    %935 = math.tanh %934 : vector<8x128xf32>
    %cst_404 = arith.constant 5.000000e-01 : f32
    %936 = vector.broadcast %cst_404 : f32 to vector<8x128xf32>
    %937 = arith.mulf %936, %935 : vector<8x128xf32>
    %cst_405 = arith.constant 5.000000e-01 : f32
    %938 = vector.broadcast %cst_405 : f32 to vector<8x128xf32>
    %939 = arith.addf %937, %938 : vector<8x128xf32>
    %940 = vector.extract_strided_slice %923 {offsets = [0, 256], sizes = [8, 128], strides = [1, 1]} : vector<8x512xf32> to vector<8x128xf32>
    %941 = math.tanh %940 : vector<8x128xf32>
    %942 = vector.extract_strided_slice %923 {offsets = [0, 384], sizes = [8, 128], strides = [1, 1]} : vector<8x512xf32> to vector<8x128xf32>
    %cst_406 = arith.constant 5.000000e-01 : f32
    %943 = vector.broadcast %cst_406 : f32 to vector<8x128xf32>
    %944 = arith.mulf %943, %942 : vector<8x128xf32>
    %945 = math.tanh %944 : vector<8x128xf32>
    %cst_407 = arith.constant 5.000000e-01 : f32
    %946 = vector.broadcast %cst_407 : f32 to vector<8x128xf32>
    %947 = arith.mulf %946, %945 : vector<8x128xf32>
    %cst_408 = arith.constant 5.000000e-01 : f32
    %948 = vector.broadcast %cst_408 : f32 to vector<8x128xf32>
    %949 = arith.addf %947, %948 : vector<8x128xf32>
    %950 = arith.mulf %939, %912 : vector<8x128xf32>
    %951 = arith.mulf %931, %941 : vector<8x128xf32>
    %952 = arith.addf %950, %951 : vector<8x128xf32>
    %953 = math.tanh %952 : vector<8x128xf32>
    %954 = arith.mulf %949, %953 : vector<8x128xf32>
    %955 = arith.truncf %954 : vector<8x128xf32> to vector<8x128xbf16>
    %c4_409 = arith.constant 4 : index
    %c0_410 = arith.constant 0 : index
    %c0_411 = arith.constant 0 : index
    %956 = vector.load %arg13[%c4_409, %c0_410, %c0_411] : memref<8x8x128xbf16, #tpu.memory_space<vmem>>, vector<1x8x128xbf16>
    %957 = vector.shape_cast %956 : vector<1x8x128xbf16> to vector<8x128xbf16>
    %958 = vector.shape_cast %955 : vector<8x128xbf16> to vector<1x8x128xbf16>
    tpu.vector_store %arg13[%c4_409, %c0_410, %c0_411], %958 {strides = array<i32>} : memref<8x8x128xbf16, #tpu.memory_space<vmem>>, vector<1x8x128xbf16>,
    %c5_412 = arith.constant 5 : index
    %c0_413 = arith.constant 0 : index
    %c0_414 = arith.constant 0 : index
    %959 = vector.load %arg12[%c5_412, %c0_413, %c0_414] : memref<8x8x512xf32, #tpu.memory_space<vmem>>, vector<1x8x512xf32>
    %960 = vector.shape_cast %959 : vector<1x8x512xf32> to vector<8x512xf32>
    %961 = arith.truncf %954 : vector<8x128xf32> to vector<8x128xbf16>
    %cst_415 = arith.constant dense<0.000000e+00> : vector<8x512xf32>
    %962 = tpu.matmul %961, %756, %cst_415 {dimension_numbers = #tpu.dot_dimension_numbers<[1], [0], [0], [1], [0, 0, 1, 1], [], []>} : vector<8x128xbf16>, vector<128x512xbf16>, vector<8x512xf32> -> vector<8x512xf32>
    %963 = arith.addf %960, %962 : vector<8x512xf32>
    %964 = vector.extract_strided_slice %963 {offsets = [0, 0], sizes = [8, 128], strides = [1, 1]} : vector<8x512xf32> to vector<8x128xf32>
    %cst_416 = arith.constant 5.000000e-01 : f32
    %965 = vector.broadcast %cst_416 : f32 to vector<8x128xf32>
    %966 = arith.mulf %965, %964 : vector<8x128xf32>
    %967 = math.tanh %966 : vector<8x128xf32>
    %cst_417 = arith.constant 5.000000e-01 : f32
    %968 = vector.broadcast %cst_417 : f32 to vector<8x128xf32>
    %969 = arith.mulf %968, %967 : vector<8x128xf32>
    %cst_418 = arith.constant 5.000000e-01 : f32
    %970 = vector.broadcast %cst_418 : f32 to vector<8x128xf32>
    %971 = arith.addf %969, %970 : vector<8x128xf32>
    %972 = vector.extract_strided_slice %963 {offsets = [0, 128], sizes = [8, 128], strides = [1, 1]} : vector<8x512xf32> to vector<8x128xf32>
    %cst_419 = arith.constant 5.000000e-01 : f32
    %973 = vector.broadcast %cst_419 : f32 to vector<8x128xf32>
    %974 = arith.mulf %973, %972 : vector<8x128xf32>
    %975 = math.tanh %974 : vector<8x128xf32>
    %cst_420 = arith.constant 5.000000e-01 : f32
    %976 = vector.broadcast %cst_420 : f32 to vector<8x128xf32>
    %977 = arith.mulf %976, %975 : vector<8x128xf32>
    %cst_421 = arith.constant 5.000000e-01 : f32
    %978 = vector.broadcast %cst_421 : f32 to vector<8x128xf32>
    %979 = arith.addf %977, %978 : vector<8x128xf32>
    %980 = vector.extract_strided_slice %963 {offsets = [0, 256], sizes = [8, 128], strides = [1, 1]} : vector<8x512xf32> to vector<8x128xf32>
    %981 = math.tanh %980 : vector<8x128xf32>
    %982 = vector.extract_strided_slice %963 {offsets = [0, 384], sizes = [8, 128], strides = [1, 1]} : vector<8x512xf32> to vector<8x128xf32>
    %cst_422 = arith.constant 5.000000e-01 : f32
    %983 = vector.broadcast %cst_422 : f32 to vector<8x128xf32>
    %984 = arith.mulf %983, %982 : vector<8x128xf32>
    %985 = math.tanh %984 : vector<8x128xf32>
    %cst_423 = arith.constant 5.000000e-01 : f32
    %986 = vector.broadcast %cst_423 : f32 to vector<8x128xf32>
    %987 = arith.mulf %986, %985 : vector<8x128xf32>
    %cst_424 = arith.constant 5.000000e-01 : f32
    %988 = vector.broadcast %cst_424 : f32 to vector<8x128xf32>
    %989 = arith.addf %987, %988 : vector<8x128xf32>
    %990 = arith.mulf %979, %952 : vector<8x128xf32>
    %991 = arith.mulf %971, %981 : vector<8x128xf32>
    %992 = arith.addf %990, %991 : vector<8x128xf32>
    %993 = math.tanh %992 : vector<8x128xf32>
    %994 = arith.mulf %989, %993 : vector<8x128xf32>
    %995 = arith.truncf %994 : vector<8x128xf32> to vector<8x128xbf16>
    %c5_425 = arith.constant 5 : index
    %c0_426 = arith.constant 0 : index
    %c0_427 = arith.constant 0 : index
    %996 = vector.load %arg13[%c5_425, %c0_426, %c0_427] : memref<8x8x128xbf16, #tpu.memory_space<vmem>>, vector<1x8x128xbf16>
    %997 = vector.shape_cast %996 : vector<1x8x128xbf16> to vector<8x128xbf16>
    %998 = vector.shape_cast %995 : vector<8x128xbf16> to vector<1x8x128xbf16>
    tpu.vector_store %arg13[%c5_425, %c0_426, %c0_427], %998 {strides = array<i32>} : memref<8x8x128xbf16, #tpu.memory_space<vmem>>, vector<1x8x128xbf16>,
    %c6_428 = arith.constant 6 : index
    %c0_429 = arith.constant 0 : index
    %c0_430 = arith.constant 0 : index
    %999 = vector.load %arg12[%c6_428, %c0_429, %c0_430] : memref<8x8x512xf32, #tpu.memory_space<vmem>>, vector<1x8x512xf32>
    %1000 = vector.shape_cast %999 : vector<1x8x512xf32> to vector<8x512xf32>
    %1001 = arith.truncf %994 : vector<8x128xf32> to vector<8x128xbf16>
    %cst_431 = arith.constant dense<0.000000e+00> : vector<8x512xf32>
    %1002 = tpu.matmul %1001, %756, %cst_431 {dimension_numbers = #tpu.dot_dimension_numbers<[1], [0], [0], [1], [0, 0, 1, 1], [], []>} : vector<8x128xbf16>, vector<128x512xbf16>, vector<8x512xf32> -> vector<8x512xf32>
    %1003 = arith.addf %1000, %1002 : vector<8x512xf32>
    %1004 = vector.extract_strided_slice %1003 {offsets = [0, 0], sizes = [8, 128], strides = [1, 1]} : vector<8x512xf32> to vector<8x128xf32>
    %cst_432 = arith.constant 5.000000e-01 : f32
    %1005 = vector.broadcast %cst_432 : f32 to vector<8x128xf32>
    %1006 = arith.mulf %1005, %1004 : vector<8x128xf32>
    %1007 = math.tanh %1006 : vector<8x128xf32>
    %cst_433 = arith.constant 5.000000e-01 : f32
    %1008 = vector.broadcast %cst_433 : f32 to vector<8x128xf32>
    %1009 = arith.mulf %1008, %1007 : vector<8x128xf32>
    %cst_434 = arith.constant 5.000000e-01 : f32
    %1010 = vector.broadcast %cst_434 : f32 to vector<8x128xf32>
    %1011 = arith.addf %1009, %1010 : vector<8x128xf32>
    %1012 = vector.extract_strided_slice %1003 {offsets = [0, 128], sizes = [8, 128], strides = [1, 1]} : vector<8x512xf32> to vector<8x128xf32>
    %cst_435 = arith.constant 5.000000e-01 : f32
    %1013 = vector.broadcast %cst_435 : f32 to vector<8x128xf32>
    %1014 = arith.mulf %1013, %1012 : vector<8x128xf32>
    %1015 = math.tanh %1014 : vector<8x128xf32>
    %cst_436 = arith.constant 5.000000e-01 : f32
    %1016 = vector.broadcast %cst_436 : f32 to vector<8x128xf32>
    %1017 = arith.mulf %1016, %1015 : vector<8x128xf32>
    %cst_437 = arith.constant 5.000000e-01 : f32
    %1018 = vector.broadcast %cst_437 : f32 to vector<8x128xf32>
    %1019 = arith.addf %1017, %1018 : vector<8x128xf32>
    %1020 = vector.extract_strided_slice %1003 {offsets = [0, 256], sizes = [8, 128], strides = [1, 1]} : vector<8x512xf32> to vector<8x128xf32>
    %1021 = math.tanh %1020 : vector<8x128xf32>
    %1022 = vector.extract_strided_slice %1003 {offsets = [0, 384], sizes = [8, 128], strides = [1, 1]} : vector<8x512xf32> to vector<8x128xf32>
    %cst_438 = arith.constant 5.000000e-01 : f32
    %1023 = vector.broadcast %cst_438 : f32 to vector<8x128xf32>
    %1024 = arith.mulf %1023, %1022 : vector<8x128xf32>
    %1025 = math.tanh %1024 : vector<8x128xf32>
    %cst_439 = arith.constant 5.000000e-01 : f32
    %1026 = vector.broadcast %cst_439 : f32 to vector<8x128xf32>
    %1027 = arith.mulf %1026, %1025 : vector<8x128xf32>
    %cst_440 = arith.constant 5.000000e-01 : f32
    %1028 = vector.broadcast %cst_440 : f32 to vector<8x128xf32>
    %1029 = arith.addf %1027, %1028 : vector<8x128xf32>
    %1030 = arith.mulf %1019, %992 : vector<8x128xf32>
    %1031 = arith.mulf %1011, %1021 : vector<8x128xf32>
    %1032 = arith.addf %1030, %1031 : vector<8x128xf32>
    %1033 = math.tanh %1032 : vector<8x128xf32>
    %1034 = arith.mulf %1029, %1033 : vector<8x128xf32>
    %1035 = arith.truncf %1034 : vector<8x128xf32> to vector<8x128xbf16>
    %c6_441 = arith.constant 6 : index
    %c0_442 = arith.constant 0 : index
    %c0_443 = arith.constant 0 : index
    %1036 = vector.load %arg13[%c6_441, %c0_442, %c0_443] : memref<8x8x128xbf16, #tpu.memory_space<vmem>>, vector<1x8x128xbf16>
    %1037 = vector.shape_cast %1036 : vector<1x8x128xbf16> to vector<8x128xbf16>
    %1038 = vector.shape_cast %1035 : vector<8x128xbf16> to vector<1x8x128xbf16>
    tpu.vector_store %arg13[%c6_441, %c0_442, %c0_443], %1038 {strides = array<i32>} : memref<8x8x128xbf16, #tpu.memory_space<vmem>>, vector<1x8x128xbf16>,
    %c7_444 = arith.constant 7 : index
    %c0_445 = arith.constant 0 : index
    %c0_446 = arith.constant 0 : index
    %1039 = vector.load %arg12[%c7_444, %c0_445, %c0_446] : memref<8x8x512xf32, #tpu.memory_space<vmem>>, vector<1x8x512xf32>
    %1040 = vector.shape_cast %1039 : vector<1x8x512xf32> to vector<8x512xf32>
    %1041 = arith.truncf %1034 : vector<8x128xf32> to vector<8x128xbf16>
    %cst_447 = arith.constant dense<0.000000e+00> : vector<8x512xf32>
    %1042 = tpu.matmul %1041, %756, %cst_447 {dimension_numbers = #tpu.dot_dimension_numbers<[1], [0], [0], [1], [0, 0, 1, 1], [], []>} : vector<8x128xbf16>, vector<128x512xbf16>, vector<8x512xf32> -> vector<8x512xf32>
    %1043 = arith.addf %1040, %1042 : vector<8x512xf32>
    %1044 = vector.extract_strided_slice %1043 {offsets = [0, 0], sizes = [8, 128], strides = [1, 1]} : vector<8x512xf32> to vector<8x128xf32>
    %cst_448 = arith.constant 5.000000e-01 : f32
    %1045 = vector.broadcast %cst_448 : f32 to vector<8x128xf32>
    %1046 = arith.mulf %1045, %1044 : vector<8x128xf32>
    %1047 = math.tanh %1046 : vector<8x128xf32>
    %cst_449 = arith.constant 5.000000e-01 : f32
    %1048 = vector.broadcast %cst_449 : f32 to vector<8x128xf32>
    %1049 = arith.mulf %1048, %1047 : vector<8x128xf32>
    %cst_450 = arith.constant 5.000000e-01 : f32
    %1050 = vector.broadcast %cst_450 : f32 to vector<8x128xf32>
    %1051 = arith.addf %1049, %1050 : vector<8x128xf32>
    %1052 = vector.extract_strided_slice %1043 {offsets = [0, 128], sizes = [8, 128], strides = [1, 1]} : vector<8x512xf32> to vector<8x128xf32>
    %cst_451 = arith.constant 5.000000e-01 : f32
    %1053 = vector.broadcast %cst_451 : f32 to vector<8x128xf32>
    %1054 = arith.mulf %1053, %1052 : vector<8x128xf32>
    %1055 = math.tanh %1054 : vector<8x128xf32>
    %cst_452 = arith.constant 5.000000e-01 : f32
    %1056 = vector.broadcast %cst_452 : f32 to vector<8x128xf32>
    %1057 = arith.mulf %1056, %1055 : vector<8x128xf32>
    %cst_453 = arith.constant 5.000000e-01 : f32
    %1058 = vector.broadcast %cst_453 : f32 to vector<8x128xf32>
    %1059 = arith.addf %1057, %1058 : vector<8x128xf32>
    %1060 = vector.extract_strided_slice %1043 {offsets = [0, 256], sizes = [8, 128], strides = [1, 1]} : vector<8x512xf32> to vector<8x128xf32>
    %1061 = math.tanh %1060 : vector<8x128xf32>
    %1062 = vector.extract_strided_slice %1043 {offsets = [0, 384], sizes = [8, 128], strides = [1, 1]} : vector<8x512xf32> to vector<8x128xf32>
    %cst_454 = arith.constant 5.000000e-01 : f32
    %1063 = vector.broadcast %cst_454 : f32 to vector<8x128xf32>
    %1064 = arith.mulf %1063, %1062 : vector<8x128xf32>
    %1065 = math.tanh %1064 : vector<8x128xf32>
    %cst_455 = arith.constant 5.000000e-01 : f32
    %1066 = vector.broadcast %cst_455 : f32 to vector<8x128xf32>
    %1067 = arith.mulf %1066, %1065 : vector<8x128xf32>
    %cst_456 = arith.constant 5.000000e-01 : f32
    %1068 = vector.broadcast %cst_456 : f32 to vector<8x128xf32>
    %1069 = arith.addf %1067, %1068 : vector<8x128xf32>
    %1070 = arith.mulf %1059, %1032 : vector<8x128xf32>
    %1071 = arith.mulf %1051, %1061 : vector<8x128xf32>
    %1072 = arith.addf %1070, %1071 : vector<8x128xf32>
    %1073 = math.tanh %1072 : vector<8x128xf32>
    %1074 = arith.mulf %1069, %1073 : vector<8x128xf32>
    %1075 = arith.truncf %1074 : vector<8x128xf32> to vector<8x128xbf16>
    %c7_457 = arith.constant 7 : index
    %c0_458 = arith.constant 0 : index
    %c0_459 = arith.constant 0 : index
    %1076 = vector.load %arg13[%c7_457, %c0_458, %c0_459] : memref<8x8x128xbf16, #tpu.memory_space<vmem>>, vector<1x8x128xbf16>
    %1077 = vector.shape_cast %1076 : vector<1x8x128xbf16> to vector<8x128xbf16>
    %1078 = vector.shape_cast %1075 : vector<8x128xbf16> to vector<1x8x128xbf16>
    tpu.vector_store %arg13[%c7_457, %c0_458, %c0_459], %1078 {strides = array<i32>} : memref<8x8x128xbf16, #tpu.memory_space<vmem>>, vector<1x8x128xbf16>,
    %c0_460 = arith.constant 0 : index
    %c0_461 = arith.constant 0 : index
    %c0_462 = arith.constant 0 : index
    %1079 = vector.load %arg13[%c0_460, %c0_461, %c0_462] : memref<8x8x128xbf16, #tpu.memory_space<vmem>>, vector<8x8x128xbf16>
    %1080 = vector.shape_cast %1079 : vector<8x8x128xbf16> to vector<64x128xbf16>
    %c0_463 = arith.constant 0 : index
    %c0_464 = arith.constant 0 : index
    %1081 = vector.load %arg8[%c0_463, %c0_464] : memref<128x128xbf16, #tpu.memory_space<vmem>>, vector<128x128xbf16>
    %cst_465 = arith.constant dense<0.000000e+00> : vector<64x128xf32>
    %1082 = tpu.matmul %1080, %1081, %cst_465 {dimension_numbers = #tpu.dot_dimension_numbers<[1], [0], [0], [1], [0, 0, 1, 1], [], []>} : vector<64x128xbf16>, vector<128x128xbf16>, vector<64x128xf32> -> vector<64x128xf32>
    %c0_466 = arith.constant 0 : index
    %c0_467 = arith.constant 0 : index
    %1083 = vector.load %arg9[%c0_466, %c0_467] : memref<1x128xf32, #tpu.memory_space<vmem>>, vector<1x128xf32>
    %1084 = vector.broadcast %1083 : vector<1x128xf32> to vector<64x128xf32>
    %1085 = arith.addf %1082, %1084 : vector<64x128xf32>
    %cst_468 = arith.constant dense<0xFF800000> : vector<64xf32>
    %1086 = vector.multi_reduction <maximumf>, %1085, %cst_468 [1] : vector<64x128xf32> to vector<64xf32>
    %1087 = vector.shape_cast %1086 : vector<64xf32> to vector<64x1xf32>
    %1088 = vector.broadcast %1087 : vector<64x1xf32> to vector<64x128xf32>
    %1089 = arith.subf %1085, %1088 : vector<64x128xf32>
    %1090 = math.exp %1089 : vector<64x128xf32>
    %cst_469 = arith.constant dense<0.000000e+00> : vector<64xf32>
    %1091 = vector.multi_reduction <add>, %1090, %cst_469 [1] : vector<64x128xf32> to vector<64xf32>
    %1092 = vector.shape_cast %1091 : vector<64xf32> to vector<64x1xf32>
    %1093 = tpu.reciprocal %1092 : vector<64x1xf32> -> vector<64x1xf32>
    %1094 = vector.broadcast %1093 : vector<64x1xf32> to vector<64x128xf32>
    %1095 = arith.mulf %1090, %1094 : vector<64x128xf32>
    %1096 = vector.shape_cast %1095 : vector<64x128xf32> to vector<8x8x128xf32>
    %c0_470 = arith.constant 0 : index
    %c0_471 = arith.constant 0 : index
    %c0_472 = arith.constant 0 : index
    %1097 = vector.load %arg10[%c0_470, %c0_471, %c0_472] : memref<8x8x128xf32, #tpu.memory_space<vmem>>, vector<8x8x128xf32>
    tpu.vector_store %arg10[%c0_470, %c0_471, %c0_472], %1096 {strides = array<i32>} : memref<8x8x128xf32, #tpu.memory_space<vmem>>, vector<8x8x128xf32>,
    return
  }
}

</mosaic_0001>

<bundles_post_ra>
// kernel: tpu_custom_call.1
= control target key start
LH: loop header
LB: loop body
LE: loop exit
PB: predicated region body
PF: predicated region fallthrough
CT: control target
= control target key end

     0   :  { %15 = vsyncpa [#allocation6], 0  ;;  %s11768_s0 = inlined_call_operand.hbm [shape: bf16[8,8,128], index: 0, kind: input, shape index: {}]   ;;  %s11769_s1 = inlined_call_operand.hbm [shape: bf16[128,1024], index: 1, kind: input, shape index: {}]   ;;  %s11770_s2 = inlined_call_operand.hbm [shape: f32[1,1024], index: 2, kind: input, shape index: {}]   ;;  %s11771_s3 = inlined_call_operand.hbm [shape: bf16[256,1024], index: 3, kind: input, shape index: {}]   ;;  %s11772_s4 = inlined_call_operand.hbm [shape: bf16[128,512], index: 4, kind: input, shape index: {}]   ;;  %s11773_s5 = inlined_call_operand.hbm [shape: bf16[128,512], index: 5, kind: input, shape index: {}]   ;;  %s11774_s6 = inlined_call_operand.hbm [shape: bf16[128,512], index: 6, kind: input, shape index: {}]   ;;  %s11775_s7 = inlined_call_operand.vmem [shape: f32[1,512], index: 7, kind: input, shape index: {}]   ;;  %s11776_s8 = inlined_call_operand.hbm [shape: bf16[128,128], index: 8, kind: input, shape index: {}]   ;;  %s11777_s9 = inlined_call_operand.vmem [shape: f32[1,128], index: 9, kind: input, shape index: {}]   ;;  %s11778_s10 = inlined_call_operand.hbm [shape: f32[8,8,128], index: 10, kind: output, shape index: {}]  }
   0x1   :  { %16 = vsyncpa [#allocation9], 0 }
   0x2   :  { %17 = vsyncpa [#allocation12], 0 }
   0x3   :  { %18 = vsyncpa [#allocation15], 0 }
   0x4   :  { %19 = vsyncpa [#allocation18], 0 }
   0x5   :  { %20 = vsyncpa [#allocation7], 0  ;;  %s8393_s13 = smov [#allocation8]   ;;  %s8183_s17 = scalar_lea.hbm %s11769_s1, 8192 }
   0x6   :  { %s38_s14 = sshll.u32 %s8393_s13, 4  ;;  %p8184_p0 = scmp.ne.s32.totalorder %s11769_s1, %s8183_s17  ;;  %s39_s14 = int_to_ptr.vmem [resolvable:$true] %s38_s14 }
   0x7   :  { %p8187_p1 = scmp.lt.u32.totalorder %s8183_s17, %s11769_s1 }
   0x9   :  { %p8189_p2 = pnand %p8187_p1, %p8184_p0 }
   0xb   :  { %8192 = shalt.err (!%p8189_p2)
}
   0xc   :  { %s8193_s22 = scalar_lea.vmem %s39_s14, 8192  ;;  %p8198_p4 = scmp.lt.s32.totalorder %s39_s14, %s39_s14 }
   0xd   :  { %p8194_p3 = scmp.ne.s32.totalorder %s39_s14, %s8193_s22  ;;  %p8199_p5 = scmp.lt.s32.totalorder %s8193_s22, %s8193_s22 }
   0xf   :  { %p8200_p6 = por %p8199_p5, %p8198_p4 }
  0x11   :  { %p8201_p7 = pnand %p8200_p6, %p8194_p3 }
  0x13   :  { %8204 = shalt.err (!%p8201_p7)
}
  0x14   :  { %s8394_s23 = smov 512   ;;  %s8395_s24 = smov 32  }
  0x15   :  { %44 = dma.hbm_to_vmem [thread:$0]  %s11769_s1, 8192, %s39_s14, [#allocation9], %s8394_s23, %s8394_s23, %s8395_s24  }
  0x16   :  { %s8396_s27 = smov [#allocation11]   ;;  %s8205_s11 = scalar_lea.hbm %s11771_s3, 16384 }
  0x17   :  { %s60_s28 = sshll.u32 %s8396_s27, 4  ;;  %p8206_p8 = scmp.ne.s32.totalorder %s11771_s3, %s8205_s11  ;;  %s61_s28 = int_to_ptr.vmem [resolvable:$true] %s60_s28 }
  0x18   :  { %p8209_p9 = scmp.lt.u32.totalorder %s8205_s11, %s11771_s3 }
  0x1a   :  { %p8211_p10 = pnand %p8209_p9, %p8206_p8 }
  0x1c   :  { %8214 = shalt.err (!%p8211_p10)
}
  0x1d   :  { %s8215_s17 = scalar_lea.vmem %s61_s28, 16384  ;;  %p8220_p12 = scmp.lt.s32.totalorder %s61_s28, %s61_s28 }
  0x1e   :  { %p8216_p11 = scmp.ne.s32.totalorder %s61_s28, %s8215_s17  ;;  %p8221_p13 = scmp.lt.s32.totalorder %s8215_s17, %s8215_s17 }
  0x20   :  { %p8222_p0 = por %p8221_p13, %p8220_p12 }
  0x22   :  { %p8223_p1 = pnand %p8222_p0, %p8216_p11 }
  0x24   :  { %8226 = shalt.err (!%p8223_p1)
}
  0x25   :  { %66 = dma.hbm_to_vmem [thread:$0]  %s11771_s3, 16384, %s61_s28, [#allocation12], %s8394_s23, %s8394_s23, %s8395_s24  }
  0x26   :  { %s8397_s18 = smov [#allocation14]   ;;  %s8398_s20 = smov [#allocation5]  }
  0x27   :  { %s84_s19 = sshll.u32 %s8397_s18, 4  ;;  %s26_s21 = sshll.u32 %s8398_s20, 4  ;;  %s85_s19 = int_to_ptr.vmem [resolvable:$true] %s84_s19  ;;  %s8490_s21 = int_to_ptr.vmem [resolvable:$true] %s26_s21 }
  0x28   :  { %s8227_s26 = scalar_lea.hbm %s11773_s5, 4096 }
  0x29   :  { %p8228_p2 = scmp.ne.s32.totalorder %s11773_s5, %s8227_s26  ;;  %p8231_p3 = scmp.lt.u32.totalorder %s8227_s26, %s11773_s5 }
  0x2b   :  { %p8233_p4 = pnand %p8231_p3, %p8228_p2 }
  0x2d   :  { %8236 = shalt.err (!%p8233_p4)
}
  0x2e   :  { %s8237_s3 = scalar_lea.vmem %s85_s19, 4096  ;;  %p8242_p6 = scmp.lt.s32.totalorder %s85_s19, %s85_s19 }
  0x2f   :  { %p8238_p5 = scmp.ne.s32.totalorder %s85_s19, %s8237_s3  ;;  %p8243_p7 = scmp.lt.s32.totalorder %s8237_s3, %s8237_s3 }
  0x31   :  { %p8244_p8 = por %p8243_p7, %p8242_p6 }
  0x33   :  { %p8245_p9 = pnand %p8244_p8, %p8238_p5 }
  0x35   :  { %8248 = shalt.err (!%p8245_p9)
}
  0x36   :  { %s8399_s23 = smov 256   ;;  %s8400_s24 = smov 16  }
  0x37   :  { %90 = dma.hbm_to_vmem [thread:$0]  %s11773_s5, 4096, %s85_s19, [#allocation15], %s8399_s23, %s8399_s23, %s8400_s24  }
  0x38   :  { %s8249_s16 = scalar_lea.hbm %s11768_s0, 512 }
  0x39   :  { %p8250_p10 = scmp.ne.s32.totalorder %s11768_s0, %s8249_s16  ;;  %p8253_p11 = scmp.lt.u32.totalorder %s8249_s16, %s11768_s0 }
  0x3b   :  { %p8255_p12 = pnand %p8253_p11, %p8250_p10 }
  0x3d   :  { %8258 = shalt.err (!%p8255_p12)
}
  0x3e   :  { %s8259_s20 = scalar_lea.vmem %s8490_s21, 512  ;;  %p8264_p0 = scmp.lt.s32.totalorder %s8490_s21, %s8490_s21 }
  0x3f   :  { %p8260_p13 = scmp.ne.s32.totalorder %s8490_s21, %s8259_s20  ;;  %p8265_p1 = scmp.lt.s32.totalorder %s8259_s20, %s8259_s20 }
  0x41   :  { %p8266_p2 = por %p8265_p1, %p8264_p0 }
  0x43   :  { %p8267_p3 = pnand %p8266_p2, %p8260_p13 }
  0x45   :  { %8270 = shalt.err (!%p8267_p3)
}
  0x46   :  { %s8401_s5 = smov 64   ;;  %s8402_s19 = smov 4  }
  0x47   :  { %32 = dma.hbm_to_vmem [thread:$0]  %s11768_s0, 512, %s8490_s21, [#allocation6], %s8401_s5, %s8401_s5, %s8402_s19  }
  0x48   :  { %s8403_s26 = smov [#allocation10]   ;;  %s8404_s29 = smov [#allocation13]  }
  0x49   :  { %s51_s27 = sshll.u32 %s8403_s26, 4  ;;  %s72_s30 = sshll.u32 %s8404_s29, 4  ;;  %s52_s27 = int_to_ptr.vmem [resolvable:$true] %s51_s27  ;;  %s8527_s30 = int_to_ptr.vmem [resolvable:$true] %s72_s30 }
  0x4a   :  { %s8271_s28 = scalar_lea.hbm %s11770_s2, 128 }
  0x4b   :  { %p8272_p4 = scmp.ne.s32.totalorder %s11770_s2, %s8271_s28  ;;  %p8275_p5 = scmp.lt.u32.totalorder %s8271_s28, %s11770_s2 }
  0x4d   :  { %p8277_p6 = pnand %p8275_p5, %p8272_p4 }
  0x4f   :  { %8280 = shalt.err (!%p8277_p6)
}
  0x50   :  { %s8281_s0 = scalar_lea.vmem %s52_s27, 128  ;;  %p8286_p8 = scmp.lt.s32.totalorder %s52_s27, %s52_s27 }
  0x51   :  { %p8282_p7 = scmp.ne.s32.totalorder %s52_s27, %s8281_s0  ;;  %p8287_p9 = scmp.lt.s32.totalorder %s8281_s0, %s8281_s0 }
  0x53   :  { %p8288_p10 = por %p8287_p9, %p8286_p8 }
  0x55   :  { %p8289_p11 = pnand %p8288_p10, %p8282_p7 }
  0x57   :  { %8292 = shalt.err (!%p8289_p11)
}
  0x58   :  { %54 = dma.hbm_to_vmem [thread:$0]  %s11770_s2, 128, %s52_s27, [#allocation9]  }
  0x59   :  { %s8293_s18 = scalar_lea.hbm %s11772_s4, 4096 }
  0x5a   :  { %p8294_p12 = scmp.ne.s32.totalorder %s11772_s4, %s8293_s18  ;;  %p8297_p13 = scmp.lt.u32.totalorder %s8293_s18, %s11772_s4 }
  0x5c   :  { %p8299_p0 = pnand %p8297_p13, %p8294_p12 }
  0x5e   :  { %8302 = shalt.err (!%p8299_p0)
}
  0x5f   :  { %s8303_s29 = scalar_lea.vmem %s8527_s30, 4096  ;;  %p8308_p2 = scmp.lt.s32.totalorder %s8527_s30, %s8527_s30 }
  0x60   :  { %p8304_p1 = scmp.ne.s32.totalorder %s8527_s30, %s8303_s29  ;;  %p8309_p3 = scmp.lt.s32.totalorder %s8303_s29, %s8303_s29 }
  0x62   :  { %p8310_p4 = por %p8309_p3, %p8308_p2 }
  0x64   :  { %p8311_p5 = pnand %p8310_p4, %p8304_p1 }
  0x66   :  { %8314 = shalt.err (!%p8311_p5)
}
  0x67   :  { %78 = dma.hbm_to_vmem [thread:$0]  %s11772_s4, 4096, %s8527_s30, [#allocation12], %s8399_s23, %s8399_s23, %s8400_s24  }
  0x68   :  { %s8405_s11 = smov [#allocation16]   ;;  %s8406_s28 = smov [#allocation17]  }
  0x69   :  { %s96_s3 = sshll.u32 %s8405_s11, 4  ;;  %s110_s12 = sshll.u32 %s8406_s28, 4  ;;  %s97_s3 = int_to_ptr.vmem [resolvable:$true] %s96_s3  ;;  %s8561_s12 = int_to_ptr.vmem [resolvable:$true] %s110_s12 }
  0x6a   :  { %s8315_s16 = scalar_lea.hbm %s11774_s6, 4096 }
  0x6b   :  { %p8316_p6 = scmp.ne.s32.totalorder %s11774_s6, %s8315_s16  ;;  %p8319_p7 = scmp.lt.u32.totalorder %s8315_s16, %s11774_s6 }
  0x6d   :  { %p8321_p8 = pnand %p8319_p7, %p8316_p6 }
  0x6f   :  { %8324 = shalt.err (!%p8321_p8)
}
  0x70   :  { %s8325_s4 = scalar_lea.vmem %s97_s3, 4096  ;;  %p8330_p10 = scmp.lt.s32.totalorder %s97_s3, %s97_s3 }
  0x71   :  { %p8326_p9 = scmp.ne.s32.totalorder %s97_s3, %s8325_s4  ;;  %p8331_p11 = scmp.lt.s32.totalorder %s8325_s4, %s8325_s4 }
  0x73   :  { %p8332_p12 = por %p8331_p11, %p8330_p10 }
  0x75   :  { %p8333_p13 = pnand %p8332_p12, %p8326_p9 }
  0x77   :  { %8336 = shalt.err (!%p8333_p13)
}
  0x78   :  { %102 = dma.hbm_to_vmem [thread:$0]  %s11774_s6, 4096, %s97_s3, [#allocation15], %s8399_s23, %s8399_s23, %s8400_s24  }
  0x79   :  { %s8337_s22 = scalar_lea.hbm %s11776_s8, 1024 }
  0x7a   :  { %p8338_p0 = scmp.ne.s32.totalorder %s11776_s8, %s8337_s22  ;;  %p8341_p1 = scmp.lt.u32.totalorder %s8337_s22, %s11776_s8 }
  0x7c   :  { %p8343_p2 = pnand %p8341_p1, %p8338_p0 }
  0x7e   :  { %8346 = shalt.err (!%p8343_p2)
}
  0x7f   :  { %s8347_s27 = scalar_lea.vmem %s8561_s12, 1024  ;;  %p8352_p4 = scmp.lt.s32.totalorder %s8561_s12, %s8561_s12 }
  0x80   :  { %p8348_p3 = scmp.ne.s32.totalorder %s8561_s12, %s8347_s27  ;;  %p8353_p5 = scmp.lt.s32.totalorder %s8347_s27, %s8347_s27 }
  0x82   :  { %p8354_p6 = por %p8353_p5, %p8352_p4 }
  0x84   :  { %p8355_p7 = pnand %p8354_p6, %p8348_p3 }
  0x86   :  { %8358 = shalt.err (!%p8355_p7)
}
  0x87   :  { %116 = dma.hbm_to_vmem [thread:$0]  %s11776_s8, 1024, %s8561_s12, [#allocation18], %s8401_s5, %s8401_s5, %s8402_s19  }
  0x88   :  { %8381 = dma.done.wait [#allocation6], 512  }
  0x89   :  { %8382 = vsyncadd [#allocation6], 4294966784 }
  0x8a   :  { %8383 = dma.done.wait [#allocation9], 8320  }
  0x8b   :  { %8384 = vsyncadd [#allocation9], 4294958976 }
  0x8c   :  { %8385 = dma.done.wait [#allocation12], 20480  }
  0x8d   :  { %8386 = vsyncadd [#allocation12], 4294946816 }
  0x8e   :  { %8387 = dma.done.wait [#allocation15], 8192  }
  0x8f   :  { %8388 = vsyncadd [#allocation15], 4294959104 }
  0x90   :  { %8389 = dma.done.wait [#allocation18], 1024  }
  0x91   :  { %8390 = vsyncadd [#allocation18], 4294966272  ;;  %v11781_v0 = vmov 0   ;;  %v152_v1 = vld [vmem:[#allocation8] sm:$0xff]  ;;  %v154_v3 = vld [vmem:[#allocation8 + $0x10] sm:$0xff] }
  0x92   :  { %634 = vmatprep.mubr.bf16.mxu1 %v11781_v0  ;;  %780 = vmatprep.mubr.bf16.mxu0 %v11781_v0  ;;  %v156_v2 = vld [vmem:[#allocation8 + $0x20] sm:$0xff]  ;;  %v158_v5 = vld [vmem:[#allocation8 + $0x30] sm:$0xff]  ;;  %v153_v63 = vld [vmem:[#allocation8 + $0x8] sm:$0xff] }
  0x93   :  { %v6971_v4 = vcombine.high %v152_v1, %v156_v2  ;;  %v6970_v6 = vcombine.low %v152_v1, %v156_v2  ;;  %v160_v7 = vld [vmem:[#allocation8 + $0x40] sm:$0xff]  ;;  %v6975_v9 = vcombine.high %v154_v3, %v158_v5  ;;  %v6974_v10 = vcombine.low %v154_v3, %v158_v5  ;;  %v162_v12 = vld [vmem:[#allocation8 + $0x50] sm:$0xff]  ;;  %v157_v1 = vld [vmem:[#allocation8 + $0x28] sm:$0xff] }
  0x94   :  { %v164_v8 = vld [vmem:[#allocation8 + $0x60] sm:$0xff]  ;;  %v166_v13 = vld [vmem:[#allocation8 + $0x70] sm:$0xff]  ;;  %v1172_v2 = vld [vmem:[#allocation11] sm:$0xff] }
  0x95   :  { %v6979_v11 = vcombine.high %v160_v7, %v164_v8  ;;  %v168_v14 = vld [vmem:[#allocation8 + $0x80] sm:$0xff]  ;;  %602 = vmatprep.subr.bf16.mxu1 %v6971_v4  ;;  %v6983_v15 = vcombine.high %v162_v12, %v166_v13  ;;  %v170_v17 = vld [vmem:[#allocation8 + $0x90] sm:$0xff]  ;;  %748 = vmatprep.subr.bf16.mxu0 %v6975_v9  ;;  %v6978_v19 = vcombine.low %v160_v7, %v164_v8  ;;  %v1176_v3 = vld [vmem:[#allocation11 + $0x20] sm:$0xff] }
  0x96   :  { %v172_v16 = vld [vmem:[#allocation8 + $0xa0] sm:$0xff]  ;;  %v174_v18 = vld [vmem:[#allocation8 + $0xb0] sm:$0xff]  ;;  %603 = vmatpush1.bf16.msra.mxu1 %v6970_v6  ;;  %749 = vmatpush1.bf16.msra.mxu0 %v6974_v10  ;;  %v6982_v20 = vcombine.low %v162_v12, %v166_v13  ;;  %v6973_v6 = vcombine.high %v153_v63, %v157_v1  ;;  %v8600_v7 = vcombine.high %v1172_v2, %v1176_v3  ;;  %v161_v8 = vld [vmem:[#allocation8 + $0x48] sm:$0xff] }
  0x97   :  { %604 = vmatprep.subr.bf16.mxu1 %v6979_v11  ;;  %v6987_v21 = vcombine.high %v168_v14, %v172_v16  ;;  %750 = vmatprep.subr.bf16.mxu0 %v6983_v15  ;;  %v6991_v22 = vcombine.high %v170_v17, %v174_v18  ;;  %v176_v23 = vld [vmem:[#allocation8 + $0xc0] sm:$0xff]  ;;  %v178_v25 = vld [vmem:[#allocation8 + $0xd0] sm:$0xff]  ;;  %v6986_v27 = vcombine.low %v168_v14, %v172_v16  ;;  %v165_v9 = vld [vmem:[#allocation8 + $0x68] sm:$0xff] }
  0x98   :  { %v180_v24 = vld [vmem:[#allocation8 + $0xe0] sm:$0xff]  ;;  %v182_v26 = vld [vmem:[#allocation8 + $0xf0] sm:$0xff]  ;;  %v6990_v28 = vcombine.low %v170_v17, %v174_v18  ;;  %12247 = vst [vmem:[#allocation26_spill] sm:$0xff] %v8600_v7  ;;  %v1180_v11 = vld [vmem:[#allocation11 + $0x40] sm:$0xff]  ;;  %v6972_v13 = vcombine.low %v153_v63, %v157_v1  ;;  %v8604_v14 = vcombine.low %v1172_v2, %v1176_v3  ;;  %v6981_v15 = vcombine.high %v161_v8, %v165_v9 }
  0x99   :  { %v6995_v29 = vcombine.high %v176_v23, %v180_v24  ;;  %v6999_v30 = vcombine.high %v178_v25, %v182_v26  ;;  %v184_v31 = vld [vmem:[#allocation8 + $0x100] sm:$0xff]  ;;  %v186_v33 = vld [vmem:[#allocation8 + $0x110] sm:$0xff]  ;;  %v6994_v35 = vcombine.low %v176_v23, %v180_v24  ;;  %v6998_v36 = vcombine.low %v178_v25, %v182_v26  ;;  %v1184_v12 = vld [vmem:[#allocation11 + $0x60] sm:$0xff] }
  0x9a   :  { %605 = vmatpush1.bf16.msra.mxu1 %v6978_v19  ;;  %751 = vmatpush1.bf16.msra.mxu0 %v6982_v20  ;;  %v188_v32 = vld [vmem:[#allocation8 + $0x120] sm:$0xff]  ;;  %v190_v34 = vld [vmem:[#allocation8 + $0x130] sm:$0xff]  ;;  %v8607_v16 = vcombine.high %v1180_v11, %v1184_v12  ;;  %v169_v17 = vld [vmem:[#allocation8 + $0x88] sm:$0xff] }
  0x9b   :  { %606 = vmatprep.subr.bf16.mxu1 %v6987_v21  ;;  %752 = vmatprep.subr.bf16.mxu0 %v6991_v22  ;;  %v7003_v37 = vcombine.high %v184_v31, %v188_v32  ;;  %v192_v38 = vld [vmem:[#allocation8 + $0x140] sm:$0xff]  ;;  %v7007_v39 = vcombine.high %v186_v33, %v190_v34  ;;  %v194_v41 = vld [vmem:[#allocation8 + $0x150] sm:$0xff]  ;;  %v7002_v43 = vcombine.low %v184_v31, %v188_v32  ;;  %v173_v18 = vld [vmem:[#allocation8 + $0xa8] sm:$0xff] }
  0x9c   :  { %v196_v40 = vld [vmem:[#allocation8 + $0x160] sm:$0xff]  ;;  %v198_v42 = vld [vmem:[#allocation8 + $0x170] sm:$0xff]  ;;  %v7006_v44 = vcombine.low %v186_v33, %v190_v34  ;;  %v1188_v19 = vld [vmem:[#allocation11 + $0x80] sm:$0xff]  ;;  %v6980_v21 = vcombine.low %v161_v8, %v165_v9  ;;  %v8612_v22 = vcombine.low %v1180_v11, %v1184_v12  ;;  %v6989_v23 = vcombine.high %v169_v17, %v173_v18 }
  0x9d   :  { %v7011_v45 = vcombine.high %v192_v38, %v196_v40  ;;  %v200_v46 = vld [vmem:[#allocation8 + $0x180] sm:$0xff]  ;;  %v7015_v47 = vcombine.high %v194_v41, %v198_v42  ;;  %v202_v49 = vld [vmem:[#allocation8 + $0x190] sm:$0xff]  ;;  %v7010_v51 = vcombine.low %v192_v38, %v196_v40  ;;  %v7014_v52 = vcombine.low %v194_v41, %v198_v42  ;;  %v1192_v20 = vld [vmem:[#allocation11 + $0xa0] sm:$0xff] }
  0x9e   :  { %607 = vmatpush1.bf16.msra.mxu1 %v6986_v27  ;;  %753 = vmatpush1.bf16.msra.mxu0 %v6990_v28  ;;  %v204_v48 = vld [vmem:[#allocation8 + $0x1a0] sm:$0xff]  ;;  %v206_v50 = vld [vmem:[#allocation8 + $0x1b0] sm:$0xff]  ;;  %v8616_v24 = vcombine.high %v1188_v19, %v1192_v20  ;;  %v177_v25 = vld [vmem:[#allocation8 + $0xc8] sm:$0xff]  ;;  %v8622_v31 = vcombine.low %v1188_v19, %v1192_v20 }
  0x9f   :  { %608 = vmatprep.subr.bf16.mxu1 %v6995_v29  ;;  %754 = vmatprep.subr.bf16.mxu0 %v6999_v30  ;;  %v7019_v53 = vcombine.high %v200_v46, %v204_v48  ;;  %v7023_v54 = vcombine.high %v202_v49, %v206_v50  ;;  %v208_v55 = vld [vmem:[#allocation8 + $0x1c0] sm:$0xff]  ;;  %v210_v57 = vld [vmem:[#allocation8 + $0x1d0] sm:$0xff]  ;;  %v7018_v59 = vcombine.low %v200_v46, %v204_v48  ;;  %v181_v26 = vld [vmem:[#allocation8 + $0xe8] sm:$0xff] }
  0xa0   :  { %v212_v56 = vld [vmem:[#allocation8 + $0x1e0] sm:$0xff]  ;;  %v214_v58 = vld [vmem:[#allocation8 + $0x1f0] sm:$0xff]  ;;  %v7022_v60 = vcombine.low %v202_v49, %v206_v50  ;;  %v8618_v27 = vld [vmem:[#allocation5 + $0x8] sm:$0xff]   ;;  %v6988_v30 = vcombine.low %v169_v17, %v173_v18  ;;  %v6997_v32 = vcombine.high %v177_v25, %v181_v26  ;;  %v6996_v38 = vcombine.low %v177_v25, %v181_v26 }
  0xa1   :  { %v7027_v61 = vcombine.high %v208_v55, %v212_v56  ;;  %v7031_v62 = vcombine.high %v210_v57, %v214_v58  ;;  %v7026_v4 = vcombine.low %v208_v55, %v212_v56  ;;  %v7030_v5 = vcombine.low %v210_v57, %v214_v58  ;;  %v8602_v10 = vld [vmem:[#allocation5] sm:$0xff]   ;;  %v1196_v28 = vld [vmem:[#allocation11 + $0xc0] sm:$0xff]  ;;  %v167_v17 = vld [vmem:[#allocation8 + $0x78] sm:$0xff] }
  0xa2   :  { %609 = vmatpush1.bf16.msra.mxu1 %v6994_v35  ;;  %755 = vmatpush1.bf16.msra.mxu0 %v6998_v36  ;;  %v1200_v29 = vld [vmem:[#allocation11 + $0xe0] sm:$0xff]  ;;  %v175_v25 = vld [vmem:[#allocation8 + $0xb8] sm:$0xff] }
  0xa3   :  { %610 = vmatprep.subr.bf16.mxu1 %v7003_v37  ;;  %756 = vmatprep.subr.bf16.mxu0 %v7007_v39  ;;  %v8625_v33 = vcombine.high %v1196_v28, %v1200_v29  ;;  %v185_v34 = vld [vmem:[#allocation8 + $0x108] sm:$0xff]  ;;  %v8630_v39 = vcombine.low %v1196_v28, %v1200_v29 }
  0xa4   :  { %v189_v35 = vld [vmem:[#allocation8 + $0x128] sm:$0xff] }
  0xa5   :  { %v1204_v36 = vld [vmem:[#allocation11 + $0x100] sm:$0xff]  ;;  %v7005_v40 = vcombine.high %v185_v34, %v189_v35 }
  0xa6   :  { %611 = vmatpush1.bf16.msra.mxu1 %v7002_v43  ;;  %757 = vmatpush1.bf16.msra.mxu0 %v7006_v44  ;;  %v1208_v37 = vld [vmem:[#allocation11 + $0x120] sm:$0xff]  ;;  %v8636_v44 = vld [vmem:[#allocation5 + $0x10] sm:$0xff]  }
  0xa7   :  { %612 = vmatprep.subr.bf16.mxu1 %v7011_v45  ;;  %758 = vmatprep.subr.bf16.mxu0 %v7015_v47  ;;  %v8633_v41 = vcombine.high %v1204_v36, %v1208_v37  ;;  %v193_v42 = vld [vmem:[#allocation8 + $0x148] sm:$0xff]  ;;  %v7004_v47 = vcombine.low %v185_v34, %v189_v35  ;;  %v8640_v48 = vcombine.low %v1204_v36, %v1208_v37  ;;  %v179_v35 = vld [vmem:[#allocation8 + $0xd8] sm:$0xff] }
  0xa8   :  { %v197_v43 = vld [vmem:[#allocation8 + $0x168] sm:$0xff]  ;;  %v183_v36 = vld [vmem:[#allocation8 + $0xf8] sm:$0xff] }
  0xa9   :  { %v1212_v45 = vld [vmem:[#allocation11 + $0x140] sm:$0xff]  ;;  %v7013_v49 = vcombine.high %v193_v42, %v197_v43  ;;  %v7012_v55 = vcombine.low %v193_v42, %v197_v43 }
  0xaa   :  { %613 = vmatpush1.bf16.msra.mxu1 %v7010_v51  ;;  %759 = vmatpush1.bf16.msra.mxu0 %v7014_v52  ;;  %v1216_v46 = vld [vmem:[#allocation11 + $0x160] sm:$0xff] }
  0xab   :  { %614 = vmatprep.subr.bf16.mxu1 %v7019_v53  ;;  %760 = vmatprep.subr.bf16.mxu0 %v7023_v54  ;;  %v8643_v50 = vcombine.high %v1212_v45, %v1216_v46  ;;  %v201_v51 = vld [vmem:[#allocation8 + $0x188] sm:$0xff]  ;;  %v8648_v56 = vcombine.low %v1212_v45, %v1216_v46  ;;  %v187_v46 = vld [vmem:[#allocation8 + $0x118] sm:$0xff] }
  0xac   :  { %v205_v52 = vld [vmem:[#allocation8 + $0x1a8] sm:$0xff] }
  0xad   :  { %v1220_v53 = vld [vmem:[#allocation11 + $0x180] sm:$0xff]  ;;  %v7021_v57 = vcombine.high %v201_v51, %v205_v52  ;;  %v7020_v1 = vcombine.low %v201_v51, %v205_v52  ;;  %v7001_v51 = vcombine.high %v179_v35, %v183_v36 }
  0xae   :  { %615 = vmatpush1.bf16.msra.mxu1 %v7018_v59  ;;  %761 = vmatpush1.bf16.msra.mxu0 %v7022_v60  ;;  %v1224_v54 = vld [vmem:[#allocation11 + $0x1a0] sm:$0xff] }
  0xaf   :  { %616 = vmatprep.subr.bf16.mxu1 %v7027_v61  ;;  %762 = vmatprep.subr.bf16.mxu0 %v7031_v62  ;;  %v8651_v58 = vcombine.high %v1220_v53, %v1224_v54  ;;  %v209_v59 = vld [vmem:[#allocation8 + $0x1c8] sm:$0xff]  ;;  %v8654_v61 = vld [vmem:[#allocation5 + $0x18] sm:$0xff]   ;;  %v8658_v2 = vcombine.low %v1220_v53, %v1224_v54 }
  0xb0   :  { %v213_v60 = vld [vmem:[#allocation8 + $0x1e8] sm:$0xff] }
  0xb1   :  { %v1228_v62 = vld [vmem:[#allocation11 + $0x1c0] sm:$0xff]  ;;  %v7029_v3 = vcombine.high %v209_v59, %v213_v60  ;;  %v7028_v11 = vcombine.low %v209_v59, %v213_v60  ;;  %v199_v59 = vld [vmem:[#allocation8 + $0x178] sm:$0xff] }
  0xb2   :  { %617 = vmatpush1.bf16.msra.mxu1 %v7026_v4  ;;  %763 = vmatpush1.bf16.msra.mxu0 %v7030_v5  ;;  %v1232_v63 = vld [vmem:[#allocation11 + $0x1e0] sm:$0xff]  ;;  %v155_v5 = vld [vmem:[#allocation8 + $0x18] sm:$0xff] }
  0xb3   :  { %675 = vmatprep.subr.bf16.mxu1 %v6973_v6  ;;  %2004 = vmatprep.subr.bf16.mxu0 %v8600_v7  ;;  %v8661_v4 = vcombine.high %v1228_v62, %v1232_v63  ;;  %v159_v6 = vld [vmem:[#allocation8 + $0x38] sm:$0xff]  ;;  %v1236_v8 = vld [vmem:[#allocation11 + $0x200] sm:$0xff]  ;;  %v8666_v12 = vcombine.low %v1228_v62, %v1232_v63 }
  0xb4   :  { %v1240_v9 = vld [vmem:[#allocation11 + $0x220] sm:$0xff] }
  0xb5   :  { %635 = vmatmul.mubr.bf16.vlgmr.msra.gmra.mrb[0].mxu1 %v8602_v10  ;;  %781 = vmatmul.mubr.bf16.vlgmr.msra.gmra.mrb[0].mxu0 %v8602_v10  ;;  %v8669_v18 = vcombine.high %v1236_v8, %v1240_v9  ;;  %v1244_v19 = vld [vmem:[#allocation11 + $0x240] sm:$0xff]  ;;  %v8674_v26 = vcombine.low %v1236_v8, %v1240_v9  ;;  %v207_v8 = vld [vmem:[#allocation8 + $0x1b8] sm:$0xff] }
  0xb6   :  { %676 = vmatpush1.bf16.msra.mxu1 %v6972_v13  ;;  %2005 = vmatpush1.bf16.msra.mxu0 %v8604_v14  ;;  %v6977_v13 = vcombine.high %v155_v5, %v159_v6  ;;  %v1248_v20 = vld [vmem:[#allocation11 + $0x260] sm:$0xff] }
  0xb7   :  { %677 = vmatprep.subr.bf16.mxu1 %v6981_v15  ;;  %2006 = vmatprep.subr.bf16.mxu0 %v8607_v16  ;;  %v163_v15 = vld [vmem:[#allocation8 + $0x58] sm:$0xff]  ;;  %12248 = vst [vmem:[#allocation27_spill] sm:$0xff] %v8674_v26  ;;  %v1252_v29 = vld [vmem:[#allocation11 + $0x280] sm:$0xff]  ;;  %v8682_v37 = vcombine.low %v1244_v19, %v1248_v20 }
  0xb8   :  { %644 = vmatprep.mubr.bf16.mxu1 %v11781_v0  ;;  %790 = vmatprep.mubr.bf16.mxu0 %v11781_v0  ;;  %v6985_v28 = vcombine.high %v163_v15, %v167_v17  ;;  %v6984_v34 = vcombine.low %v163_v15, %v167_v17  ;;  %v1264_v42 = vld [vmem:[#allocation11 + $0x2e0] sm:$0xff] }
  0xb9   :  { %12250 = vst [vmem:[#allocation29_spill] sm:$0xff] %v8682_v37  ;;  %v1268_v52 = vld [vmem:[#allocation11 + $0x300] sm:$0xff] }
  0xba   :  { %678 = vmatpush1.bf16.msra.mxu1 %v6980_v21  ;;  %2007 = vmatpush1.bf16.msra.mxu0 %v8612_v22  ;;  %v6976_v21 = vcombine.low %v155_v5, %v159_v6  ;;  %v1272_v53 = vld [vmem:[#allocation11 + $0x320] sm:$0xff]  ;;  %v203_v6 = vld [vmem:[#allocation8 + $0x198] sm:$0xff] }
  0xbb   :  { %679 = vmatprep.subr.bf16.mxu1 %v6989_v23  ;;  %2008 = vmatprep.subr.bf16.mxu0 %v8616_v24  ;;  %v171_v23 = vld [vmem:[#allocation8 + $0x98] sm:$0xff]  ;;  %v1276_v63 = vld [vmem:[#allocation11 + $0x340] sm:$0xff]  ;;  %v8702_v9 = vcombine.low %v1268_v52, %v1272_v53 }
  0xbc   :  { %v6992_v45 = vcombine.low %v171_v23, %v175_v25  ;;  %v1288_v15 = vld [vmem:[#allocation11 + $0x3a0] sm:$0xff] }
  0xbd   :  { %645 = vmatmul.mubr.bf16.gmra.mrb[4].mxu1 %v8618_v27  ;;  %791 = vmatmul.mubr.bf16.gmra.mrb[4].mxu0 %v8618_v27  ;;  %12256 = vst [vmem:[#allocation35_spill] sm:$0xff] %v8702_v9 }
  0xbe   :  { %680 = vmatpush1.bf16.msra.mxu1 %v6988_v30  ;;  %654 = vmatprep.mubr.bf16.mxu1 %v11781_v0  ;;  %v1256_v30 = vld [vmem:[#allocation11 + $0x2a0] sm:$0xff] }
  0xbf   :  { %2009 = vmatpush1.bf16.msra.mxu0 %v8622_v31  ;;  %681 = vmatprep.subr.bf16.mxu1 %v6997_v32  ;;  %v8677_v32 = vcombine.high %v1244_v19, %v1248_v20  ;;  %v8685_v43 = vcombine.high %v1252_v29, %v1256_v30  ;;  %v211_v20 = vld [vmem:[#allocation8 + $0x1d8] sm:$0xff] }
  0xc0   :  { %2010 = vmatprep.subr.bf16.mxu0 %v8625_v33  ;;  %800 = vmatprep.mubr.bf16.mxu0 %v11781_v0 }
  0xc1   :  { %12249 = vst [vmem:[#allocation28_spill] sm:$0xff] %v8677_v32  ;;  %12251 = vst [vmem:[#allocation30_spill] sm:$0xff] %v8685_v43 }
  0xc2   :  { %682 = vmatpush1.bf16.msra.mxu1 %v6996_v38  ;;  %v6993_v38 = vcombine.high %v171_v23, %v175_v25  ;;  %v7025_v25 = vcombine.high %v203_v6, %v207_v8 }
  0xc3   :  { %2011 = vmatpush1.bf16.msra.mxu0 %v8630_v39  ;;  %683 = vmatprep.subr.bf16.mxu1 %v7005_v40  ;;  %v1260_v40 = vld [vmem:[#allocation11 + $0x2c0] sm:$0xff] }
  0xc4   :  { %2012 = vmatprep.subr.bf16.mxu0 %v8633_v41  ;;  %v8691_v54 = vcombine.high %v1260_v40, %v1264_v42  ;;  %v8696_v60 = vcombine.low %v1260_v40, %v1264_v42  ;;  %v1174_v42 = vld [vmem:[#allocation11 + $0x10] sm:$0xff] }
  0xc5   :  { %655 = vmatmul.mubr.bf16.gmra.mrb[8].mxu1 %v8636_v44  ;;  %801 = vmatmul.mubr.bf16.gmra.mrb[8].mxu0 %v8636_v44 }
  0xc6   :  { %684 = vmatpush1.bf16.msra.mxu1 %v7004_v47  ;;  %664 = vmatprep.mubr.bf16.mxu1 %v11781_v0  ;;  %v191_v47 = vld [vmem:[#allocation8 + $0x138] sm:$0xff]  ;;  %12253 = vst [vmem:[#allocation32_spill] sm:$0xff] %v8691_v54  ;;  %12254 = vst [vmem:[#allocation33_spill] sm:$0xff] %v8696_v60 }
  0xc7   :  { %2013 = vmatpush1.bf16.msra.mxu0 %v8640_v48  ;;  %685 = vmatprep.subr.bf16.mxu1 %v7013_v49  ;;  %v8688_v49 = vcombine.low %v1252_v29, %v1256_v30  ;;  %v7009_v62 = vcombine.high %v187_v46, %v191_v47  ;;  %v7008_v5 = vcombine.low %v187_v46, %v191_v47  ;;  %v1296_v29 = vld [vmem:[#allocation11 + $0x3e0] sm:$0xff] }
  0xc8   :  { %2014 = vmatprep.subr.bf16.mxu0 %v8643_v50  ;;  %810 = vmatprep.mubr.bf16.mxu0 %v11781_v0 }
  0xc9   :  { %12252 = vst [vmem:[#allocation31_spill] sm:$0xff] %v8688_v49 }
  0xca   :  { %686 = vmatpush1.bf16.msra.mxu1 %v7012_v55  ;;  %v7000_v55 = vcombine.low %v179_v35, %v183_v36  ;;  %v1173_v35 = vld [vmem:[#allocation11 + $0x8] sm:$0xff] }
  0xcb   :  { %2015 = vmatpush1.bf16.msra.mxu0 %v8648_v56  ;;  %687 = vmatprep.subr.bf16.mxu1 %v7021_v57  ;;  %v195_v57 = vld [vmem:[#allocation8 + $0x158] sm:$0xff]  ;;  %v1177_v36 = vld [vmem:[#allocation11 + $0x28] sm:$0xff] }
  0xcc   :  { %2016 = vmatprep.subr.bf16.mxu0 %v8651_v58  ;;  %v7016_v19 = vcombine.low %v195_v57, %v199_v59 }
  0xcd   :  { %665 = vmatmul.mubr.bf16.gmra.mrb[12].mxu1 %v8654_v61  ;;  %811 = vmatmul.mubr.bf16.gmra.mrb[12].mxu0 %v8654_v61 }
  0xce   :  { %688 = vmatpush1.bf16.msra.mxu1 %v7020_v1  ;;  %707 = vmatprep.mubr.bf16.mxu1 %v11781_v0  ;;  %v1280_v1 = vld [vmem:[#allocation11 + $0x360] sm:$0xff] }
  0xcf   :  { %2017 = vmatpush1.bf16.msra.mxu0 %v8658_v2  ;;  %689 = vmatprep.subr.bf16.mxu1 %v7029_v3  ;;  %v8699_v3 = vcombine.high %v1268_v52, %v1272_v53  ;;  %v8705_v17 = vcombine.high %v1276_v63, %v1280_v1  ;;  %v8710_v23 = vcombine.low %v1276_v63, %v1280_v1  ;;  %v1185_v52 = vld [vmem:[#allocation11 + $0x68] sm:$0xff] }
  0xd0   :  { %2018 = vmatprep.subr.bf16.mxu0 %v8661_v4  ;;  %2036 = vmatprep.mubr.bf16.mxu0 %v11781_v0  ;;  %v8731_v63 = vcombine.low %v1173_v35, %v1177_v36  ;;  %v1189_v1 = vld [vmem:[#allocation11 + $0x88] sm:$0xff] }
  0xd1   :  { %12255 = vst [vmem:[#allocation34_spill] sm:$0xff] %v8699_v3  ;;  %12257 = vst [vmem:[#allocation36_spill] sm:$0xff] %v8705_v17 }
  0xd2   :  { %690 = vmatpush1.bf16.msra.mxu1 %v7028_v11  ;;  %v7017_v11 = vcombine.high %v195_v57, %v199_v59  ;;  %12258 = vst [vmem:[#allocation37_spill] sm:$0xff] %v8710_v23  ;;  %v1182_v57 = vld [vmem:[#allocation11 + $0x50] sm:$0xff] }
  0xd3   :  { %2019 = vmatpush1.bf16.msra.mxu0 %v8666_v12  ;;  %821 = vmatprep.subr.bf16.mxu1 %v6977_v13  ;;  %v1284_v13 = vld [vmem:[#allocation11 + $0x380] sm:$0xff]  ;;  %v1186_v59 = vld [vmem:[#allocation11 + $0x70] sm:$0xff] }
  0xd4   :  { %2020 = vmatprep.subr.bf16.mxu0 %v8669_v18  ;;  %v8713_v30 = vcombine.high %v1284_v13, %v1288_v15 }
  0xd5   :  { %708 = vmatmul.mubr.bf16.vlgmr.msra.gmra.mrb[16].mxu1 %v8602_v10 }
  0xd6   :  { %822 = vmatpush1.bf16.msra.mxu1 %v6976_v21  ;;  %717 = vmatprep.mubr.bf16.mxu1 %v11781_v0  ;;  %v215_v21 = vld [vmem:[#allocation8 + $0x1f8] sm:$0xff]  ;;  %12259 = vst [vmem:[#allocation38_spill] sm:$0xff] %v8713_v30 }
  0xd7   :  { %2021 = vmatpush1.bf16.msra.mxu0 %v8674_v26  ;;  %823 = vmatprep.subr.bf16.mxu1 %v6985_v28  ;;  %v1292_v28 = vld [vmem:[#allocation11 + $0x3c0] sm:$0xff]  ;;  %v7033_v40 = vcombine.high %v211_v20, %v215_v21  ;;  %v7032_v47 = vcombine.low %v211_v20, %v215_v21  ;;  %v1197_v20 = vld [vmem:[#allocation11 + $0xc8] sm:$0xff] }
  0xd8   :  { %2022 = vmatprep.subr.bf16.mxu0 %v8677_v32  ;;  %v8719_v46 = vcombine.high %v1292_v28, %v1296_v29  ;;  %v8724_v53 = vcombine.low %v1292_v28, %v1296_v29  ;;  %v1201_v21 = vld [vmem:[#allocation11 + $0xe8] sm:$0xff]  ;;  %v1198_v29 = vld [vmem:[#allocation11 + $0xd0] sm:$0xff] }
  0xda   :  { %824 = vmatpush1.bf16.msra.mxu1 %v6984_v34  ;;  %v7024_v34 = vcombine.low %v203_v6, %v207_v8  ;;  %12261 = vst [vmem:[#allocation40_spill] sm:$0xff] %v8719_v46  ;;  %12262 = vst [vmem:[#allocation41_spill] sm:$0xff] %v8724_v53 }
  0xdb   :  { %2023 = vmatpush1.bf16.msra.mxu0 %v8682_v37  ;;  %825 = vmatprep.subr.bf16.mxu1 %v6993_v38  ;;  %v8716_v38 = vcombine.low %v1284_v13, %v1288_v15  ;;  %v8740_v13 = vcombine.high %v1182_v57, %v1186_v59  ;;  %v1194_v15 = vld [vmem:[#allocation11 + $0xb0] sm:$0xff] }
  0xdc   :  { %2024 = vmatprep.subr.bf16.mxu0 %v8685_v43  ;;  %v9074_v37 = vld [vmem:[#allocation13 + $0x24] ss:$16 sps:$4 sm:$0xff]  }
  0xdd   :  { %718 = vmatmul.mubr.bf16.gmra.mrb[20].mxu1 %v8618_v27  ;;  %12260 = vst [vmem:[#allocation39_spill] sm:$0xff] %v8716_v38  ;;  %12266 = vst [vmem:[#allocation45_spill] sm:$0xff] %v8740_v13 }
  0xde   :  { %826 = vmatpush1.bf16.msra.mxu1 %v6992_v45  ;;  %727 = vmatprep.mubr.bf16.mxu1 %v11781_v0  ;;  %v1178_v45 = vld [vmem:[#allocation11 + $0x30] sm:$0xff]  ;;  %12349 = vst [vmem:[#allocation127_spill] sm:$0xff] %v9074_v37 }
  0xdf   :  { %2025 = vmatpush1.bf16.msra.mxu0 %v8688_v49  ;;  %827 = vmatprep.subr.bf16.mxu1 %v7001_v51  ;;  %v1181_v51 = vld [vmem:[#allocation11 + $0x48] sm:$0xff]  ;;  %v8735_v6 = vcombine.low %v1174_v42, %v1178_v45 }
  0xe0   :  { %2026 = vmatprep.subr.bf16.mxu0 %v8691_v54  ;;  %v8737_v8 = vcombine.high %v1181_v51, %v1185_v52  ;;  %v1282_v54 = vld [vmem:[#allocation11 + $0x370] sm:$0xff] }
  0xe1   :  { %12265 = vst [vmem:[#allocation44_spill] sm:$0xff] %v8735_v6 }
  0xe2   :  { %828 = vmatpush1.bf16.msra.mxu1 %v7000_v55  ;;  %v8726_v55 = vcombine.high %v1173_v35, %v1177_v36 }
  0xe3   :  { %2027 = vmatpush1.bf16.msra.mxu0 %v8696_v60  ;;  %829 = vmatprep.subr.bf16.mxu1 %v7009_v62  ;;  %v8729_v62 = vcombine.high %v1174_v42, %v1178_v45  ;;  %v1205_v45 = vld [vmem:[#allocation11 + $0x108] sm:$0xff]  ;;  %v1278_v60 = vld [vmem:[#allocation11 + $0x350] sm:$0xff] }
  0xe4   :  { %2028 = vmatprep.subr.bf16.mxu0 %v8699_v3  ;;  %12263 = vst [vmem:[#allocation42_spill] sm:$0xff] %v8726_v55  ;;  %v1274_v3 = vld [vmem:[#allocation11 + $0x330] sm:$0xff] }
  0xe5   :  { %728 = vmatmul.mubr.bf16.gmra.mrb[24].mxu1 %v8636_v44  ;;  %12264 = vst [vmem:[#allocation43_spill] sm:$0xff] %v8729_v62 }
  0xe6   :  { %830 = vmatpush1.bf16.msra.mxu1 %v7008_v5  ;;  %737 = vmatprep.mubr.bf16.mxu1 %v11781_v0  ;;  %v1193_v5 = vld [vmem:[#allocation11 + $0xa8] sm:$0xff] }
  0xe7   :  { %2029 = vmatpush1.bf16.msra.mxu0 %v8702_v9  ;;  %831 = vmatprep.subr.bf16.mxu1 %v7017_v11  ;;  %v1190_v11 = vld [vmem:[#allocation11 + $0x90] sm:$0xff]  ;;  %v8751_v28 = vcombine.high %v1189_v1, %v1193_v5  ;;  %v8759_v35 = vcombine.low %v1189_v1, %v1193_v5 }
  0xe8   :  { %2030 = vmatprep.subr.bf16.mxu0 %v8705_v17  ;;  %v8763_v36 = vcombine.low %v1190_v11, %v1194_v15  ;;  %v1266_v17 = vld [vmem:[#allocation11 + $0x2f0] sm:$0xff] }
  0xe9   :  { %v1270_v9 = vld [vmem:[#allocation11 + $0x310] sm:$0xff] }
  0xea   :  { %832 = vmatpush1.bf16.msra.mxu1 %v7016_v19  ;;  %v8745_v19 = vcombine.low %v1181_v51, %v1185_v52  ;;  %12269 = vst [vmem:[#allocation48_spill] sm:$0xff] %v8763_v36  ;;  %v1206_v51 = vld [vmem:[#allocation11 + $0x110] sm:$0xff] }
  0xeb   :  { %2031 = vmatpush1.bf16.msra.mxu0 %v8710_v23  ;;  %833 = vmatprep.subr.bf16.mxu1 %v7025_v25  ;;  %v8749_v25 = vcombine.low %v1182_v57, %v1186_v59  ;;  %v1210_v52 = vld [vmem:[#allocation11 + $0x130] sm:$0xff]  ;;  %v8772_v57 = vcombine.low %v1197_v20, %v1201_v21 }
  0xec   :  { %2032 = vmatprep.subr.bf16.mxu0 %v8713_v30  ;;  %v8782_v5 = vcombine.high %v1206_v51, %v1210_v52  ;;  %v1258_v30 = vld [vmem:[#allocation11 + $0x2b0] sm:$0xff] }
  0xed   :  { %738 = vmatmul.mubr.bf16.gmra.mrb[28].mxu1 %v8654_v61  ;;  %12267 = vst [vmem:[#allocation46_spill] sm:$0xff] %v8749_v25  ;;  %v1262_v23 = vld [vmem:[#allocation11 + $0x2d0] sm:$0xff] }
  0xee   :  { %834 = vmatpush1.bf16.msra.mxu1 %v7024_v34  ;;  %853 = vmatprep.mubr.bf16.mxu1 %v11781_v0  ;;  %v1202_v34 = vld [vmem:[#allocation11 + $0xf0] sm:$0xff]  ;;  %12272 = vst [vmem:[#allocation51_spill] sm:$0xff] %v8782_v5 }
  0xef   :  { %2033 = vmatpush1.bf16.msra.mxu0 %v8716_v38  ;;  %835 = vmatprep.subr.bf16.mxu1 %v7033_v40  ;;  %v8765_v40 = vcombine.high %v1197_v20, %v1201_v21  ;;  %v8768_v42 = vcombine.high %v1198_v29, %v1202_v34  ;;  %v8777_v59 = vcombine.low %v1198_v29, %v1202_v34  ;;  %v1254_v38 = vld [vmem:[#allocation11 + $0x290] sm:$0xff] }
  0xf0   :  { %2034 = vmatprep.subr.bf16.mxu0 %v8719_v46  ;;  %v8789_v21 = vcombine.low %v1206_v51, %v1210_v52  ;;  %v1250_v46 = vld [vmem:[#allocation11 + $0x270] sm:$0xff] }
  0xf1   :  { %12270 = vst [vmem:[#allocation49_spill] sm:$0xff] %v8768_v42  ;;  %12271 = vst [vmem:[#allocation50_spill] sm:$0xff] %v8777_v59 }
  0xf2   :  { %836 = vmatpush1.bf16.msra.mxu1 %v7032_v47  ;;  %v1209_v47 = vld [vmem:[#allocation11 + $0x128] sm:$0xff]  ;;  %12273 = vst [vmem:[#allocation52_spill] sm:$0xff] %v8789_v21 }
  0xf3   :  { %2035 = vmatpush1.bf16.msra.mxu0 %v8724_v53  ;;  %2045 = vmatprep.subr.bf16.mxu1 %v8726_v55  ;;  %v8779_v1 = vcombine.high %v1205_v45, %v1209_v47  ;;  %v8785_v20 = vcombine.low %v1205_v45, %v1209_v47  ;;  %v12275_v47 = vmov 0   ;;  %v1242_v53 = vld [vmem:[#allocation11 + $0x230] sm:$0xff] }
  0xf4   :  { %2086 = vmatprep.subr.bf16.mxu0 %v8729_v62  ;;  %v1238_v62 = vld [vmem:[#allocation11 + $0x210] sm:$0xff] }
  0xf5   :  { %854 = vmatmul.mubr.bf16.vlgmr.msra.gmra.mrb[32].mxu1 %v8602_v10  ;;  %v8754_v10 = vcombine.high %v1190_v11, %v1194_v15  ;;  %v1213_v11 = vld [vmem:[#allocation11 + $0x148] sm:$0xff]  ;;  %v1214_v15 = vld [vmem:[#allocation11 + $0x150] sm:$0xff] }
  0xf6   :  { %2037 = vmatmul.mubr.bf16.vlgmr.msra.gmra.mrb[16].mxu0 %v11781_v0  ;;  %2046 = vmatpush1.bf16.msra.mxu1 %v8731_v63 }
  0xf7   :  { %2087 = vmatpush1.bf16.msra.mxu0 %v8735_v6  ;;  %2047 = vmatprep.subr.bf16.mxu1 %v8737_v8  ;;  %12268 = vst [vmem:[#allocation47_spill] sm:$0xff] %v8754_v10  ;;  %v1234_v6 = vld [vmem:[#allocation11 + $0x1f0] sm:$0xff] }
  0xf8   :  { %2088 = vmatprep.subr.bf16.mxu0 %v8740_v13  ;;  %863 = vmatprep.mubr.bf16.mxu1 %v11781_v0  ;;  %v1230_v13 = vld [vmem:[#allocation11 + $0x1d0] sm:$0xff] }
  0xf9   :  { %2118 = vmatprep.mubr.bf16.mxu0 %v11781_v0 }
  0xfa   :  { %2048 = vmatpush1.bf16.msra.mxu1 %v8745_v19 }
  0xfb   :  { %2089 = vmatpush1.bf16.msra.mxu0 %v8749_v25  ;;  %2049 = vmatprep.subr.bf16.mxu1 %v8751_v28  ;;  %v1226_v25 = vld [vmem:[#allocation11 + $0x1b0] sm:$0xff] }
  0xfc   :  { %2090 = vmatprep.subr.bf16.mxu0 %v8754_v10  ;;  %v1218_v10 = vld [vmem:[#allocation11 + $0x170] sm:$0xff] }
  0xfd   :  { %864 = vmatmul.mubr.bf16.gmra.mrb[36].mxu1 %v8618_v27  ;;  %v1217_v27 = vld [vmem:[#allocation11 + $0x168] sm:$0xff]  ;;  %v8794_v34 = vcombine.high %v1214_v15, %v1218_v10  ;;  %v8803_v51 = vcombine.low %v1214_v15, %v1218_v10  ;;  %v8820_v15 = vcombine.high %v1230_v13, %v1234_v6 }
  0xfe   :  { %2050 = vmatpush1.bf16.msra.mxu1 %v8759_v35  ;;  %873 = vmatprep.mubr.bf16.mxu1 %v11781_v0  ;;  %v8791_v29 = vcombine.high %v1213_v11, %v1217_v27  ;;  %v1221_v0 = vld [vmem:[#allocation11 + $0x188] sm:$0xff]  ;;  %v8798_v45 = vcombine.low %v1213_v11, %v1217_v27 }
  0xff   :  { %2091 = vmatpush1.bf16.msra.mxu0 %v8763_v36  ;;  %2051 = vmatprep.subr.bf16.mxu1 %v8765_v40  ;;  %12274 = vst [vmem:[#allocation53_spill] sm:$0xff] %v8794_v34  ;;  %v1222_v36 = vld [vmem:[#allocation11 + $0x190] sm:$0xff]  ;;  %12276 = vst [vmem:[#allocation54_spill] sm:$0xff] %v8803_v51 }
 0x100   :  { %2092 = vmatprep.subr.bf16.mxu0 %v8768_v42  ;;  %v1225_v42 = vld [vmem:[#allocation11 + $0x1a8] sm:$0xff]  ;;  %v8815_v10 = vcombine.low %v1222_v36, %v1226_v25  ;;  %12279 = vst [vmem:[#allocation57_spill] sm:$0xff] %v8820_v15 }
 0x101   :  { %v8805_v52 = vcombine.high %v1221_v0, %v1225_v42  ;;  %v8811_v11 = vcombine.low %v1221_v0, %v1225_v42  ;;  %v8834_v42 = vcombine.high %v1238_v62, %v1242_v53 }
 0x102   :  { %2052 = vmatpush1.bf16.msra.mxu1 %v8772_v57  ;;  %12278 = vst [vmem:[#allocation56_spill] sm:$0xff] %v8815_v10 }
 0x103   :  { %2093 = vmatpush1.bf16.msra.mxu0 %v8777_v59  ;;  %2053 = vmatprep.subr.bf16.mxu1 %v8779_v1  ;;  %v1229_v59 = vld [vmem:[#allocation11 + $0x1c8] sm:$0xff]  ;;  %12282 = vst [vmem:[#allocation60_spill] sm:$0xff] %v8834_v42 }
 0x104   :  { %2094 = vmatprep.subr.bf16.mxu0 %v8782_v5  ;;  %v8808_v5 = vcombine.high %v1222_v36, %v1226_v25  ;;  %v8829_v25 = vcombine.low %v1230_v13, %v1234_v6  ;;  %v8841_v6 = vcombine.low %v1238_v62, %v1242_v53 }
 0x105   :  { %874 = vmatmul.mubr.bf16.gmra.mrb[40].mxu1 %v8636_v44  ;;  %v1233_v44 = vld [vmem:[#allocation11 + $0x1e8] sm:$0xff] }
 0x106   :  { %2054 = vmatpush1.bf16.msra.mxu1 %v8785_v20  ;;  %883 = vmatprep.mubr.bf16.mxu1 %v12275_v47  ;;  %12277 = vst [vmem:[#allocation55_spill] sm:$0xff] %v8808_v5  ;;  %v8817_v27 = vcombine.high %v1229_v59, %v1233_v44  ;;  %v8824_v0 = vcombine.low %v1229_v59, %v1233_v44  ;;  %12280 = vst [vmem:[#allocation58_spill] sm:$0xff] %v8829_v25 }
 0x107   :  { %2095 = vmatpush1.bf16.msra.mxu0 %v8789_v21  ;;  %2055 = vmatprep.subr.bf16.mxu1 %v8791_v29  ;;  %v1241_v21 = vld [vmem:[#allocation11 + $0x228] sm:$0xff]  ;;  %12284 = vst [vmem:[#allocation62_spill] sm:$0xff] %v8841_v6 }
 0x108   :  { %2096 = vmatprep.subr.bf16.mxu0 %v8794_v34  ;;  %v1237_v34 = vld [vmem:[#allocation11 + $0x208] sm:$0xff] }
 0x109   :  { %v8831_v36 = vcombine.high %v1237_v34, %v1241_v21  ;;  %v8837_v59 = vcombine.low %v1237_v34, %v1241_v21  ;;  %v8858_v34 = vcombine.high %v1254_v38, %v1258_v30 }
 0x10a   :  { %2056 = vmatpush1.bf16.msra.mxu1 %v8798_v45 }
 0x10b   :  { %2097 = vmatpush1.bf16.msra.mxu0 %v8803_v51  ;;  %2057 = vmatprep.subr.bf16.mxu1 %v8805_v52  ;;  %12281 = vst [vmem:[#allocation59_spill] sm:$0xff] %v8831_v36  ;;  %v1246_v51 = vld [vmem:[#allocation11 + $0x250] sm:$0xff]  ;;  %12283 = vst [vmem:[#allocation61_spill] sm:$0xff] %v8837_v59 }
 0x10c   :  { %2098 = vmatprep.subr.bf16.mxu0 %v8808_v5  ;;  %v1245_v5 = vld [vmem:[#allocation11 + $0x248] sm:$0xff]  ;;  %v8846_v44 = vcombine.high %v1246_v51, %v1250_v46  ;;  %v8853_v53 = vcombine.low %v1246_v51, %v1250_v46  ;;  %12290 = vst [vmem:[#allocation68_spill] sm:$0xff] %v8858_v34  ;;  %v8865_v46 = vcombine.low %v1254_v38, %v1258_v30 }
 0x10d   :  { %884 = vmatmul.mubr.bf16.gmra.mrb[44].mxu1 %v8654_v61  ;;  %v1249_v61 = vld [vmem:[#allocation11 + $0x268] sm:$0xff]  ;;  %v8877_v30 = vcombine.low %v1262_v23, %v1266_v17 }
 0x10e   :  { %2058 = vmatpush1.bf16.msra.mxu1 %v8811_v11  ;;  %2077 = vmatprep.mubr.bf16.mxu1 %v12275_v47  ;;  %v8843_v13 = vcombine.high %v1245_v5, %v1249_v61  ;;  %12286 = vst [vmem:[#allocation64_spill] sm:$0xff] %v8846_v44  ;;  %v8849_v21 = vcombine.low %v1245_v5, %v1249_v61  ;;  %12288 = vst [vmem:[#allocation66_spill] sm:$0xff] %v8853_v53 }
 0x10f   :  { %2099 = vmatpush1.bf16.msra.mxu0 %v8815_v10  ;;  %2059 = vmatprep.subr.bf16.mxu1 %v8817_v27  ;;  %v1257_v10 = vld [vmem:[#allocation11 + $0x2a8] sm:$0xff]  ;;  %12292 = vst [vmem:[#allocation70_spill] sm:$0xff] %v8865_v46  ;;  %v8870_v61 = vcombine.high %v1262_v23, %v1266_v17  ;;  %12296 = vst [vmem:[#allocation74_spill] sm:$0xff] %v8877_v30  ;;  %v8889_v17 = vcombine.low %v1270_v9, %v1274_v3 }
 0x110   :  { %2100 = vmatprep.subr.bf16.mxu0 %v8820_v15  ;;  %12285 = vst [vmem:[#allocation63_spill] sm:$0xff] %v8843_v13  ;;  %v1253_v15 = vld [vmem:[#allocation11 + $0x288] sm:$0xff]  ;;  %12287 = vst [vmem:[#allocation65_spill] sm:$0xff] %v8849_v21 }
 0x111   :  { %v8855_v62 = vcombine.high %v1253_v15, %v1257_v10  ;;  %v8861_v5 = vcombine.low %v1253_v15, %v1257_v10  ;;  %12294 = vst [vmem:[#allocation72_spill] sm:$0xff] %v8870_v61  ;;  %v8882_v15 = vcombine.high %v1270_v9, %v1274_v3  ;;  %12300 = vst [vmem:[#allocation78_spill] sm:$0xff] %v8889_v17 }
 0x112   :  { %2060 = vmatpush1.bf16.msra.mxu1 %v8824_v0  ;;  %v8901_v3 = vcombine.low %v1278_v60, %v1282_v54 }
 0x113   :  { %2101 = vmatpush1.bf16.msra.mxu0 %v8829_v25  ;;  %2061 = vmatprep.subr.bf16.mxu1 %v8831_v36  ;;  %12289 = vst [vmem:[#allocation67_spill] sm:$0xff] %v8855_v62  ;;  %v1265_v25 = vld [vmem:[#allocation11 + $0x2e8] sm:$0xff]  ;;  %12291 = vst [vmem:[#allocation69_spill] sm:$0xff] %v8861_v5 }
 0x114   :  { %2102 = vmatprep.subr.bf16.mxu0 %v8834_v42  ;;  %v1261_v42 = vld [vmem:[#allocation11 + $0x2c8] sm:$0xff]  ;;  %12298 = vst [vmem:[#allocation76_spill] sm:$0xff] %v8882_v15  ;;  %12304 = vst [vmem:[#allocation82_spill] sm:$0xff] %v8901_v3 }
 0x115   :  { %v8867_v51 = vcombine.high %v1261_v42, %v1265_v25  ;;  %v8873_v10 = vcombine.low %v1261_v42, %v1265_v25  ;;  %v8894_v42 = vcombine.high %v1278_v60, %v1282_v54 }
 0x116   :  { %2062 = vmatpush1.bf16.msra.mxu1 %v8837_v59 }
 0x117   :  { %2103 = vmatpush1.bf16.msra.mxu0 %v8841_v6  ;;  %2063 = vmatprep.subr.bf16.mxu1 %v8843_v13  ;;  %12293 = vst [vmem:[#allocation71_spill] sm:$0xff] %v8867_v51  ;;  %v1273_v6 = vld [vmem:[#allocation11 + $0x328] sm:$0xff]  ;;  %12295 = vst [vmem:[#allocation73_spill] sm:$0xff] %v8873_v10 }
 0x118   :  { %2104 = vmatprep.subr.bf16.mxu0 %v8846_v44  ;;  %v1269_v44 = vld [vmem:[#allocation11 + $0x308] sm:$0xff]  ;;  %12302 = vst [vmem:[#allocation80_spill] sm:$0xff] %v8894_v42 }
 0x119   :  { %v8879_v38 = vcombine.high %v1269_v44, %v1273_v6  ;;  %v8885_v25 = vcombine.low %v1269_v44, %v1273_v6 }
 0x11a   :  { %2064 = vmatpush1.bf16.msra.mxu1 %v8849_v21 }
 0x11b   :  { %2105 = vmatpush1.bf16.msra.mxu0 %v8853_v53  ;;  %2065 = vmatprep.subr.bf16.mxu1 %v8855_v62  ;;  %12297 = vst [vmem:[#allocation75_spill] sm:$0xff] %v8879_v38  ;;  %v1281_v53 = vld [vmem:[#allocation11 + $0x368] sm:$0xff]  ;;  %12299 = vst [vmem:[#allocation77_spill] sm:$0xff] %v8885_v25 }
 0x11c   :  { %2106 = vmatprep.subr.bf16.mxu0 %v8858_v34  ;;  %v1277_v34 = vld [vmem:[#allocation11 + $0x348] sm:$0xff] }
 0x11d   :  { %v8891_v23 = vcombine.high %v1277_v34, %v1281_v53  ;;  %v8897_v6 = vcombine.low %v1277_v34, %v1281_v53 }
 0x11e   :  { %2066 = vmatpush1.bf16.msra.mxu1 %v8861_v5  ;;  %v1290_v5 = vld [vmem:[#allocation11 + $0x3b0] sm:$0xff] }
 0x11f   :  { %2107 = vmatpush1.bf16.msra.mxu0 %v8865_v46  ;;  %2067 = vmatprep.subr.bf16.mxu1 %v8867_v51  ;;  %12301 = vst [vmem:[#allocation79_spill] sm:$0xff] %v8891_v23  ;;  %v1289_v46 = vld [vmem:[#allocation11 + $0x3a8] sm:$0xff]  ;;  %v1286_v51 = vld [vmem:[#allocation11 + $0x390] sm:$0xff]  ;;  %12303 = vst [vmem:[#allocation81_spill] sm:$0xff] %v8897_v6 }
 0x120   :  { %2108 = vmatprep.subr.bf16.mxu0 %v8870_v61  ;;  %v1285_v61 = vld [vmem:[#allocation11 + $0x388] sm:$0xff]  ;;  %v8906_v44 = vcombine.high %v1286_v51, %v1290_v5  ;;  %v8913_v54 = vcombine.low %v1286_v51, %v1290_v5  ;;  %v1183_v51 = vld [vmem:[#allocation11 + $0x58] sm:$0xff] }
 0x121   :  { %v8903_v9 = vcombine.high %v1285_v61, %v1289_v46  ;;  %v8909_v53 = vcombine.low %v1285_v61, %v1289_v46  ;;  %v1187_v61 = vld [vmem:[#allocation11 + $0x78] sm:$0xff] }
 0x122   :  { %2068 = vmatpush1.bf16.msra.mxu1 %v8873_v10  ;;  %12306 = vst [vmem:[#allocation84_spill] sm:$0xff] %v8906_v44  ;;  %v1298_v10 = vld [vmem:[#allocation11 + $0x3f0] sm:$0xff]  ;;  %12308 = vst [vmem:[#allocation86_spill] sm:$0xff] %v8913_v54 }
 0x123   :  { %2109 = vmatpush1.bf16.msra.mxu0 %v8877_v30  ;;  %2069 = vmatprep.subr.bf16.mxu1 %v8879_v38  ;;  %12305 = vst [vmem:[#allocation83_spill] sm:$0xff] %v8903_v9  ;;  %v1297_v30 = vld [vmem:[#allocation11 + $0x3e8] sm:$0xff]  ;;  %v1294_v38 = vld [vmem:[#allocation11 + $0x3d0] sm:$0xff]  ;;  %12307 = vst [vmem:[#allocation85_spill] sm:$0xff] %v8909_v53 }
 0x124   :  { %2110 = vmatprep.subr.bf16.mxu0 %v8882_v15  ;;  %v1293_v15 = vld [vmem:[#allocation11 + $0x3c8] sm:$0xff]  ;;  %v8918_v34 = vcombine.high %v1294_v38, %v1298_v10  ;;  %v8925_v46 = vcombine.low %v1294_v38, %v1298_v10  ;;  %v8940_v10 = vcombine.low %v1183_v51, %v1187_v61 }
 0x125   :  { %v8915_v60 = vcombine.high %v1293_v15, %v1297_v30 }
 0x126   :  { %2070 = vmatpush1.bf16.msra.mxu1 %v8885_v25  ;;  %12310 = vst [vmem:[#allocation88_spill] sm:$0xff] %v8918_v34  ;;  %12312 = vst [vmem:[#allocation90_spill] sm:$0xff] %v8925_v46 }
 0x127   :  { %2111 = vmatpush1.bf16.msra.mxu0 %v8889_v17  ;;  %2071 = vmatprep.subr.bf16.mxu1 %v8891_v23  ;;  %12309 = vst [vmem:[#allocation87_spill] sm:$0xff] %v8915_v60  ;;  %v1179_v17 = vld [vmem:[#allocation11 + $0x38] sm:$0xff]  ;;  %v8921_v23 = vcombine.low %v1293_v15, %v1297_v30  ;;  %v8935_v30 = vcombine.high %v1183_v51, %v1187_v61  ;;  %12316 = vst [vmem:[#allocation94_spill] sm:$0xff] %v8940_v10 }
 0x128   :  { %2112 = vmatprep.subr.bf16.mxu0 %v8894_v42  ;;  %v1175_v42 = vld [vmem:[#allocation11 + $0x18] sm:$0xff] }
 0x129   :  { %12311 = vst [vmem:[#allocation89_spill] sm:$0xff] %v8921_v23  ;;  %v8927_v5 = vcombine.high %v1175_v42, %v1179_v17  ;;  %12315 = vst [vmem:[#allocation93_spill] sm:$0xff] %v8935_v30  ;;  %v1191_v15 = vld [vmem:[#allocation11 + $0x98] sm:$0xff] }
 0x12a   :  { %2072 = vmatpush1.bf16.msra.mxu1 %v8897_v6  ;;  %v1207_v51 = vld [vmem:[#allocation11 + $0x118] sm:$0xff]  ;;  %v9059_v6 = vld [vmem:[#allocation13] ss:$16 sps:$4 sm:$0xff]  }
 0x12b   :  { %2113 = vmatpush1.bf16.msra.mxu0 %v8901_v3  ;;  %2073 = vmatprep.subr.bf16.mxu1 %v8903_v9  ;;  %12313 = vst [vmem:[#allocation91_spill] sm:$0xff] %v8927_v5  ;;  %v1211_v61 = vld [vmem:[#allocation11 + $0x138] sm:$0xff]  ;;  %12346 = vst [vmem:[#allocation124_spill] sm:$0xff] %v9059_v6 }
 0x12c   :  { %2114 = vmatprep.subr.bf16.mxu0 %v8906_v44  ;;  %v8931_v44 = vcombine.low %v1175_v42, %v1179_v17  ;;  %v1199_v17 = vld [vmem:[#allocation11 + $0xd8] sm:$0xff] }
 0x12d   :  { %v1203_v42 = vld [vmem:[#allocation11 + $0xf8] sm:$0xff] }
 0x12e   :  { %2074 = vmatpush1.bf16.msra.mxu1 %v8909_v53  ;;  %12314 = vst [vmem:[#allocation92_spill] sm:$0xff] %v8931_v44  ;;  %v8954_v3 = vcombine.low %v1199_v17, %v1203_v42 }
 0x12f   :  { %2115 = vmatpush1.bf16.msra.mxu0 %v8913_v54  ;;  %2075 = vmatprep.subr.bf16.mxu1 %v8915_v60  ;;  %v1195_v54 = vld [vmem:[#allocation11 + $0xb8] sm:$0xff] }
 0x130   :  { %2116 = vmatprep.subr.bf16.mxu0 %v8918_v34  ;;  %v8943_v38 = vcombine.high %v1191_v15, %v1195_v54  ;;  %v8951_v34 = vcombine.high %v1199_v17, %v1203_v42  ;;  %12320 = vst [vmem:[#allocation98_spill] sm:$0xff] %v8954_v3  ;;  %v7555_v60 = vld [vmem:[#allocation13 + $0xc] ss:$16 sps:$4 sm:$0xff]  }
 0x132   :  { %2076 = vmatpush1.bf16.msra.mxu1 %v8921_v23  ;;  %12317 = vst [vmem:[#allocation95_spill] sm:$0xff] %v8943_v38  ;;  %12319 = vst [vmem:[#allocation97_spill] sm:$0xff] %v8951_v34  ;;  %v7553_v23 = vld [vmem:[#allocation13 + $0x4] ss:$16 sps:$4 sm:$0xff]  }
 0x133   :  { %2117 = vmatpush1.bf16.msra.mxu0 %v8925_v46  ;;  %2127 = vmatprep.subr.bf16.mxu1 %v8927_v5  ;;  %v8948_v46 = vcombine.low %v1191_v15, %v1195_v54  ;;  %v1219_v5 = vld [vmem:[#allocation11 + $0x178] sm:$0xff]  ;;  %v8960_v54 = vcombine.low %v1207_v51, %v1211_v61 }
 0x134   :  { %2391 = vmatprep.subr.bf16.mxu0 %v7553_v23 }
 0x135   :  { %2078 = vmatmul.mubr.bf16.vlgmr.msra.gmra.mrb[48].mxu1 %v12275_v47  ;;  %12318 = vst [vmem:[#allocation96_spill] sm:$0xff] %v8948_v46  ;;  %12322 = vst [vmem:[#allocation100_spill] sm:$0xff] %v8960_v54 }
 0x136   :  { %2119 = vmatmul.mubr.bf16.vlgmr.msra.gmra.mrb[20].mxu0 %v12275_v47  ;;  %2128 = vmatpush1.bf16.msra.mxu1 %v8931_v44  ;;  %v1215_v44 = vld [vmem:[#allocation11 + $0x158] sm:$0xff] }
 0x137   :  { %2129 = vmatprep.subr.bf16.mxu1 %v8935_v30  ;;  %2159 = vmatprep.mubr.bf16.mxu1 %v12275_v47  ;;  %v8957_v30 = vcombine.high %v1207_v51, %v1211_v61  ;;  %v8963_v15 = vcombine.high %v1215_v44, %v1219_v5  ;;  %v8966_v17 = vcombine.low %v1215_v44, %v1219_v5 }
 0x138   :  { %2423 = vmatprep.mubr.bf16.mxu0 %v12275_v47  ;;  %2392 = vmatpush1.bf16.msra.mxu0 %v9059_v6 }
 0x139   :  { %12321 = vst [vmem:[#allocation99_spill] sm:$0xff] %v8957_v30  ;;  %12323 = vst [vmem:[#allocation101_spill] sm:$0xff] %v8963_v15  ;;  %2393 = vmatprep.subr.bf16.mxu0 %v9074_v37  ;;  %v9110_v37 = vld [vmem:[#allocation13 + $0x64] ss:$16 sps:$4 sm:$0xff]  }
 0x13a   :  { %2130 = vmatpush1.bf16.msra.mxu1 %v8940_v10  ;;  %v1227_v10 = vld [vmem:[#allocation11 + $0x1b8] sm:$0xff]  ;;  %12324 = vst [vmem:[#allocation102_spill] sm:$0xff] %v8966_v17  ;;  %12360 = vst [vmem:[#allocation138_spill] sm:$0xff] %v9110_v37 }
 0x13b   :  { %2131 = vmatprep.subr.bf16.mxu1 %v8943_v38  ;;  %v1223_v38 = vld [vmem:[#allocation11 + $0x198] sm:$0xff] }
 0x13c   :  { %v8969_v42 = vcombine.high %v1223_v38, %v1227_v10  ;;  %v8972_v51 = vcombine.low %v1223_v38, %v1227_v10 }
 0x13e   :  { %2132 = vmatpush1.bf16.msra.mxu1 %v8948_v46  ;;  %12325 = vst [vmem:[#allocation103_spill] sm:$0xff] %v8969_v42  ;;  %v1235_v46 = vld [vmem:[#allocation11 + $0x1f8] sm:$0xff]  ;;  %12326 = vst [vmem:[#allocation104_spill] sm:$0xff] %v8972_v51 }
 0x13f   :  { %2133 = vmatprep.subr.bf16.mxu1 %v8951_v34  ;;  %v1231_v34 = vld [vmem:[#allocation11 + $0x1d8] sm:$0xff] }
 0x140   :  { %v8975_v61 = vcombine.high %v1231_v34, %v1235_v46  ;;  %v8978_v44 = vcombine.low %v1231_v34, %v1235_v46 }
 0x142   :  { %2134 = vmatpush1.bf16.msra.mxu1 %v8954_v3  ;;  %12327 = vst [vmem:[#allocation105_spill] sm:$0xff] %v8975_v61  ;;  %v1243_v3 = vld [vmem:[#allocation11 + $0x238] sm:$0xff]  ;;  %12328 = vst [vmem:[#allocation106_spill] sm:$0xff] %v8978_v44 }
 0x143   :  { %2135 = vmatprep.subr.bf16.mxu1 %v8957_v30  ;;  %v1239_v30 = vld [vmem:[#allocation11 + $0x218] sm:$0xff] }
 0x144   :  { %v8981_v5 = vcombine.high %v1239_v30, %v1243_v3  ;;  %v8984_v10 = vcombine.low %v1239_v30, %v1243_v3 }
 0x146   :  { %2136 = vmatpush1.bf16.msra.mxu1 %v8960_v54  ;;  %12329 = vst [vmem:[#allocation107_spill] sm:$0xff] %v8981_v5  ;;  %v1251_v54 = vld [vmem:[#allocation11 + $0x278] sm:$0xff]  ;;  %12330 = vst [vmem:[#allocation108_spill] sm:$0xff] %v8984_v10 }
 0x147   :  { %2137 = vmatprep.subr.bf16.mxu1 %v8963_v15  ;;  %v1247_v15 = vld [vmem:[#allocation11 + $0x258] sm:$0xff] }
 0x148   :  { %v8987_v38 = vcombine.high %v1247_v15, %v1251_v54  ;;  %v8990_v34 = vcombine.low %v1247_v15, %v1251_v54 }
 0x14a   :  { %2138 = vmatpush1.bf16.msra.mxu1 %v8966_v17  ;;  %12331 = vst [vmem:[#allocation109_spill] sm:$0xff] %v8987_v38  ;;  %v1259_v17 = vld [vmem:[#allocation11 + $0x2b8] sm:$0xff]  ;;  %12332 = vst [vmem:[#allocation110_spill] sm:$0xff] %v8990_v34 }
 0x14b   :  { %2139 = vmatprep.subr.bf16.mxu1 %v8969_v42  ;;  %v1255_v42 = vld [vmem:[#allocation11 + $0x298] sm:$0xff] }
 0x14c   :  { %v8993_v46 = vcombine.high %v1255_v42, %v1259_v17  ;;  %v8996_v3 = vcombine.low %v1255_v42, %v1259_v17 }
 0x14e   :  { %2140 = vmatpush1.bf16.msra.mxu1 %v8972_v51  ;;  %12333 = vst [vmem:[#allocation111_spill] sm:$0xff] %v8993_v46  ;;  %v1267_v51 = vld [vmem:[#allocation11 + $0x2f8] sm:$0xff]  ;;  %12334 = vst [vmem:[#allocation112_spill] sm:$0xff] %v8996_v3 }
 0x14f   :  { %2141 = vmatprep.subr.bf16.mxu1 %v8975_v61  ;;  %v1263_v61 = vld [vmem:[#allocation11 + $0x2d8] sm:$0xff] }
 0x150   :  { %v8999_v30 = vcombine.high %v1263_v61, %v1267_v51  ;;  %v9002_v54 = vcombine.low %v1263_v61, %v1267_v51 }
 0x152   :  { %2142 = vmatpush1.bf16.msra.mxu1 %v8978_v44  ;;  %12335 = vst [vmem:[#allocation113_spill] sm:$0xff] %v8999_v30  ;;  %v1275_v44 = vld [vmem:[#allocation11 + $0x338] sm:$0xff]  ;;  %12336 = vst [vmem:[#allocation114_spill] sm:$0xff] %v9002_v54 }
 0x153   :  { %2143 = vmatprep.subr.bf16.mxu1 %v8981_v5  ;;  %v1271_v5 = vld [vmem:[#allocation11 + $0x318] sm:$0xff] }
 0x154   :  { %v9005_v15 = vcombine.high %v1271_v5, %v1275_v44  ;;  %v9008_v17 = vcombine.low %v1271_v5, %v1275_v44 }
 0x156   :  { %2144 = vmatpush1.bf16.msra.mxu1 %v8984_v10  ;;  %12337 = vst [vmem:[#allocation115_spill] sm:$0xff] %v9005_v15  ;;  %v1283_v10 = vld [vmem:[#allocation11 + $0x378] sm:$0xff]  ;;  %12338 = vst [vmem:[#allocation116_spill] sm:$0xff] %v9008_v17 }
 0x157   :  { %2145 = vmatprep.subr.bf16.mxu1 %v8987_v38  ;;  %v1279_v38 = vld [vmem:[#allocation11 + $0x358] sm:$0xff] }
 0x158   :  { %v9011_v42 = vcombine.high %v1279_v38, %v1283_v10  ;;  %v9014_v51 = vcombine.low %v1279_v38, %v1283_v10  ;;  %v218_v10 = vlaneseq }
 0x15a   :  { %2146 = vmatpush1.bf16.msra.mxu1 %v8990_v34  ;;  %12339 = vst [vmem:[#allocation117_spill] sm:$0xff] %v9011_v42  ;;  %v1291_v34 = vld [vmem:[#allocation11 + $0x3b8] sm:$0xff]  ;;  %12340 = vst [vmem:[#allocation118_spill] sm:$0xff] %v9014_v51  ;;  %v9032_v38 = vshrl.u32 %v218_v10, 7 }
 0x15b   :  { %2147 = vmatprep.subr.bf16.mxu1 %v8993_v46  ;;  %v1287_v46 = vld [vmem:[#allocation11 + $0x398] sm:$0xff] }
 0x15c   :  { %v9017_v61 = vcombine.high %v1287_v46, %v1291_v34  ;;  %v9020_v44 = vcombine.low %v1287_v46, %v1291_v34  ;;  %12345 = vst [vmem:[#allocation123_spill] sm:$0xff] %v9032_v38  ;;  %v11943_v34 = vsub.s32 0, %v9032_v38  ;;  %v9035_v46 = vld [vmem:[#allocation10] sm:$0xff] }
 0x15e   :  { %2148 = vmatpush1.bf16.msra.mxu1 %v8996_v3  ;;  %12341 = vst [vmem:[#allocation119_spill] sm:$0xff] %v9017_v61  ;;  %v1299_v3 = vld [vmem:[#allocation11 + $0x3f8] sm:$0xff]  ;;  %12342 = vst [vmem:[#allocation120_spill] sm:$0xff] %v9020_v44 }
 0x15f   :  { %2149 = vmatprep.subr.bf16.mxu1 %v8999_v30  ;;  %v1295_v30 = vld [vmem:[#allocation11 + $0x3d8] sm:$0xff] }
 0x160   :  { %v9023_v5 = vcombine.high %v1295_v30, %v1299_v3 }
 0x162   :  { %2150 = vmatpush1.bf16.msra.mxu1 %v9002_v54  ;;  %12343 = vst [vmem:[#allocation121_spill] sm:$0xff] %v9023_v5 }
 0x163   :  { %2151 = vmatprep.subr.bf16.mxu1 %v9005_v15  ;;  %v9026_v15 = vcombine.low %v1295_v30, %v1299_v3  ;;  %v236_v3 = vsub.s32 4, %v9032_v38  ;;  %v240_v30 = vsub.s32 5, %v9032_v38 }
 0x165   :  { %12344 = vst [vmem:[#allocation122_spill] sm:$0xff] %v9026_v15 }
 0x166   :  { %2152 = vmatpush1.bf16.msra.mxu1 %v9008_v17 }
 0x167   :  { %2153 = vmatprep.subr.bf16.mxu1 %v9011_v42 }
 0x16a   :  { %2154 = vmatpush1.bf16.msra.mxu1 %v9014_v51 }
 0x16b   :  { %2155 = vmatprep.subr.bf16.mxu1 %v9017_v61  ;;  %v11948_v61 = vsub.s32 1, %v9032_v38 }
 0x16d   :  { %v9048_v10 = vrot.slane %v9035_v46, %v11948_v61 }
 0x16e   :  { %2156 = vmatpush1.bf16.msra.mxu1 %v9020_v44  ;;  %v9054_v44 = vrot.slane %v9035_v46, %v240_v30 }
 0x16f   :  { %2157 = vmatprep.subr.bf16.mxu1 %v9023_v5  ;;  %v9051_v5 = vrot.slane %v9035_v46, %v236_v3  ;;  %v9061_v3 = vld [vmem:[#allocation13 + $0x8] ss:$16 sps:$4 sm:$0xff]  }
 0x170   :  { %12347 = vst [vmem:[#allocation125_spill] sm:$0xff] %v9061_v3 }
 0x172   :  { %2158 = vmatpush1.bf16.msra.mxu1 %v9026_v15  ;;  %v9043_v15 = vrot.slane %v9035_v46, %v11943_v34 }
 0x173   :  { %2432 = vmatprep.subr.bf16.mxu1 %v7555_v60  ;;  %v9080_v60 = vld [vmem:[#allocation13 + $0x20] ss:$16 sps:$4 sm:$0xff]  }
 0x174   :  { %12352 = vst [vmem:[#allocation130_spill] sm:$0xff] %v9080_v60  ;;  %2394 = vmatpush1.bf16.msra.mxu0 %v9080_v60 }
 0x175   :  { %2160 = vmatmul.mubr.bf16.vlgmr.msra.gmra.mrb[52].mxu1 %v12275_v47 }
 0x176   :  { %2464 = vmatprep.mubr.bf16.mxu1 %v12275_v47  ;;  %2433 = vmatpush1.bf16.msra.mxu1 %v9061_v3  ;;  %v9112_v3 = vld [vmem:[#allocation13 + $0x6c] ss:$16 sps:$4 sm:$0xff]  }
 0x177   :  { %12361 = vst [vmem:[#allocation139_spill] sm:$0xff] %v9112_v3 }
 0x188   :  { %v636_v51 = vpop.f32.mrb[0].mxu1  ;;  %v782_v54 = vpop.f32.mrb[0].mxu0 }
 0x189   :  { %v637_v42 = vadd.f32 %v636_v51, %v9043_v15  ;;  %v638_v17 = vpop.f32.mrb[1].mxu1  ;;  %v783_v9 = vadd.f32 %v782_v54, %v9051_v5  ;;  %v784_v61 = vpop.f32.mrb[1].mxu0 }
 0x18a   :  { %v639_v34 = vadd.f32 %v638_v17, %v9048_v10  ;;  %v640_v53 = vpop.f32.mrb[2].mxu1  ;;  %v785_v49 = vadd.f32 %v784_v61, %v9054_v44  ;;  %v786_v51 = vpop.f32.mrb[2].mxu0  ;;  %v9076_v61 = vld [vmem:[#allocation13 + $0x2c] ss:$16 sps:$4 sm:$0xff]  }
 0x18b   :  { %v641_v30 = vadd.f32 %v640_v53, %v9043_v15  ;;  %v642_v25 = vpop.f32.mrb[3].mxu1  ;;  %v787_v43 = vadd.f32 %v786_v51, %v9051_v5  ;;  %v788_v54 = vpop.f32.mrb[3].mxu0  ;;  %12350 = vst [vmem:[#allocation128_spill] sm:$0xff] %v9076_v61  ;;  %2434 = vmatprep.subr.bf16.mxu1 %v9076_v61  ;;  %v9093_v51 = vld [vmem:[#allocation13 + $0x4c] ss:$16 sps:$4 sm:$0xff]  }
 0x18c   :  { %v9065_v62 = vpack.c.bf16 %v639_v34, %v637_v42  ;;  %v643_v17 = vadd.f32 %v642_v25, %v9048_v10  ;;  %v9071_v21 = vpack.c.bf16 %v785_v49, %v783_v9  ;;  %v789_v53 = vadd.f32 %v788_v54, %v9054_v44  ;;  %v9082_v25 = vld [vmem:[#allocation13 + $0x28] ss:$16 sps:$4 sm:$0xff]   ;;  %12356 = vst [vmem:[#allocation134_spill] sm:$0xff] %v9093_v51  ;;  %v9096_v54 = vld [vmem:[#allocation13 + $0x40] ss:$16 sps:$4 sm:$0xff]  }
 0x18d   :  { %12353 = vst [vmem:[#allocation131_spill] sm:$0xff] %v9082_v25  ;;  %2435 = vmatpush1.bf16.msra.mxu1 %v9082_v25  ;;  %12357 = vst [vmem:[#allocation135_spill] sm:$0xff] %v9096_v54 }
 0x18e   :  { %12348 = vst [vmem:[#allocation126_spill] sm:$0xff] %v9071_v21  ;;  %v9078_v23 = vpack.c.bf16 %v643_v17, %v641_v30  ;;  %v9084_v42 = vpack.c.bf16 %v789_v53, %v787_v43  ;;  %v9091_v30 = vld [vmem:[#allocation13 + $0x44] ss:$16 sps:$4 sm:$0xff]   ;;  %v9098_v53 = vld [vmem:[#allocation13 + $0x48] ss:$16 sps:$4 sm:$0xff]   ;;  %2436 = vmatprep.subr.bf16.mxu1 %v9093_v51 }
 0x18f   :  { %12355 = vst [vmem:[#allocation133_spill] sm:$0xff] %v9091_v30  ;;  %12358 = vst [vmem:[#allocation136_spill] sm:$0xff] %v9098_v53  ;;  %2395 = vmatprep.subr.bf16.mxu0 %v9091_v30  ;;  %v9152_v51 = vld [vmem:[#allocation13 + $0xac] ss:$16 sps:$4 sm:$0xff]  }
 0x190   :  { %12351 = vst [vmem:[#allocation129_spill] sm:$0xff] %v9078_v23  ;;  %12354 = vst [vmem:[#allocation132_spill] sm:$0xff] %v9084_v42  ;;  %v646_v49 = vpop.f32.mrb[4].mxu1  ;;  %v792_v23 = vpop.f32.mrb[4].mxu0  ;;  %2396 = vmatpush1.bf16.msra.mxu0 %v9096_v54  ;;  %v9150_v54 = vld [vmem:[#allocation13 + $0xa4] ss:$16 sps:$4 sm:$0xff]  }
 0x191   :  { %v647_v9 = vadd.f32 %v646_v49, %v9043_v15  ;;  %v648_v34 = vpop.f32.mrb[5].mxu1  ;;  %v793_v60 = vadd.f32 %v792_v23, %v9051_v5  ;;  %2437 = vmatpush1.bf16.msra.mxu1 %v9098_v53  ;;  %v9119_v23 = vld [vmem:[#allocation13 + $0x68] ss:$16 sps:$4 sm:$0xff]   ;;  %2397 = vmatprep.subr.bf16.mxu0 %v9110_v37  ;;  %12372 = vst [vmem:[#allocation150_spill] sm:$0xff] %v9150_v54  ;;  %12373 = vst [vmem:[#allocation151_spill] sm:$0xff] %v9152_v51 }
 0x192   :  { %v649_v17 = vadd.f32 %v648_v34, %v9048_v10  ;;  %v650_v43 = vpop.f32.mrb[6].mxu1  ;;  %v794_v34 = vpop.f32.mrb[5].mxu0  ;;  %12364 = vst [vmem:[#allocation142_spill] sm:$0xff] %v9119_v23  ;;  %2438 = vmatprep.subr.bf16.mxu1 %v9112_v3  ;;  %v9138_v3 = vld [vmem:[#allocation13 + $0x88] ss:$16 sps:$4 sm:$0xff]  }
 0x193   :  { %v651_v21 = vadd.f32 %v650_v43, %v9043_v15  ;;  %v652_v42 = vpop.f32.mrb[7].mxu1  ;;  %v795_v61 = vadd.f32 %v794_v34, %v9054_v44  ;;  %v796_v43 = vpop.f32.mrb[6].mxu0  ;;  %12370 = vst [vmem:[#allocation148_spill] sm:$0xff] %v9138_v3 }
 0x194   :  { %v9103_v49 = vpack.c.bf16 %v649_v17, %v647_v9  ;;  %v653_v25 = vadd.f32 %v652_v42, %v9048_v10  ;;  %v797_v9 = vadd.f32 %v796_v43, %v9051_v5  ;;  %v798_v17 = vpop.f32.mrb[7].mxu0  ;;  %v9117_v42 = vld [vmem:[#allocation13 + $0x60] ss:$16 sps:$4 sm:$0xff]  }
 0x195   :  { %12363 = vst [vmem:[#allocation141_spill] sm:$0xff] %v9117_v42  ;;  %v799_v53 = vadd.f32 %v798_v17, %v9054_v44  ;;  %2398 = vmatpush1.bf16.msra.mxu0 %v9117_v42  ;;  %2439 = vmatpush1.bf16.msra.mxu1 %v9119_v23 }
 0x196   :  { %12359 = vst [vmem:[#allocation137_spill] sm:$0xff] %v9103_v49  ;;  %v9114_v30 = vpack.c.bf16 %v653_v25, %v651_v21  ;;  %v9121_v49 = vpack.c.bf16 %v795_v61, %v793_v60  ;;  %v9133_v61 = vld [vmem:[#allocation13 + $0x8c] ss:$16 sps:$4 sm:$0xff]  }
 0x197   :  { %v9129_v43 = vpack.c.bf16 %v799_v53, %v797_v9  ;;  %12368 = vst [vmem:[#allocation146_spill] sm:$0xff] %v9133_v61  ;;  %2440 = vmatprep.subr.bf16.mxu1 %v9133_v61 }
 0x198   :  { %12362 = vst [vmem:[#allocation140_spill] sm:$0xff] %v9114_v30  ;;  %12365 = vst [vmem:[#allocation143_spill] sm:$0xff] %v9121_v49  ;;  %v656_v34 = vpop.f32.mrb[8].mxu1  ;;  %v9131_v30 = vld [vmem:[#allocation13 + $0x84] ss:$16 sps:$4 sm:$0xff]   ;;  %v802_v23 = vpop.f32.mrb[8].mxu0 }
 0x199   :  { %v657_v21 = vadd.f32 %v656_v34, %v9043_v15  ;;  %v658_v25 = vpop.f32.mrb[9].mxu1  ;;  %12366 = vst [vmem:[#allocation144_spill] sm:$0xff] %v9129_v43  ;;  %12367 = vst [vmem:[#allocation145_spill] sm:$0xff] %v9131_v30  ;;  %v9136_v49 = vld [vmem:[#allocation13 + $0x80] ss:$16 sps:$4 sm:$0xff]   ;;  %2399 = vmatprep.subr.bf16.mxu0 %v9131_v30  ;;  %v803_v34 = vadd.f32 %v802_v23, %v9051_v5  ;;  %2441 = vmatpush1.bf16.msra.mxu1 %v9138_v3 }
 0x19a   :  { %v659_v60 = vadd.f32 %v658_v25, %v9048_v10  ;;  %v660_v17 = vpop.f32.mrb[10].mxu1  ;;  %12369 = vst [vmem:[#allocation147_spill] sm:$0xff] %v9136_v49  ;;  %v804_v25 = vpop.f32.mrb[9].mxu0  ;;  %2400 = vmatpush1.bf16.msra.mxu0 %v9136_v49  ;;  %v9159_v23 = vld [vmem:[#allocation13 + $0xa8] ss:$16 sps:$4 sm:$0xff]   ;;  %2442 = vmatprep.subr.bf16.mxu1 %v9152_v51  ;;  %v12384_v51 = vsub.s32 2, %v9032_v38 }
 0x19b   :  { %v661_v42 = vadd.f32 %v660_v17, %v9043_v15  ;;  %v662_v37 = vpop.f32.mrb[11].mxu1  ;;  %v805_v43 = vadd.f32 %v804_v25, %v9054_v44  ;;  %v806_v17 = vpop.f32.mrb[10].mxu0  ;;  %12376 = vst [vmem:[#allocation154_spill] sm:$0xff] %v9159_v23  ;;  %2401 = vmatprep.subr.bf16.mxu0 %v9150_v54  ;;  %v9178_v54 = vld [vmem:[#allocation13 + $0xc0] ss:$16 sps:$4 sm:$0xff]  }
 0x19c   :  { %v9143_v53 = vpack.c.bf16 %v659_v60, %v657_v21  ;;  %v663_v9 = vadd.f32 %v662_v37, %v9048_v10  ;;  %v807_v21 = vadd.f32 %v806_v17, %v9051_v5  ;;  %v808_v60 = vpop.f32.mrb[11].mxu0  ;;  %v9157_v37 = vld [vmem:[#allocation13 + $0xa0] ss:$16 sps:$4 sm:$0xff]   ;;  %12381 = vst [vmem:[#allocation159_spill] sm:$0xff] %v9178_v54 }
 0x19d   :  { %12375 = vst [vmem:[#allocation153_spill] sm:$0xff] %v9157_v37  ;;  %v809_v3 = vadd.f32 %v808_v60, %v9054_v44  ;;  %2443 = vmatpush1.bf16.msra.mxu1 %v9159_v23 }
 0x19e   :  { %12371 = vst [vmem:[#allocation149_spill] sm:$0xff] %v9143_v53  ;;  %v9154_v30 = vpack.c.bf16 %v663_v9, %v661_v42  ;;  %v9161_v53 = vpack.c.bf16 %v805_v43, %v803_v34  ;;  %2402 = vmatpush1.bf16.msra.mxu0 %v9157_v37  ;;  %v9172_v43 = vld [vmem:[#allocation13 + $0xc4] ss:$16 sps:$4 sm:$0xff]   ;;  %v9174_v34 = vld [vmem:[#allocation13 + $0xcc] ss:$16 sps:$4 sm:$0xff]  }
 0x19f   :  { %12379 = vst [vmem:[#allocation157_spill] sm:$0xff] %v9172_v43  ;;  %12380 = vst [vmem:[#allocation158_spill] sm:$0xff] %v9174_v34  ;;  %v9180_v37 = vld [vmem:[#allocation13 + $0xc8] ss:$16 sps:$4 sm:$0xff]   ;;  %2403 = vmatprep.subr.bf16.mxu0 %v9172_v43  ;;  %2444 = vmatprep.subr.bf16.mxu1 %v9174_v34  ;;  %v9195_v43 = vld [vmem:[#allocation13 + $0xe4] ss:$16 sps:$4 sm:$0xff]  }
 0x1a0   :  { %12374 = vst [vmem:[#allocation152_spill] sm:$0xff] %v9154_v30  ;;  %12377 = vst [vmem:[#allocation155_spill] sm:$0xff] %v9161_v53  ;;  %v666_v25 = vpop.f32.mrb[12].mxu1  ;;  %v9170_v30 = vpack.c.bf16 %v809_v3, %v807_v21  ;;  %v812_v49 = vpop.f32.mrb[12].mxu0 }
 0x1a1   :  { %v667_v42 = vadd.f32 %v666_v25, %v9043_v15  ;;  %v668_v9 = vpop.f32.mrb[13].mxu1  ;;  %12382 = vst [vmem:[#allocation160_spill] sm:$0xff] %v9180_v37  ;;  %v814_v17 = vpop.f32.mrb[13].mxu0  ;;  %2445 = vmatpush1.bf16.msra.mxu1 %v9180_v37  ;;  %12385 = vst [vmem:[#allocation162_spill] sm:$0xff] %v9195_v43  ;;  %v9205_v37 = vld [vmem:[#allocation13 + $0xe0] ss:$16 sps:$4 sm:$0xff]  }
 0x1a2   :  { %12378 = vst [vmem:[#allocation156_spill] sm:$0xff] %v9170_v30  ;;  %v669_v60 = vadd.f32 %v668_v9, %v9048_v10  ;;  %v670_v53 = vpop.f32.mrb[14].mxu1  ;;  %v813_v9 = vadd.f32 %v812_v49, %v9051_v5  ;;  %2404 = vmatpush1.bf16.msra.mxu0 %v9178_v54  ;;  %v816_v30 = vpop.f32.mrb[14].mxu0  ;;  %12389 = vst [vmem:[#allocation165_spill] sm:$0xff] %v9205_v37  ;;  %v9207_v54 = vld [vmem:[#allocation13 + $0xe8] ss:$16 sps:$4 sm:$0xff]  }
 0x1a3   :  { %v671_v25 = vadd.f32 %v670_v53, %v9043_v15  ;;  %v672_v23 = vpop.f32.mrb[15].mxu1  ;;  %v229_v15 = vrot.slane %v9035_v46, %v12384_v51  ;;  %v815_v53 = vadd.f32 %v814_v17, %v9054_v44  ;;  %12390 = vst [vmem:[#allocation166_spill] sm:$0xff] %v9207_v54  ;;  %2405 = vmatprep.subr.bf16.mxu0 %v9195_v43 }
 0x1a4   :  { %v9185_v3 = vpack.c.bf16 %v669_v60, %v667_v42  ;;  %v673_v21 = vadd.f32 %v672_v23, %v9048_v10  ;;  %v9197_v42 = vld [vmem:[#allocation13 + $0xec] ss:$16 sps:$4 sm:$0xff]   ;;  %v12388_v10 = vsub.s32 3, %v9032_v38  ;;  %v817_v23 = vadd.f32 %v816_v30, %v9051_v5 }
 0x1a5   :  { %12386 = vst [vmem:[#allocation163_spill] sm:$0xff] %v9197_v42  ;;  %v9209_v51 = vpack.c.bf16 %v815_v53, %v813_v9  ;;  %2446 = vmatprep.subr.bf16.mxu1 %v9197_v42 }
 0x1a6   :  { %12383 = vst [vmem:[#allocation161_spill] sm:$0xff] %v9185_v3  ;;  %v9199_v60 = vpack.c.bf16 %v673_v21, %v671_v25  ;;  %v233_v49 = vrot.slane %v9035_v46, %v12388_v10  ;;  %v818_v3 = vpop.f32.mrb[15].mxu0  ;;  %2406 = vmatpush1.bf16.msra.mxu0 %v9205_v37  ;;  %2447 = vmatpush1.bf16.msra.mxu1 %v9207_v54 }
 0x1a7   :  { %12391 = vst [vmem:[#allocation167_spill] sm:$0xff] %v9209_v51  ;;  %v819_v17 = vadd.f32 %v818_v3, %v9054_v44 }
 0x1a8   :  { %12387 = vst [vmem:[#allocation164_spill] sm:$0xff] %v9199_v60  ;;  %v709_v25 = vpop.f32.mrb[16].mxu1 }
 0x1a9   :  { %v710_v21 = vadd.f32 %v709_v25, %v229_v15  ;;  %v711_v5 = vpop.f32.mrb[17].mxu1  ;;  %v9216_v30 = vpack.c.bf16 %v819_v17, %v817_v23 }
 0x1aa   :  { %v712_v10 = vadd.f32 %v711_v5, %v233_v49  ;;  %v713_v60 = vpop.f32.mrb[18].mxu1 }
 0x1ab   :  { %v714_v34 = vadd.f32 %v713_v60, %v229_v15  ;;  %v715_v9 = vpop.f32.mrb[19].mxu1 }
 0x1ac   :  { %v9218_v53 = vpack.c.bf16 %v712_v10, %v710_v21  ;;  %v716_v44 = vadd.f32 %v715_v9, %v233_v49 }
 0x1ae   :  { %v9220_v3 = vpack.c.bf16 %v716_v44, %v714_v34 }
 0x1b0   :  { %12392 = vst [vmem:[#allocation168_spill] sm:$0xff] %v9220_v3  ;;  %v719_v51 = vpop.f32.mrb[20].mxu1 }
 0x1b1   :  { %v720_v42 = vadd.f32 %v719_v51, %v229_v15  ;;  %v721_v43 = vpop.f32.mrb[21].mxu1 }
 0x1b2   :  { %v722_v61 = vadd.f32 %v721_v43, %v233_v49  ;;  %v723_v37 = vpop.f32.mrb[22].mxu1 }
 0x1b3   :  { %v724_v6 = vadd.f32 %v723_v37, %v229_v15  ;;  %v725_v54 = vpop.f32.mrb[23].mxu1 }
 0x1b4   :  { %v9222_v25 = vpack.c.bf16 %v722_v61, %v720_v42  ;;  %v726_v23 = vadd.f32 %v725_v54, %v233_v49  ;;  %v244_v61 = vsub.s32 6, %v9032_v38  ;;  %v248_v42 = vsub.s32 7, %v9032_v38 }
 0x1b6   :  { %12393 = vst [vmem:[#allocation169_spill] sm:$0xff] %v9222_v25  ;;  %v9224_v17 = vpack.c.bf16 %v726_v23, %v724_v6 }
 0x1b8   :  { %12394 = vst [vmem:[#allocation170_spill] sm:$0xff] %v9224_v17  ;;  %v729_v5 = vpop.f32.mrb[24].mxu1 }
 0x1b9   :  { %v730_v60 = vadd.f32 %v729_v5, %v229_v15  ;;  %v731_v13 = vpop.f32.mrb[25].mxu1 }
 0x1ba   :  { %v732_v21 = vadd.f32 %v731_v13, %v233_v49  ;;  %v733_v10 = vpop.f32.mrb[26].mxu1 }
 0x1bb   :  { %v734_v9 = vadd.f32 %v733_v10, %v229_v15  ;;  %v735_v34 = vpop.f32.mrb[27].mxu1 }
 0x1bc   :  { %v9226_v44 = vpack.c.bf16 %v732_v21, %v730_v60  ;;  %v736_v51 = vadd.f32 %v735_v34, %v233_v49  ;;  %v245_v60 = vrot.slane %v9035_v46, %v244_v61 }
 0x1be   :  { %12395 = vst [vmem:[#allocation171_spill] sm:$0xff] %v9226_v44  ;;  %v9228_v3 = vpack.c.bf16 %v736_v51, %v734_v9  ;;  %v249_v9 = vrot.slane %v9035_v46, %v248_v42  ;;  %v2170_v51 = vunpack.c.l.bf16 %v9065_v62 }
 0x1c0   :  { %12396 = vst [vmem:[#allocation172_spill] sm:$0xff] %v9228_v3  ;;  %v739_v43 = vpop.f32.mrb[28].mxu1 }
 0x1c1   :  { %v740_v37 = vadd.f32 %v739_v43, %v229_v15  ;;  %v741_v32 = vpop.f32.mrb[29].mxu1  ;;  %v9239_v43 = vld [vmem:[#allocation14 + $0x4] ss:$16 sps:$4 sm:$0xff]  }
 0x1c2   :  { %v742_v54 = vadd.f32 %v741_v32, %v233_v49  ;;  %v743_v6 = vpop.f32.mrb[30].mxu1  ;;  %12399 = vst [vmem:[#allocation175_spill] sm:$0xff] %v9239_v43  ;;  %v9241_v32 = vld [vmem:[#allocation14 + $0xc] ss:$16 sps:$4 sm:$0xff]   ;;  %2646 = vmatprep.subr.bf16.mxu0 %v9239_v43 }
 0x1c3   :  { %v744_v23 = vadd.f32 %v743_v6, %v229_v15  ;;  %v745_v5 = vpop.f32.mrb[31].mxu1  ;;  %12400 = vst [vmem:[#allocation176_spill] sm:$0xff] %v9241_v32  ;;  %2687 = vmatprep.subr.bf16.mxu1 %v9241_v32 }
 0x1c4   :  { %v9232_v13 = vpack.c.bf16 %v742_v54, %v740_v37  ;;  %v746_v10 = vadd.f32 %v745_v5, %v233_v49  ;;  %v2171_v37 = vunpack.c.h.bf16 %v9065_v62 }
 0x1c6   :  { %12397 = vst [vmem:[#allocation173_spill] sm:$0xff] %v9232_v13  ;;  %v9235_v21 = vpack.c.bf16 %v746_v10, %v744_v23 }
 0x1c8   :  { %12398 = vst [vmem:[#allocation174_spill] sm:$0xff] %v9235_v21  ;;  %v855_v34 = vpop.f32.mrb[32].mxu1 }
 0x1c9   :  { %v856_v3 = vadd.f32 %v855_v34, %v245_v60  ;;  %v2038_v38 = vpop.f32.mrb[16].mxu0  ;;  %v857_v15 = vpop.f32.mrb[33].mxu1 }
 0x1ca   :  { %v2174_v54 = vadd.f32 %v2170_v51, %v2038_v38  ;;  %v858_v49 = vadd.f32 %v857_v15, %v249_v9  ;;  %v2040_v6 = vpop.f32.mrb[17].mxu0  ;;  %v859_v61 = vpop.f32.mrb[34].mxu1 }
 0x1cb   :  { %v2175_v46 = vadd.f32 %v2171_v37, %v2040_v6  ;;  %v860_v42 = vadd.f32 %v859_v61, %v245_v60  ;;  %v861_v23 = vpop.f32.mrb[35].mxu1  ;;  %v2042_v5 = vpop.f32.mrb[18].mxu0 }
 0x1cc   :  { %v9246_v10 = vpack.c.bf16 %v858_v49, %v856_v3  ;;  %v862_v21 = vadd.f32 %v861_v23, %v249_v9  ;;  %v2043_v34 = vpop.f32.mrb[19].mxu0 }
 0x1ce   :  { %12401 = vst [vmem:[#allocation177_spill] sm:$0xff] %v9246_v10  ;;  %v9248_v13 = vpack.c.bf16 %v862_v21, %v860_v42 }
 0x1d0   :  { %12402 = vst [vmem:[#allocation178_spill] sm:$0xff] %v9248_v13  ;;  %v865_v44 = vpop.f32.mrb[36].mxu1 }
 0x1d1   :  { %v866_v62 = vadd.f32 %v865_v44, %v245_v60  ;;  %v867_v38 = vpop.f32.mrb[37].mxu1 }
 0x1d2   :  { %v868_v51 = vadd.f32 %v867_v38, %v249_v9  ;;  %v869_v15 = vpop.f32.mrb[38].mxu1 }
 0x1d3   :  { %v870_v17 = vadd.f32 %v869_v15, %v245_v60  ;;  %v871_v25 = vpop.f32.mrb[39].mxu1 }
 0x1d4   :  { %v9250_v43 = vpack.c.bf16 %v868_v51, %v866_v62  ;;  %v872_v32 = vadd.f32 %v871_v25, %v249_v9 }
 0x1d6   :  { %12403 = vst [vmem:[#allocation179_spill] sm:$0xff] %v9250_v43  ;;  %v9252_v37 = vpack.c.bf16 %v872_v32, %v870_v17 }
 0x1d8   :  { %12404 = vst [vmem:[#allocation180_spill] sm:$0xff] %v9252_v37  ;;  %v875_v6 = vpop.f32.mrb[40].mxu1  ;;  %v9331_v37 = vld [vmem:[#allocation14 + $0xa4] ss:$16 sps:$4 sm:$0xff]  }
 0x1d9   :  { %v876_v61 = vadd.f32 %v875_v6, %v245_v60  ;;  %v877_v3 = vpop.f32.mrb[41].mxu1  ;;  %12419 = vst [vmem:[#allocation195_spill] sm:$0xff] %v9331_v37 }
 0x1da   :  { %v878_v49 = vadd.f32 %v877_v3, %v249_v9  ;;  %v879_v23 = vpop.f32.mrb[42].mxu1  ;;  %v2193_v3 = vmul.f32 0.5, %v2175_v46 }
 0x1db   :  { %v880_v5 = vadd.f32 %v879_v23, %v245_v60  ;;  %v881_v21 = vpop.f32.mrb[43].mxu1  ;;  %v2189_v23 = vmul.f32 0.5, %v2174_v54 }
 0x1dc   :  { %v9254_v42 = vpack.c.bf16 %v878_v49, %v876_v61  ;;  %v882_v44 = vadd.f32 %v881_v21, %v249_v9  ;;  %7709 = vtanh.f32 %v2193_v3  ;;  %v2172_v61 = vunpack.c.l.bf16 %v9218_v53 }
 0x1dd   :  { %7711 = vtanh.f32 %v2189_v23  ;;  %v2173_v21 = vunpack.c.h.bf16 %v9218_v53 }
 0x1de   :  { %12405 = vst [vmem:[#allocation181_spill] sm:$0xff] %v9254_v42  ;;  %v9256_v34 = vpack.c.bf16 %v882_v44, %v880_v5  ;;  %v2181_v5 = vunpack.c.l.bf16 %v9216_v30  ;;  %v9333_v42 = vld [vmem:[#allocation14 + $0xac] ss:$16 sps:$4 sm:$0xff]  }
 0x1df   :  { %12420 = vst [vmem:[#allocation196_spill] sm:$0xff] %v9333_v42 }
 0x1e0   :  { %12406 = vst [vmem:[#allocation182_spill] sm:$0xff] %v9256_v34  ;;  %v885_v38 = vpop.f32.mrb[44].mxu1  ;;  %v9337_v34 = vld [vmem:[#allocation14 + $0xa0] ss:$16 sps:$4 sm:$0xff]  }
 0x1e1   :  { %v886_v15 = vadd.f32 %v885_v38, %v245_v60  ;;  %v887_v10 = vpop.f32.mrb[45].mxu1  ;;  %v2182_v38 = vunpack.c.h.bf16 %v9216_v30  ;;  %12421 = vst [vmem:[#allocation197_spill] sm:$0xff] %v9337_v34 }
 0x1e2   :  { %v888_v62 = vadd.f32 %v887_v10, %v249_v9  ;;  %v889_v51 = vpop.f32.mrb[46].mxu1 }
 0x1e3   :  { %v890_v25 = vadd.f32 %v889_v51, %v245_v60  ;;  %v891_v17 = vpop.f32.mrb[47].mxu1 }
 0x1e4   :  { %v9258_v32 = vpack.c.bf16 %v888_v62, %v886_v15  ;;  %v892_v6 = vadd.f32 %v891_v17, %v249_v9 }
 0x1e6   :  { %12407 = vst [vmem:[#allocation183_spill] sm:$0xff] %v9258_v32  ;;  %v9260_v13 = vpack.c.bf16 %v892_v6, %v890_v25  ;;  %v7710_v54 = vpop.eup %7709  ;;  %v9339_v32 = vld [vmem:[#allocation14 + $0xa8] ss:$16 sps:$4 sm:$0xff]  }
 0x1e7   :  { %v7712_v3 = vpop.eup %7711  ;;  %v2195_v23 = vmul.f32 0.5, %v7710_v54  ;;  %v9275_v54 = vld [vmem:[#allocation14 + $0x8] ss:$16 sps:$4 sm:$0xff]   ;;  %12422 = vst [vmem:[#allocation198_spill] sm:$0xff] %v9339_v32 }
 0x208   :  { %v2079_v49 = vpop.f32.mrb[48].mxu1 }
 0x209   :  { %v2176_v10 = vadd.f32 %v2172_v61, %v2079_v49  ;;  %v2120_v44 = vpop.f32.mrb[20].mxu0  ;;  %v2081_v60 = vpop.f32.mrb[49].mxu1  ;;  %v2191_v61 = vmul.f32 0.5, %v7712_v3  ;;  %v2196_v49 = vadd.f32 0.5, %v2195_v23  ;;  %v9289_v3 = vld [vmem:[#allocation14 + $0x28] ss:$16 sps:$4 sm:$0xff]  }
 0x20a   :  { %v9266_v15 = vadd.f32 %v2181_v5, %v2120_v44  ;;  %v2177_v9 = vadd.f32 %v2173_v21, %v2081_v60  ;;  %v2122_v62 = vpop.f32.mrb[21].mxu0  ;;  %v2083_v46 = vpop.f32.mrb[50].mxu1  ;;  %v9293_v23 = vld [vmem:[#allocation14 + $0x44] ss:$16 sps:$4 sm:$0xff]  }
 0x20b   :  { %7713 = vtanh.f32 %v2176_v10  ;;  %v9268_v51 = vadd.f32 %v2182_v38, %v2122_v62  ;;  %v2084_v25 = vpop.f32.mrb[51].mxu1  ;;  %v2124_v17 = vpop.f32.mrb[22].mxu0  ;;  %v2192_v43 = vadd.f32 0.5, %v2191_v61  ;;  %v2202_v5 = vmul.f32 0.0, %v2196_v49  ;;  %v9301_v61 = vld [vmem:[#allocation14 + $0x40] ss:$16 sps:$4 sm:$0xff]  }
 0x20c   :  { %v2125_v6 = vpop.f32.mrb[23].mxu0  ;;  %v2198_v53 = vmul.f32 0.5, %v2177_v9  ;;  %v9273_v25 = vld [vmem:[#allocation14] ss:$16 sps:$4 sm:$0xff]   ;;  %v9279_v17 = vld [vmem:[#allocation14 + $0x24] ss:$16 sps:$4 sm:$0xff]  }
 0x20d   :  { %v9281_v6 = vld [vmem:[#allocation14 + $0x2c] ss:$16 sps:$4 sm:$0xff]   ;;  %12409 = vst [vmem:[#allocation185_spill] sm:$0xff] %v9301_v61  ;;  %v9303_v49 = vld [vmem:[#allocation14 + $0x48] ss:$16 sps:$4 sm:$0xff]  }
 0x20e   :  { %7715 = vtanh.f32 %v2198_v53  ;;  %v9295_v53 = vld [vmem:[#allocation14 + $0x4c] ss:$16 sps:$4 sm:$0xff]   ;;  %12410 = vst [vmem:[#allocation186_spill] sm:$0xff] %v9303_v49 }
 0x20f   :  { %12408 = vst [vmem:[#allocation184_spill] sm:$0xff] %v9295_v53 }
 0x215   :  { %v7714_v30 = vpop.eup %7713 }
 0x216   :  { %v2203_v44 = vmul.f32 %v7714_v30, %v2192_v43  ;;  %v9287_v43 = vld [vmem:[#allocation14 + $0x20] ss:$16 sps:$4 sm:$0xff]   ;;  %v9307_v30 = vld [vmem:[#allocation14 + $0x64] ss:$16 sps:$4 sm:$0xff]  }
 0x217   :  { %12411 = vst [vmem:[#allocation187_spill] sm:$0xff] %v9307_v30 }
 0x218   :  { %v9270_v21 = vadd.f32 %v2203_v44, %v2202_v5  ;;  %v7716_v10 = vpop.eup %7715  ;;  %v9309_v5 = vld [vmem:[#allocation14 + $0x6c] ss:$16 sps:$4 sm:$0xff]   ;;  %v9313_v44 = vld [vmem:[#allocation14 + $0x60] ss:$16 sps:$4 sm:$0xff]  }
 0x219   :  { %v2200_v60 = vmul.f32 0.5, %v7716_v10  ;;  %12412 = vst [vmem:[#allocation188_spill] sm:$0xff] %v9309_v5  ;;  %12413 = vst [vmem:[#allocation189_spill] sm:$0xff] %v9313_v44  ;;  %v9315_v10 = vld [vmem:[#allocation14 + $0x68] ss:$16 sps:$4 sm:$0xff]  }
 0x21a   :  { %7717 = vtanh.f32 %v9270_v21  ;;  %12414 = vst [vmem:[#allocation190_spill] sm:$0xff] %v9315_v10 }
 0x21b   :  { %v2201_v38 = vadd.f32 0.5, %v2200_v60  ;;  %v9319_v60 = vld [vmem:[#allocation14 + $0x84] ss:$16 sps:$4 sm:$0xff]  }
 0x21c   :  { %12415 = vst [vmem:[#allocation191_spill] sm:$0xff] %v9319_v60 }
 0x224   :  { %v7718_v62 = vpop.eup %7717 }
 0x225   :  { %v2206_v46 = vmul.f32 %v7718_v62, %v2201_v38  ;;  %v9321_v38 = vld [vmem:[#allocation14 + $0x8c] ss:$16 sps:$4 sm:$0xff]   ;;  %v9325_v62 = vld [vmem:[#allocation14 + $0x80] ss:$16 sps:$4 sm:$0xff]  }
 0x226   :  { %12416 = vst [vmem:[#allocation192_spill] sm:$0xff] %v9321_v38  ;;  %12417 = vst [vmem:[#allocation193_spill] sm:$0xff] %v9325_v62 }
 0x227   :  { %v9277_v9 = vpack.c.bf16 %v2206_v46, %v2206_v46  ;;  %v9327_v46 = vld [vmem:[#allocation14 + $0x88] ss:$16 sps:$4 sm:$0xff]  }
 0x228   :  { %12418 = vst [vmem:[#allocation194_spill] sm:$0xff] %v9327_v46 }
 0x229   :  { %2424 = vmatmul.mubr.bf16.vlgmr.msra.gmra.mrb[24].mxu0 %v9277_v9  ;;  %2465 = vmatmul.mubr.bf16.vlgmr.msra.gmra.mrb[56].mxu1 %v9277_v9 }
 0x22a   :  { %2647 = vmatpush1.bf16.msra.mxu0 %v9273_v25  ;;  %2688 = vmatpush1.bf16.msra.mxu1 %v9275_v54 }
 0x22b   :  { %2648 = vmatprep.subr.bf16.mxu0 %v9279_v17  ;;  %2689 = vmatprep.subr.bf16.mxu1 %v9281_v6 }
 0x22c   :  { %2678 = vmatprep.mubr.bf16.mxu0 %v12275_v47  ;;  %2719 = vmatprep.mubr.bf16.mxu1 %v12275_v47 }
 0x22e   :  { %2649 = vmatpush1.bf16.msra.mxu0 %v9287_v43  ;;  %2690 = vmatpush1.bf16.msra.mxu1 %v9289_v3 }
 0x22f   :  { %2650 = vmatprep.subr.bf16.mxu0 %v9293_v23  ;;  %2691 = vmatprep.subr.bf16.mxu1 %v9295_v53 }
 0x232   :  { %2651 = vmatpush1.bf16.msra.mxu0 %v9301_v61  ;;  %2692 = vmatpush1.bf16.msra.mxu1 %v9303_v49 }
 0x233   :  { %2652 = vmatprep.subr.bf16.mxu0 %v9307_v30  ;;  %2693 = vmatprep.subr.bf16.mxu1 %v9309_v5 }
 0x236   :  { %2653 = vmatpush1.bf16.msra.mxu0 %v9313_v44  ;;  %2694 = vmatpush1.bf16.msra.mxu1 %v9315_v10  ;;  %v9343_v10 = vld [vmem:[#allocation14 + $0xc4] ss:$16 sps:$4 sm:$0xff]   ;;  %v2207_v44 = vmul.f32 0.5, %v9266_v15  ;;  %v2183_v15 = vunpack.c.l.bf16 %v9260_v13 }
 0x237   :  { %2654 = vmatprep.subr.bf16.mxu0 %v9319_v60  ;;  %2695 = vmatprep.subr.bf16.mxu1 %v9321_v38  ;;  %12423 = vst [vmem:[#allocation199_spill] sm:$0xff] %v9343_v10  ;;  %v9345_v60 = vld [vmem:[#allocation14 + $0xcc] ss:$16 sps:$4 sm:$0xff]   ;;  %v2211_v38 = vmul.f32 0.5, %v9268_v51  ;;  %v9363_v51 = vld [vmem:[#allocation14 + $0xe0] ss:$16 sps:$4 sm:$0xff]  }
 0x238   :  { %12424 = vst [vmem:[#allocation200_spill] sm:$0xff] %v9345_v60  ;;  %12429 = vst [vmem:[#allocation205_spill] sm:$0xff] %v9363_v51 }
 0x239   :  { %7719 = vtanh.f32 %v2211_v38 }
 0x23a   :  { %2655 = vmatpush1.bf16.msra.mxu0 %v9325_v62  ;;  %2696 = vmatpush1.bf16.msra.mxu1 %v9327_v46  ;;  %v9350_v62 = vld [vmem:[#allocation14 + $0xc0] ss:$16 sps:$4 sm:$0xff]   ;;  %v9352_v46 = vld [vmem:[#allocation14 + $0xc8] ss:$16 sps:$4 sm:$0xff]   ;;  %7721 = vtanh.f32 %v2207_v44 }
 0x23b   :  { %2656 = vmatprep.subr.bf16.mxu0 %v9331_v37  ;;  %2697 = vmatprep.subr.bf16.mxu1 %v9333_v42  ;;  %12425 = vst [vmem:[#allocation201_spill] sm:$0xff] %v9350_v62  ;;  %12426 = vst [vmem:[#allocation202_spill] sm:$0xff] %v9352_v46  ;;  %v9357_v42 = vld [vmem:[#allocation14 + $0xe4] ss:$16 sps:$4 sm:$0xff]   ;;  %v9359_v37 = vld [vmem:[#allocation14 + $0xec] ss:$16 sps:$4 sm:$0xff]  }
 0x23c   :  { %12427 = vst [vmem:[#allocation203_spill] sm:$0xff] %v9357_v42  ;;  %12428 = vst [vmem:[#allocation204_spill] sm:$0xff] %v9359_v37 }
 0x23e   :  { %2657 = vmatpush1.bf16.msra.mxu0 %v9337_v34  ;;  %2698 = vmatpush1.bf16.msra.mxu1 %v9339_v32  ;;  %v9365_v32 = vld [vmem:[#allocation14 + $0xe8] ss:$16 sps:$4 sm:$0xff]  }
 0x23f   :  { %2658 = vmatprep.subr.bf16.mxu0 %v9343_v10  ;;  %2699 = vmatprep.subr.bf16.mxu1 %v9345_v60  ;;  %12430 = vst [vmem:[#allocation206_spill] sm:$0xff] %v9365_v32 }
 0x242   :  { %2659 = vmatpush1.bf16.msra.mxu0 %v9350_v62  ;;  %2700 = vmatpush1.bf16.msra.mxu1 %v9352_v46  ;;  %v2184_v46 = vunpack.c.h.bf16 %v9260_v13 }
 0x243   :  { %2660 = vmatprep.subr.bf16.mxu0 %v9357_v42  ;;  %2701 = vmatprep.subr.bf16.mxu1 %v9359_v37  ;;  %v7720_v42 = vpop.eup %7719 }
 0x244   :  { %v7722_v34 = vpop.eup %7721 }
 0x246   :  { %2661 = vmatpush1.bf16.msra.mxu0 %v9363_v51  ;;  %2702 = vmatpush1.bf16.msra.mxu1 %v9365_v32  ;;  %v2213_v51 = vmul.f32 0.5, %v7720_v42  ;;  %v2209_v32 = vmul.f32 0.5, %v7722_v34  ;;  %v12433_v42 = vld [vmem:[#allocation29_spill] sm:$0xff] }
 0x247   :  { %2736 = vmatprep.subr.bf16.mxu0 %v8600_v7  ;;  %2777 = vmatprep.subr.bf16.mxu1 %v8726_v55  ;;  %v12434_v34 = vld [vmem:[#allocation65_spill] sm:$0xff] }
 0x248   :  { %v2161_v38 = vpop.f32.mrb[52].mxu1  ;;  %v2214_v30 = vadd.f32 0.5, %v2213_v51  ;;  %v2210_v49 = vadd.f32 0.5, %v2209_v32  ;;  %v12435_v32 = vld [vmem:[#allocation30_spill] sm:$0xff]  ;;  %v12440_v51 = vld [vmem:[#allocation71_spill] sm:$0xff] }
 0x249   :  { %v2187_v62 = vadd.f32 %v2183_v15, %v2161_v38  ;;  %v2163_v60 = vpop.f32.mrb[53].mxu1  ;;  %v12441_v15 = vld [vmem:[#allocation33_spill] sm:$0xff] }
 0x24a   :  { %v2188_v44 = vadd.f32 %v2184_v46, %v2163_v60  ;;  %v2165_v10 = vpop.f32.mrb[54].mxu1  ;;  %v2220_v61 = vmul.f32 0.0, %v2214_v30  ;;  %v12438_v30 = vld [vmem:[#allocation69_spill] sm:$0xff] }
 0x24b   :  { %7723 = vtanh.f32 %v2187_v62  ;;  %v2166_v37 = vpop.f32.mrb[55].mxu1  ;;  %v12442_v38 = vld [vmem:[#allocation73_spill] sm:$0xff] }
 0x24c   :  { %v2216_v5 = vmul.f32 0.5, %v2188_v44  ;;  %v12443_v44 = vld [vmem:[#allocation34_spill] sm:$0xff] }
 0x24e   :  { %7725 = vtanh.f32 %v2216_v5  ;;  %v12439_v5 = vld [vmem:[#allocation32_spill] sm:$0xff] }
 0x255   :  { %v7724_v7 = vpop.eup %7723 }
 0x256   :  { %v2221_v55 = vmul.f32 %v7724_v7, %v2210_v49  ;;  %v12431_v7 = vld [vmem:[#allocation28_spill] sm:$0xff]  ;;  %v12437_v49 = vld [vmem:[#allocation31_spill] sm:$0xff] }
 0x258   :  { %v9375_v53 = vadd.f32 %v2221_v55, %v2220_v61  ;;  %v7726_v13 = vpop.eup %7725  ;;  %v12432_v55 = vld [vmem:[#allocation63_spill] sm:$0xff] }
 0x259   :  { %v2218_v60 = vmul.f32 0.5, %v7726_v13  ;;  %v12436_v61 = vld [vmem:[#allocation67_spill] sm:$0xff] }
 0x25a   :  { %7727 = vtanh.f32 %v9375_v53  ;;  %v12444_v13 = vld [vmem:[#allocation75_spill] sm:$0xff] }
 0x25b   :  { %v2219_v10 = vadd.f32 0.5, %v2218_v60  ;;  %v12445_v60 = vld [vmem:[#allocation35_spill] sm:$0xff] }
 0x264   :  { %v7728_v46 = vpop.eup %7727 }
 0x265   :  { %v2224_v62 = vmul.f32 %v7728_v46, %v2219_v10  ;;  %v12446_v10 = vld [vmem:[#allocation77_spill] sm:$0xff]  ;;  %v12447_v46 = vld [vmem:[#allocation36_spill] sm:$0xff] }
 0x267   :  { %v9378_v37 = vpack.c.bf16 %v2224_v62, %v2224_v62  ;;  %v12448_v62 = vld [vmem:[#allocation79_spill] sm:$0xff] }
 0x269   :  { %2679 = vmatmul.mubr.bf16.vlgmr.msra.gmra.mrb[28].mxu0 %v9378_v37  ;;  %2720 = vmatmul.mubr.bf16.vlgmr.msra.gmra.mrb[60].mxu1 %v9378_v37 }
 0x26a   :  { %2737 = vmatpush1.bf16.msra.mxu0 %v8604_v14  ;;  %2778 = vmatpush1.bf16.msra.mxu1 %v8731_v63 }
 0x26b   :  { %2768 = vmatprep.mubr.bf16.mxu0 %v9378_v37  ;;  %2809 = vmatprep.mubr.bf16.mxu1 %v9378_v37 }
 0x26c   :  { %2738 = vmatprep.subr.bf16.mxu0 %v8607_v16  ;;  %2779 = vmatprep.subr.bf16.mxu1 %v8737_v8 }
 0x26e   :  { %2739 = vmatpush1.bf16.msra.mxu0 %v8612_v22  ;;  %2780 = vmatpush1.bf16.msra.mxu1 %v8745_v19 }
 0x26f   :  { %2740 = vmatprep.subr.bf16.mxu0 %v8616_v24  ;;  %2781 = vmatprep.subr.bf16.mxu1 %v8751_v28 }
 0x272   :  { %2741 = vmatpush1.bf16.msra.mxu0 %v8622_v31  ;;  %2782 = vmatpush1.bf16.msra.mxu1 %v8759_v35 }
 0x273   :  { %2742 = vmatprep.subr.bf16.mxu0 %v8625_v33  ;;  %2783 = vmatprep.subr.bf16.mxu1 %v8765_v40 }
 0x276   :  { %2743 = vmatpush1.bf16.msra.mxu0 %v8630_v39  ;;  %2784 = vmatpush1.bf16.msra.mxu1 %v8772_v57 }
 0x277   :  { %2744 = vmatprep.subr.bf16.mxu0 %v8633_v41  ;;  %2785 = vmatprep.subr.bf16.mxu1 %v8779_v1 }
 0x27a   :  { %2745 = vmatpush1.bf16.msra.mxu0 %v8640_v48  ;;  %2786 = vmatpush1.bf16.msra.mxu1 %v8785_v20 }
 0x27b   :  { %2746 = vmatprep.subr.bf16.mxu0 %v8643_v50  ;;  %2787 = vmatprep.subr.bf16.mxu1 %v8791_v29 }
 0x27e   :  { %2747 = vmatpush1.bf16.msra.mxu0 %v8648_v56  ;;  %2788 = vmatpush1.bf16.msra.mxu1 %v8798_v45 }
 0x27f   :  { %2748 = vmatprep.subr.bf16.mxu0 %v8651_v58  ;;  %2789 = vmatprep.subr.bf16.mxu1 %v8805_v52 }
 0x282   :  { %2749 = vmatpush1.bf16.msra.mxu0 %v8658_v2  ;;  %2790 = vmatpush1.bf16.msra.mxu1 %v8811_v11 }
 0x283   :  { %2750 = vmatprep.subr.bf16.mxu0 %v8661_v4  ;;  %2791 = vmatprep.subr.bf16.mxu1 %v8817_v27 }
 0x286   :  { %2751 = vmatpush1.bf16.msra.mxu0 %v8666_v12  ;;  %2792 = vmatpush1.bf16.msra.mxu1 %v8824_v0 }
 0x287   :  { %2752 = vmatprep.subr.bf16.mxu0 %v8669_v18  ;;  %2793 = vmatprep.subr.bf16.mxu1 %v8831_v36 }
 0x28a   :  { %2753 = vmatpush1.bf16.msra.mxu0 %v8674_v26  ;;  %2794 = vmatpush1.bf16.msra.mxu1 %v8837_v59 }
 0x28b   :  { %2754 = vmatprep.subr.bf16.mxu0 %v12431_v7  ;;  %2795 = vmatprep.subr.bf16.mxu1 %v12432_v55 }
 0x28e   :  { %2755 = vmatpush1.bf16.msra.mxu0 %v12433_v42  ;;  %2796 = vmatpush1.bf16.msra.mxu1 %v12434_v34 }
 0x28f   :  { %2756 = vmatprep.subr.bf16.mxu0 %v12435_v32  ;;  %2797 = vmatprep.subr.bf16.mxu1 %v12436_v61 }
 0x292   :  { %2757 = vmatpush1.bf16.msra.mxu0 %v12437_v49  ;;  %2798 = vmatpush1.bf16.msra.mxu1 %v12438_v30  ;;  %v12449_v30 = vld [vmem:[#allocation37_spill] sm:$0xff] }
 0x293   :  { %2758 = vmatprep.subr.bf16.mxu0 %v12439_v5  ;;  %2799 = vmatprep.subr.bf16.mxu1 %v12440_v51  ;;  %v12450_v5 = vld [vmem:[#allocation81_spill] sm:$0xff]  ;;  %v12451_v51 = vld [vmem:[#allocation38_spill] sm:$0xff] }
 0x296   :  { %2759 = vmatpush1.bf16.msra.mxu0 %v12441_v15  ;;  %2800 = vmatpush1.bf16.msra.mxu1 %v12442_v38  ;;  %v12452_v15 = vld [vmem:[#allocation83_spill] sm:$0xff] }
 0x297   :  { %2760 = vmatprep.subr.bf16.mxu0 %v12443_v44  ;;  %2801 = vmatprep.subr.bf16.mxu1 %v12444_v13  ;;  %v12453_v38 = vld [vmem:[#allocation39_spill] sm:$0xff]  ;;  %v12454_v44 = vld [vmem:[#allocation85_spill] sm:$0xff]  ;;  %v12455_v13 = vld [vmem:[#allocation40_spill] sm:$0xff] }
 0x29a   :  { %2761 = vmatpush1.bf16.msra.mxu0 %v12445_v60  ;;  %2802 = vmatpush1.bf16.msra.mxu1 %v12446_v10  ;;  %v12456_v60 = vld [vmem:[#allocation87_spill] sm:$0xff]  ;;  %v12457_v10 = vld [vmem:[#allocation41_spill] sm:$0xff] }
 0x29b   :  { %2762 = vmatprep.subr.bf16.mxu0 %v12447_v46  ;;  %2803 = vmatprep.subr.bf16.mxu1 %v12448_v62  ;;  %v12458_v46 = vld [vmem:[#allocation89_spill] sm:$0xff]  ;;  %v12459_v62 = vld [vmem:[#allocation43_spill] sm:$0xff] }
 0x29e   :  { %2763 = vmatpush1.bf16.msra.mxu0 %v12449_v30  ;;  %2804 = vmatpush1.bf16.msra.mxu1 %v12450_v5  ;;  %v12460_v30 = vld [vmem:[#allocation91_spill] sm:$0xff] }
 0x29f   :  { %2764 = vmatprep.subr.bf16.mxu0 %v12451_v51  ;;  %2805 = vmatprep.subr.bf16.mxu1 %v12452_v15  ;;  %v12461_v15 = vld [vmem:[#allocation44_spill] sm:$0xff]  ;;  %v12471_v51 = vld [vmem:[#allocation49_spill] sm:$0xff] }
 0x2a2   :  { %2765 = vmatpush1.bf16.msra.mxu0 %v12453_v38  ;;  %2806 = vmatpush1.bf16.msra.mxu1 %v12454_v44  ;;  %v12462_v44 = vld [vmem:[#allocation92_spill] sm:$0xff] }
 0x2a3   :  { %2766 = vmatprep.subr.bf16.mxu0 %v12455_v13  ;;  %2807 = vmatprep.subr.bf16.mxu1 %v12456_v60  ;;  %v12463_v60 = vld [vmem:[#allocation45_spill] sm:$0xff]  ;;  %v12468_v13 = vld [vmem:[#allocation95_spill] sm:$0xff]  ;;  %v12469_v38 = vld [vmem:[#allocation48_spill] sm:$0xff] }
 0x2a6   :  { %2767 = vmatpush1.bf16.msra.mxu0 %v12457_v10  ;;  %2808 = vmatpush1.bf16.msra.mxu1 %v12458_v46  ;;  %v12464_v10 = vld [vmem:[#allocation93_spill] sm:$0xff]  ;;  %v12465_v46 = vld [vmem:[#allocation46_spill] sm:$0xff] }
 0x2a7   :  { %2818 = vmatprep.subr.bf16.mxu0 %v12459_v62  ;;  %2859 = vmatprep.subr.bf16.mxu1 %v12460_v30  ;;  %v12466_v62 = vld [vmem:[#allocation94_spill] sm:$0xff]  ;;  %v12467_v30 = vld [vmem:[#allocation47_spill] sm:$0xff] }
 0x2a9   :  { %2769 = vmatmul.mubr.bf16.vlgmr.msra.gmra.mrb[32].mxu0 %v9277_v9  ;;  %2810 = vmatmul.mubr.bf16.vlgmr.msra.gmra.mrb[64].mxu1 %v9277_v9 }
 0x2aa   :  { %2819 = vmatpush1.bf16.msra.mxu0 %v12461_v15  ;;  %2850 = vmatprep.mubr.bf16.mxu0 %v9378_v37  ;;  %v12470_v15 = vld [vmem:[#allocation96_spill] sm:$0xff] }
 0x2ab   :  { %2860 = vmatpush1.bf16.msra.mxu1 %v12462_v44  ;;  %2891 = vmatprep.mubr.bf16.mxu1 %v9378_v37  ;;  %v12472_v44 = vld [vmem:[#allocation97_spill] sm:$0xff]  ;;  %v12473_v37 = vld [vmem:[#allocation50_spill] sm:$0xff] }
 0x2ac   :  { %2820 = vmatprep.subr.bf16.mxu0 %v12463_v60  ;;  %2861 = vmatprep.subr.bf16.mxu1 %v12464_v10  ;;  %v12474_v60 = vld [vmem:[#allocation98_spill] sm:$0xff]  ;;  %v12475_v10 = vld [vmem:[#allocation51_spill] sm:$0xff] }
 0x2ae   :  { %2821 = vmatpush1.bf16.msra.mxu0 %v12465_v46  ;;  %v12476_v46 = vld [vmem:[#allocation99_spill] sm:$0xff] }
 0x2af   :  { %2862 = vmatpush1.bf16.msra.mxu1 %v12466_v62  ;;  %2822 = vmatprep.subr.bf16.mxu0 %v12467_v30  ;;  %v12477_v62 = vld [vmem:[#allocation52_spill] sm:$0xff] }
 0x2b0   :  { %2863 = vmatprep.subr.bf16.mxu1 %v12468_v13  ;;  %v12478_v30 = vld [vmem:[#allocation100_spill] sm:$0xff]  ;;  %v12479_v13 = vld [vmem:[#allocation53_spill] sm:$0xff] }
 0x2b2   :  { %2823 = vmatpush1.bf16.msra.mxu0 %v12469_v38  ;;  %v12480_v38 = vld [vmem:[#allocation101_spill] sm:$0xff] }
 0x2b3   :  { %2864 = vmatpush1.bf16.msra.mxu1 %v12470_v15  ;;  %2824 = vmatprep.subr.bf16.mxu0 %v12471_v51  ;;  %v12481_v15 = vld [vmem:[#allocation54_spill] sm:$0xff] }
 0x2b4   :  { %2865 = vmatprep.subr.bf16.mxu1 %v12472_v44  ;;  %v12482_v51 = vld [vmem:[#allocation102_spill] sm:$0xff]  ;;  %v12483_v44 = vld [vmem:[#allocation55_spill] sm:$0xff] }
 0x2b6   :  { %2825 = vmatpush1.bf16.msra.mxu0 %v12473_v37  ;;  %v12484_v37 = vld [vmem:[#allocation103_spill] sm:$0xff] }
 0x2b7   :  { %2866 = vmatpush1.bf16.msra.mxu1 %v12474_v60  ;;  %2826 = vmatprep.subr.bf16.mxu0 %v12475_v10  ;;  %v12485_v60 = vld [vmem:[#allocation56_spill] sm:$0xff] }
 0x2b8   :  { %2867 = vmatprep.subr.bf16.mxu1 %v12476_v46  ;;  %v12486_v10 = vld [vmem:[#allocation104_spill] sm:$0xff]  ;;  %v12487_v46 = vld [vmem:[#allocation57_spill] sm:$0xff] }
 0x2ba   :  { %2827 = vmatpush1.bf16.msra.mxu0 %v12477_v62  ;;  %v12488_v62 = vld [vmem:[#allocation105_spill] sm:$0xff] }
 0x2bb   :  { %2868 = vmatpush1.bf16.msra.mxu1 %v12478_v30  ;;  %2828 = vmatprep.subr.bf16.mxu0 %v12479_v13  ;;  %v12489_v30 = vld [vmem:[#allocation58_spill] sm:$0xff] }
 0x2bc   :  { %2869 = vmatprep.subr.bf16.mxu1 %v12480_v38  ;;  %v12490_v13 = vld [vmem:[#allocation106_spill] sm:$0xff]  ;;  %v12491_v38 = vld [vmem:[#allocation60_spill] sm:$0xff] }
 0x2be   :  { %2829 = vmatpush1.bf16.msra.mxu0 %v12481_v15  ;;  %v12492_v15 = vld [vmem:[#allocation107_spill] sm:$0xff] }
 0x2bf   :  { %2870 = vmatpush1.bf16.msra.mxu1 %v12482_v51  ;;  %2830 = vmatprep.subr.bf16.mxu0 %v12483_v44  ;;  %v12493_v51 = vld [vmem:[#allocation62_spill] sm:$0xff]  ;;  %v12494_v44 = vld [vmem:[#allocation108_spill] sm:$0xff] }
 0x2c0   :  { %2871 = vmatprep.subr.bf16.mxu1 %v12484_v37  ;;  %v12495_v37 = vld [vmem:[#allocation64_spill] sm:$0xff] }
 0x2c2   :  { %2831 = vmatpush1.bf16.msra.mxu0 %v12485_v60  ;;  %v12496_v60 = vld [vmem:[#allocation109_spill] sm:$0xff] }
 0x2c3   :  { %2872 = vmatpush1.bf16.msra.mxu1 %v12486_v10  ;;  %2832 = vmatprep.subr.bf16.mxu0 %v12487_v46  ;;  %v12497_v10 = vld [vmem:[#allocation66_spill] sm:$0xff] }
 0x2c4   :  { %2873 = vmatprep.subr.bf16.mxu1 %v12488_v62  ;;  %v12498_v46 = vld [vmem:[#allocation110_spill] sm:$0xff]  ;;  %v12499_v62 = vld [vmem:[#allocation68_spill] sm:$0xff] }
 0x2c6   :  { %2833 = vmatpush1.bf16.msra.mxu0 %v12489_v30  ;;  %v12500_v30 = vld [vmem:[#allocation111_spill] sm:$0xff] }
 0x2c7   :  { %2874 = vmatpush1.bf16.msra.mxu1 %v12490_v13  ;;  %2834 = vmatprep.subr.bf16.mxu0 %v12491_v38  ;;  %v12501_v13 = vld [vmem:[#allocation70_spill] sm:$0xff]  ;;  %v12502_v38 = vld [vmem:[#allocation112_spill] sm:$0xff] }
 0x2c8   :  { %2875 = vmatprep.subr.bf16.mxu1 %v12492_v15  ;;  %v12503_v15 = vld [vmem:[#allocation72_spill] sm:$0xff] }
 0x2ca   :  { %2835 = vmatpush1.bf16.msra.mxu0 %v12493_v51  ;;  %v12504_v51 = vld [vmem:[#allocation113_spill] sm:$0xff] }
 0x2cb   :  { %2876 = vmatpush1.bf16.msra.mxu1 %v12494_v44  ;;  %2836 = vmatprep.subr.bf16.mxu0 %v12495_v37  ;;  %v12505_v44 = vld [vmem:[#allocation74_spill] sm:$0xff] }
 0x2cc   :  { %2877 = vmatprep.subr.bf16.mxu1 %v12496_v60  ;;  %v12506_v37 = vld [vmem:[#allocation114_spill] sm:$0xff]  ;;  %v12507_v60 = vld [vmem:[#allocation76_spill] sm:$0xff] }
 0x2ce   :  { %2837 = vmatpush1.bf16.msra.mxu0 %v12497_v10  ;;  %v12508_v10 = vld [vmem:[#allocation115_spill] sm:$0xff] }
 0x2cf   :  { %2878 = vmatpush1.bf16.msra.mxu1 %v12498_v46  ;;  %2838 = vmatprep.subr.bf16.mxu0 %v12499_v62  ;;  %v12509_v46 = vld [vmem:[#allocation78_spill] sm:$0xff]  ;;  %v12510_v62 = vld [vmem:[#allocation116_spill] sm:$0xff] }
 0x2d0   :  { %2879 = vmatprep.subr.bf16.mxu1 %v12500_v30  ;;  %v12511_v30 = vld [vmem:[#allocation80_spill] sm:$0xff] }
 0x2d2   :  { %2839 = vmatpush1.bf16.msra.mxu0 %v12501_v13  ;;  %v12512_v13 = vld [vmem:[#allocation117_spill] sm:$0xff] }
 0x2d3   :  { %2880 = vmatpush1.bf16.msra.mxu1 %v12502_v38  ;;  %2840 = vmatprep.subr.bf16.mxu0 %v12503_v15  ;;  %v12513_v38 = vld [vmem:[#allocation82_spill] sm:$0xff] }
 0x2d4   :  { %2881 = vmatprep.subr.bf16.mxu1 %v12504_v51  ;;  %v12514_v15 = vld [vmem:[#allocation118_spill] sm:$0xff]  ;;  %v12515_v51 = vld [vmem:[#allocation84_spill] sm:$0xff] }
 0x2d6   :  { %2841 = vmatpush1.bf16.msra.mxu0 %v12505_v44  ;;  %v12516_v44 = vld [vmem:[#allocation119_spill] sm:$0xff] }
 0x2d7   :  { %2882 = vmatpush1.bf16.msra.mxu1 %v12506_v37  ;;  %2842 = vmatprep.subr.bf16.mxu0 %v12507_v60  ;;  %v12517_v37 = vld [vmem:[#allocation86_spill] sm:$0xff]  ;;  %v12518_v60 = vld [vmem:[#allocation120_spill] sm:$0xff] }
 0x2d8   :  { %2883 = vmatprep.subr.bf16.mxu1 %v12508_v10  ;;  %v12519_v10 = vld [vmem:[#allocation88_spill] sm:$0xff] }
 0x2da   :  { %2843 = vmatpush1.bf16.msra.mxu0 %v12509_v46  ;;  %v12520_v46 = vld [vmem:[#allocation121_spill] sm:$0xff] }
 0x2db   :  { %2884 = vmatpush1.bf16.msra.mxu1 %v12510_v62  ;;  %2844 = vmatprep.subr.bf16.mxu0 %v12511_v30  ;;  %v12521_v62 = vld [vmem:[#allocation90_spill] sm:$0xff] }
 0x2dc   :  { %2885 = vmatprep.subr.bf16.mxu1 %v12512_v13  ;;  %v12522_v30 = vld [vmem:[#allocation122_spill] sm:$0xff] }
 0x2dd   :  { %v9514_v13 = vld [vmem:[#allocation13 + $0x4] ss:$16 sps:$4 sm:$0xff]  }
 0x2de   :  { %2845 = vmatpush1.bf16.msra.mxu0 %v12513_v38  ;;  %12523 = vst [vmem:[#allocation207_spill] sm:$0xff] %v9514_v13  ;;  %v12558_v38 = vld [vmem:[#allocation168_spill] sm:$0xff] }
 0x2df   :  { %2886 = vmatpush1.bf16.msra.mxu1 %v12514_v15  ;;  %2846 = vmatprep.subr.bf16.mxu0 %v12515_v51  ;;  %v9517_v15 = vld [vmem:[#allocation13 + $0xc] ss:$16 sps:$4 sm:$0xff]  }
 0x2e0   :  { %2887 = vmatprep.subr.bf16.mxu1 %v12516_v44  ;;  %12524 = vst [vmem:[#allocation208_spill] sm:$0xff] %v9517_v15  ;;  %v12538_v44 = vld [vmem:[#allocation142_spill] sm:$0xff]  ;;  %v12539_v51 = vld [vmem:[#allocation145_spill] sm:$0xff] }
 0x2e2   :  { %2847 = vmatpush1.bf16.msra.mxu0 %v12517_v37  ;;  %v12532_v37 = vld [vmem:[#allocation134_spill] sm:$0xff] }
 0x2e3   :  { %2888 = vmatpush1.bf16.msra.mxu1 %v12518_v60  ;;  %2848 = vmatprep.subr.bf16.mxu0 %v12519_v10  ;;  %v12525_v60 = vld [vmem:[#allocation124_spill] sm:$0xff]  ;;  %v12526_v10 = vld [vmem:[#allocation125_spill] sm:$0xff] }
 0x2e4   :  { %2889 = vmatprep.subr.bf16.mxu1 %v12520_v46  ;;  %v12527_v46 = vld [vmem:[#allocation127_spill] sm:$0xff] }
 0x2e6   :  { %2849 = vmatpush1.bf16.msra.mxu0 %v12521_v62  ;;  %v12528_v62 = vld [vmem:[#allocation128_spill] sm:$0xff] }
 0x2e7   :  { %2890 = vmatpush1.bf16.msra.mxu1 %v12522_v30  ;;  %2965 = vmatprep.subr.bf16.mxu0 %v9514_v13  ;;  %v12529_v13 = vld [vmem:[#allocation130_spill] sm:$0xff]  ;;  %v12530_v30 = vld [vmem:[#allocation131_spill] sm:$0xff] }
 0x2e8   :  { %3006 = vmatprep.subr.bf16.mxu1 %v9517_v15  ;;  %v12531_v15 = vld [vmem:[#allocation133_spill] sm:$0xff] }
 0x2e9   :  { %2851 = vmatmul.mubr.bf16.vlgmr.msra.gmra.mrb[36].mxu0 %v9277_v9 }
 0x2ea   :  { %2892 = vmatmul.mubr.bf16.vlgmr.msra.gmra.mrb[68].mxu1 %v9277_v9  ;;  %2966 = vmatpush1.bf16.msra.mxu0 %v12525_v60  ;;  %v12533_v9 = vld [vmem:[#allocation135_spill] sm:$0xff]  ;;  %v12534_v60 = vld [vmem:[#allocation136_spill] sm:$0xff] }
 0x2eb   :  { %3007 = vmatpush1.bf16.msra.mxu1 %v12526_v10  ;;  %2967 = vmatprep.subr.bf16.mxu0 %v12527_v46  ;;  %v12535_v10 = vld [vmem:[#allocation138_spill] sm:$0xff]  ;;  %v12536_v46 = vld [vmem:[#allocation139_spill] sm:$0xff] }
 0x2ec   :  { %3008 = vmatprep.subr.bf16.mxu1 %v12528_v62  ;;  %2997 = vmatprep.mubr.bf16.mxu0 %v12275_v47  ;;  %v12537_v62 = vld [vmem:[#allocation141_spill] sm:$0xff] }
 0x2ed   :  { %3038 = vmatprep.mubr.bf16.mxu1 %v12275_v47 }
 0x2ee   :  { %2968 = vmatpush1.bf16.msra.mxu0 %v12529_v13  ;;  %v12540_v13 = vld [vmem:[#allocation146_spill] sm:$0xff] }
 0x2ef   :  { %3009 = vmatpush1.bf16.msra.mxu1 %v12530_v30  ;;  %2969 = vmatprep.subr.bf16.mxu0 %v12531_v15  ;;  %v12541_v30 = vld [vmem:[#allocation147_spill] sm:$0xff]  ;;  %v12542_v15 = vld [vmem:[#allocation148_spill] sm:$0xff] }
 0x2f0   :  { %3010 = vmatprep.subr.bf16.mxu1 %v12532_v37  ;;  %v12543_v37 = vld [vmem:[#allocation150_spill] sm:$0xff] }
 0x2f2   :  { %2970 = vmatpush1.bf16.msra.mxu0 %v12533_v9  ;;  %v12544_v9 = vld [vmem:[#allocation151_spill] sm:$0xff] }
 0x2f3   :  { %3011 = vmatpush1.bf16.msra.mxu1 %v12534_v60  ;;  %2971 = vmatprep.subr.bf16.mxu0 %v12535_v10  ;;  %v12545_v60 = vld [vmem:[#allocation153_spill] sm:$0xff]  ;;  %v12546_v10 = vld [vmem:[#allocation154_spill] sm:$0xff] }
 0x2f4   :  { %3012 = vmatprep.subr.bf16.mxu1 %v12536_v46  ;;  %v12547_v46 = vld [vmem:[#allocation157_spill] sm:$0xff] }
 0x2f6   :  { %2972 = vmatpush1.bf16.msra.mxu0 %v12537_v62  ;;  %v12548_v62 = vld [vmem:[#allocation158_spill] sm:$0xff] }
 0x2f7   :  { %3013 = vmatpush1.bf16.msra.mxu1 %v12538_v44  ;;  %2973 = vmatprep.subr.bf16.mxu0 %v12539_v51  ;;  %v12549_v44 = vld [vmem:[#allocation159_spill] sm:$0xff]  ;;  %v12550_v51 = vld [vmem:[#allocation160_spill] sm:$0xff] }
 0x2f8   :  { %3014 = vmatprep.subr.bf16.mxu1 %v12540_v13  ;;  %v12551_v13 = vld [vmem:[#allocation162_spill] sm:$0xff] }
 0x2fa   :  { %2974 = vmatpush1.bf16.msra.mxu0 %v12541_v30  ;;  %v12552_v30 = vld [vmem:[#allocation163_spill] sm:$0xff] }
 0x2fb   :  { %3015 = vmatpush1.bf16.msra.mxu1 %v12542_v15  ;;  %2975 = vmatprep.subr.bf16.mxu0 %v12543_v37  ;;  %v12553_v15 = vld [vmem:[#allocation165_spill] sm:$0xff]  ;;  %v12554_v37 = vld [vmem:[#allocation166_spill] sm:$0xff] }
 0x2fc   :  { %3016 = vmatprep.subr.bf16.mxu1 %v12544_v9  ;;  %v12555_v9 = vld [vmem:[#allocation175_spill] sm:$0xff] }
 0x2fe   :  { %2976 = vmatpush1.bf16.msra.mxu0 %v12545_v60  ;;  %v12556_v60 = vld [vmem:[#allocation176_spill] sm:$0xff] }
 0x2ff   :  { %3017 = vmatpush1.bf16.msra.mxu1 %v12546_v10  ;;  %2977 = vmatprep.subr.bf16.mxu0 %v12547_v46  ;;  %v12557_v10 = vld [vmem:[#allocation129_spill] sm:$0xff] }
 0x300   :  { %3018 = vmatprep.subr.bf16.mxu1 %v12548_v62  ;;  %v2903_v46 = vunpack.c.l.bf16 %v12557_v10  ;;  %v2905_v62 = vunpack.c.l.bf16 %v12558_v38 }
 0x302   :  { %2978 = vmatpush1.bf16.msra.mxu0 %v12549_v44 }
 0x303   :  { %3019 = vmatpush1.bf16.msra.mxu1 %v12550_v51  ;;  %2979 = vmatprep.subr.bf16.mxu0 %v12551_v13  ;;  %v2904_v51 = vunpack.c.h.bf16 %v12557_v10  ;;  %v2906_v13 = vunpack.c.h.bf16 %v12558_v38 }
 0x304   :  { %3020 = vmatprep.subr.bf16.mxu1 %v12552_v30 }
 0x306   :  { %2980 = vmatpush1.bf16.msra.mxu0 %v12553_v15 }
 0x307   :  { %3021 = vmatpush1.bf16.msra.mxu1 %v12554_v37  ;;  %3060 = vmatprep.subr.bf16.mxu0 %v12555_v9 }
 0x308   :  { %3101 = vmatprep.subr.bf16.mxu1 %v12556_v60 }
 0x37c   :  { %v2770_v5 = vpop.f32.mrb[32].mxu0  ;;  %v2811_v44 = vpop.f32.mrb[64].mxu1 }
 0x37d   :  { %v2907_v49 = vadd.f32 %v2903_v46, %v2770_v5  ;;  %v2909_v30 = vadd.f32 %v2905_v62, %v2811_v44  ;;  %v2772_v61 = vpop.f32.mrb[33].mxu0  ;;  %v2813_v15 = vpop.f32.mrb[65].mxu1 }
 0x37e   :  { %v2908_v32 = vadd.f32 %v2904_v51, %v2772_v61  ;;  %v2910_v37 = vadd.f32 %v2906_v13, %v2813_v15  ;;  %v2774_v34 = vpop.f32.mrb[34].mxu0  ;;  %v2815_v9 = vpop.f32.mrb[66].mxu1  ;;  %v12570_v13 = vld [vmem:[#allocation195_spill] sm:$0xff]  ;;  %v12572_v15 = vld [vmem:[#allocation197_spill] sm:$0xff] }
 0x37f   :  { %v2922_v42 = vmul.f32 0.5, %v2907_v49  ;;  %v2775_v60 = vpop.f32.mrb[35].mxu0  ;;  %v2816_v55 = vpop.f32.mrb[67].mxu1  ;;  %v12574_v9 = vld [vmem:[#allocation199_spill] sm:$0xff] }
 0x380   :  { %v2926_v7 = vmul.f32 0.5, %v2908_v32  ;;  %v2931_v59 = vmul.f32 0.5, %v2910_v37  ;;  %v12573_v37 = vld [vmem:[#allocation198_spill] sm:$0xff]  ;;  %v12575_v60 = vld [vmem:[#allocation200_spill] sm:$0xff] }
 0x381   :  { %7729 = vtanh.f32 %v2922_v42 }
 0x382   :  { %7731 = vtanh.f32 %v2926_v7 }
 0x383   :  { %7733 = vtanh.f32 %v2909_v30  ;;  %v12571_v30 = vld [vmem:[#allocation196_spill] sm:$0xff] }
 0x384   :  { %7735 = vtanh.f32 %v2931_v59  ;;  %v12561_v59 = vld [vmem:[#allocation186_spill] sm:$0xff] }
 0x38b   :  { %v7730_v26 = vpop.eup %7729 }
 0x38c   :  { %v7732_v10 = vpop.eup %7731  ;;  %v2924_v36 = vmul.f32 0.5, %v7730_v26  ;;  %v12559_v26 = vld [vmem:[#allocation184_spill] sm:$0xff] }
 0x38d   :  { %v2928_v38 = vmul.f32 0.5, %v7732_v10  ;;  %v7734_v46 = vpop.eup %7733  ;;  %v12576_v10 = vld [vmem:[#allocation167_spill] sm:$0xff] }
 0x38e   :  { %v2925_v5 = vadd.f32 0.5, %v2924_v36  ;;  %v7736_v55 = vpop.eup %7735  ;;  %v12560_v36 = vld [vmem:[#allocation185_spill] sm:$0xff] }
 0x38f   :  { %v2929_v62 = vadd.f32 0.5, %v2928_v38  ;;  %v2933_v42 = vmul.f32 0.5, %v7736_v55  ;;  %v2914_v38 = vunpack.c.l.bf16 %v12576_v10 }
 0x390   :  { %v2936_v61 = vmul.f32 %v7734_v46, %v2925_v5  ;;  %v12577_v46 = vld [vmem:[#allocation183_spill] sm:$0xff] }
 0x391   :  { %v2935_v34 = vmul.f32 %v2929_v62, %v9270_v21  ;;  %v2934_v7 = vadd.f32 0.5, %v2933_v42  ;;  %v12562_v21 = vld [vmem:[#allocation187_spill] sm:$0xff]  ;;  %v2916_v62 = vunpack.c.l.bf16 %v12577_v46 }
 0x393   :  { %v9561_v44 = vadd.f32 %v2936_v61, %v2935_v34  ;;  %v2915_v61 = vunpack.c.h.bf16 %v12576_v10 }
 0x395   :  { %7737 = vtanh.f32 %v9561_v44 }
 0x39f   :  { %v7738_v32 = vpop.eup %7737 }
 0x3a0   :  { %v2939_v49 = vmul.f32 %v7738_v32, %v2934_v7  ;;  %v2917_v7 = vunpack.c.h.bf16 %v12577_v46  ;;  %v12578_v32 = vld [vmem:[#allocation201_spill] sm:$0xff] }
 0x3a2   :  { %v9564_v51 = vpack.c.bf16 %v2939_v49, %v2939_v49  ;;  %v12579_v49 = vld [vmem:[#allocation202_spill] sm:$0xff] }
 0x3a4   :  { %2998 = vmatmul.mubr.bf16.vlgmr.msra.gmra.mrb[40].mxu0 %v9564_v51  ;;  %3039 = vmatmul.mubr.bf16.vlgmr.msra.gmra.mrb[72].mxu1 %v9564_v51 }
 0x3a5   :  { %3061 = vmatpush1.bf16.msra.mxu0 %v9273_v25  ;;  %3102 = vmatpush1.bf16.msra.mxu1 %v9275_v54  ;;  %v12563_v25 = vld [vmem:[#allocation188_spill] sm:$0xff]  ;;  %v12564_v54 = vld [vmem:[#allocation189_spill] sm:$0xff] }
 0x3a6   :  { %3062 = vmatprep.subr.bf16.mxu0 %v9279_v17  ;;  %3103 = vmatprep.subr.bf16.mxu1 %v9281_v6  ;;  %v12565_v17 = vld [vmem:[#allocation190_spill] sm:$0xff]  ;;  %v12566_v6 = vld [vmem:[#allocation191_spill] sm:$0xff] }
 0x3a7   :  { %3092 = vmatprep.mubr.bf16.mxu0 %v12275_v47  ;;  %3133 = vmatprep.mubr.bf16.mxu1 %v12275_v47 }
 0x3a9   :  { %3063 = vmatpush1.bf16.msra.mxu0 %v9287_v43  ;;  %3104 = vmatpush1.bf16.msra.mxu1 %v9289_v3  ;;  %v12567_v43 = vld [vmem:[#allocation192_spill] sm:$0xff]  ;;  %v12568_v3 = vld [vmem:[#allocation193_spill] sm:$0xff] }
 0x3aa   :  { %3064 = vmatprep.subr.bf16.mxu0 %v9293_v23  ;;  %3105 = vmatprep.subr.bf16.mxu1 %v12559_v26  ;;  %v12569_v23 = vld [vmem:[#allocation194_spill] sm:$0xff] }
 0x3ad   :  { %3065 = vmatpush1.bf16.msra.mxu0 %v12560_v36  ;;  %3106 = vmatpush1.bf16.msra.mxu1 %v12561_v59 }
 0x3ae   :  { %3066 = vmatprep.subr.bf16.mxu0 %v12562_v21  ;;  %3107 = vmatprep.subr.bf16.mxu1 %v12563_v25  ;;  %v12580_v25 = vld [vmem:[#allocation203_spill] sm:$0xff] }
 0x3b1   :  { %3067 = vmatpush1.bf16.msra.mxu0 %v12564_v54  ;;  %3108 = vmatpush1.bf16.msra.mxu1 %v12565_v17  ;;  %v12581_v54 = vld [vmem:[#allocation204_spill] sm:$0xff] }
 0x3b2   :  { %3068 = vmatprep.subr.bf16.mxu0 %v12566_v6  ;;  %3109 = vmatprep.subr.bf16.mxu1 %v12567_v43 }
 0x3b5   :  { %3069 = vmatpush1.bf16.msra.mxu0 %v12568_v3  ;;  %3110 = vmatpush1.bf16.msra.mxu1 %v12569_v23 }
 0x3b6   :  { %3070 = vmatprep.subr.bf16.mxu0 %v12570_v13  ;;  %3111 = vmatprep.subr.bf16.mxu1 %v12571_v30  ;;  %v12582_v30 = vld [vmem:[#allocation205_spill] sm:$0xff] }
 0x3b9   :  { %3071 = vmatpush1.bf16.msra.mxu0 %v12572_v15  ;;  %3112 = vmatpush1.bf16.msra.mxu1 %v12573_v37  ;;  %v12583_v15 = vld [vmem:[#allocation206_spill] sm:$0xff] }
 0x3ba   :  { %3072 = vmatprep.subr.bf16.mxu0 %v12574_v9  ;;  %3113 = vmatprep.subr.bf16.mxu1 %v12575_v60  ;;  %v12584_v37 = vld [vmem:[#allocation26_spill] sm:$0xff] }
 0x3bb   :  { %v12585_v9 = vld [vmem:[#allocation42_spill] sm:$0xff] }
 0x3bc   :  { %v2852_v5 = vpop.f32.mrb[36].mxu0 }
 0x3bd   :  { %v2918_v34 = vadd.f32 %v2914_v38, %v2852_v5  ;;  %v2893_v55 = vpop.f32.mrb[68].mxu1  ;;  %v2854_v42 = vpop.f32.mrb[37].mxu0  ;;  %3073 = vmatpush1.bf16.msra.mxu0 %v12578_v32  ;;  %3114 = vmatpush1.bf16.msra.mxu1 %v12579_v49 }
 0x3be   :  { %v2920_v26 = vadd.f32 %v2916_v62, %v2893_v55  ;;  %v2919_v36 = vadd.f32 %v2915_v61, %v2854_v42  ;;  %v2895_v59 = vpop.f32.mrb[69].mxu1  ;;  %v2856_v21 = vpop.f32.mrb[38].mxu0  ;;  %3074 = vmatprep.subr.bf16.mxu0 %v12580_v25  ;;  %3115 = vmatprep.subr.bf16.mxu1 %v12581_v54  ;;  %v12587_v25 = vld [vmem:[#allocation27_spill] sm:$0xff]  ;;  %v12588_v54 = vld [vmem:[#allocation61_spill] sm:$0xff] }
 0x3bf   :  { %v2940_v17 = vmul.f32 0.5, %v2918_v34  ;;  %v2921_v6 = vadd.f32 %v2917_v7, %v2895_v59  ;;  %v2897_v43 = vpop.f32.mrb[70].mxu1  ;;  %v2857_v3 = vpop.f32.mrb[39].mxu0 }
 0x3c0   :  { %v2944_v23 = vmul.f32 0.5, %v2919_v36  ;;  %v2898_v13 = vpop.f32.mrb[71].mxu1  ;;  %v12591_v43 = vld [vmem:[#allocation29_spill] sm:$0xff] }
 0x3c1   :  { %7739 = vtanh.f32 %v2940_v17  ;;  %3075 = vmatpush1.bf16.msra.mxu0 %v12582_v30  ;;  %3116 = vmatpush1.bf16.msra.mxu1 %v12583_v15  ;;  %v2949_v60 = vmul.f32 0.5, %v2921_v6  ;;  %v12589_v17 = vld [vmem:[#allocation28_spill] sm:$0xff]  ;;  %v12590_v6 = vld [vmem:[#allocation63_spill] sm:$0xff]  ;;  %v12592_v3 = vld [vmem:[#allocation65_spill] sm:$0xff] }
 0x3c2   :  { %7741 = vtanh.f32 %v2944_v23  ;;  %3150 = vmatprep.subr.bf16.mxu0 %v12584_v37  ;;  %3191 = vmatprep.subr.bf16.mxu1 %v12585_v9  ;;  %v12593_v23 = vld [vmem:[#allocation30_spill] sm:$0xff]  ;;  %v12594_v13 = vld [vmem:[#allocation67_spill] sm:$0xff]  ;;  %v12596_v15 = vld [vmem:[#allocation69_spill] sm:$0xff] }
 0x3c3   :  { %7743 = vtanh.f32 %v2920_v26  ;;  %v12595_v30 = vld [vmem:[#allocation31_spill] sm:$0xff] }
 0x3c4   :  { %7745 = vtanh.f32 %v2949_v60  ;;  %v12597_v60 = vld [vmem:[#allocation32_spill] sm:$0xff] }
 0x3cb   :  { %v7740_v10 = vpop.eup %7739 }
 0x3cc   :  { %v7742_v38 = vpop.eup %7741  ;;  %v2942_v5 = vmul.f32 0.5, %v7740_v10  ;;  %v12598_v10 = vld [vmem:[#allocation71_spill] sm:$0xff] }
 0x3cd   :  { %v2946_v46 = vmul.f32 0.5, %v7742_v38  ;;  %v7744_v61 = vpop.eup %7743  ;;  %v12599_v38 = vld [vmem:[#allocation33_spill] sm:$0xff] }
 0x3ce   :  { %v2943_v62 = vadd.f32 0.5, %v2942_v5  ;;  %v7746_v32 = vpop.eup %7745  ;;  %v12600_v5 = vld [vmem:[#allocation73_spill] sm:$0xff] }
 0x3cf   :  { %v2947_v34 = vadd.f32 0.5, %v2946_v46  ;;  %v2951_v49 = vmul.f32 0.5, %v7746_v32  ;;  %v12601_v46 = vld [vmem:[#allocation34_spill] sm:$0xff]  ;;  %v12607_v32 = vld [vmem:[#allocation37_spill] sm:$0xff] }
 0x3d0   :  { %v2954_v55 = vmul.f32 %v7744_v61, %v2943_v62  ;;  %v12602_v62 = vld [vmem:[#allocation75_spill] sm:$0xff] }
 0x3d1   :  { %v2953_v42 = vmul.f32 %v2947_v34, %v9375_v53  ;;  %v2952_v36 = vadd.f32 0.5, %v2951_v49  ;;  %v12586_v53 = vld [vmem:[#allocation59_spill] sm:$0xff]  ;;  %v12604_v34 = vld [vmem:[#allocation77_spill] sm:$0xff] }
 0x3d2   :  { %v12603_v61 = vld [vmem:[#allocation35_spill] sm:$0xff]  ;;  %v12608_v49 = vld [vmem:[#allocation81_spill] sm:$0xff] }
 0x3d3   :  { %v9607_v7 = vadd.f32 %v2954_v55, %v2953_v42  ;;  %v12605_v55 = vld [vmem:[#allocation36_spill] sm:$0xff]  ;;  %v12606_v42 = vld [vmem:[#allocation79_spill] sm:$0xff] }
 0x3d5   :  { %7747 = vtanh.f32 %v9607_v7 }
 0x3df   :  { %v7748_v26 = vpop.eup %7747 }
 0x3e0   :  { %v2957_v59 = vmul.f32 %v7748_v26, %v2952_v36  ;;  %v12609_v36 = vld [vmem:[#allocation38_spill] sm:$0xff]  ;;  %v12610_v26 = vld [vmem:[#allocation83_spill] sm:$0xff] }
 0x3e2   :  { %v9610_v21 = vpack.c.bf16 %v2957_v59, %v2957_v59  ;;  %v12611_v59 = vld [vmem:[#allocation39_spill] sm:$0xff] }
 0x3e4   :  { %3093 = vmatmul.mubr.bf16.vlgmr.msra.gmra.mrb[44].mxu0 %v9610_v21  ;;  %3134 = vmatmul.mubr.bf16.vlgmr.msra.gmra.mrb[76].mxu1 %v9610_v21 }
 0x3e5   :  { %3151 = vmatpush1.bf16.msra.mxu0 %v8604_v14  ;;  %3192 = vmatpush1.bf16.msra.mxu1 %v8731_v63 }
 0x3e6   :  { %3182 = vmatprep.mubr.bf16.mxu0 %v9610_v21  ;;  %3223 = vmatprep.mubr.bf16.mxu1 %v9610_v21 }
 0x3e7   :  { %3152 = vmatprep.subr.bf16.mxu0 %v8607_v16  ;;  %3193 = vmatprep.subr.bf16.mxu1 %v8737_v8 }
 0x3e9   :  { %3153 = vmatpush1.bf16.msra.mxu0 %v8612_v22  ;;  %3194 = vmatpush1.bf16.msra.mxu1 %v8745_v19 }
 0x3ea   :  { %3154 = vmatprep.subr.bf16.mxu0 %v8616_v24  ;;  %3195 = vmatprep.subr.bf16.mxu1 %v8751_v28 }
 0x3ed   :  { %3155 = vmatpush1.bf16.msra.mxu0 %v8622_v31  ;;  %3196 = vmatpush1.bf16.msra.mxu1 %v8759_v35 }
 0x3ee   :  { %3156 = vmatprep.subr.bf16.mxu0 %v8625_v33  ;;  %3197 = vmatprep.subr.bf16.mxu1 %v8765_v40 }
 0x3f1   :  { %3157 = vmatpush1.bf16.msra.mxu0 %v8630_v39  ;;  %3198 = vmatpush1.bf16.msra.mxu1 %v8772_v57 }
 0x3f2   :  { %3158 = vmatprep.subr.bf16.mxu0 %v8633_v41  ;;  %3199 = vmatprep.subr.bf16.mxu1 %v8779_v1 }
 0x3f5   :  { %3159 = vmatpush1.bf16.msra.mxu0 %v8640_v48  ;;  %3200 = vmatpush1.bf16.msra.mxu1 %v8785_v20 }
 0x3f6   :  { %3160 = vmatprep.subr.bf16.mxu0 %v8643_v50  ;;  %3201 = vmatprep.subr.bf16.mxu1 %v8791_v29 }
 0x3f9   :  { %3161 = vmatpush1.bf16.msra.mxu0 %v8648_v56  ;;  %3202 = vmatpush1.bf16.msra.mxu1 %v8798_v45 }
 0x3fa   :  { %3162 = vmatprep.subr.bf16.mxu0 %v8651_v58  ;;  %3203 = vmatprep.subr.bf16.mxu1 %v8805_v52 }
 0x3fd   :  { %3163 = vmatpush1.bf16.msra.mxu0 %v8658_v2  ;;  %3204 = vmatpush1.bf16.msra.mxu1 %v8811_v11 }
 0x3fe   :  { %3164 = vmatprep.subr.bf16.mxu0 %v8661_v4  ;;  %3205 = vmatprep.subr.bf16.mxu1 %v8817_v27 }
 0x401   :  { %3165 = vmatpush1.bf16.msra.mxu0 %v8666_v12  ;;  %3206 = vmatpush1.bf16.msra.mxu1 %v8824_v0 }
 0x402   :  { %3166 = vmatprep.subr.bf16.mxu0 %v8669_v18  ;;  %3207 = vmatprep.subr.bf16.mxu1 %v12586_v53 }
 0x405   :  { %3167 = vmatpush1.bf16.msra.mxu0 %v12587_v25  ;;  %3208 = vmatpush1.bf16.msra.mxu1 %v12588_v54 }
 0x406   :  { %3168 = vmatprep.subr.bf16.mxu0 %v12589_v17  ;;  %3209 = vmatprep.subr.bf16.mxu1 %v12590_v6 }
 0x409   :  { %3169 = vmatpush1.bf16.msra.mxu0 %v12591_v43  ;;  %3210 = vmatpush1.bf16.msra.mxu1 %v12592_v3 }
 0x40a   :  { %3170 = vmatprep.subr.bf16.mxu0 %v12593_v23  ;;  %3211 = vmatprep.subr.bf16.mxu1 %v12594_v13 }
 0x40d   :  { %3171 = vmatpush1.bf16.msra.mxu0 %v12595_v30  ;;  %3212 = vmatpush1.bf16.msra.mxu1 %v12596_v15 }
 0x40e   :  { %3172 = vmatprep.subr.bf16.mxu0 %v12597_v60  ;;  %3213 = vmatprep.subr.bf16.mxu1 %v12598_v10 }
 0x411   :  { %3173 = vmatpush1.bf16.msra.mxu0 %v12599_v38  ;;  %3214 = vmatpush1.bf16.msra.mxu1 %v12600_v5 }
 0x412   :  { %3174 = vmatprep.subr.bf16.mxu0 %v12601_v46  ;;  %3215 = vmatprep.subr.bf16.mxu1 %v12602_v62  ;;  %v12612_v46 = vld [vmem:[#allocation85_spill] sm:$0xff]  ;;  %v12613_v62 = vld [vmem:[#allocation40_spill] sm:$0xff] }
 0x415   :  { %3175 = vmatpush1.bf16.msra.mxu0 %v12603_v61  ;;  %3216 = vmatpush1.bf16.msra.mxu1 %v12604_v34  ;;  %v12614_v61 = vld [vmem:[#allocation87_spill] sm:$0xff]  ;;  %v12615_v34 = vld [vmem:[#allocation41_spill] sm:$0xff] }
 0x416   :  { %3176 = vmatprep.subr.bf16.mxu0 %v12605_v55  ;;  %3217 = vmatprep.subr.bf16.mxu1 %v12606_v42  ;;  %v12616_v55 = vld [vmem:[#allocation89_spill] sm:$0xff]  ;;  %v12617_v42 = vld [vmem:[#allocation43_spill] sm:$0xff] }
 0x419   :  { %3177 = vmatpush1.bf16.msra.mxu0 %v12607_v32  ;;  %3218 = vmatpush1.bf16.msra.mxu1 %v12608_v49  ;;  %v12618_v32 = vld [vmem:[#allocation91_spill] sm:$0xff] }
 0x41a   :  { %3178 = vmatprep.subr.bf16.mxu0 %v12609_v36  ;;  %3219 = vmatprep.subr.bf16.mxu1 %v12610_v26  ;;  %v12619_v26 = vld [vmem:[#allocation44_spill] sm:$0xff]  ;;  %v12629_v36 = vld [vmem:[#allocation49_spill] sm:$0xff] }
 0x41d   :  { %3179 = vmatpush1.bf16.msra.mxu0 %v12611_v59  ;;  %3220 = vmatpush1.bf16.msra.mxu1 %v12612_v46  ;;  %v12620_v46 = vld [vmem:[#allocation92_spill] sm:$0xff] }
 0x41e   :  { %3180 = vmatprep.subr.bf16.mxu0 %v12613_v62  ;;  %3221 = vmatprep.subr.bf16.mxu1 %v12614_v61  ;;  %v12621_v61 = vld [vmem:[#allocation45_spill] sm:$0xff]  ;;  %v12626_v62 = vld [vmem:[#allocation95_spill] sm:$0xff]  ;;  %v12627_v59 = vld [vmem:[#allocation48_spill] sm:$0xff] }
 0x421   :  { %3181 = vmatpush1.bf16.msra.mxu0 %v12615_v34  ;;  %3222 = vmatpush1.bf16.msra.mxu1 %v12616_v55  ;;  %v12622_v34 = vld [vmem:[#allocation93_spill] sm:$0xff]  ;;  %v12623_v55 = vld [vmem:[#allocation46_spill] sm:$0xff] }
 0x422   :  { %3232 = vmatprep.subr.bf16.mxu0 %v12617_v42  ;;  %3273 = vmatprep.subr.bf16.mxu1 %v12618_v32  ;;  %v12624_v42 = vld [vmem:[#allocation94_spill] sm:$0xff]  ;;  %v12625_v32 = vld [vmem:[#allocation47_spill] sm:$0xff] }
 0x424   :  { %3183 = vmatmul.mubr.bf16.vlgmr.msra.gmra.mrb[48].mxu0 %v9564_v51  ;;  %3224 = vmatmul.mubr.bf16.vlgmr.msra.gmra.mrb[80].mxu1 %v9564_v51 }
 0x425   :  { %3233 = vmatpush1.bf16.msra.mxu0 %v12619_v26  ;;  %3264 = vmatprep.mubr.bf16.mxu0 %v9610_v21  ;;  %v12628_v26 = vld [vmem:[#allocation96_spill] sm:$0xff] }
 0x426   :  { %3274 = vmatpush1.bf16.msra.mxu1 %v12620_v46  ;;  %3305 = vmatprep.mubr.bf16.mxu1 %v9610_v21  ;;  %v12630_v46 = vld [vmem:[#allocation97_spill] sm:$0xff]  ;;  %v12631_v21 = vld [vmem:[#allocation50_spill] sm:$0xff] }
 0x427   :  { %3234 = vmatprep.subr.bf16.mxu0 %v12621_v61  ;;  %3275 = vmatprep.subr.bf16.mxu1 %v12622_v34  ;;  %v12632_v61 = vld [vmem:[#allocation98_spill] sm:$0xff]  ;;  %v12633_v34 = vld [vmem:[#allocation51_spill] sm:$0xff] }
 0x429   :  { %3235 = vmatpush1.bf16.msra.mxu0 %v12623_v55  ;;  %v12634_v55 = vld [vmem:[#allocation99_spill] sm:$0xff] }
 0x42a   :  { %3276 = vmatpush1.bf16.msra.mxu1 %v12624_v42  ;;  %3236 = vmatprep.subr.bf16.mxu0 %v12625_v32  ;;  %v12635_v42 = vld [vmem:[#allocation52_spill] sm:$0xff] }
 0x42b   :  { %3277 = vmatprep.subr.bf16.mxu1 %v12626_v62  ;;  %v12636_v32 = vld [vmem:[#allocation100_spill] sm:$0xff]  ;;  %v12637_v62 = vld [vmem:[#allocation53_spill] sm:$0xff] }
 0x42d   :  { %3237 = vmatpush1.bf16.msra.mxu0 %v12627_v59  ;;  %v12638_v59 = vld [vmem:[#allocation101_spill] sm:$0xff] }
 0x42e   :  { %3278 = vmatpush1.bf16.msra.mxu1 %v12628_v26  ;;  %3238 = vmatprep.subr.bf16.mxu0 %v12629_v36  ;;  %v12639_v26 = vld [vmem:[#allocation54_spill] sm:$0xff] }
 0x42f   :  { %3279 = vmatprep.subr.bf16.mxu1 %v12630_v46  ;;  %v12640_v36 = vld [vmem:[#allocation102_spill] sm:$0xff]  ;;  %v12641_v46 = vld [vmem:[#allocation55_spill] sm:$0xff] }
 0x431   :  { %3239 = vmatpush1.bf16.msra.mxu0 %v12631_v21  ;;  %v12642_v21 = vld [vmem:[#allocation103_spill] sm:$0xff] }
 0x432   :  { %3280 = vmatpush1.bf16.msra.mxu1 %v12632_v61  ;;  %3240 = vmatprep.subr.bf16.mxu0 %v12633_v34  ;;  %v12643_v61 = vld [vmem:[#allocation56_spill] sm:$0xff] }
 0x433   :  { %3281 = vmatprep.subr.bf16.mxu1 %v12634_v55  ;;  %v12644_v34 = vld [vmem:[#allocation104_spill] sm:$0xff]  ;;  %v12645_v55 = vld [vmem:[#allocation57_spill] sm:$0xff] }
 0x435   :  { %3241 = vmatpush1.bf16.msra.mxu0 %v12635_v42  ;;  %v12646_v42 = vld [vmem:[#allocation105_spill] sm:$0xff] }
 0x436   :  { %3282 = vmatpush1.bf16.msra.mxu1 %v12636_v32  ;;  %3242 = vmatprep.subr.bf16.mxu0 %v12637_v62  ;;  %v12647_v32 = vld [vmem:[#allocation58_spill] sm:$0xff] }
 0x437   :  { %3283 = vmatprep.subr.bf16.mxu1 %v12638_v59  ;;  %v12648_v62 = vld [vmem:[#allocation106_spill] sm:$0xff]  ;;  %v12649_v59 = vld [vmem:[#allocation60_spill] sm:$0xff] }
 0x439   :  { %3243 = vmatpush1.bf16.msra.mxu0 %v12639_v26  ;;  %v12650_v26 = vld [vmem:[#allocation107_spill] sm:$0xff] }
 0x43a   :  { %3284 = vmatpush1.bf16.msra.mxu1 %v12640_v36  ;;  %3244 = vmatprep.subr.bf16.mxu0 %v12641_v46  ;;  %v12651_v36 = vld [vmem:[#allocation62_spill] sm:$0xff]  ;;  %v12652_v46 = vld [vmem:[#allocation108_spill] sm:$0xff] }
 0x43b   :  { %3285 = vmatprep.subr.bf16.mxu1 %v12642_v21  ;;  %v12653_v21 = vld [vmem:[#allocation64_spill] sm:$0xff] }
 0x43d   :  { %3245 = vmatpush1.bf16.msra.mxu0 %v12643_v61  ;;  %v12654_v61 = vld [vmem:[#allocation109_spill] sm:$0xff] }
 0x43e   :  { %3286 = vmatpush1.bf16.msra.mxu1 %v12644_v34  ;;  %3246 = vmatprep.subr.bf16.mxu0 %v12645_v55  ;;  %v12655_v34 = vld [vmem:[#allocation66_spill] sm:$0xff] }
 0x43f   :  { %3287 = vmatprep.subr.bf16.mxu1 %v12646_v42  ;;  %v12656_v55 = vld [vmem:[#allocation110_spill] sm:$0xff]  ;;  %v12657_v42 = vld [vmem:[#allocation68_spill] sm:$0xff] }
 0x441   :  { %3247 = vmatpush1.bf16.msra.mxu0 %v12647_v32  ;;  %v12658_v32 = vld [vmem:[#allocation111_spill] sm:$0xff] }
 0x442   :  { %3288 = vmatpush1.bf16.msra.mxu1 %v12648_v62  ;;  %3248 = vmatprep.subr.bf16.mxu0 %v12649_v59  ;;  %v12659_v62 = vld [vmem:[#allocation70_spill] sm:$0xff]  ;;  %v12660_v59 = vld [vmem:[#allocation112_spill] sm:$0xff] }
 0x443   :  { %3289 = vmatprep.subr.bf16.mxu1 %v12650_v26  ;;  %v12661_v26 = vld [vmem:[#allocation72_spill] sm:$0xff] }
 0x445   :  { %3249 = vmatpush1.bf16.msra.mxu0 %v12651_v36  ;;  %v12662_v36 = vld [vmem:[#allocation113_spill] sm:$0xff] }
 0x446   :  { %3290 = vmatpush1.bf16.msra.mxu1 %v12652_v46  ;;  %3250 = vmatprep.subr.bf16.mxu0 %v12653_v21  ;;  %v12663_v46 = vld [vmem:[#allocation74_spill] sm:$0xff] }
 0x447   :  { %3291 = vmatprep.subr.bf16.mxu1 %v12654_v61  ;;  %v12664_v21 = vld [vmem:[#allocation114_spill] sm:$0xff]  ;;  %v12665_v61 = vld [vmem:[#allocation76_spill] sm:$0xff] }
 0x449   :  { %3251 = vmatpush1.bf16.msra.mxu0 %v12655_v34  ;;  %v12666_v34 = vld [vmem:[#allocation115_spill] sm:$0xff] }
 0x44a   :  { %3292 = vmatpush1.bf16.msra.mxu1 %v12656_v55  ;;  %3252 = vmatprep.subr.bf16.mxu0 %v12657_v42  ;;  %v12667_v55 = vld [vmem:[#allocation78_spill] sm:$0xff]  ;;  %v12668_v42 = vld [vmem:[#allocation116_spill] sm:$0xff] }
 0x44b   :  { %3293 = vmatprep.subr.bf16.mxu1 %v12658_v32  ;;  %v12669_v32 = vld [vmem:[#allocation80_spill] sm:$0xff] }
 0x44d   :  { %3253 = vmatpush1.bf16.msra.mxu0 %v12659_v62  ;;  %v12670_v62 = vld [vmem:[#allocation117_spill] sm:$0xff] }
 0x44e   :  { %3294 = vmatpush1.bf16.msra.mxu1 %v12660_v59  ;;  %3254 = vmatprep.subr.bf16.mxu0 %v12661_v26  ;;  %v12671_v59 = vld [vmem:[#allocation82_spill] sm:$0xff] }
 0x44f   :  { %3295 = vmatprep.subr.bf16.mxu1 %v12662_v36  ;;  %v12672_v26 = vld [vmem:[#allocation118_spill] sm:$0xff]  ;;  %v12673_v36 = vld [vmem:[#allocation84_spill] sm:$0xff] }
 0x451   :  { %3255 = vmatpush1.bf16.msra.mxu0 %v12663_v46  ;;  %v12674_v46 = vld [vmem:[#allocation119_spill] sm:$0xff] }
 0x452   :  { %3296 = vmatpush1.bf16.msra.mxu1 %v12664_v21  ;;  %3256 = vmatprep.subr.bf16.mxu0 %v12665_v61  ;;  %v12675_v21 = vld [vmem:[#allocation86_spill] sm:$0xff]  ;;  %v12676_v61 = vld [vmem:[#allocation120_spill] sm:$0xff] }
 0x453   :  { %3297 = vmatprep.subr.bf16.mxu1 %v12666_v34  ;;  %v12677_v34 = vld [vmem:[#allocation88_spill] sm:$0xff] }
 0x455   :  { %3257 = vmatpush1.bf16.msra.mxu0 %v12667_v55  ;;  %v12678_v55 = vld [vmem:[#allocation121_spill] sm:$0xff] }
 0x456   :  { %3298 = vmatpush1.bf16.msra.mxu1 %v12668_v42  ;;  %3258 = vmatprep.subr.bf16.mxu0 %v12669_v32  ;;  %v12679_v42 = vld [vmem:[#allocation90_spill] sm:$0xff] }
 0x457   :  { %3299 = vmatprep.subr.bf16.mxu1 %v12670_v62  ;;  %v12680_v32 = vld [vmem:[#allocation122_spill] sm:$0xff]  ;;  %v12681_v62 = vld [vmem:[#allocation207_spill] sm:$0xff] }
 0x459   :  { %3259 = vmatpush1.bf16.msra.mxu0 %v12671_v59  ;;  %v12682_v59 = vld [vmem:[#allocation208_spill] sm:$0xff] }
 0x45a   :  { %3300 = vmatpush1.bf16.msra.mxu1 %v12672_v26  ;;  %3260 = vmatprep.subr.bf16.mxu0 %v12673_v36 }
 0x45b   :  { %3301 = vmatprep.subr.bf16.mxu1 %v12674_v46  ;;  %v9750_v46 = vld [vmem:[#allocation13] ss:$16 sps:$4 sm:$0xff]  }
 0x45c   :  { %12683 = vst [vmem:[#allocation124_spill] sm:$0xff] %v9750_v46 }
 0x45d   :  { %3261 = vmatpush1.bf16.msra.mxu0 %v12675_v21 }
 0x45e   :  { %3302 = vmatpush1.bf16.msra.mxu1 %v12676_v61  ;;  %3262 = vmatprep.subr.bf16.mxu0 %v12677_v34  ;;  %v9753_v61 = vld [vmem:[#allocation13 + $0x8] ss:$16 sps:$4 sm:$0xff]  }
 0x45f   :  { %3303 = vmatprep.subr.bf16.mxu1 %v12678_v55  ;;  %12684 = vst [vmem:[#allocation125_spill] sm:$0xff] %v9753_v61  ;;  %v9756_v55 = vld [vmem:[#allocation13 + $0x24] ss:$16 sps:$4 sm:$0xff]  }
 0x460   :  { %12685 = vst [vmem:[#allocation127_spill] sm:$0xff] %v9756_v55 }
 0x461   :  { %3263 = vmatpush1.bf16.msra.mxu0 %v12679_v42  ;;  %v12716_v42 = vld [vmem:[#allocation169_spill] sm:$0xff] }
 0x462   :  { %3304 = vmatpush1.bf16.msra.mxu1 %v12680_v32  ;;  %3379 = vmatprep.subr.bf16.mxu0 %v12681_v62  ;;  %v9759_v32 = vld [vmem:[#allocation13 + $0x2c] ss:$16 sps:$4 sm:$0xff]   ;;  %v9767_v62 = vld [vmem:[#allocation13 + $0x28] ss:$16 sps:$4 sm:$0xff]   ;;  %v3320_v36 = vunpack.c.h.bf16 %v12716_v42 }
 0x463   :  { %3420 = vmatprep.subr.bf16.mxu1 %v12682_v59  ;;  %12686 = vst [vmem:[#allocation128_spill] sm:$0xff] %v9759_v32  ;;  %12688 = vst [vmem:[#allocation131_spill] sm:$0xff] %v9767_v62  ;;  %v9770_v59 = vld [vmem:[#allocation13 + $0x44] ss:$16 sps:$4 sm:$0xff]  }
 0x464   :  { %3265 = vmatmul.mubr.bf16.vlgmr.msra.gmra.mrb[52].mxu0 %v9564_v51  ;;  %12689 = vst [vmem:[#allocation133_spill] sm:$0xff] %v9770_v59 }
 0x465   :  { %3306 = vmatmul.mubr.bf16.vlgmr.msra.gmra.mrb[84].mxu1 %v9564_v51  ;;  %3380 = vmatpush1.bf16.msra.mxu0 %v9750_v46  ;;  %v9764_v51 = vld [vmem:[#allocation13 + $0x20] ss:$16 sps:$4 sm:$0xff]  }
 0x466   :  { %3421 = vmatpush1.bf16.msra.mxu1 %v9753_v61  ;;  %3381 = vmatprep.subr.bf16.mxu0 %v9756_v55  ;;  %12687 = vst [vmem:[#allocation130_spill] sm:$0xff] %v9764_v51  ;;  %v9773_v55 = vld [vmem:[#allocation13 + $0x4c] ss:$16 sps:$4 sm:$0xff]   ;;  %v9779_v61 = vld [vmem:[#allocation13 + $0x48] ss:$16 sps:$4 sm:$0xff]  }
 0x467   :  { %3422 = vmatprep.subr.bf16.mxu1 %v9759_v32  ;;  %3411 = vmatprep.mubr.bf16.mxu0 %v12275_v47  ;;  %12690 = vst [vmem:[#allocation134_spill] sm:$0xff] %v9773_v55  ;;  %v9776_v32 = vld [vmem:[#allocation13 + $0x40] ss:$16 sps:$4 sm:$0xff]   ;;  %12692 = vst [vmem:[#allocation136_spill] sm:$0xff] %v9779_v61 }
 0x468   :  { %3452 = vmatprep.mubr.bf16.mxu1 %v12275_v47  ;;  %12691 = vst [vmem:[#allocation135_spill] sm:$0xff] %v9776_v32 }
 0x469   :  { %3382 = vmatpush1.bf16.msra.mxu0 %v9764_v51  ;;  %v9782_v51 = vld [vmem:[#allocation13 + $0x64] ss:$16 sps:$4 sm:$0xff]  }
 0x46a   :  { %3423 = vmatpush1.bf16.msra.mxu1 %v9767_v62  ;;  %3383 = vmatprep.subr.bf16.mxu0 %v9770_v59  ;;  %12693 = vst [vmem:[#allocation138_spill] sm:$0xff] %v9782_v51  ;;  %v9785_v62 = vld [vmem:[#allocation13 + $0x6c] ss:$16 sps:$4 sm:$0xff]   ;;  %v9788_v59 = vld [vmem:[#allocation13 + $0x60] ss:$16 sps:$4 sm:$0xff]  }
 0x46b   :  { %3424 = vmatprep.subr.bf16.mxu1 %v9773_v55  ;;  %12694 = vst [vmem:[#allocation139_spill] sm:$0xff] %v9785_v62  ;;  %12695 = vst [vmem:[#allocation141_spill] sm:$0xff] %v9788_v59  ;;  %v9791_v55 = vld [vmem:[#allocation13 + $0x68] ss:$16 sps:$4 sm:$0xff]  }
 0x46c   :  { %12696 = vst [vmem:[#allocation142_spill] sm:$0xff] %v9791_v55 }
 0x46d   :  { %3384 = vmatpush1.bf16.msra.mxu0 %v9776_v32  ;;  %v9794_v32 = vld [vmem:[#allocation13 + $0x84] ss:$16 sps:$4 sm:$0xff]  }
 0x46e   :  { %3425 = vmatpush1.bf16.msra.mxu1 %v9779_v61  ;;  %3385 = vmatprep.subr.bf16.mxu0 %v9782_v51  ;;  %12697 = vst [vmem:[#allocation145_spill] sm:$0xff] %v9794_v32  ;;  %v9797_v61 = vld [vmem:[#allocation13 + $0x8c] ss:$16 sps:$4 sm:$0xff]   ;;  %v9800_v51 = vld [vmem:[#allocation13 + $0x80] ss:$16 sps:$4 sm:$0xff]  }
 0x46f   :  { %3426 = vmatprep.subr.bf16.mxu1 %v9785_v62  ;;  %12698 = vst [vmem:[#allocation146_spill] sm:$0xff] %v9797_v61  ;;  %12699 = vst [vmem:[#allocation147_spill] sm:$0xff] %v9800_v51  ;;  %v9803_v62 = vld [vmem:[#allocation13 + $0x88] ss:$16 sps:$4 sm:$0xff]  }
 0x470   :  { %12700 = vst [vmem:[#allocation148_spill] sm:$0xff] %v9803_v62 }
 0x471   :  { %3386 = vmatpush1.bf16.msra.mxu0 %v9788_v59  ;;  %v9806_v59 = vld [vmem:[#allocation13 + $0xa4] ss:$16 sps:$4 sm:$0xff]  }
 0x472   :  { %3427 = vmatpush1.bf16.msra.mxu1 %v9791_v55  ;;  %3387 = vmatprep.subr.bf16.mxu0 %v9794_v32  ;;  %12701 = vst [vmem:[#allocation150_spill] sm:$0xff] %v9806_v59  ;;  %v9809_v55 = vld [vmem:[#allocation13 + $0xac] ss:$16 sps:$4 sm:$0xff]   ;;  %v9812_v32 = vld [vmem:[#allocation13 + $0xa0] ss:$16 sps:$4 sm:$0xff]  }
 0x473   :  { %3428 = vmatprep.subr.bf16.mxu1 %v9797_v61  ;;  %12702 = vst [vmem:[#allocation151_spill] sm:$0xff] %v9809_v55  ;;  %12703 = vst [vmem:[#allocation153_spill] sm:$0xff] %v9812_v32  ;;  %v9815_v61 = vld [vmem:[#allocation13 + $0xa8] ss:$16 sps:$4 sm:$0xff]  }
 0x474   :  { %12704 = vst [vmem:[#allocation154_spill] sm:$0xff] %v9815_v61 }
 0x475   :  { %3388 = vmatpush1.bf16.msra.mxu0 %v9800_v51  ;;  %v9818_v51 = vld [vmem:[#allocation13 + $0xc4] ss:$16 sps:$4 sm:$0xff]  }
 0x476   :  { %3429 = vmatpush1.bf16.msra.mxu1 %v9803_v62  ;;  %3389 = vmatprep.subr.bf16.mxu0 %v9806_v59  ;;  %12705 = vst [vmem:[#allocation157_spill] sm:$0xff] %v9818_v51  ;;  %v9821_v62 = vld [vmem:[#allocation13 + $0xcc] ss:$16 sps:$4 sm:$0xff]   ;;  %v9824_v59 = vld [vmem:[#allocation13 + $0xc0] ss:$16 sps:$4 sm:$0xff]  }
 0x477   :  { %3430 = vmatprep.subr.bf16.mxu1 %v9809_v55  ;;  %12706 = vst [vmem:[#allocation158_spill] sm:$0xff] %v9821_v62  ;;  %12707 = vst [vmem:[#allocation159_spill] sm:$0xff] %v9824_v59  ;;  %v9827_v55 = vld [vmem:[#allocation13 + $0xc8] ss:$16 sps:$4 sm:$0xff]  }
 0x478   :  { %12708 = vst [vmem:[#allocation160_spill] sm:$0xff] %v9827_v55 }
 0x479   :  { %3390 = vmatpush1.bf16.msra.mxu0 %v9812_v32  ;;  %v9830_v32 = vld [vmem:[#allocation13 + $0xe4] ss:$16 sps:$4 sm:$0xff]  }
 0x47a   :  { %3431 = vmatpush1.bf16.msra.mxu1 %v9815_v61  ;;  %3391 = vmatprep.subr.bf16.mxu0 %v9818_v51  ;;  %12709 = vst [vmem:[#allocation162_spill] sm:$0xff] %v9830_v32  ;;  %v9833_v61 = vld [vmem:[#allocation13 + $0xec] ss:$16 sps:$4 sm:$0xff]   ;;  %v9836_v51 = vld [vmem:[#allocation13 + $0xe0] ss:$16 sps:$4 sm:$0xff]  }
 0x47b   :  { %3432 = vmatprep.subr.bf16.mxu1 %v9821_v62  ;;  %12710 = vst [vmem:[#allocation163_spill] sm:$0xff] %v9833_v61  ;;  %12711 = vst [vmem:[#allocation165_spill] sm:$0xff] %v9836_v51  ;;  %v9839_v62 = vld [vmem:[#allocation13 + $0xe8] ss:$16 sps:$4 sm:$0xff]  }
 0x47c   :  { %12712 = vst [vmem:[#allocation166_spill] sm:$0xff] %v9839_v62 }
 0x47d   :  { %3392 = vmatpush1.bf16.msra.mxu0 %v9824_v59  ;;  %v9842_v59 = vld [vmem:[#allocation14 + $0x4] ss:$16 sps:$4 sm:$0xff]  }
 0x47e   :  { %3433 = vmatpush1.bf16.msra.mxu1 %v9827_v55  ;;  %3393 = vmatprep.subr.bf16.mxu0 %v9830_v32  ;;  %12713 = vst [vmem:[#allocation175_spill] sm:$0xff] %v9842_v59  ;;  %v9845_v55 = vld [vmem:[#allocation14 + $0xc] ss:$16 sps:$4 sm:$0xff]  }
 0x47f   :  { %3434 = vmatprep.subr.bf16.mxu1 %v9833_v61  ;;  %12714 = vst [vmem:[#allocation176_spill] sm:$0xff] %v9845_v55  ;;  %v12715_v32 = vld [vmem:[#allocation137_spill] sm:$0xff]  ;;  %v3319_v61 = vunpack.c.l.bf16 %v12716_v42 }
 0x480   :  { %v3317_v46 = vunpack.c.l.bf16 %v12715_v32 }
 0x481   :  { %3394 = vmatpush1.bf16.msra.mxu0 %v9836_v51  ;;  %v3318_v51 = vunpack.c.h.bf16 %v12715_v32 }
 0x482   :  { %3435 = vmatpush1.bf16.msra.mxu1 %v9839_v62  ;;  %3474 = vmatprep.subr.bf16.mxu0 %v9842_v59 }
 0x483   :  { %3515 = vmatprep.subr.bf16.mxu1 %v9845_v55 }
 0x4f7   :  { %v3184_v34 = vpop.f32.mrb[48].mxu0  ;;  %v3225_v21 = vpop.f32.mrb[80].mxu1 }
 0x4f8   :  { %v3321_v26 = vadd.f32 %v3317_v46, %v3184_v34  ;;  %v3323_v62 = vadd.f32 %v3319_v61, %v3225_v21  ;;  %v3186_v49 = vpop.f32.mrb[49].mxu0  ;;  %v3227_v5 = vpop.f32.mrb[81].mxu1  ;;  %v9880_v21 = vld [vmem:[#allocation14 + $0x44] ss:$16 sps:$4 sm:$0xff]  }
 0x4f9   :  { %v3322_v38 = vadd.f32 %v3318_v51, %v3186_v49  ;;  %v3324_v59 = vadd.f32 %v3320_v36, %v3227_v5  ;;  %v3188_v10 = vpop.f32.mrb[50].mxu0  ;;  %v3229_v60 = vpop.f32.mrb[82].mxu1  ;;  %v9874_v36 = vld [vmem:[#allocation14 + $0x20] ss:$16 sps:$4 sm:$0xff]   ;;  %12720 = vst [vmem:[#allocation185_spill] sm:$0xff] %v9880_v21 }
 0x4fa   :  { %v3336_v15 = vmul.f32 0.5, %v3321_v26  ;;  %v3189_v55 = vpop.f32.mrb[51].mxu0  ;;  %v3230_v30 = vpop.f32.mrb[83].mxu1  ;;  %12718 = vst [vmem:[#allocation168_spill] sm:$0xff] %v9874_v36  ;;  %v9877_v26 = vld [vmem:[#allocation14 + $0x28] ss:$16 sps:$4 sm:$0xff]  }
 0x4fb   :  { %v3340_v13 = vmul.f32 0.5, %v3322_v38  ;;  %v3345_v23 = vmul.f32 0.5, %v3324_v59  ;;  %12719 = vst [vmem:[#allocation184_spill] sm:$0xff] %v9877_v26  ;;  %v9883_v51 = vld [vmem:[#allocation14 + $0x4c] ss:$16 sps:$4 sm:$0xff]  }
 0x4fc   :  { %7749 = vtanh.f32 %v3336_v15  ;;  %12721 = vst [vmem:[#allocation186_spill] sm:$0xff] %v9883_v51  ;;  %v9889_v59 = vld [vmem:[#allocation14 + $0x48] ss:$16 sps:$4 sm:$0xff]  }
 0x4fd   :  { %7751 = vtanh.f32 %v3340_v13  ;;  %12723 = vst [vmem:[#allocation188_spill] sm:$0xff] %v9889_v59 }
 0x4fe   :  { %7753 = vtanh.f32 %v3323_v62  ;;  %v9886_v62 = vld [vmem:[#allocation14 + $0x40] ss:$16 sps:$4 sm:$0xff]  }
 0x4ff   :  { %7755 = vtanh.f32 %v3345_v23  ;;  %v9869_v23 = vld [vmem:[#allocation14 + $0x2c] ss:$16 sps:$4 sm:$0xff]   ;;  %12722 = vst [vmem:[#allocation187_spill] sm:$0xff] %v9886_v62 }
 0x500   :  { %12717 = vst [vmem:[#allocation129_spill] sm:$0xff] %v9869_v23 }
 0x506   :  { %v7750_v3 = vpop.eup %7749 }
 0x507   :  { %v7752_v32 = vpop.eup %7751  ;;  %v3338_v43 = vmul.f32 0.5, %v7750_v3  ;;  %v9866_v3 = vld [vmem:[#allocation14 + $0x24] ss:$16 sps:$4 sm:$0xff]  }
 0x508   :  { %v3342_v42 = vmul.f32 0.5, %v7752_v32  ;;  %v7754_v61 = vpop.eup %7753  ;;  %v9892_v32 = vld [vmem:[#allocation14 + $0x64] ss:$16 sps:$4 sm:$0xff]  }
 0x509   :  { %v3339_v46 = vadd.f32 0.5, %v3338_v43  ;;  %v7756_v30 = vpop.eup %7755  ;;  %v9860_v43 = vld [vmem:[#allocation14] ss:$16 sps:$4 sm:$0xff]   ;;  %12724 = vst [vmem:[#allocation189_spill] sm:$0xff] %v9892_v32 }
 0x50a   :  { %v3343_v34 = vadd.f32 0.5, %v3342_v42  ;;  %v3347_v15 = vmul.f32 0.5, %v7756_v30  ;;  %v9895_v42 = vld [vmem:[#allocation14 + $0x6c] ss:$16 sps:$4 sm:$0xff]   ;;  %v9913_v30 = vld [vmem:[#allocation14 + $0x88] ss:$16 sps:$4 sm:$0xff]  }
 0x50b   :  { %v3350_v49 = vmul.f32 %v7754_v61, %v3339_v46  ;;  %12725 = vst [vmem:[#allocation190_spill] sm:$0xff] %v9895_v42  ;;  %v9898_v46 = vld [vmem:[#allocation14 + $0x60] ss:$16 sps:$4 sm:$0xff]   ;;  %v9901_v61 = vld [vmem:[#allocation14 + $0x68] ss:$16 sps:$4 sm:$0xff]   ;;  %12731 = vst [vmem:[#allocation196_spill] sm:$0xff] %v9913_v30 }
 0x50c   :  { %v3349_v10 = vmul.f32 %v3343_v34, %v9561_v44  ;;  %v3348_v13 = vadd.f32 0.5, %v3347_v15  ;;  %v9863_v44 = vld [vmem:[#allocation14 + $0x8] ss:$16 sps:$4 sm:$0xff]   ;;  %12726 = vst [vmem:[#allocation191_spill] sm:$0xff] %v9898_v46  ;;  %12727 = vst [vmem:[#allocation192_spill] sm:$0xff] %v9901_v61 }
 0x50d   :  { %v9904_v34 = vld [vmem:[#allocation14 + $0x84] ss:$16 sps:$4 sm:$0xff]  }
 0x50e   :  { %v9853_v60 = vadd.f32 %v3350_v49, %v3349_v10  ;;  %12728 = vst [vmem:[#allocation193_spill] sm:$0xff] %v9904_v34  ;;  %v9907_v49 = vld [vmem:[#allocation14 + $0x8c] ss:$16 sps:$4 sm:$0xff]   ;;  %v9910_v10 = vld [vmem:[#allocation14 + $0x80] ss:$16 sps:$4 sm:$0xff]  }
 0x50f   :  { %12729 = vst [vmem:[#allocation194_spill] sm:$0xff] %v9907_v49  ;;  %12730 = vst [vmem:[#allocation195_spill] sm:$0xff] %v9910_v10  ;;  %v9916_v15 = vld [vmem:[#allocation14 + $0xa4] ss:$16 sps:$4 sm:$0xff]  }
 0x510   :  { %7757 = vtanh.f32 %v9853_v60  ;;  %12732 = vst [vmem:[#allocation197_spill] sm:$0xff] %v9916_v15 }
 0x51a   :  { %v7758_v38 = vpop.eup %7757 }
 0x51b   :  { %v3353_v5 = vmul.f32 %v7758_v38, %v3348_v13  ;;  %v9919_v13 = vld [vmem:[#allocation14 + $0xac] ss:$16 sps:$4 sm:$0xff]   ;;  %v9922_v38 = vld [vmem:[#allocation14 + $0xa0] ss:$16 sps:$4 sm:$0xff]  }
 0x51c   :  { %12733 = vst [vmem:[#allocation198_spill] sm:$0xff] %v9919_v13  ;;  %12734 = vst [vmem:[#allocation199_spill] sm:$0xff] %v9922_v38 }
 0x51d   :  { %v9856_v55 = vpack.c.bf16 %v3353_v5, %v3353_v5  ;;  %v9925_v5 = vld [vmem:[#allocation14 + $0xa8] ss:$16 sps:$4 sm:$0xff]  }
 0x51e   :  { %12735 = vst [vmem:[#allocation200_spill] sm:$0xff] %v9925_v5 }
 0x51f   :  { %3412 = vmatmul.mubr.bf16.vlgmr.msra.gmra.mrb[56].mxu0 %v9856_v55  ;;  %3453 = vmatmul.mubr.bf16.vlgmr.msra.gmra.mrb[88].mxu1 %v9856_v55 }
 0x520   :  { %3475 = vmatpush1.bf16.msra.mxu0 %v9860_v43  ;;  %3516 = vmatpush1.bf16.msra.mxu1 %v9863_v44 }
 0x521   :  { %3476 = vmatprep.subr.bf16.mxu0 %v9866_v3  ;;  %3517 = vmatprep.subr.bf16.mxu1 %v9869_v23 }
 0x522   :  { %3506 = vmatprep.mubr.bf16.mxu0 %v12275_v47  ;;  %3547 = vmatprep.mubr.bf16.mxu1 %v12275_v47 }
 0x524   :  { %3477 = vmatpush1.bf16.msra.mxu0 %v9874_v36  ;;  %3518 = vmatpush1.bf16.msra.mxu1 %v9877_v26  ;;  %v9944_v26 = vld [vmem:[#allocation14 + $0xe4] ss:$16 sps:$4 sm:$0xff]  }
 0x525   :  { %3478 = vmatprep.subr.bf16.mxu0 %v9880_v21  ;;  %3519 = vmatprep.subr.bf16.mxu1 %v9883_v51 }
 0x528   :  { %3479 = vmatpush1.bf16.msra.mxu0 %v9886_v62  ;;  %3520 = vmatpush1.bf16.msra.mxu1 %v9889_v59  ;;  %v9938_v59 = vld [vmem:[#allocation14 + $0xc0] ss:$16 sps:$4 sm:$0xff]  }
 0x529   :  { %3480 = vmatprep.subr.bf16.mxu0 %v9892_v32  ;;  %3521 = vmatprep.subr.bf16.mxu1 %v9895_v42  ;;  %12740 = vst [vmem:[#allocation201_spill] sm:$0xff] %v9938_v59 }
 0x52c   :  { %3481 = vmatpush1.bf16.msra.mxu0 %v9898_v46  ;;  %3522 = vmatpush1.bf16.msra.mxu1 %v9901_v61 }
 0x52d   :  { %3482 = vmatprep.subr.bf16.mxu0 %v9904_v34  ;;  %3523 = vmatprep.subr.bf16.mxu1 %v9907_v49 }
 0x530   :  { %3483 = vmatpush1.bf16.msra.mxu0 %v9910_v10  ;;  %3524 = vmatpush1.bf16.msra.mxu1 %v9913_v30  ;;  %v9928_v10 = vld [vmem:[#allocation14 + $0xc4] ss:$16 sps:$4 sm:$0xff]   ;;  %v9931_v30 = vld [vmem:[#allocation14 + $0xcc] ss:$16 sps:$4 sm:$0xff]  }
 0x531   :  { %3484 = vmatprep.subr.bf16.mxu0 %v9916_v15  ;;  %3525 = vmatprep.subr.bf16.mxu1 %v9919_v13  ;;  %12736 = vst [vmem:[#allocation167_spill] sm:$0xff] %v9928_v10  ;;  %12737 = vst [vmem:[#allocation183_spill] sm:$0xff] %v9931_v30  ;;  %v12738_v15 = vld [vmem:[#allocation156_spill] sm:$0xff]  ;;  %v12739_v13 = vld [vmem:[#allocation182_spill] sm:$0xff] }
 0x532   :  { %v3328_v49 = vunpack.c.l.bf16 %v12738_v15  ;;  %v3330_v61 = vunpack.c.l.bf16 %v12739_v13  ;;  %v3329_v46 = vunpack.c.h.bf16 %v12738_v15 }
 0x534   :  { %3485 = vmatpush1.bf16.msra.mxu0 %v9922_v38  ;;  %3526 = vmatpush1.bf16.msra.mxu1 %v9925_v5  ;;  %v3331_v5 = vunpack.c.h.bf16 %v12739_v13 }
 0x535   :  { %3486 = vmatprep.subr.bf16.mxu0 %v9928_v10  ;;  %3527 = vmatprep.subr.bf16.mxu1 %v9931_v30  ;;  %v9941_v10 = vld [vmem:[#allocation14 + $0xc8] ss:$16 sps:$4 sm:$0xff]  }
 0x536   :  { %12741 = vst [vmem:[#allocation202_spill] sm:$0xff] %v9941_v10 }
 0x537   :  { %v3266_v34 = vpop.f32.mrb[52].mxu0 }
 0x538   :  { %v3332_v38 = vadd.f32 %v3328_v49, %v3266_v34  ;;  %v3307_v42 = vpop.f32.mrb[84].mxu1  ;;  %v3268_v32 = vpop.f32.mrb[53].mxu0  ;;  %3487 = vmatpush1.bf16.msra.mxu0 %v9938_v59  ;;  %3528 = vmatpush1.bf16.msra.mxu1 %v9941_v10  ;;  %v9947_v34 = vld [vmem:[#allocation14 + $0xec] ss:$16 sps:$4 sm:$0xff]   ;;  %v9950_v10 = vld [vmem:[#allocation14 + $0xe0] ss:$16 sps:$4 sm:$0xff]  }
 0x539   :  { %v3334_v30 = vadd.f32 %v3330_v61, %v3307_v42  ;;  %v3333_v62 = vadd.f32 %v3329_v46, %v3268_v32  ;;  %v3309_v51 = vpop.f32.mrb[85].mxu1  ;;  %v3270_v21 = vpop.f32.mrb[54].mxu0  ;;  %3488 = vmatprep.subr.bf16.mxu0 %v9944_v26  ;;  %3529 = vmatprep.subr.bf16.mxu1 %v9947_v34 }
 0x53a   :  { %v3354_v49 = vmul.f32 0.5, %v3332_v38  ;;  %v3335_v15 = vadd.f32 %v3331_v5, %v3309_v51  ;;  %v3311_v13 = vpop.f32.mrb[86].mxu1  ;;  %v3271_v59 = vpop.f32.mrb[55].mxu0  ;;  %v9953_v21 = vld [vmem:[#allocation14 + $0xe8] ss:$16 sps:$4 sm:$0xff]  }
 0x53b   :  { %v3358_v36 = vmul.f32 0.5, %v3333_v62  ;;  %v3312_v23 = vpop.f32.mrb[87].mxu1 }
 0x53c   :  { %7759 = vtanh.f32 %v3354_v49  ;;  %3489 = vmatpush1.bf16.msra.mxu0 %v9950_v10  ;;  %3530 = vmatpush1.bf16.msra.mxu1 %v9953_v21  ;;  %v3363_v51 = vmul.f32 0.5, %v3335_v15 }
 0x53d   :  { %7761 = vtanh.f32 %v3358_v36  ;;  %3564 = vmatprep.subr.bf16.mxu0 %v12584_v37  ;;  %3605 = vmatprep.subr.bf16.mxu1 %v12585_v9 }
 0x53e   :  { %7763 = vtanh.f32 %v3334_v30 }
 0x53f   :  { %7765 = vtanh.f32 %v3363_v51  ;;  %v12744_v51 = vld [vmem:[#allocation30_spill] sm:$0xff] }
 0x546   :  { %v7760_v32 = vpop.eup %7759 }
 0x547   :  { %v7762_v59 = vpop.eup %7761  ;;  %v3356_v62 = vmul.f32 0.5, %v7760_v32  ;;  %v12745_v32 = vld [vmem:[#allocation67_spill] sm:$0xff] }
 0x548   :  { %v3360_v23 = vmul.f32 0.5, %v7762_v59  ;;  %v7764_v46 = vpop.eup %7763  ;;  %v12746_v59 = vld [vmem:[#allocation31_spill] sm:$0xff] }
 0x549   :  { %v3357_v42 = vadd.f32 0.5, %v3356_v62  ;;  %v7766_v36 = vpop.eup %7765  ;;  %v12747_v62 = vld [vmem:[#allocation69_spill] sm:$0xff] }
 0x54a   :  { %v3361_v61 = vadd.f32 0.5, %v3360_v23  ;;  %v3365_v13 = vmul.f32 0.5, %v7766_v36  ;;  %v12748_v23 = vld [vmem:[#allocation32_spill] sm:$0xff]  ;;  %v12754_v36 = vld [vmem:[#allocation35_spill] sm:$0xff] }
 0x54b   :  { %v3368_v38 = vmul.f32 %v7764_v46, %v3357_v42  ;;  %v12749_v42 = vld [vmem:[#allocation71_spill] sm:$0xff]  ;;  %v12750_v46 = vld [vmem:[#allocation33_spill] sm:$0xff] }
 0x54c   :  { %v3367_v5 = vmul.f32 %v3361_v61, %v9607_v7  ;;  %v3366_v9 = vadd.f32 0.5, %v3365_v13  ;;  %v12743_v7 = vld [vmem:[#allocation65_spill] sm:$0xff] }
 0x54d   :  { %v12751_v61 = vld [vmem:[#allocation73_spill] sm:$0xff] }
 0x54e   :  { %v9959_v49 = vadd.f32 %v3368_v38, %v3367_v5  ;;  %v12752_v38 = vld [vmem:[#allocation34_spill] sm:$0xff]  ;;  %v12753_v5 = vld [vmem:[#allocation75_spill] sm:$0xff]  ;;  %v12755_v13 = vld [vmem:[#allocation77_spill] sm:$0xff] }
 0x550   :  { %7767 = vtanh.f32 %v9959_v49 }
 0x55a   :  { %v7768_v30 = vpop.eup %7767 }
 0x55b   :  { %v3371_v15 = vmul.f32 %v7768_v30, %v3366_v9  ;;  %v12742_v9 = vld [vmem:[#allocation29_spill] sm:$0xff]  ;;  %v12756_v30 = vld [vmem:[#allocation36_spill] sm:$0xff] }
 0x55d   :  { %v9962_v37 = vpack.c.bf16 %v3371_v15, %v3371_v15  ;;  %v12757_v15 = vld [vmem:[#allocation79_spill] sm:$0xff] }
 0x55f   :  { %3507 = vmatmul.mubr.bf16.vlgmr.msra.gmra.mrb[60].mxu0 %v9962_v37  ;;  %3548 = vmatmul.mubr.bf16.vlgmr.msra.gmra.mrb[92].mxu1 %v9962_v37 }
 0x560   :  { %3565 = vmatpush1.bf16.msra.mxu0 %v8604_v14  ;;  %3606 = vmatpush1.bf16.msra.mxu1 %v8731_v63 }
 0x561   :  { %3596 = vmatprep.mubr.bf16.mxu0 %v9962_v37  ;;  %3637 = vmatprep.mubr.bf16.mxu1 %v9962_v37 }
 0x562   :  { %3566 = vmatprep.subr.bf16.mxu0 %v8607_v16  ;;  %3607 = vmatprep.subr.bf16.mxu1 %v8737_v8 }
 0x564   :  { %3567 = vmatpush1.bf16.msra.mxu0 %v8612_v22  ;;  %3608 = vmatpush1.bf16.msra.mxu1 %v8745_v19 }
 0x565   :  { %3568 = vmatprep.subr.bf16.mxu0 %v8616_v24  ;;  %3609 = vmatprep.subr.bf16.mxu1 %v8751_v28 }
 0x568   :  { %3569 = vmatpush1.bf16.msra.mxu0 %v8622_v31  ;;  %3610 = vmatpush1.bf16.msra.mxu1 %v8759_v35 }
 0x569   :  { %3570 = vmatprep.subr.bf16.mxu0 %v8625_v33  ;;  %3611 = vmatprep.subr.bf16.mxu1 %v8765_v40 }
 0x56c   :  { %3571 = vmatpush1.bf16.msra.mxu0 %v8630_v39  ;;  %3612 = vmatpush1.bf16.msra.mxu1 %v8772_v57 }
 0x56d   :  { %3572 = vmatprep.subr.bf16.mxu0 %v8633_v41  ;;  %3613 = vmatprep.subr.bf16.mxu1 %v8779_v1 }
 0x570   :  { %3573 = vmatpush1.bf16.msra.mxu0 %v8640_v48  ;;  %3614 = vmatpush1.bf16.msra.mxu1 %v8785_v20 }
 0x571   :  { %3574 = vmatprep.subr.bf16.mxu0 %v8643_v50  ;;  %3615 = vmatprep.subr.bf16.mxu1 %v8791_v29 }
 0x574   :  { %3575 = vmatpush1.bf16.msra.mxu0 %v8648_v56  ;;  %3616 = vmatpush1.bf16.msra.mxu1 %v8798_v45 }
 0x575   :  { %3576 = vmatprep.subr.bf16.mxu0 %v8651_v58  ;;  %3617 = vmatprep.subr.bf16.mxu1 %v8805_v52 }
 0x578   :  { %3577 = vmatpush1.bf16.msra.mxu0 %v8658_v2  ;;  %3618 = vmatpush1.bf16.msra.mxu1 %v8811_v11 }
 0x579   :  { %3578 = vmatprep.subr.bf16.mxu0 %v8661_v4  ;;  %3619 = vmatprep.subr.bf16.mxu1 %v8817_v27 }
 0x57c   :  { %3579 = vmatpush1.bf16.msra.mxu0 %v8666_v12  ;;  %3620 = vmatpush1.bf16.msra.mxu1 %v8824_v0 }
 0x57d   :  { %3580 = vmatprep.subr.bf16.mxu0 %v8669_v18  ;;  %3621 = vmatprep.subr.bf16.mxu1 %v12586_v53 }
 0x580   :  { %3581 = vmatpush1.bf16.msra.mxu0 %v12587_v25  ;;  %3622 = vmatpush1.bf16.msra.mxu1 %v12588_v54 }
 0x581   :  { %3582 = vmatprep.subr.bf16.mxu0 %v12589_v17  ;;  %3623 = vmatprep.subr.bf16.mxu1 %v12590_v6 }
 0x584   :  { %3583 = vmatpush1.bf16.msra.mxu0 %v12742_v9  ;;  %3624 = vmatpush1.bf16.msra.mxu1 %v12743_v7 }
 0x585   :  { %3584 = vmatprep.subr.bf16.mxu0 %v12744_v51  ;;  %3625 = vmatprep.subr.bf16.mxu1 %v12745_v32 }
 0x588   :  { %3585 = vmatpush1.bf16.msra.mxu0 %v12746_v59  ;;  %3626 = vmatpush1.bf16.msra.mxu1 %v12747_v62  ;;  %v12758_v62 = vld [vmem:[#allocation37_spill] sm:$0xff] }
 0x589   :  { %3586 = vmatprep.subr.bf16.mxu0 %v12748_v23  ;;  %3627 = vmatprep.subr.bf16.mxu1 %v12749_v42  ;;  %v12759_v23 = vld [vmem:[#allocation81_spill] sm:$0xff]  ;;  %v12760_v42 = vld [vmem:[#allocation38_spill] sm:$0xff] }
 0x58c   :  { %3587 = vmatpush1.bf16.msra.mxu0 %v12750_v46  ;;  %3628 = vmatpush1.bf16.msra.mxu1 %v12751_v61  ;;  %v12761_v46 = vld [vmem:[#allocation83_spill] sm:$0xff] }
 0x58d   :  { %3588 = vmatprep.subr.bf16.mxu0 %v12752_v38  ;;  %3629 = vmatprep.subr.bf16.mxu1 %v12753_v5  ;;  %v12762_v61 = vld [vmem:[#allocation39_spill] sm:$0xff]  ;;  %v12763_v38 = vld [vmem:[#allocation85_spill] sm:$0xff]  ;;  %v12764_v5 = vld [vmem:[#allocation40_spill] sm:$0xff] }
 0x590   :  { %3589 = vmatpush1.bf16.msra.mxu0 %v12754_v36  ;;  %3630 = vmatpush1.bf16.msra.mxu1 %v12755_v13  ;;  %v12765_v36 = vld [vmem:[#allocation87_spill] sm:$0xff]  ;;  %v12766_v13 = vld [vmem:[#allocation41_spill] sm:$0xff] }
 0x591   :  { %3590 = vmatprep.subr.bf16.mxu0 %v12756_v30  ;;  %3631 = vmatprep.subr.bf16.mxu1 %v12757_v15  ;;  %v12767_v30 = vld [vmem:[#allocation89_spill] sm:$0xff]  ;;  %v12768_v15 = vld [vmem:[#allocation43_spill] sm:$0xff] }
 0x594   :  { %3591 = vmatpush1.bf16.msra.mxu0 %v12758_v62  ;;  %3632 = vmatpush1.bf16.msra.mxu1 %v12759_v23  ;;  %v12769_v62 = vld [vmem:[#allocation91_spill] sm:$0xff] }
 0x595   :  { %3592 = vmatprep.subr.bf16.mxu0 %v12760_v42  ;;  %3633 = vmatprep.subr.bf16.mxu1 %v12761_v46  ;;  %v12770_v46 = vld [vmem:[#allocation44_spill] sm:$0xff]  ;;  %v12780_v42 = vld [vmem:[#allocation49_spill] sm:$0xff] }
 0x598   :  { %3593 = vmatpush1.bf16.msra.mxu0 %v12762_v61  ;;  %3634 = vmatpush1.bf16.msra.mxu1 %v12763_v38  ;;  %v12771_v38 = vld [vmem:[#allocation92_spill] sm:$0xff] }
 0x599   :  { %3594 = vmatprep.subr.bf16.mxu0 %v12764_v5  ;;  %3635 = vmatprep.subr.bf16.mxu1 %v12765_v36  ;;  %v12772_v36 = vld [vmem:[#allocation45_spill] sm:$0xff]  ;;  %v12777_v5 = vld [vmem:[#allocation95_spill] sm:$0xff]  ;;  %v12778_v61 = vld [vmem:[#allocation48_spill] sm:$0xff] }
 0x59c   :  { %3595 = vmatpush1.bf16.msra.mxu0 %v12766_v13  ;;  %3636 = vmatpush1.bf16.msra.mxu1 %v12767_v30  ;;  %v12773_v13 = vld [vmem:[#allocation93_spill] sm:$0xff]  ;;  %v12774_v30 = vld [vmem:[#allocation46_spill] sm:$0xff] }
 0x59d   :  { %3646 = vmatprep.subr.bf16.mxu0 %v12768_v15  ;;  %3687 = vmatprep.subr.bf16.mxu1 %v12769_v62  ;;  %v12775_v15 = vld [vmem:[#allocation94_spill] sm:$0xff]  ;;  %v12776_v62 = vld [vmem:[#allocation47_spill] sm:$0xff] }
 0x59f   :  { %3597 = vmatmul.mubr.bf16.vlgmr.msra.gmra.mrb[64].mxu0 %v9856_v55  ;;  %3638 = vmatmul.mubr.bf16.vlgmr.msra.gmra.mrb[96].mxu1 %v9856_v55 }
 0x5a0   :  { %3647 = vmatpush1.bf16.msra.mxu0 %v12770_v46  ;;  %3678 = vmatprep.mubr.bf16.mxu0 %v9962_v37  ;;  %v12779_v46 = vld [vmem:[#allocation96_spill] sm:$0xff] }
 0x5a1   :  { %3688 = vmatpush1.bf16.msra.mxu1 %v12771_v38  ;;  %3719 = vmatprep.mubr.bf16.mxu1 %v9962_v37  ;;  %v12781_v38 = vld [vmem:[#allocation97_spill] sm:$0xff]  ;;  %v12782_v37 = vld [vmem:[#allocation50_spill] sm:$0xff] }
 0x5a2   :  { %3648 = vmatprep.subr.bf16.mxu0 %v12772_v36  ;;  %3689 = vmatprep.subr.bf16.mxu1 %v12773_v13  ;;  %v12783_v36 = vld [vmem:[#allocation98_spill] sm:$0xff]  ;;  %v12784_v13 = vld [vmem:[#allocation51_spill] sm:$0xff] }
 0x5a4   :  { %3649 = vmatpush1.bf16.msra.mxu0 %v12774_v30  ;;  %v12785_v30 = vld [vmem:[#allocation99_spill] sm:$0xff] }
 0x5a5   :  { %3690 = vmatpush1.bf16.msra.mxu1 %v12775_v15  ;;  %3650 = vmatprep.subr.bf16.mxu0 %v12776_v62  ;;  %v12786_v15 = vld [vmem:[#allocation52_spill] sm:$0xff] }
 0x5a6   :  { %3691 = vmatprep.subr.bf16.mxu1 %v12777_v5  ;;  %v12787_v62 = vld [vmem:[#allocation100_spill] sm:$0xff]  ;;  %v12788_v5 = vld [vmem:[#allocation53_spill] sm:$0xff] }
 0x5a8   :  { %3651 = vmatpush1.bf16.msra.mxu0 %v12778_v61  ;;  %v12789_v61 = vld [vmem:[#allocation101_spill] sm:$0xff] }
 0x5a9   :  { %3692 = vmatpush1.bf16.msra.mxu1 %v12779_v46  ;;  %3652 = vmatprep.subr.bf16.mxu0 %v12780_v42  ;;  %v12790_v46 = vld [vmem:[#allocation54_spill] sm:$0xff] }
 0x5aa   :  { %3693 = vmatprep.subr.bf16.mxu1 %v12781_v38  ;;  %v12791_v42 = vld [vmem:[#allocation102_spill] sm:$0xff]  ;;  %v12792_v38 = vld [vmem:[#allocation55_spill] sm:$0xff] }
 0x5ac   :  { %3653 = vmatpush1.bf16.msra.mxu0 %v12782_v37  ;;  %v12793_v37 = vld [vmem:[#allocation103_spill] sm:$0xff] }
 0x5ad   :  { %3694 = vmatpush1.bf16.msra.mxu1 %v12783_v36  ;;  %3654 = vmatprep.subr.bf16.mxu0 %v12784_v13  ;;  %v12794_v36 = vld [vmem:[#allocation56_spill] sm:$0xff] }
 0x5ae   :  { %3695 = vmatprep.subr.bf16.mxu1 %v12785_v30  ;;  %v12795_v13 = vld [vmem:[#allocation104_spill] sm:$0xff]  ;;  %v12796_v30 = vld [vmem:[#allocation57_spill] sm:$0xff] }
 0x5b0   :  { %3655 = vmatpush1.bf16.msra.mxu0 %v12786_v15  ;;  %v12797_v15 = vld [vmem:[#allocation105_spill] sm:$0xff] }
 0x5b1   :  { %3696 = vmatpush1.bf16.msra.mxu1 %v12787_v62  ;;  %3656 = vmatprep.subr.bf16.mxu0 %v12788_v5  ;;  %v12798_v62 = vld [vmem:[#allocation58_spill] sm:$0xff] }
 0x5b2   :  { %3697 = vmatprep.subr.bf16.mxu1 %v12789_v61  ;;  %v12799_v5 = vld [vmem:[#allocation106_spill] sm:$0xff]  ;;  %v12800_v61 = vld [vmem:[#allocation60_spill] sm:$0xff] }
 0x5b4   :  { %3657 = vmatpush1.bf16.msra.mxu0 %v12790_v46  ;;  %v12801_v46 = vld [vmem:[#allocation107_spill] sm:$0xff] }
 0x5b5   :  { %3698 = vmatpush1.bf16.msra.mxu1 %v12791_v42  ;;  %3658 = vmatprep.subr.bf16.mxu0 %v12792_v38  ;;  %v12802_v42 = vld [vmem:[#allocation62_spill] sm:$0xff]  ;;  %v12803_v38 = vld [vmem:[#allocation108_spill] sm:$0xff] }
 0x5b6   :  { %3699 = vmatprep.subr.bf16.mxu1 %v12793_v37  ;;  %v12804_v37 = vld [vmem:[#allocation64_spill] sm:$0xff] }
 0x5b8   :  { %3659 = vmatpush1.bf16.msra.mxu0 %v12794_v36  ;;  %v12805_v36 = vld [vmem:[#allocation109_spill] sm:$0xff] }
 0x5b9   :  { %3700 = vmatpush1.bf16.msra.mxu1 %v12795_v13  ;;  %3660 = vmatprep.subr.bf16.mxu0 %v12796_v30  ;;  %v12806_v13 = vld [vmem:[#allocation66_spill] sm:$0xff] }
 0x5ba   :  { %3701 = vmatprep.subr.bf16.mxu1 %v12797_v15  ;;  %v12807_v30 = vld [vmem:[#allocation110_spill] sm:$0xff]  ;;  %v12808_v15 = vld [vmem:[#allocation68_spill] sm:$0xff] }
 0x5bc   :  { %3661 = vmatpush1.bf16.msra.mxu0 %v12798_v62  ;;  %v12809_v62 = vld [vmem:[#allocation111_spill] sm:$0xff] }
 0x5bd   :  { %3702 = vmatpush1.bf16.msra.mxu1 %v12799_v5  ;;  %3662 = vmatprep.subr.bf16.mxu0 %v12800_v61  ;;  %v12810_v5 = vld [vmem:[#allocation70_spill] sm:$0xff]  ;;  %v12811_v61 = vld [vmem:[#allocation112_spill] sm:$0xff] }
 0x5be   :  { %3703 = vmatprep.subr.bf16.mxu1 %v12801_v46  ;;  %v12812_v46 = vld [vmem:[#allocation72_spill] sm:$0xff] }
 0x5c0   :  { %3663 = vmatpush1.bf16.msra.mxu0 %v12802_v42  ;;  %v12813_v42 = vld [vmem:[#allocation113_spill] sm:$0xff] }
 0x5c1   :  { %3704 = vmatpush1.bf16.msra.mxu1 %v12803_v38  ;;  %3664 = vmatprep.subr.bf16.mxu0 %v12804_v37  ;;  %v12814_v38 = vld [vmem:[#allocation74_spill] sm:$0xff] }
 0x5c2   :  { %3705 = vmatprep.subr.bf16.mxu1 %v12805_v36  ;;  %v12815_v37 = vld [vmem:[#allocation114_spill] sm:$0xff]  ;;  %v12816_v36 = vld [vmem:[#allocation76_spill] sm:$0xff] }
 0x5c4   :  { %3665 = vmatpush1.bf16.msra.mxu0 %v12806_v13  ;;  %v12817_v13 = vld [vmem:[#allocation115_spill] sm:$0xff] }
 0x5c5   :  { %3706 = vmatpush1.bf16.msra.mxu1 %v12807_v30  ;;  %3666 = vmatprep.subr.bf16.mxu0 %v12808_v15  ;;  %v12818_v30 = vld [vmem:[#allocation78_spill] sm:$0xff]  ;;  %v12819_v15 = vld [vmem:[#allocation116_spill] sm:$0xff] }
 0x5c6   :  { %3707 = vmatprep.subr.bf16.mxu1 %v12809_v62  ;;  %v12820_v62 = vld [vmem:[#allocation80_spill] sm:$0xff] }
 0x5c8   :  { %3667 = vmatpush1.bf16.msra.mxu0 %v12810_v5  ;;  %v12821_v5 = vld [vmem:[#allocation117_spill] sm:$0xff] }
 0x5c9   :  { %3708 = vmatpush1.bf16.msra.mxu1 %v12811_v61  ;;  %3668 = vmatprep.subr.bf16.mxu0 %v12812_v46  ;;  %v12822_v61 = vld [vmem:[#allocation82_spill] sm:$0xff] }
 0x5ca   :  { %3709 = vmatprep.subr.bf16.mxu1 %v12813_v42  ;;  %v12823_v46 = vld [vmem:[#allocation118_spill] sm:$0xff]  ;;  %v12824_v42 = vld [vmem:[#allocation84_spill] sm:$0xff] }
 0x5cc   :  { %3669 = vmatpush1.bf16.msra.mxu0 %v12814_v38  ;;  %v12825_v38 = vld [vmem:[#allocation119_spill] sm:$0xff] }
 0x5cd   :  { %3710 = vmatpush1.bf16.msra.mxu1 %v12815_v37  ;;  %3670 = vmatprep.subr.bf16.mxu0 %v12816_v36  ;;  %v12826_v37 = vld [vmem:[#allocation86_spill] sm:$0xff]  ;;  %v12827_v36 = vld [vmem:[#allocation120_spill] sm:$0xff] }
 0x5ce   :  { %3711 = vmatprep.subr.bf16.mxu1 %v12817_v13  ;;  %v12828_v13 = vld [vmem:[#allocation88_spill] sm:$0xff] }
 0x5d0   :  { %3671 = vmatpush1.bf16.msra.mxu0 %v12818_v30  ;;  %v12829_v30 = vld [vmem:[#allocation121_spill] sm:$0xff] }
 0x5d1   :  { %3712 = vmatpush1.bf16.msra.mxu1 %v12819_v15  ;;  %3672 = vmatprep.subr.bf16.mxu0 %v12820_v62  ;;  %v12830_v15 = vld [vmem:[#allocation90_spill] sm:$0xff] }
 0x5d2   :  { %3713 = vmatprep.subr.bf16.mxu1 %v12821_v5  ;;  %v12831_v62 = vld [vmem:[#allocation122_spill] sm:$0xff] }
 0x5d3   :  { %v10098_v5 = vld [vmem:[#allocation13 + $0x4] ss:$16 sps:$4 sm:$0xff]  }
 0x5d4   :  { %3673 = vmatpush1.bf16.msra.mxu0 %v12822_v61  ;;  %12832 = vst [vmem:[#allocation203_spill] sm:$0xff] %v10098_v5  ;;  %v12867_v61 = vld [vmem:[#allocation170_spill] sm:$0xff] }
 0x5d5   :  { %3714 = vmatpush1.bf16.msra.mxu1 %v12823_v46  ;;  %3674 = vmatprep.subr.bf16.mxu0 %v12824_v42  ;;  %v10101_v46 = vld [vmem:[#allocation13 + $0xc] ss:$16 sps:$4 sm:$0xff]  }
 0x5d6   :  { %3715 = vmatprep.subr.bf16.mxu1 %v12825_v38  ;;  %12833 = vst [vmem:[#allocation204_spill] sm:$0xff] %v10101_v46  ;;  %v12847_v38 = vld [vmem:[#allocation142_spill] sm:$0xff]  ;;  %v12848_v42 = vld [vmem:[#allocation145_spill] sm:$0xff] }
 0x5d8   :  { %3675 = vmatpush1.bf16.msra.mxu0 %v12826_v37  ;;  %v12841_v37 = vld [vmem:[#allocation134_spill] sm:$0xff] }
 0x5d9   :  { %3716 = vmatpush1.bf16.msra.mxu1 %v12827_v36  ;;  %3676 = vmatprep.subr.bf16.mxu0 %v12828_v13  ;;  %v12834_v36 = vld [vmem:[#allocation124_spill] sm:$0xff]  ;;  %v12835_v13 = vld [vmem:[#allocation125_spill] sm:$0xff] }
 0x5da   :  { %3717 = vmatprep.subr.bf16.mxu1 %v12829_v30  ;;  %v12836_v30 = vld [vmem:[#allocation127_spill] sm:$0xff] }
 0x5dc   :  { %3677 = vmatpush1.bf16.msra.mxu0 %v12830_v15  ;;  %v12837_v15 = vld [vmem:[#allocation128_spill] sm:$0xff] }
 0x5dd   :  { %3718 = vmatpush1.bf16.msra.mxu1 %v12831_v62  ;;  %3793 = vmatprep.subr.bf16.mxu0 %v10098_v5  ;;  %v12838_v5 = vld [vmem:[#allocation130_spill] sm:$0xff]  ;;  %v12839_v62 = vld [vmem:[#allocation131_spill] sm:$0xff] }
 0x5de   :  { %3834 = vmatprep.subr.bf16.mxu1 %v10101_v46  ;;  %v12840_v46 = vld [vmem:[#allocation133_spill] sm:$0xff] }
 0x5df   :  { %3679 = vmatmul.mubr.bf16.vlgmr.msra.gmra.mrb[68].mxu0 %v9856_v55 }
 0x5e0   :  { %3720 = vmatmul.mubr.bf16.vlgmr.msra.gmra.mrb[100].mxu1 %v9856_v55  ;;  %3794 = vmatpush1.bf16.msra.mxu0 %v12834_v36  ;;  %v12842_v55 = vld [vmem:[#allocation135_spill] sm:$0xff]  ;;  %v12843_v36 = vld [vmem:[#allocation136_spill] sm:$0xff] }
 0x5e1   :  { %3835 = vmatpush1.bf16.msra.mxu1 %v12835_v13  ;;  %3795 = vmatprep.subr.bf16.mxu0 %v12836_v30  ;;  %v12844_v13 = vld [vmem:[#allocation138_spill] sm:$0xff]  ;;  %v12845_v30 = vld [vmem:[#allocation139_spill] sm:$0xff] }
 0x5e2   :  { %3836 = vmatprep.subr.bf16.mxu1 %v12837_v15  ;;  %3825 = vmatprep.mubr.bf16.mxu0 %v12275_v47  ;;  %v12846_v15 = vld [vmem:[#allocation141_spill] sm:$0xff] }
 0x5e3   :  { %3866 = vmatprep.mubr.bf16.mxu1 %v12275_v47 }
 0x5e4   :  { %3796 = vmatpush1.bf16.msra.mxu0 %v12838_v5  ;;  %v12849_v5 = vld [vmem:[#allocation146_spill] sm:$0xff] }
 0x5e5   :  { %3837 = vmatpush1.bf16.msra.mxu1 %v12839_v62  ;;  %3797 = vmatprep.subr.bf16.mxu0 %v12840_v46  ;;  %v12850_v62 = vld [vmem:[#allocation147_spill] sm:$0xff]  ;;  %v12851_v46 = vld [vmem:[#allocation148_spill] sm:$0xff] }
 0x5e6   :  { %3838 = vmatprep.subr.bf16.mxu1 %v12841_v37  ;;  %v12852_v37 = vld [vmem:[#allocation150_spill] sm:$0xff] }
 0x5e8   :  { %3798 = vmatpush1.bf16.msra.mxu0 %v12842_v55  ;;  %v12853_v55 = vld [vmem:[#allocation151_spill] sm:$0xff] }
 0x5e9   :  { %3839 = vmatpush1.bf16.msra.mxu1 %v12843_v36  ;;  %3799 = vmatprep.subr.bf16.mxu0 %v12844_v13  ;;  %v12854_v36 = vld [vmem:[#allocation153_spill] sm:$0xff]  ;;  %v12855_v13 = vld [vmem:[#allocation154_spill] sm:$0xff] }
 0x5ea   :  { %3840 = vmatprep.subr.bf16.mxu1 %v12845_v30  ;;  %v12856_v30 = vld [vmem:[#allocation157_spill] sm:$0xff] }
 0x5ec   :  { %3800 = vmatpush1.bf16.msra.mxu0 %v12846_v15  ;;  %v12857_v15 = vld [vmem:[#allocation158_spill] sm:$0xff] }
 0x5ed   :  { %3841 = vmatpush1.bf16.msra.mxu1 %v12847_v38  ;;  %3801 = vmatprep.subr.bf16.mxu0 %v12848_v42  ;;  %v12858_v38 = vld [vmem:[#allocation159_spill] sm:$0xff]  ;;  %v12859_v42 = vld [vmem:[#allocation160_spill] sm:$0xff] }
 0x5ee   :  { %3842 = vmatprep.subr.bf16.mxu1 %v12849_v5  ;;  %v12860_v5 = vld [vmem:[#allocation162_spill] sm:$0xff] }
 0x5f0   :  { %3802 = vmatpush1.bf16.msra.mxu0 %v12850_v62  ;;  %v12861_v62 = vld [vmem:[#allocation163_spill] sm:$0xff] }
 0x5f1   :  { %3843 = vmatpush1.bf16.msra.mxu1 %v12851_v46  ;;  %3803 = vmatprep.subr.bf16.mxu0 %v12852_v37  ;;  %v12862_v46 = vld [vmem:[#allocation165_spill] sm:$0xff]  ;;  %v12863_v37 = vld [vmem:[#allocation166_spill] sm:$0xff] }
 0x5f2   :  { %3844 = vmatprep.subr.bf16.mxu1 %v12853_v55  ;;  %v12864_v55 = vld [vmem:[#allocation175_spill] sm:$0xff] }
 0x5f4   :  { %3804 = vmatpush1.bf16.msra.mxu0 %v12854_v36  ;;  %v12865_v36 = vld [vmem:[#allocation176_spill] sm:$0xff] }
 0x5f5   :  { %3845 = vmatpush1.bf16.msra.mxu1 %v12855_v13  ;;  %3805 = vmatprep.subr.bf16.mxu0 %v12856_v30  ;;  %v12866_v13 = vld [vmem:[#allocation140_spill] sm:$0xff] }
 0x5f6   :  { %3846 = vmatprep.subr.bf16.mxu1 %v12857_v15  ;;  %v3731_v30 = vunpack.c.l.bf16 %v12866_v13  ;;  %v3733_v15 = vunpack.c.l.bf16 %v12867_v61 }
 0x5f8   :  { %3806 = vmatpush1.bf16.msra.mxu0 %v12858_v38 }
 0x5f9   :  { %3847 = vmatpush1.bf16.msra.mxu1 %v12859_v42  ;;  %3807 = vmatprep.subr.bf16.mxu0 %v12860_v5  ;;  %v3732_v42 = vunpack.c.h.bf16 %v12866_v13  ;;  %v3734_v5 = vunpack.c.h.bf16 %v12867_v61 }
 0x5fa   :  { %3848 = vmatprep.subr.bf16.mxu1 %v12861_v62 }
 0x5fc   :  { %3808 = vmatpush1.bf16.msra.mxu0 %v12862_v46 }
 0x5fd   :  { %3849 = vmatpush1.bf16.msra.mxu1 %v12863_v37  ;;  %3888 = vmatprep.subr.bf16.mxu0 %v12864_v55 }
 0x5fe   :  { %3929 = vmatprep.subr.bf16.mxu1 %v12865_v36 }
 0x672   :  { %v3598_v23 = vpop.f32.mrb[64].mxu0  ;;  %v3639_v38 = vpop.f32.mrb[96].mxu1 }
 0x673   :  { %v3735_v59 = vadd.f32 %v3731_v30, %v3598_v23  ;;  %v3737_v62 = vadd.f32 %v3733_v15, %v3639_v38  ;;  %v3600_v32 = vpop.f32.mrb[65].mxu0  ;;  %v3641_v46 = vpop.f32.mrb[97].mxu1 }
 0x674   :  { %v3736_v51 = vadd.f32 %v3732_v42, %v3600_v32  ;;  %v3738_v37 = vadd.f32 %v3734_v5, %v3641_v46  ;;  %v3602_v7 = vpop.f32.mrb[66].mxu0  ;;  %v3643_v55 = vpop.f32.mrb[98].mxu1  ;;  %v12872_v5 = vld [vmem:[#allocation186_spill] sm:$0xff]  ;;  %v12877_v46 = vld [vmem:[#allocation191_spill] sm:$0xff] }
 0x675   :  { %v3750_v9 = vmul.f32 0.5, %v3735_v59  ;;  %v3603_v36 = vpop.f32.mrb[67].mxu0  ;;  %v3644_v6 = vpop.f32.mrb[99].mxu1  ;;  %v12879_v55 = vld [vmem:[#allocation193_spill] sm:$0xff] }
 0x676   :  { %v3754_v17 = vmul.f32 0.5, %v3736_v51  ;;  %v3759_v54 = vmul.f32 0.5, %v3738_v37  ;;  %v12878_v37 = vld [vmem:[#allocation192_spill] sm:$0xff]  ;;  %v12880_v36 = vld [vmem:[#allocation194_spill] sm:$0xff] }
 0x677   :  { %7769 = vtanh.f32 %v3750_v9 }
 0x678   :  { %7771 = vtanh.f32 %v3754_v17 }
 0x679   :  { %7773 = vtanh.f32 %v3737_v62  ;;  %v12873_v62 = vld [vmem:[#allocation187_spill] sm:$0xff] }
 0x67a   :  { %7775 = vtanh.f32 %v3759_v54  ;;  %v12870_v54 = vld [vmem:[#allocation184_spill] sm:$0xff] }
 0x681   :  { %v7770_v25 = vpop.eup %7769 }
 0x682   :  { %v7772_v13 = vpop.eup %7771  ;;  %v3752_v53 = vmul.f32 0.5, %v7770_v25  ;;  %v12869_v25 = vld [vmem:[#allocation168_spill] sm:$0xff] }
 0x683   :  { %v3756_v61 = vmul.f32 0.5, %v7772_v13  ;;  %v7774_v30 = vpop.eup %7773  ;;  %v12881_v13 = vld [vmem:[#allocation195_spill] sm:$0xff] }
 0x684   :  { %v3753_v23 = vadd.f32 0.5, %v3752_v53  ;;  %v7776_v6 = vpop.eup %7775  ;;  %v12868_v53 = vld [vmem:[#allocation129_spill] sm:$0xff] }
 0x685   :  { %v3757_v15 = vadd.f32 0.5, %v3756_v61  ;;  %v3761_v9 = vmul.f32 0.5, %v7776_v6  ;;  %v12882_v61 = vld [vmem:[#allocation196_spill] sm:$0xff]  ;;  %v12888_v6 = vld [vmem:[#allocation183_spill] sm:$0xff] }
 0x686   :  { %v3764_v32 = vmul.f32 %v7774_v30, %v3753_v23  ;;  %v12883_v23 = vld [vmem:[#allocation197_spill] sm:$0xff]  ;;  %v12884_v30 = vld [vmem:[#allocation198_spill] sm:$0xff] }
 0x687   :  { %v3763_v7 = vmul.f32 %v3757_v15, %v9853_v60  ;;  %v3762_v17 = vadd.f32 0.5, %v3761_v9  ;;  %v12871_v60 = vld [vmem:[#allocation185_spill] sm:$0xff]  ;;  %v12885_v15 = vld [vmem:[#allocation199_spill] sm:$0xff] }
 0x688   :  { %v12889_v9 = vld [vmem:[#allocation155_spill] sm:$0xff] }
 0x689   :  { %v10145_v38 = vadd.f32 %v3764_v32, %v3763_v7  ;;  %v12886_v32 = vld [vmem:[#allocation200_spill] sm:$0xff]  ;;  %v12887_v7 = vld [vmem:[#allocation167_spill] sm:$0xff] }
 0x68b   :  { %7777 = vtanh.f32 %v10145_v38 }
 0x695   :  { %v7778_v51 = vpop.eup %7777 }
 0x696   :  { %v3767_v59 = vmul.f32 %v7778_v51, %v3762_v17  ;;  %v3742_v17 = vunpack.c.l.bf16 %v12889_v9 }
 0x698   :  { %v10148_v42 = vpack.c.bf16 %v3767_v59, %v3767_v59  ;;  %v12890_v59 = vld [vmem:[#allocation181_spill] sm:$0xff] }
 0x69a   :  { %3826 = vmatmul.mubr.bf16.vlgmr.msra.gmra.mrb[72].mxu0 %v10148_v42  ;;  %3867 = vmatmul.mubr.bf16.vlgmr.msra.gmra.mrb[104].mxu1 %v10148_v42 }
 0x69b   :  { %3889 = vmatpush1.bf16.msra.mxu0 %v9860_v43  ;;  %3930 = vmatpush1.bf16.msra.mxu1 %v9863_v44  ;;  %v12874_v43 = vld [vmem:[#allocation188_spill] sm:$0xff]  ;;  %v12875_v44 = vld [vmem:[#allocation189_spill] sm:$0xff] }
 0x69c   :  { %3890 = vmatprep.subr.bf16.mxu0 %v9866_v3  ;;  %3931 = vmatprep.subr.bf16.mxu1 %v12868_v53  ;;  %v12876_v3 = vld [vmem:[#allocation190_spill] sm:$0xff]  ;;  %v3744_v53 = vunpack.c.l.bf16 %v12890_v59 }
 0x69d   :  { %3920 = vmatprep.mubr.bf16.mxu0 %v12275_v47  ;;  %3961 = vmatprep.mubr.bf16.mxu1 %v12275_v47 }
 0x69f   :  { %3891 = vmatpush1.bf16.msra.mxu0 %v12869_v25  ;;  %3932 = vmatpush1.bf16.msra.mxu1 %v12870_v54  ;;  %v3743_v25 = vunpack.c.h.bf16 %v12889_v9 }
 0x6a0   :  { %3892 = vmatprep.subr.bf16.mxu0 %v12871_v60  ;;  %3933 = vmatprep.subr.bf16.mxu1 %v12872_v5 }
 0x6a3   :  { %3893 = vmatpush1.bf16.msra.mxu0 %v12873_v62  ;;  %3934 = vmatpush1.bf16.msra.mxu1 %v12874_v43  ;;  %v3745_v62 = vunpack.c.h.bf16 %v12890_v59  ;;  %v12891_v43 = vld [vmem:[#allocation201_spill] sm:$0xff] }
 0x6a4   :  { %3894 = vmatprep.subr.bf16.mxu0 %v12875_v44  ;;  %3935 = vmatprep.subr.bf16.mxu1 %v12876_v3  ;;  %v12892_v44 = vld [vmem:[#allocation202_spill] sm:$0xff] }
 0x6a7   :  { %3895 = vmatpush1.bf16.msra.mxu0 %v12877_v46  ;;  %3936 = vmatpush1.bf16.msra.mxu1 %v12878_v37 }
 0x6a8   :  { %3896 = vmatprep.subr.bf16.mxu0 %v12879_v55  ;;  %3937 = vmatprep.subr.bf16.mxu1 %v12880_v36 }
 0x6ab   :  { %3897 = vmatpush1.bf16.msra.mxu0 %v12881_v13  ;;  %3938 = vmatpush1.bf16.msra.mxu1 %v12882_v61 }
 0x6ac   :  { %3898 = vmatprep.subr.bf16.mxu0 %v12883_v23  ;;  %3939 = vmatprep.subr.bf16.mxu1 %v12884_v30 }
 0x6af   :  { %3899 = vmatpush1.bf16.msra.mxu0 %v12885_v15  ;;  %3940 = vmatpush1.bf16.msra.mxu1 %v12886_v32  ;;  %v12893_v32 = vld [vmem:[#allocation26_spill] sm:$0xff] }
 0x6b0   :  { %3900 = vmatprep.subr.bf16.mxu0 %v12887_v7  ;;  %3941 = vmatprep.subr.bf16.mxu1 %v12888_v6  ;;  %v12894_v7 = vld [vmem:[#allocation42_spill] sm:$0xff] }
 0x6b2   :  { %v3680_v51 = vpop.f32.mrb[68].mxu0 }
 0x6b3   :  { %v3746_v54 = vadd.f32 %v3742_v17, %v3680_v51  ;;  %v3721_v60 = vpop.f32.mrb[100].mxu1  ;;  %v3682_v5 = vpop.f32.mrb[69].mxu0  ;;  %3901 = vmatpush1.bf16.msra.mxu0 %v12891_v43  ;;  %3942 = vmatpush1.bf16.msra.mxu1 %v12892_v44 }
 0x6b4   :  { %v3748_v3 = vadd.f32 %v3744_v53, %v3721_v60  ;;  %v3747_v46 = vadd.f32 %v3743_v25, %v3682_v5  ;;  %v3723_v37 = vpop.f32.mrb[101].mxu1  ;;  %v3684_v55 = vpop.f32.mrb[70].mxu0  ;;  %3902 = vmatprep.subr.bf16.mxu0 %v9944_v26  ;;  %3943 = vmatprep.subr.bf16.mxu1 %v9947_v34 }
 0x6b5   :  { %v3768_v36 = vmul.f32 0.5, %v3746_v54  ;;  %v3749_v13 = vadd.f32 %v3745_v62, %v3723_v37  ;;  %v3725_v61 = vpop.f32.mrb[102].mxu1  ;;  %v3685_v23 = vpop.f32.mrb[71].mxu0  ;;  %v12898_v37 = vld [vmem:[#allocation28_spill] sm:$0xff]  ;;  %v12899_v55 = vld [vmem:[#allocation63_spill] sm:$0xff] }
 0x6b6   :  { %v3772_v30 = vmul.f32 0.5, %v3747_v46  ;;  %v3726_v15 = vpop.f32.mrb[103].mxu1  ;;  %v12897_v46 = vld [vmem:[#allocation61_spill] sm:$0xff]  ;;  %v12902_v61 = vld [vmem:[#allocation30_spill] sm:$0xff]  ;;  %v12903_v23 = vld [vmem:[#allocation67_spill] sm:$0xff] }
 0x6b7   :  { %7779 = vtanh.f32 %v3768_v36  ;;  %3903 = vmatpush1.bf16.msra.mxu0 %v9950_v10  ;;  %3944 = vmatpush1.bf16.msra.mxu1 %v9953_v21  ;;  %v3777_v26 = vmul.f32 0.5, %v3749_v13  ;;  %v12900_v36 = vld [vmem:[#allocation29_spill] sm:$0xff] }
 0x6b8   :  { %7781 = vtanh.f32 %v3772_v30  ;;  %3978 = vmatprep.subr.bf16.mxu0 %v12893_v32  ;;  %4019 = vmatprep.subr.bf16.mxu1 %v12894_v7  ;;  %v12901_v13 = vld [vmem:[#allocation65_spill] sm:$0xff]  ;;  %v12904_v30 = vld [vmem:[#allocation31_spill] sm:$0xff] }
 0x6b9   :  { %7783 = vtanh.f32 %v3748_v3  ;;  %v12896_v3 = vld [vmem:[#allocation27_spill] sm:$0xff]  ;;  %v12905_v15 = vld [vmem:[#allocation69_spill] sm:$0xff] }
 0x6ba   :  { %7785 = vtanh.f32 %v3777_v26  ;;  %v12906_v26 = vld [vmem:[#allocation32_spill] sm:$0xff] }
 0x6c1   :  { %v7780_v6 = vpop.eup %7779 }
 0x6c2   :  { %v7782_v34 = vpop.eup %7781  ;;  %v3770_v9 = vmul.f32 0.5, %v7780_v6  ;;  %v12907_v6 = vld [vmem:[#allocation71_spill] sm:$0xff] }
 0x6c3   :  { %v3774_v17 = vmul.f32 0.5, %v7782_v34  ;;  %v7784_v59 = vpop.eup %7783  ;;  %v12908_v34 = vld [vmem:[#allocation33_spill] sm:$0xff] }
 0x6c4   :  { %v3771_v51 = vadd.f32 0.5, %v3770_v9  ;;  %v7786_v21 = vpop.eup %7785  ;;  %v12909_v9 = vld [vmem:[#allocation73_spill] sm:$0xff] }
 0x6c5   :  { %v3775_v53 = vadd.f32 0.5, %v3774_v17  ;;  %v3779_v60 = vmul.f32 0.5, %v7786_v21  ;;  %v12910_v17 = vld [vmem:[#allocation34_spill] sm:$0xff]  ;;  %v12916_v21 = vld [vmem:[#allocation37_spill] sm:$0xff] }
 0x6c6   :  { %v3782_v25 = vmul.f32 %v7784_v59, %v3771_v51  ;;  %v12911_v51 = vld [vmem:[#allocation75_spill] sm:$0xff] }
 0x6c7   :  { %v3781_v10 = vmul.f32 %v3775_v53, %v9959_v49  ;;  %v3780_v5 = vadd.f32 0.5, %v3779_v60  ;;  %v12895_v49 = vld [vmem:[#allocation59_spill] sm:$0xff]  ;;  %v12913_v53 = vld [vmem:[#allocation77_spill] sm:$0xff] }
 0x6c8   :  { %v12912_v59 = vld [vmem:[#allocation35_spill] sm:$0xff]  ;;  %v12917_v60 = vld [vmem:[#allocation81_spill] sm:$0xff] }
 0x6c9   :  { %v10191_v54 = vadd.f32 %v3782_v25, %v3781_v10  ;;  %v12914_v25 = vld [vmem:[#allocation36_spill] sm:$0xff]  ;;  %v12915_v10 = vld [vmem:[#allocation79_spill] sm:$0xff] }
 0x6cb   :  { %7787 = vtanh.f32 %v10191_v54 }
 0x6d5   :  { %v7788_v62 = vpop.eup %7787 }
 0x6d6   :  { %v3785_v43 = vmul.f32 %v7788_v62, %v3780_v5  ;;  %v12918_v5 = vld [vmem:[#allocation38_spill] sm:$0xff]  ;;  %v12919_v62 = vld [vmem:[#allocation83_spill] sm:$0xff] }
 0x6d8   :  { %v10194_v44 = vpack.c.bf16 %v3785_v43, %v3785_v43  ;;  %v12920_v43 = vld [vmem:[#allocation39_spill] sm:$0xff] }
 0x6da   :  { %3921 = vmatmul.mubr.bf16.vlgmr.msra.gmra.mrb[76].mxu0 %v10194_v44  ;;  %3962 = vmatmul.mubr.bf16.vlgmr.msra.gmra.mrb[108].mxu1 %v10194_v44 }
 0x6db   :  { %3979 = vmatpush1.bf16.msra.mxu0 %v8604_v14  ;;  %4020 = vmatpush1.bf16.msra.mxu1 %v8731_v63 }
 0x6dc   :  { %4010 = vmatprep.mubr.bf16.mxu0 %v10194_v44  ;;  %4051 = vmatprep.mubr.bf16.mxu1 %v10194_v44 }
 0x6dd   :  { %3980 = vmatprep.subr.bf16.mxu0 %v8607_v16  ;;  %4021 = vmatprep.subr.bf16.mxu1 %v8737_v8 }
 0x6df   :  { %3981 = vmatpush1.bf16.msra.mxu0 %v8612_v22  ;;  %4022 = vmatpush1.bf16.msra.mxu1 %v8745_v19 }
 0x6e0   :  { %3982 = vmatprep.subr.bf16.mxu0 %v8616_v24  ;;  %4023 = vmatprep.subr.bf16.mxu1 %v8751_v28 }
 0x6e3   :  { %3983 = vmatpush1.bf16.msra.mxu0 %v8622_v31  ;;  %4024 = vmatpush1.bf16.msra.mxu1 %v8759_v35 }
 0x6e4   :  { %3984 = vmatprep.subr.bf16.mxu0 %v8625_v33  ;;  %4025 = vmatprep.subr.bf16.mxu1 %v8765_v40 }
 0x6e7   :  { %3985 = vmatpush1.bf16.msra.mxu0 %v8630_v39  ;;  %4026 = vmatpush1.bf16.msra.mxu1 %v8772_v57 }
 0x6e8   :  { %3986 = vmatprep.subr.bf16.mxu0 %v8633_v41  ;;  %4027 = vmatprep.subr.bf16.mxu1 %v8779_v1 }
 0x6eb   :  { %3987 = vmatpush1.bf16.msra.mxu0 %v8640_v48  ;;  %4028 = vmatpush1.bf16.msra.mxu1 %v8785_v20 }
 0x6ec   :  { %3988 = vmatprep.subr.bf16.mxu0 %v8643_v50  ;;  %4029 = vmatprep.subr.bf16.mxu1 %v8791_v29 }
 0x6ef   :  { %3989 = vmatpush1.bf16.msra.mxu0 %v8648_v56  ;;  %4030 = vmatpush1.bf16.msra.mxu1 %v8798_v45 }
 0x6f0   :  { %3990 = vmatprep.subr.bf16.mxu0 %v8651_v58  ;;  %4031 = vmatprep.subr.bf16.mxu1 %v8805_v52 }
 0x6f3   :  { %3991 = vmatpush1.bf16.msra.mxu0 %v8658_v2  ;;  %4032 = vmatpush1.bf16.msra.mxu1 %v8811_v11 }
 0x6f4   :  { %3992 = vmatprep.subr.bf16.mxu0 %v8661_v4  ;;  %4033 = vmatprep.subr.bf16.mxu1 %v8817_v27 }
 0x6f7   :  { %3993 = vmatpush1.bf16.msra.mxu0 %v8666_v12  ;;  %4034 = vmatpush1.bf16.msra.mxu1 %v8824_v0 }
 0x6f8   :  { %3994 = vmatprep.subr.bf16.mxu0 %v8669_v18  ;;  %4035 = vmatprep.subr.bf16.mxu1 %v12895_v49 }
 0x6fb   :  { %3995 = vmatpush1.bf16.msra.mxu0 %v12896_v3  ;;  %4036 = vmatpush1.bf16.msra.mxu1 %v12897_v46 }
 0x6fc   :  { %3996 = vmatprep.subr.bf16.mxu0 %v12898_v37  ;;  %4037 = vmatprep.subr.bf16.mxu1 %v12899_v55 }
 0x6ff   :  { %3997 = vmatpush1.bf16.msra.mxu0 %v12900_v36  ;;  %4038 = vmatpush1.bf16.msra.mxu1 %v12901_v13 }
 0x700   :  { %3998 = vmatprep.subr.bf16.mxu0 %v12902_v61  ;;  %4039 = vmatprep.subr.bf16.mxu1 %v12903_v23 }
 0x703   :  { %3999 = vmatpush1.bf16.msra.mxu0 %v12904_v30  ;;  %4040 = vmatpush1.bf16.msra.mxu1 %v12905_v15 }
 0x704   :  { %4000 = vmatprep.subr.bf16.mxu0 %v12906_v26  ;;  %4041 = vmatprep.subr.bf16.mxu1 %v12907_v6 }
 0x707   :  { %4001 = vmatpush1.bf16.msra.mxu0 %v12908_v34  ;;  %4042 = vmatpush1.bf16.msra.mxu1 %v12909_v9 }
 0x708   :  { %4002 = vmatprep.subr.bf16.mxu0 %v12910_v17  ;;  %4043 = vmatprep.subr.bf16.mxu1 %v12911_v51  ;;  %v12921_v17 = vld [vmem:[#allocation85_spill] sm:$0xff]  ;;  %v12922_v51 = vld [vmem:[#allocation40_spill] sm:$0xff] }
 0x70b   :  { %4003 = vmatpush1.bf16.msra.mxu0 %v12912_v59  ;;  %4044 = vmatpush1.bf16.msra.mxu1 %v12913_v53  ;;  %v12923_v59 = vld [vmem:[#allocation87_spill] sm:$0xff]  ;;  %v12924_v53 = vld [vmem:[#allocation41_spill] sm:$0xff] }
 0x70c   :  { %4004 = vmatprep.subr.bf16.mxu0 %v12914_v25  ;;  %4045 = vmatprep.subr.bf16.mxu1 %v12915_v10  ;;  %v12925_v25 = vld [vmem:[#allocation89_spill] sm:$0xff]  ;;  %v12926_v10 = vld [vmem:[#allocation43_spill] sm:$0xff] }
 0x70f   :  { %4005 = vmatpush1.bf16.msra.mxu0 %v12916_v21  ;;  %4046 = vmatpush1.bf16.msra.mxu1 %v12917_v60  ;;  %v12927_v21 = vld [vmem:[#allocation91_spill] sm:$0xff] }
 0x710   :  { %4006 = vmatprep.subr.bf16.mxu0 %v12918_v5  ;;  %4047 = vmatprep.subr.bf16.mxu1 %v12919_v62  ;;  %v12928_v62 = vld [vmem:[#allocation44_spill] sm:$0xff]  ;;  %v12938_v5 = vld [vmem:[#allocation49_spill] sm:$0xff] }
 0x713   :  { %4007 = vmatpush1.bf16.msra.mxu0 %v12920_v43  ;;  %4048 = vmatpush1.bf16.msra.mxu1 %v12921_v17  ;;  %v12929_v17 = vld [vmem:[#allocation92_spill] sm:$0xff] }
 0x714   :  { %4008 = vmatprep.subr.bf16.mxu0 %v12922_v51  ;;  %4049 = vmatprep.subr.bf16.mxu1 %v12923_v59  ;;  %v12930_v59 = vld [vmem:[#allocation45_spill] sm:$0xff]  ;;  %v12935_v51 = vld [vmem:[#allocation95_spill] sm:$0xff]  ;;  %v12936_v43 = vld [vmem:[#allocation48_spill] sm:$0xff] }
 0x717   :  { %4009 = vmatpush1.bf16.msra.mxu0 %v12924_v53  ;;  %4050 = vmatpush1.bf16.msra.mxu1 %v12925_v25  ;;  %v12931_v53 = vld [vmem:[#allocation93_spill] sm:$0xff]  ;;  %v12932_v25 = vld [vmem:[#allocation46_spill] sm:$0xff] }
 0x718   :  { %4060 = vmatprep.subr.bf16.mxu0 %v12926_v10  ;;  %4101 = vmatprep.subr.bf16.mxu1 %v12927_v21  ;;  %v12933_v10 = vld [vmem:[#allocation94_spill] sm:$0xff]  ;;  %v12934_v21 = vld [vmem:[#allocation47_spill] sm:$0xff] }
 0x71a   :  { %4011 = vmatmul.mubr.bf16.vlgmr.msra.gmra.mrb[80].mxu0 %v10148_v42  ;;  %4052 = vmatmul.mubr.bf16.vlgmr.msra.gmra.mrb[112].mxu1 %v10148_v42 }
 0x71b   :  { %4061 = vmatpush1.bf16.msra.mxu0 %v12928_v62  ;;  %4092 = vmatprep.mubr.bf16.mxu0 %v10194_v44  ;;  %v12937_v62 = vld [vmem:[#allocation96_spill] sm:$0xff] }
 0x71c   :  { %4102 = vmatpush1.bf16.msra.mxu1 %v12929_v17  ;;  %4133 = vmatprep.mubr.bf16.mxu1 %v10194_v44  ;;  %v12939_v17 = vld [vmem:[#allocation97_spill] sm:$0xff]  ;;  %v12940_v44 = vld [vmem:[#allocation50_spill] sm:$0xff] }
 0x71d   :  { %4062 = vmatprep.subr.bf16.mxu0 %v12930_v59  ;;  %4103 = vmatprep.subr.bf16.mxu1 %v12931_v53  ;;  %v12941_v59 = vld [vmem:[#allocation98_spill] sm:$0xff]  ;;  %v12942_v53 = vld [vmem:[#allocation51_spill] sm:$0xff] }
 0x71f   :  { %4063 = vmatpush1.bf16.msra.mxu0 %v12932_v25  ;;  %v12943_v25 = vld [vmem:[#allocation99_spill] sm:$0xff] }
 0x720   :  { %4104 = vmatpush1.bf16.msra.mxu1 %v12933_v10  ;;  %4064 = vmatprep.subr.bf16.mxu0 %v12934_v21  ;;  %v12944_v10 = vld [vmem:[#allocation52_spill] sm:$0xff] }
 0x721   :  { %4105 = vmatprep.subr.bf16.mxu1 %v12935_v51  ;;  %v12945_v21 = vld [vmem:[#allocation100_spill] sm:$0xff]  ;;  %v12946_v51 = vld [vmem:[#allocation53_spill] sm:$0xff] }
 0x723   :  { %4065 = vmatpush1.bf16.msra.mxu0 %v12936_v43  ;;  %v12947_v43 = vld [vmem:[#allocation101_spill] sm:$0xff] }
 0x724   :  { %4106 = vmatpush1.bf16.msra.mxu1 %v12937_v62  ;;  %4066 = vmatprep.subr.bf16.mxu0 %v12938_v5  ;;  %v12948_v62 = vld [vmem:[#allocation54_spill] sm:$0xff] }
 0x725   :  { %4107 = vmatprep.subr.bf16.mxu1 %v12939_v17  ;;  %v12949_v5 = vld [vmem:[#allocation102_spill] sm:$0xff]  ;;  %v12950_v17 = vld [vmem:[#allocation55_spill] sm:$0xff] }
 0x727   :  { %4067 = vmatpush1.bf16.msra.mxu0 %v12940_v44  ;;  %v12951_v44 = vld [vmem:[#allocation103_spill] sm:$0xff] }
 0x728   :  { %4108 = vmatpush1.bf16.msra.mxu1 %v12941_v59  ;;  %4068 = vmatprep.subr.bf16.mxu0 %v12942_v53  ;;  %v12952_v59 = vld [vmem:[#allocation56_spill] sm:$0xff] }
 0x729   :  { %4109 = vmatprep.subr.bf16.mxu1 %v12943_v25  ;;  %v12953_v53 = vld [vmem:[#allocation104_spill] sm:$0xff]  ;;  %v12954_v25 = vld [vmem:[#allocation57_spill] sm:$0xff] }
 0x72b   :  { %4069 = vmatpush1.bf16.msra.mxu0 %v12944_v10  ;;  %v12955_v10 = vld [vmem:[#allocation105_spill] sm:$0xff] }
 0x72c   :  { %4110 = vmatpush1.bf16.msra.mxu1 %v12945_v21  ;;  %4070 = vmatprep.subr.bf16.mxu0 %v12946_v51  ;;  %v12956_v21 = vld [vmem:[#allocation58_spill] sm:$0xff] }
 0x72d   :  { %4111 = vmatprep.subr.bf16.mxu1 %v12947_v43  ;;  %v12957_v51 = vld [vmem:[#allocation106_spill] sm:$0xff]  ;;  %v12958_v43 = vld [vmem:[#allocation60_spill] sm:$0xff] }
 0x72f   :  { %4071 = vmatpush1.bf16.msra.mxu0 %v12948_v62  ;;  %v12959_v62 = vld [vmem:[#allocation107_spill] sm:$0xff] }
 0x730   :  { %4112 = vmatpush1.bf16.msra.mxu1 %v12949_v5  ;;  %4072 = vmatprep.subr.bf16.mxu0 %v12950_v17  ;;  %v12960_v5 = vld [vmem:[#allocation62_spill] sm:$0xff]  ;;  %v12961_v17 = vld [vmem:[#allocation108_spill] sm:$0xff] }
 0x731   :  { %4113 = vmatprep.subr.bf16.mxu1 %v12951_v44  ;;  %v12962_v44 = vld [vmem:[#allocation64_spill] sm:$0xff] }
 0x733   :  { %4073 = vmatpush1.bf16.msra.mxu0 %v12952_v59  ;;  %v12963_v59 = vld [vmem:[#allocation109_spill] sm:$0xff] }
 0x734   :  { %4114 = vmatpush1.bf16.msra.mxu1 %v12953_v53  ;;  %4074 = vmatprep.subr.bf16.mxu0 %v12954_v25  ;;  %v12964_v53 = vld [vmem:[#allocation66_spill] sm:$0xff] }
 0x735   :  { %4115 = vmatprep.subr.bf16.mxu1 %v12955_v10  ;;  %v12965_v25 = vld [vmem:[#allocation110_spill] sm:$0xff]  ;;  %v12966_v10 = vld [vmem:[#allocation68_spill] sm:$0xff] }
 0x737   :  { %4075 = vmatpush1.bf16.msra.mxu0 %v12956_v21  ;;  %v12967_v21 = vld [vmem:[#allocation111_spill] sm:$0xff] }
 0x738   :  { %4116 = vmatpush1.bf16.msra.mxu1 %v12957_v51  ;;  %4076 = vmatprep.subr.bf16.mxu0 %v12958_v43  ;;  %v12968_v51 = vld [vmem:[#allocation70_spill] sm:$0xff]  ;;  %v12969_v43 = vld [vmem:[#allocation112_spill] sm:$0xff] }
 0x739   :  { %4117 = vmatprep.subr.bf16.mxu1 %v12959_v62  ;;  %v12970_v62 = vld [vmem:[#allocation72_spill] sm:$0xff] }
 0x73b   :  { %4077 = vmatpush1.bf16.msra.mxu0 %v12960_v5  ;;  %v12971_v5 = vld [vmem:[#allocation113_spill] sm:$0xff] }
 0x73c   :  { %4118 = vmatpush1.bf16.msra.mxu1 %v12961_v17  ;;  %4078 = vmatprep.subr.bf16.mxu0 %v12962_v44  ;;  %v12972_v17 = vld [vmem:[#allocation74_spill] sm:$0xff] }
 0x73d   :  { %4119 = vmatprep.subr.bf16.mxu1 %v12963_v59  ;;  %v12973_v44 = vld [vmem:[#allocation114_spill] sm:$0xff]  ;;  %v12974_v59 = vld [vmem:[#allocation76_spill] sm:$0xff] }
 0x73f   :  { %4079 = vmatpush1.bf16.msra.mxu0 %v12964_v53  ;;  %v12975_v53 = vld [vmem:[#allocation115_spill] sm:$0xff] }
 0x740   :  { %4120 = vmatpush1.bf16.msra.mxu1 %v12965_v25  ;;  %4080 = vmatprep.subr.bf16.mxu0 %v12966_v10  ;;  %v12976_v25 = vld [vmem:[#allocation78_spill] sm:$0xff]  ;;  %v12977_v10 = vld [vmem:[#allocation116_spill] sm:$0xff] }
 0x741   :  { %4121 = vmatprep.subr.bf16.mxu1 %v12967_v21  ;;  %v12978_v21 = vld [vmem:[#allocation80_spill] sm:$0xff] }
 0x743   :  { %4081 = vmatpush1.bf16.msra.mxu0 %v12968_v51  ;;  %v12979_v51 = vld [vmem:[#allocation117_spill] sm:$0xff] }
 0x744   :  { %4122 = vmatpush1.bf16.msra.mxu1 %v12969_v43  ;;  %4082 = vmatprep.subr.bf16.mxu0 %v12970_v62  ;;  %v12980_v43 = vld [vmem:[#allocation82_spill] sm:$0xff] }
 0x745   :  { %4123 = vmatprep.subr.bf16.mxu1 %v12971_v5  ;;  %v12981_v62 = vld [vmem:[#allocation118_spill] sm:$0xff]  ;;  %v12982_v5 = vld [vmem:[#allocation84_spill] sm:$0xff] }
 0x747   :  { %4083 = vmatpush1.bf16.msra.mxu0 %v12972_v17  ;;  %v12983_v17 = vld [vmem:[#allocation119_spill] sm:$0xff] }
 0x748   :  { %4124 = vmatpush1.bf16.msra.mxu1 %v12973_v44  ;;  %4084 = vmatprep.subr.bf16.mxu0 %v12974_v59  ;;  %v12984_v44 = vld [vmem:[#allocation86_spill] sm:$0xff]  ;;  %v12985_v59 = vld [vmem:[#allocation120_spill] sm:$0xff] }
 0x749   :  { %4125 = vmatprep.subr.bf16.mxu1 %v12975_v53  ;;  %v12986_v53 = vld [vmem:[#allocation88_spill] sm:$0xff] }
 0x74b   :  { %4085 = vmatpush1.bf16.msra.mxu0 %v12976_v25  ;;  %v12987_v25 = vld [vmem:[#allocation121_spill] sm:$0xff] }
 0x74c   :  { %4126 = vmatpush1.bf16.msra.mxu1 %v12977_v10  ;;  %4086 = vmatprep.subr.bf16.mxu0 %v12978_v21  ;;  %v12988_v10 = vld [vmem:[#allocation90_spill] sm:$0xff] }
 0x74d   :  { %4127 = vmatprep.subr.bf16.mxu1 %v12979_v51  ;;  %v12989_v21 = vld [vmem:[#allocation122_spill] sm:$0xff]  ;;  %v12990_v51 = vld [vmem:[#allocation203_spill] sm:$0xff] }
 0x74f   :  { %4087 = vmatpush1.bf16.msra.mxu0 %v12980_v43  ;;  %v12991_v43 = vld [vmem:[#allocation204_spill] sm:$0xff] }
 0x750   :  { %4128 = vmatpush1.bf16.msra.mxu1 %v12981_v62  ;;  %4088 = vmatprep.subr.bf16.mxu0 %v12982_v5 }
 0x751   :  { %4129 = vmatprep.subr.bf16.mxu1 %v12983_v17  ;;  %v10334_v17 = vld [vmem:[#allocation13] ss:$16 sps:$4 sm:$0xff]  }
 0x752   :  { %12992 = vst [vmem:[#allocation205_spill] sm:$0xff] %v10334_v17 }
 0x753   :  { %4089 = vmatpush1.bf16.msra.mxu0 %v12984_v44 }
 0x754   :  { %4130 = vmatpush1.bf16.msra.mxu1 %v12985_v59  ;;  %4090 = vmatprep.subr.bf16.mxu0 %v12986_v53  ;;  %v10337_v59 = vld [vmem:[#allocation13 + $0x8] ss:$16 sps:$4 sm:$0xff]  }
 0x755   :  { %4131 = vmatprep.subr.bf16.mxu1 %v12987_v25  ;;  %12993 = vst [vmem:[#allocation206_spill] sm:$0xff] %v10337_v59  ;;  %v10340_v25 = vld [vmem:[#allocation13 + $0x24] ss:$16 sps:$4 sm:$0xff]  }
 0x756   :  { %12994 = vst [vmem:[#allocation207_spill] sm:$0xff] %v10340_v25 }
 0x757   :  { %4091 = vmatpush1.bf16.msra.mxu0 %v12988_v10  ;;  %v13025_v10 = vld [vmem:[#allocation171_spill] sm:$0xff] }
 0x758   :  { %4132 = vmatpush1.bf16.msra.mxu1 %v12989_v21  ;;  %4204 = vmatprep.subr.bf16.mxu0 %v12990_v51  ;;  %v10343_v21 = vld [vmem:[#allocation13 + $0x2c] ss:$16 sps:$4 sm:$0xff]   ;;  %v10351_v51 = vld [vmem:[#allocation13 + $0x28] ss:$16 sps:$4 sm:$0xff]   ;;  %v4147_v5 = vunpack.c.h.bf16 %v13025_v10 }
 0x759   :  { %4245 = vmatprep.subr.bf16.mxu1 %v12991_v43  ;;  %12995 = vst [vmem:[#allocation208_spill] sm:$0xff] %v10343_v21  ;;  %12997 = vst [vmem:[#allocation169_spill] sm:$0xff] %v10351_v51  ;;  %v10354_v43 = vld [vmem:[#allocation13 + $0x44] ss:$16 sps:$4 sm:$0xff]  }
 0x75a   :  { %4093 = vmatmul.mubr.bf16.vlgmr.msra.gmra.mrb[84].mxu0 %v10148_v42  ;;  %12998 = vst [vmem:[#allocation156_spill] sm:$0xff] %v10354_v43 }
 0x75b   :  { %4134 = vmatmul.mubr.bf16.vlgmr.msra.gmra.mrb[116].mxu1 %v10148_v42  ;;  %4205 = vmatpush1.bf16.msra.mxu0 %v10334_v17  ;;  %v10348_v42 = vld [vmem:[#allocation13 + $0x20] ss:$16 sps:$4 sm:$0xff]  }
 0x75c   :  { %4246 = vmatpush1.bf16.msra.mxu1 %v10337_v59  ;;  %4206 = vmatprep.subr.bf16.mxu0 %v10340_v25  ;;  %12996 = vst [vmem:[#allocation137_spill] sm:$0xff] %v10348_v42  ;;  %v10357_v25 = vld [vmem:[#allocation13 + $0x4c] ss:$16 sps:$4 sm:$0xff]   ;;  %v10363_v59 = vld [vmem:[#allocation13 + $0x48] ss:$16 sps:$4 sm:$0xff]  }
 0x75d   :  { %4247 = vmatprep.subr.bf16.mxu1 %v10343_v21  ;;  %4236 = vmatprep.mubr.bf16.mxu0 %v12275_v47  ;;  %12999 = vst [vmem:[#allocation182_spill] sm:$0xff] %v10357_v25  ;;  %v10360_v21 = vld [vmem:[#allocation13 + $0x40] ss:$16 sps:$4 sm:$0xff]   ;;  %13001 = vst [vmem:[#allocation125_spill] sm:$0xff] %v10363_v59 }
 0x75e   :  { %4277 = vmatprep.mubr.bf16.mxu1 %v12275_v47  ;;  %13000 = vst [vmem:[#allocation124_spill] sm:$0xff] %v10360_v21 }
 0x75f   :  { %4207 = vmatpush1.bf16.msra.mxu0 %v10348_v42  ;;  %v10366_v42 = vld [vmem:[#allocation13 + $0x64] ss:$16 sps:$4 sm:$0xff]  }
 0x760   :  { %4248 = vmatpush1.bf16.msra.mxu1 %v10351_v51  ;;  %4208 = vmatprep.subr.bf16.mxu0 %v10354_v43  ;;  %13002 = vst [vmem:[#allocation127_spill] sm:$0xff] %v10366_v42  ;;  %v10369_v51 = vld [vmem:[#allocation13 + $0x6c] ss:$16 sps:$4 sm:$0xff]   ;;  %v10372_v43 = vld [vmem:[#allocation13 + $0x60] ss:$16 sps:$4 sm:$0xff]  }
 0x761   :  { %4249 = vmatprep.subr.bf16.mxu1 %v10357_v25  ;;  %13003 = vst [vmem:[#allocation128_spill] sm:$0xff] %v10369_v51  ;;  %13004 = vst [vmem:[#allocation130_spill] sm:$0xff] %v10372_v43  ;;  %v10375_v25 = vld [vmem:[#allocation13 + $0x68] ss:$16 sps:$4 sm:$0xff]  }
 0x762   :  { %13005 = vst [vmem:[#allocation131_spill] sm:$0xff] %v10375_v25 }
 0x763   :  { %4209 = vmatpush1.bf16.msra.mxu0 %v10360_v21  ;;  %v10378_v21 = vld [vmem:[#allocation13 + $0x84] ss:$16 sps:$4 sm:$0xff]  }
 0x764   :  { %4250 = vmatpush1.bf16.msra.mxu1 %v10363_v59  ;;  %4210 = vmatprep.subr.bf16.mxu0 %v10366_v42  ;;  %13006 = vst [vmem:[#allocation133_spill] sm:$0xff] %v10378_v21  ;;  %v10381_v59 = vld [vmem:[#allocation13 + $0x8c] ss:$16 sps:$4 sm:$0xff]   ;;  %v10384_v42 = vld [vmem:[#allocation13 + $0x80] ss:$16 sps:$4 sm:$0xff]  }
 0x765   :  { %4251 = vmatprep.subr.bf16.mxu1 %v10369_v51  ;;  %13007 = vst [vmem:[#allocation134_spill] sm:$0xff] %v10381_v59  ;;  %13008 = vst [vmem:[#allocation135_spill] sm:$0xff] %v10384_v42  ;;  %v10387_v51 = vld [vmem:[#allocation13 + $0x88] ss:$16 sps:$4 sm:$0xff]  }
 0x766   :  { %13009 = vst [vmem:[#allocation136_spill] sm:$0xff] %v10387_v51 }
 0x767   :  { %4211 = vmatpush1.bf16.msra.mxu0 %v10372_v43  ;;  %v10390_v43 = vld [vmem:[#allocation13 + $0xa4] ss:$16 sps:$4 sm:$0xff]  }
 0x768   :  { %4252 = vmatpush1.bf16.msra.mxu1 %v10375_v25  ;;  %4212 = vmatprep.subr.bf16.mxu0 %v10378_v21  ;;  %13010 = vst [vmem:[#allocation138_spill] sm:$0xff] %v10390_v43  ;;  %v10393_v25 = vld [vmem:[#allocation13 + $0xac] ss:$16 sps:$4 sm:$0xff]   ;;  %v10396_v21 = vld [vmem:[#allocation13 + $0xa0] ss:$16 sps:$4 sm:$0xff]  }
 0x769   :  { %4253 = vmatprep.subr.bf16.mxu1 %v10381_v59  ;;  %13011 = vst [vmem:[#allocation139_spill] sm:$0xff] %v10393_v25  ;;  %13012 = vst [vmem:[#allocation141_spill] sm:$0xff] %v10396_v21  ;;  %v10399_v59 = vld [vmem:[#allocation13 + $0xa8] ss:$16 sps:$4 sm:$0xff]  }
 0x76a   :  { %13013 = vst [vmem:[#allocation142_spill] sm:$0xff] %v10399_v59 }
 0x76b   :  { %4213 = vmatpush1.bf16.msra.mxu0 %v10384_v42  ;;  %v10402_v42 = vld [vmem:[#allocation13 + $0xc4] ss:$16 sps:$4 sm:$0xff]  }
 0x76c   :  { %4254 = vmatpush1.bf16.msra.mxu1 %v10387_v51  ;;  %4214 = vmatprep.subr.bf16.mxu0 %v10390_v43  ;;  %13014 = vst [vmem:[#allocation145_spill] sm:$0xff] %v10402_v42  ;;  %v10405_v51 = vld [vmem:[#allocation13 + $0xcc] ss:$16 sps:$4 sm:$0xff]   ;;  %v10408_v43 = vld [vmem:[#allocation13 + $0xc0] ss:$16 sps:$4 sm:$0xff]  }
 0x76d   :  { %4255 = vmatprep.subr.bf16.mxu1 %v10393_v25  ;;  %13015 = vst [vmem:[#allocation146_spill] sm:$0xff] %v10405_v51  ;;  %13016 = vst [vmem:[#allocation147_spill] sm:$0xff] %v10408_v43  ;;  %v10411_v25 = vld [vmem:[#allocation13 + $0xc8] ss:$16 sps:$4 sm:$0xff]  }
 0x76e   :  { %13017 = vst [vmem:[#allocation148_spill] sm:$0xff] %v10411_v25 }
 0x76f   :  { %4215 = vmatpush1.bf16.msra.mxu0 %v10396_v21  ;;  %v10414_v21 = vld [vmem:[#allocation13 + $0xe4] ss:$16 sps:$4 sm:$0xff]  }
 0x770   :  { %4256 = vmatpush1.bf16.msra.mxu1 %v10399_v59  ;;  %4216 = vmatprep.subr.bf16.mxu0 %v10402_v42  ;;  %13018 = vst [vmem:[#allocation150_spill] sm:$0xff] %v10414_v21  ;;  %v10417_v59 = vld [vmem:[#allocation13 + $0xec] ss:$16 sps:$4 sm:$0xff]   ;;  %v10420_v42 = vld [vmem:[#allocation13 + $0xe0] ss:$16 sps:$4 sm:$0xff]  }
 0x771   :  { %4257 = vmatprep.subr.bf16.mxu1 %v10405_v51  ;;  %13019 = vst [vmem:[#allocation151_spill] sm:$0xff] %v10417_v59  ;;  %13020 = vst [vmem:[#allocation153_spill] sm:$0xff] %v10420_v42  ;;  %v10423_v51 = vld [vmem:[#allocation13 + $0xe8] ss:$16 sps:$4 sm:$0xff]  }
 0x772   :  { %13021 = vst [vmem:[#allocation154_spill] sm:$0xff] %v10423_v51 }
 0x773   :  { %4217 = vmatpush1.bf16.msra.mxu0 %v10408_v43  ;;  %v10426_v43 = vld [vmem:[#allocation14 + $0x4] ss:$16 sps:$4 sm:$0xff]  }
 0x774   :  { %4258 = vmatpush1.bf16.msra.mxu1 %v10411_v25  ;;  %4218 = vmatprep.subr.bf16.mxu0 %v10414_v21  ;;  %13022 = vst [vmem:[#allocation157_spill] sm:$0xff] %v10426_v43  ;;  %v10429_v25 = vld [vmem:[#allocation14 + $0xc] ss:$16 sps:$4 sm:$0xff]  }
 0x775   :  { %4259 = vmatprep.subr.bf16.mxu1 %v10417_v59  ;;  %13023 = vst [vmem:[#allocation158_spill] sm:$0xff] %v10429_v25  ;;  %v13024_v21 = vld [vmem:[#allocation149_spill] sm:$0xff]  ;;  %v4146_v59 = vunpack.c.l.bf16 %v13025_v10 }
 0x776   :  { %v4144_v17 = vunpack.c.l.bf16 %v13024_v21 }
 0x777   :  { %4219 = vmatpush1.bf16.msra.mxu0 %v10420_v42  ;;  %v4145_v42 = vunpack.c.h.bf16 %v13024_v21 }
 0x778   :  { %4260 = vmatpush1.bf16.msra.mxu1 %v10423_v51  ;;  %4298 = vmatprep.subr.bf16.mxu0 %v10426_v43 }
 0x779   :  { %4339 = vmatprep.subr.bf16.mxu1 %v10429_v25 }
 0x7ed   :  { %v4012_v53 = vpop.f32.mrb[80].mxu0  ;;  %v4053_v44 = vpop.f32.mrb[112].mxu1 }
 0x7ee   :  { %v4148_v62 = vadd.f32 %v4144_v17, %v4012_v53  ;;  %v4150_v51 = vadd.f32 %v4146_v59, %v4053_v44  ;;  %v4014_v60 = vpop.f32.mrb[81].mxu0  ;;  %v4055_v9 = vpop.f32.mrb[113].mxu1  ;;  %v10464_v44 = vld [vmem:[#allocation14 + $0x44] ss:$16 sps:$4 sm:$0xff]  }
 0x7ef   :  { %v4149_v34 = vadd.f32 %v4145_v42, %v4014_v60  ;;  %v4151_v43 = vadd.f32 %v4147_v5, %v4055_v9  ;;  %v4016_v6 = vpop.f32.mrb[82].mxu0  ;;  %v4057_v26 = vpop.f32.mrb[114].mxu1  ;;  %v10458_v5 = vld [vmem:[#allocation14 + $0x20] ss:$16 sps:$4 sm:$0xff]   ;;  %13029 = vst [vmem:[#allocation163_spill] sm:$0xff] %v10464_v44 }
 0x7f0   :  { %v4162_v15 = vmul.f32 0.5, %v4148_v62  ;;  %v4017_v25 = vpop.f32.mrb[83].mxu0  ;;  %v4058_v30 = vpop.f32.mrb[115].mxu1  ;;  %13027 = vst [vmem:[#allocation160_spill] sm:$0xff] %v10458_v5  ;;  %v10461_v62 = vld [vmem:[#allocation14 + $0x28] ss:$16 sps:$4 sm:$0xff]  }
 0x7f1   :  { %v4166_v23 = vmul.f32 0.5, %v4149_v34  ;;  %v4171_v61 = vmul.f32 0.5, %v4151_v43  ;;  %13028 = vst [vmem:[#allocation162_spill] sm:$0xff] %v10461_v62  ;;  %v10467_v42 = vld [vmem:[#allocation14 + $0x4c] ss:$16 sps:$4 sm:$0xff]  }
 0x7f2   :  { %7789 = vtanh.f32 %v4162_v15  ;;  %13030 = vst [vmem:[#allocation165_spill] sm:$0xff] %v10467_v42  ;;  %v10473_v43 = vld [vmem:[#allocation14 + $0x48] ss:$16 sps:$4 sm:$0xff]  }
 0x7f3   :  { %7791 = vtanh.f32 %v4166_v23  ;;  %13032 = vst [vmem:[#allocation175_spill] sm:$0xff] %v10473_v43 }
 0x7f4   :  { %7793 = vtanh.f32 %v4150_v51  ;;  %v10470_v51 = vld [vmem:[#allocation14 + $0x40] ss:$16 sps:$4 sm:$0xff]  }
 0x7f5   :  { %7795 = vtanh.f32 %v4171_v61  ;;  %v10453_v61 = vld [vmem:[#allocation14 + $0x2c] ss:$16 sps:$4 sm:$0xff]   ;;  %13031 = vst [vmem:[#allocation166_spill] sm:$0xff] %v10470_v51 }
 0x7f6   :  { %13026 = vst [vmem:[#allocation159_spill] sm:$0xff] %v10453_v61 }
 0x7fc   :  { %v7790_v13 = vpop.eup %7789 }
 0x7fd   :  { %v7792_v21 = vpop.eup %7791  ;;  %v4164_v36 = vmul.f32 0.5, %v7790_v13  ;;  %v10450_v13 = vld [vmem:[#allocation14 + $0x24] ss:$16 sps:$4 sm:$0xff]  }
 0x7fe   :  { %v4168_v10 = vmul.f32 0.5, %v7792_v21  ;;  %v7794_v59 = vpop.eup %7793  ;;  %v10476_v21 = vld [vmem:[#allocation14 + $0x64] ss:$16 sps:$4 sm:$0xff]  }
 0x7ff   :  { %v4165_v17 = vadd.f32 0.5, %v4164_v36  ;;  %v7796_v30 = vpop.eup %7795  ;;  %v10444_v36 = vld [vmem:[#allocation14] ss:$16 sps:$4 sm:$0xff]   ;;  %13033 = vst [vmem:[#allocation176_spill] sm:$0xff] %v10476_v21 }
 0x800   :  { %v4169_v53 = vadd.f32 0.5, %v4168_v10  ;;  %v4173_v15 = vmul.f32 0.5, %v7796_v30  ;;  %v10479_v10 = vld [vmem:[#allocation14 + $0x6c] ss:$16 sps:$4 sm:$0xff]   ;;  %v10497_v30 = vld [vmem:[#allocation14 + $0x88] ss:$16 sps:$4 sm:$0xff]  }
 0x801   :  { %v4176_v60 = vmul.f32 %v7794_v59, %v4165_v17  ;;  %13034 = vst [vmem:[#allocation140_spill] sm:$0xff] %v10479_v10  ;;  %v10482_v17 = vld [vmem:[#allocation14 + $0x60] ss:$16 sps:$4 sm:$0xff]   ;;  %v10485_v59 = vld [vmem:[#allocation14 + $0x68] ss:$16 sps:$4 sm:$0xff]   ;;  %13040 = vst [vmem:[#allocation186_spill] sm:$0xff] %v10497_v30 }
 0x802   :  { %v4175_v6 = vmul.f32 %v4169_v53, %v10145_v38  ;;  %v4174_v23 = vadd.f32 0.5, %v4173_v15  ;;  %v10447_v38 = vld [vmem:[#allocation14 + $0x8] ss:$16 sps:$4 sm:$0xff]   ;;  %13035 = vst [vmem:[#allocation170_spill] sm:$0xff] %v10482_v17  ;;  %13036 = vst [vmem:[#allocation129_spill] sm:$0xff] %v10485_v59 }
 0x803   :  { %v10488_v53 = vld [vmem:[#allocation14 + $0x84] ss:$16 sps:$4 sm:$0xff]  }
 0x804   :  { %v10437_v26 = vadd.f32 %v4176_v60, %v4175_v6  ;;  %13037 = vst [vmem:[#allocation168_spill] sm:$0xff] %v10488_v53  ;;  %v10491_v60 = vld [vmem:[#allocation14 + $0x8c] ss:$16 sps:$4 sm:$0xff]   ;;  %v10494_v6 = vld [vmem:[#allocation14 + $0x80] ss:$16 sps:$4 sm:$0xff]  }
 0x805   :  { %13038 = vst [vmem:[#allocation184_spill] sm:$0xff] %v10491_v60  ;;  %13039 = vst [vmem:[#allocation185_spill] sm:$0xff] %v10494_v6  ;;  %v10500_v15 = vld [vmem:[#allocation14 + $0xa4] ss:$16 sps:$4 sm:$0xff]  }
 0x806   :  { %7797 = vtanh.f32 %v10437_v26  ;;  %13041 = vst [vmem:[#allocation187_spill] sm:$0xff] %v10500_v15 }
 0x810   :  { %v7798_v34 = vpop.eup %7797 }
 0x811   :  { %v4179_v9 = vmul.f32 %v7798_v34, %v4174_v23  ;;  %v10503_v23 = vld [vmem:[#allocation14 + $0xac] ss:$16 sps:$4 sm:$0xff]   ;;  %v10506_v34 = vld [vmem:[#allocation14 + $0xa0] ss:$16 sps:$4 sm:$0xff]  }
 0x812   :  { %13042 = vst [vmem:[#allocation188_spill] sm:$0xff] %v10503_v23  ;;  %13043 = vst [vmem:[#allocation189_spill] sm:$0xff] %v10506_v34 }
 0x813   :  { %v10440_v25 = vpack.c.bf16 %v4179_v9, %v4179_v9  ;;  %v10509_v9 = vld [vmem:[#allocation14 + $0xa8] ss:$16 sps:$4 sm:$0xff]  }
 0x814   :  { %13044 = vst [vmem:[#allocation190_spill] sm:$0xff] %v10509_v9 }
 0x815   :  { %4237 = vmatmul.mubr.bf16.vlgmr.msra.gmra.mrb[76].mxu0 %v10440_v25  ;;  %4278 = vmatmul.mubr.bf16.vlgmr.msra.gmra.mrb[108].mxu1 %v10440_v25 }
 0x816   :  { %4299 = vmatpush1.bf16.msra.mxu0 %v10444_v36  ;;  %4340 = vmatpush1.bf16.msra.mxu1 %v10447_v38 }
 0x817   :  { %4300 = vmatprep.subr.bf16.mxu0 %v10450_v13  ;;  %4341 = vmatprep.subr.bf16.mxu1 %v10453_v61 }
 0x818   :  { %4330 = vmatprep.mubr.bf16.mxu0 %v12275_v47  ;;  %4371 = vmatprep.mubr.bf16.mxu1 %v12275_v47 }
 0x81a   :  { %4301 = vmatpush1.bf16.msra.mxu0 %v10458_v5  ;;  %4342 = vmatpush1.bf16.msra.mxu1 %v10461_v62  ;;  %v10528_v62 = vld [vmem:[#allocation14 + $0xe4] ss:$16 sps:$4 sm:$0xff]  }
 0x81b   :  { %4302 = vmatprep.subr.bf16.mxu0 %v10464_v44  ;;  %4343 = vmatprep.subr.bf16.mxu1 %v10467_v42 }
 0x81e   :  { %4303 = vmatpush1.bf16.msra.mxu0 %v10470_v51  ;;  %4344 = vmatpush1.bf16.msra.mxu1 %v10473_v43  ;;  %v10522_v43 = vld [vmem:[#allocation14 + $0xc0] ss:$16 sps:$4 sm:$0xff]  }
 0x81f   :  { %4304 = vmatprep.subr.bf16.mxu0 %v10476_v21  ;;  %4345 = vmatprep.subr.bf16.mxu1 %v10479_v10  ;;  %13049 = vst [vmem:[#allocation193_spill] sm:$0xff] %v10522_v43 }
 0x822   :  { %4305 = vmatpush1.bf16.msra.mxu0 %v10482_v17  ;;  %4346 = vmatpush1.bf16.msra.mxu1 %v10485_v59 }
 0x823   :  { %4306 = vmatprep.subr.bf16.mxu0 %v10488_v53  ;;  %4347 = vmatprep.subr.bf16.mxu1 %v10491_v60 }
 0x826   :  { %4307 = vmatpush1.bf16.msra.mxu0 %v10494_v6  ;;  %4348 = vmatpush1.bf16.msra.mxu1 %v10497_v30  ;;  %v10512_v6 = vld [vmem:[#allocation14 + $0xc4] ss:$16 sps:$4 sm:$0xff]   ;;  %v10515_v30 = vld [vmem:[#allocation14 + $0xcc] ss:$16 sps:$4 sm:$0xff]  }
 0x827   :  { %4308 = vmatprep.subr.bf16.mxu0 %v10500_v15  ;;  %4349 = vmatprep.subr.bf16.mxu1 %v10503_v23  ;;  %13045 = vst [vmem:[#allocation191_spill] sm:$0xff] %v10512_v6  ;;  %13046 = vst [vmem:[#allocation192_spill] sm:$0xff] %v10515_v30  ;;  %v13047_v15 = vld [vmem:[#allocation144_spill] sm:$0xff] }
 0x828   :  { %v4154_v60 = vunpack.c.l.bf16 %v13047_v15  ;;  %v13048_v23 = vld [vmem:[#allocation180_spill] sm:$0xff]  ;;  %v4155_v17 = vunpack.c.h.bf16 %v13047_v15 }
 0x829   :  { %v4156_v59 = vunpack.c.l.bf16 %v13048_v23 }
 0x82a   :  { %4309 = vmatpush1.bf16.msra.mxu0 %v10506_v34  ;;  %4350 = vmatpush1.bf16.msra.mxu1 %v10509_v9  ;;  %v4157_v9 = vunpack.c.h.bf16 %v13048_v23 }
 0x82b   :  { %4310 = vmatprep.subr.bf16.mxu0 %v10512_v6  ;;  %4351 = vmatprep.subr.bf16.mxu1 %v10515_v30  ;;  %v10525_v6 = vld [vmem:[#allocation14 + $0xc8] ss:$16 sps:$4 sm:$0xff]  }
 0x82c   :  { %13050 = vst [vmem:[#allocation194_spill] sm:$0xff] %v10525_v6 }
 0x82d   :  { %v4094_v53 = vpop.f32.mrb[84].mxu0 }
 0x82e   :  { %v4158_v34 = vadd.f32 %v4154_v60, %v4094_v53  ;;  %v4135_v10 = vpop.f32.mrb[116].mxu1  ;;  %v4096_v21 = vpop.f32.mrb[85].mxu0  ;;  %4311 = vmatpush1.bf16.msra.mxu0 %v10522_v43  ;;  %4352 = vmatpush1.bf16.msra.mxu1 %v10525_v6  ;;  %v10531_v53 = vld [vmem:[#allocation14 + $0xec] ss:$16 sps:$4 sm:$0xff]   ;;  %v10534_v6 = vld [vmem:[#allocation14 + $0xe0] ss:$16 sps:$4 sm:$0xff]  }
 0x82f   :  { %v4160_v30 = vadd.f32 %v4156_v59, %v4135_v10  ;;  %v4159_v51 = vadd.f32 %v4155_v17, %v4096_v21  ;;  %v4137_v42 = vpop.f32.mrb[117].mxu1  ;;  %v4098_v44 = vpop.f32.mrb[86].mxu0  ;;  %4312 = vmatprep.subr.bf16.mxu0 %v10528_v62  ;;  %4353 = vmatprep.subr.bf16.mxu1 %v10531_v53 }
 0x830   :  { %v4180_v60 = vmul.f32 0.5, %v4158_v34  ;;  %v4161_v15 = vadd.f32 %v4157_v9, %v4137_v42  ;;  %v4139_v23 = vpop.f32.mrb[118].mxu1  ;;  %v4099_v43 = vpop.f32.mrb[87].mxu0  ;;  %v10537_v44 = vld [vmem:[#allocation14 + $0xe8] ss:$16 sps:$4 sm:$0xff]  }
 0x831   :  { %v4184_v5 = vmul.f32 0.5, %v4159_v51  ;;  %v4140_v61 = vpop.f32.mrb[119].mxu1 }
 0x832   :  { %7799 = vtanh.f32 %v4180_v60  ;;  %4313 = vmatpush1.bf16.msra.mxu0 %v10534_v6  ;;  %4354 = vmatpush1.bf16.msra.mxu1 %v10537_v44  ;;  %v4189_v42 = vmul.f32 0.5, %v4161_v15 }
 0x833   :  { %7801 = vtanh.f32 %v4184_v5  ;;  %4388 = vmatprep.subr.bf16.mxu0 %v12893_v32  ;;  %4429 = vmatprep.subr.bf16.mxu1 %v12894_v7 }
 0x834   :  { %7803 = vtanh.f32 %v4160_v30 }
 0x835   :  { %7805 = vtanh.f32 %v4189_v42  ;;  %v13053_v42 = vld [vmem:[#allocation30_spill] sm:$0xff] }
 0x83c   :  { %v7800_v21 = vpop.eup %7799 }
 0x83d   :  { %v7802_v43 = vpop.eup %7801  ;;  %v4182_v51 = vmul.f32 0.5, %v7800_v21  ;;  %v13054_v21 = vld [vmem:[#allocation67_spill] sm:$0xff] }
 0x83e   :  { %v4186_v61 = vmul.f32 0.5, %v7802_v43  ;;  %v7804_v17 = vpop.eup %7803  ;;  %v13055_v43 = vld [vmem:[#allocation31_spill] sm:$0xff] }
 0x83f   :  { %v4183_v10 = vadd.f32 0.5, %v4182_v51  ;;  %v7806_v5 = vpop.eup %7805  ;;  %v13056_v51 = vld [vmem:[#allocation69_spill] sm:$0xff] }
 0x840   :  { %v4187_v59 = vadd.f32 0.5, %v4186_v61  ;;  %v4191_v23 = vmul.f32 0.5, %v7806_v5  ;;  %v13057_v61 = vld [vmem:[#allocation32_spill] sm:$0xff]  ;;  %v13063_v5 = vld [vmem:[#allocation35_spill] sm:$0xff] }
 0x841   :  { %v4194_v34 = vmul.f32 %v7804_v17, %v4183_v10  ;;  %v13058_v10 = vld [vmem:[#allocation71_spill] sm:$0xff]  ;;  %v13059_v17 = vld [vmem:[#allocation33_spill] sm:$0xff] }
 0x842   :  { %v4193_v9 = vmul.f32 %v4187_v59, %v10191_v54  ;;  %v4192_v7 = vadd.f32 0.5, %v4191_v23  ;;  %v13052_v54 = vld [vmem:[#allocation65_spill] sm:$0xff] }
 0x843   :  { %v13060_v59 = vld [vmem:[#allocation73_spill] sm:$0xff] }
 0x844   :  { %v10543_v60 = vadd.f32 %v4194_v34, %v4193_v9  ;;  %v13061_v34 = vld [vmem:[#allocation34_spill] sm:$0xff]  ;;  %v13062_v9 = vld [vmem:[#allocation75_spill] sm:$0xff]  ;;  %v13064_v23 = vld [vmem:[#allocation77_spill] sm:$0xff] }
 0x846   :  { %7807 = vtanh.f32 %v10543_v60 }
 0x850   :  { %v7808_v30 = vpop.eup %7807 }
 0x851   :  { %v4197_v15 = vmul.f32 %v7808_v30, %v4192_v7  ;;  %v13051_v7 = vld [vmem:[#allocation29_spill] sm:$0xff]  ;;  %v13065_v30 = vld [vmem:[#allocation36_spill] sm:$0xff] }
 0x853   :  { %v10546_v32 = vpack.c.bf16 %v4197_v15, %v4197_v15  ;;  %v13066_v15 = vld [vmem:[#allocation79_spill] sm:$0xff] }
 0x855   :  { %4331 = vmatmul.mubr.bf16.vlgmr.msra.gmra.mrb[72].mxu0 %v10546_v32  ;;  %4372 = vmatmul.mubr.bf16.vlgmr.msra.gmra.mrb[104].mxu1 %v10546_v32 }
 0x856   :  { %4389 = vmatpush1.bf16.msra.mxu0 %v8604_v14  ;;  %4430 = vmatpush1.bf16.msra.mxu1 %v8731_v63 }
 0x857   :  { %4420 = vmatprep.mubr.bf16.mxu0 %v10546_v32  ;;  %4461 = vmatprep.mubr.bf16.mxu1 %v10546_v32 }
 0x858   :  { %4390 = vmatprep.subr.bf16.mxu0 %v8607_v16  ;;  %4431 = vmatprep.subr.bf16.mxu1 %v8737_v8 }
 0x85a   :  { %4391 = vmatpush1.bf16.msra.mxu0 %v8612_v22  ;;  %4432 = vmatpush1.bf16.msra.mxu1 %v8745_v19 }
 0x85b   :  { %4392 = vmatprep.subr.bf16.mxu0 %v8616_v24  ;;  %4433 = vmatprep.subr.bf16.mxu1 %v8751_v28 }
 0x85e   :  { %4393 = vmatpush1.bf16.msra.mxu0 %v8622_v31  ;;  %4434 = vmatpush1.bf16.msra.mxu1 %v8759_v35 }
 0x85f   :  { %4394 = vmatprep.subr.bf16.mxu0 %v8625_v33  ;;  %4435 = vmatprep.subr.bf16.mxu1 %v8765_v40 }
 0x862   :  { %4395 = vmatpush1.bf16.msra.mxu0 %v8630_v39  ;;  %4436 = vmatpush1.bf16.msra.mxu1 %v8772_v57 }
 0x863   :  { %4396 = vmatprep.subr.bf16.mxu0 %v8633_v41  ;;  %4437 = vmatprep.subr.bf16.mxu1 %v8779_v1 }
 0x866   :  { %4397 = vmatpush1.bf16.msra.mxu0 %v8640_v48  ;;  %4438 = vmatpush1.bf16.msra.mxu1 %v8785_v20 }
 0x867   :  { %4398 = vmatprep.subr.bf16.mxu0 %v8643_v50  ;;  %4439 = vmatprep.subr.bf16.mxu1 %v8791_v29 }
 0x86a   :  { %4399 = vmatpush1.bf16.msra.mxu0 %v8648_v56  ;;  %4440 = vmatpush1.bf16.msra.mxu1 %v8798_v45 }
 0x86b   :  { %4400 = vmatprep.subr.bf16.mxu0 %v8651_v58  ;;  %4441 = vmatprep.subr.bf16.mxu1 %v8805_v52 }
 0x86e   :  { %4401 = vmatpush1.bf16.msra.mxu0 %v8658_v2  ;;  %4442 = vmatpush1.bf16.msra.mxu1 %v8811_v11 }
 0x86f   :  { %4402 = vmatprep.subr.bf16.mxu0 %v8661_v4  ;;  %4443 = vmatprep.subr.bf16.mxu1 %v8817_v27 }
 0x872   :  { %4403 = vmatpush1.bf16.msra.mxu0 %v8666_v12  ;;  %4444 = vmatpush1.bf16.msra.mxu1 %v8824_v0 }
 0x873   :  { %4404 = vmatprep.subr.bf16.mxu0 %v8669_v18  ;;  %4445 = vmatprep.subr.bf16.mxu1 %v12895_v49 }
 0x876   :  { %4405 = vmatpush1.bf16.msra.mxu0 %v12896_v3  ;;  %4446 = vmatpush1.bf16.msra.mxu1 %v12897_v46 }
 0x877   :  { %4406 = vmatprep.subr.bf16.mxu0 %v12898_v37  ;;  %4447 = vmatprep.subr.bf16.mxu1 %v12899_v55 }
 0x87a   :  { %4407 = vmatpush1.bf16.msra.mxu0 %v13051_v7  ;;  %4448 = vmatpush1.bf16.msra.mxu1 %v13052_v54 }
 0x87b   :  { %4408 = vmatprep.subr.bf16.mxu0 %v13053_v42  ;;  %4449 = vmatprep.subr.bf16.mxu1 %v13054_v21 }
 0x87e   :  { %4409 = vmatpush1.bf16.msra.mxu0 %v13055_v43  ;;  %4450 = vmatpush1.bf16.msra.mxu1 %v13056_v51  ;;  %v13067_v51 = vld [vmem:[#allocation37_spill] sm:$0xff] }
 0x87f   :  { %4410 = vmatprep.subr.bf16.mxu0 %v13057_v61  ;;  %4451 = vmatprep.subr.bf16.mxu1 %v13058_v10  ;;  %v13068_v61 = vld [vmem:[#allocation81_spill] sm:$0xff]  ;;  %v13069_v10 = vld [vmem:[#allocation38_spill] sm:$0xff] }
 0x882   :  { %4411 = vmatpush1.bf16.msra.mxu0 %v13059_v17  ;;  %4452 = vmatpush1.bf16.msra.mxu1 %v13060_v59  ;;  %v13070_v17 = vld [vmem:[#allocation83_spill] sm:$0xff] }
 0x883   :  { %4412 = vmatprep.subr.bf16.mxu0 %v13061_v34  ;;  %4453 = vmatprep.subr.bf16.mxu1 %v13062_v9  ;;  %v13071_v59 = vld [vmem:[#allocation39_spill] sm:$0xff]  ;;  %v13072_v34 = vld [vmem:[#allocation85_spill] sm:$0xff]  ;;  %v13073_v9 = vld [vmem:[#allocation40_spill] sm:$0xff] }
 0x886   :  { %4413 = vmatpush1.bf16.msra.mxu0 %v13063_v5  ;;  %4454 = vmatpush1.bf16.msra.mxu1 %v13064_v23  ;;  %v13074_v5 = vld [vmem:[#allocation87_spill] sm:$0xff]  ;;  %v13075_v23 = vld [vmem:[#allocation41_spill] sm:$0xff] }
 0x887   :  { %4414 = vmatprep.subr.bf16.mxu0 %v13065_v30  ;;  %4455 = vmatprep.subr.bf16.mxu1 %v13066_v15  ;;  %v13076_v30 = vld [vmem:[#allocation89_spill] sm:$0xff]  ;;  %v13077_v15 = vld [vmem:[#allocation43_spill] sm:$0xff] }
 0x88a   :  { %4415 = vmatpush1.bf16.msra.mxu0 %v13067_v51  ;;  %4456 = vmatpush1.bf16.msra.mxu1 %v13068_v61  ;;  %v13078_v51 = vld [vmem:[#allocation91_spill] sm:$0xff] }
 0x88b   :  { %4416 = vmatprep.subr.bf16.mxu0 %v13069_v10  ;;  %4457 = vmatprep.subr.bf16.mxu1 %v13070_v17  ;;  %v13079_v17 = vld [vmem:[#allocation44_spill] sm:$0xff]  ;;  %v13089_v10 = vld [vmem:[#allocation49_spill] sm:$0xff] }
 0x88e   :  { %4417 = vmatpush1.bf16.msra.mxu0 %v13071_v59  ;;  %4458 = vmatpush1.bf16.msra.mxu1 %v13072_v34  ;;  %v13080_v34 = vld [vmem:[#allocation92_spill] sm:$0xff] }
 0x88f   :  { %4418 = vmatprep.subr.bf16.mxu0 %v13073_v9  ;;  %4459 = vmatprep.subr.bf16.mxu1 %v13074_v5  ;;  %v13081_v5 = vld [vmem:[#allocation45_spill] sm:$0xff]  ;;  %v13086_v9 = vld [vmem:[#allocation95_spill] sm:$0xff]  ;;  %v13087_v59 = vld [vmem:[#allocation48_spill] sm:$0xff] }
 0x892   :  { %4419 = vmatpush1.bf16.msra.mxu0 %v13075_v23  ;;  %4460 = vmatpush1.bf16.msra.mxu1 %v13076_v30  ;;  %v13082_v23 = vld [vmem:[#allocation93_spill] sm:$0xff]  ;;  %v13083_v30 = vld [vmem:[#allocation46_spill] sm:$0xff] }
 0x893   :  { %4470 = vmatprep.subr.bf16.mxu0 %v13077_v15  ;;  %4511 = vmatprep.subr.bf16.mxu1 %v13078_v51  ;;  %v13084_v15 = vld [vmem:[#allocation94_spill] sm:$0xff]  ;;  %v13085_v51 = vld [vmem:[#allocation47_spill] sm:$0xff] }
 0x895   :  { %4421 = vmatmul.mubr.bf16.vlgmr.msra.gmra.mrb[88].mxu0 %v10440_v25  ;;  %4462 = vmatmul.mubr.bf16.vlgmr.msra.gmra.mrb[120].mxu1 %v10440_v25 }
 0x896   :  { %4471 = vmatpush1.bf16.msra.mxu0 %v13079_v17  ;;  %4502 = vmatprep.mubr.bf16.mxu0 %v10546_v32  ;;  %v13088_v17 = vld [vmem:[#allocation96_spill] sm:$0xff] }
 0x897   :  { %4512 = vmatpush1.bf16.msra.mxu1 %v13080_v34  ;;  %4543 = vmatprep.mubr.bf16.mxu1 %v10546_v32  ;;  %v13090_v34 = vld [vmem:[#allocation97_spill] sm:$0xff]  ;;  %v13091_v32 = vld [vmem:[#allocation50_spill] sm:$0xff] }
 0x898   :  { %4472 = vmatprep.subr.bf16.mxu0 %v13081_v5  ;;  %4513 = vmatprep.subr.bf16.mxu1 %v13082_v23  ;;  %v13092_v5 = vld [vmem:[#allocation98_spill] sm:$0xff]  ;;  %v13093_v23 = vld [vmem:[#allocation51_spill] sm:$0xff] }
 0x89a   :  { %4473 = vmatpush1.bf16.msra.mxu0 %v13083_v30  ;;  %v13094_v30 = vld [vmem:[#allocation99_spill] sm:$0xff] }
 0x89b   :  { %4514 = vmatpush1.bf16.msra.mxu1 %v13084_v15  ;;  %4474 = vmatprep.subr.bf16.mxu0 %v13085_v51  ;;  %v13095_v15 = vld [vmem:[#allocation52_spill] sm:$0xff] }
 0x89c   :  { %4515 = vmatprep.subr.bf16.mxu1 %v13086_v9  ;;  %v13096_v51 = vld [vmem:[#allocation100_spill] sm:$0xff]  ;;  %v13097_v9 = vld [vmem:[#allocation53_spill] sm:$0xff] }
 0x89e   :  { %4475 = vmatpush1.bf16.msra.mxu0 %v13087_v59  ;;  %v13098_v59 = vld [vmem:[#allocation101_spill] sm:$0xff] }
 0x89f   :  { %4516 = vmatpush1.bf16.msra.mxu1 %v13088_v17  ;;  %4476 = vmatprep.subr.bf16.mxu0 %v13089_v10  ;;  %v13099_v17 = vld [vmem:[#allocation54_spill] sm:$0xff] }
 0x8a0   :  { %4517 = vmatprep.subr.bf16.mxu1 %v13090_v34  ;;  %v13100_v10 = vld [vmem:[#allocation102_spill] sm:$0xff]  ;;  %v13101_v34 = vld [vmem:[#allocation55_spill] sm:$0xff] }
 0x8a2   :  { %4477 = vmatpush1.bf16.msra.mxu0 %v13091_v32  ;;  %v13102_v32 = vld [vmem:[#allocation103_spill] sm:$0xff] }
 0x8a3   :  { %4518 = vmatpush1.bf16.msra.mxu1 %v13092_v5  ;;  %4478 = vmatprep.subr.bf16.mxu0 %v13093_v23  ;;  %v13103_v5 = vld [vmem:[#allocation56_spill] sm:$0xff] }
 0x8a4   :  { %4519 = vmatprep.subr.bf16.mxu1 %v13094_v30  ;;  %v13104_v23 = vld [vmem:[#allocation104_spill] sm:$0xff]  ;;  %v13105_v30 = vld [vmem:[#allocation57_spill] sm:$0xff] }
 0x8a6   :  { %4479 = vmatpush1.bf16.msra.mxu0 %v13095_v15  ;;  %v13106_v15 = vld [vmem:[#allocation105_spill] sm:$0xff] }
 0x8a7   :  { %4520 = vmatpush1.bf16.msra.mxu1 %v13096_v51  ;;  %4480 = vmatprep.subr.bf16.mxu0 %v13097_v9  ;;  %v13107_v51 = vld [vmem:[#allocation58_spill] sm:$0xff] }
 0x8a8   :  { %4521 = vmatprep.subr.bf16.mxu1 %v13098_v59  ;;  %v13108_v9 = vld [vmem:[#allocation106_spill] sm:$0xff]  ;;  %v13109_v59 = vld [vmem:[#allocation60_spill] sm:$0xff] }
 0x8aa   :  { %4481 = vmatpush1.bf16.msra.mxu0 %v13099_v17  ;;  %v13110_v17 = vld [vmem:[#allocation107_spill] sm:$0xff] }
 0x8ab   :  { %4522 = vmatpush1.bf16.msra.mxu1 %v13100_v10  ;;  %4482 = vmatprep.subr.bf16.mxu0 %v13101_v34  ;;  %v13111_v10 = vld [vmem:[#allocation62_spill] sm:$0xff]  ;;  %v13112_v34 = vld [vmem:[#allocation108_spill] sm:$0xff] }
 0x8ac   :  { %4523 = vmatprep.subr.bf16.mxu1 %v13102_v32  ;;  %v13113_v32 = vld [vmem:[#allocation64_spill] sm:$0xff] }
 0x8ae   :  { %4483 = vmatpush1.bf16.msra.mxu0 %v13103_v5  ;;  %v13114_v5 = vld [vmem:[#allocation109_spill] sm:$0xff] }
 0x8af   :  { %4524 = vmatpush1.bf16.msra.mxu1 %v13104_v23  ;;  %4484 = vmatprep.subr.bf16.mxu0 %v13105_v30  ;;  %v13115_v23 = vld [vmem:[#allocation66_spill] sm:$0xff] }
 0x8b0   :  { %4525 = vmatprep.subr.bf16.mxu1 %v13106_v15  ;;  %v13116_v30 = vld [vmem:[#allocation110_spill] sm:$0xff]  ;;  %v13117_v15 = vld [vmem:[#allocation68_spill] sm:$0xff] }
 0x8b2   :  { %4485 = vmatpush1.bf16.msra.mxu0 %v13107_v51  ;;  %v13118_v51 = vld [vmem:[#allocation111_spill] sm:$0xff] }
 0x8b3   :  { %4526 = vmatpush1.bf16.msra.mxu1 %v13108_v9  ;;  %4486 = vmatprep.subr.bf16.mxu0 %v13109_v59  ;;  %v13119_v9 = vld [vmem:[#allocation70_spill] sm:$0xff]  ;;  %v13120_v59 = vld [vmem:[#allocation112_spill] sm:$0xff] }
 0x8b4   :  { %4527 = vmatprep.subr.bf16.mxu1 %v13110_v17  ;;  %v13121_v17 = vld [vmem:[#allocation72_spill] sm:$0xff] }
 0x8b6   :  { %4487 = vmatpush1.bf16.msra.mxu0 %v13111_v10  ;;  %v13122_v10 = vld [vmem:[#allocation113_spill] sm:$0xff] }
 0x8b7   :  { %4528 = vmatpush1.bf16.msra.mxu1 %v13112_v34  ;;  %4488 = vmatprep.subr.bf16.mxu0 %v13113_v32  ;;  %v13123_v34 = vld [vmem:[#allocation74_spill] sm:$0xff] }
 0x8b8   :  { %4529 = vmatprep.subr.bf16.mxu1 %v13114_v5  ;;  %v13124_v32 = vld [vmem:[#allocation114_spill] sm:$0xff]  ;;  %v13125_v5 = vld [vmem:[#allocation76_spill] sm:$0xff] }
 0x8ba   :  { %4489 = vmatpush1.bf16.msra.mxu0 %v13115_v23  ;;  %v13126_v23 = vld [vmem:[#allocation115_spill] sm:$0xff] }
 0x8bb   :  { %4530 = vmatpush1.bf16.msra.mxu1 %v13116_v30  ;;  %4490 = vmatprep.subr.bf16.mxu0 %v13117_v15  ;;  %v13127_v30 = vld [vmem:[#allocation78_spill] sm:$0xff]  ;;  %v13128_v15 = vld [vmem:[#allocation116_spill] sm:$0xff] }
 0x8bc   :  { %4531 = vmatprep.subr.bf16.mxu1 %v13118_v51  ;;  %v13129_v51 = vld [vmem:[#allocation80_spill] sm:$0xff] }
 0x8be   :  { %4491 = vmatpush1.bf16.msra.mxu0 %v13119_v9  ;;  %v13130_v9 = vld [vmem:[#allocation117_spill] sm:$0xff] }
 0x8bf   :  { %4532 = vmatpush1.bf16.msra.mxu1 %v13120_v59  ;;  %4492 = vmatprep.subr.bf16.mxu0 %v13121_v17  ;;  %v13131_v59 = vld [vmem:[#allocation82_spill] sm:$0xff] }
 0x8c0   :  { %4533 = vmatprep.subr.bf16.mxu1 %v13122_v10  ;;  %v13132_v17 = vld [vmem:[#allocation118_spill] sm:$0xff]  ;;  %v13133_v10 = vld [vmem:[#allocation84_spill] sm:$0xff] }
 0x8c2   :  { %4493 = vmatpush1.bf16.msra.mxu0 %v13123_v34  ;;  %v13134_v34 = vld [vmem:[#allocation119_spill] sm:$0xff] }
 0x8c3   :  { %4534 = vmatpush1.bf16.msra.mxu1 %v13124_v32  ;;  %4494 = vmatprep.subr.bf16.mxu0 %v13125_v5  ;;  %v13135_v32 = vld [vmem:[#allocation86_spill] sm:$0xff]  ;;  %v13136_v5 = vld [vmem:[#allocation120_spill] sm:$0xff] }
 0x8c4   :  { %4535 = vmatprep.subr.bf16.mxu1 %v13126_v23  ;;  %v13137_v23 = vld [vmem:[#allocation88_spill] sm:$0xff] }
 0x8c6   :  { %4495 = vmatpush1.bf16.msra.mxu0 %v13127_v30  ;;  %v13138_v30 = vld [vmem:[#allocation121_spill] sm:$0xff] }
 0x8c7   :  { %4536 = vmatpush1.bf16.msra.mxu1 %v13128_v15  ;;  %4496 = vmatprep.subr.bf16.mxu0 %v13129_v51  ;;  %v13139_v15 = vld [vmem:[#allocation90_spill] sm:$0xff] }
 0x8c8   :  { %4537 = vmatprep.subr.bf16.mxu1 %v13130_v9  ;;  %v13140_v51 = vld [vmem:[#allocation122_spill] sm:$0xff] }
 0x8c9   :  { %v10682_v9 = vld [vmem:[#allocation13 + $0x4] ss:$16 sps:$4 sm:$0xff]  }
 0x8ca   :  { %4497 = vmatpush1.bf16.msra.mxu0 %v13131_v59  ;;  %13141 = vst [vmem:[#allocation195_spill] sm:$0xff] %v10682_v9  ;;  %v13176_v59 = vld [vmem:[#allocation172_spill] sm:$0xff] }
 0x8cb   :  { %4538 = vmatpush1.bf16.msra.mxu1 %v13132_v17  ;;  %4498 = vmatprep.subr.bf16.mxu0 %v13133_v10  ;;  %v10685_v17 = vld [vmem:[#allocation13 + $0xc] ss:$16 sps:$4 sm:$0xff]  }
 0x8cc   :  { %4539 = vmatprep.subr.bf16.mxu1 %v13134_v34  ;;  %13142 = vst [vmem:[#allocation196_spill] sm:$0xff] %v10685_v17  ;;  %v13156_v34 = vld [vmem:[#allocation131_spill] sm:$0xff]  ;;  %v13157_v10 = vld [vmem:[#allocation133_spill] sm:$0xff] }
 0x8ce   :  { %4499 = vmatpush1.bf16.msra.mxu0 %v13135_v32  ;;  %v13150_v32 = vld [vmem:[#allocation182_spill] sm:$0xff] }
 0x8cf   :  { %4540 = vmatpush1.bf16.msra.mxu1 %v13136_v5  ;;  %4500 = vmatprep.subr.bf16.mxu0 %v13137_v23  ;;  %v13143_v5 = vld [vmem:[#allocation205_spill] sm:$0xff]  ;;  %v13144_v23 = vld [vmem:[#allocation206_spill] sm:$0xff] }
 0x8d0   :  { %4541 = vmatprep.subr.bf16.mxu1 %v13138_v30  ;;  %v13145_v30 = vld [vmem:[#allocation207_spill] sm:$0xff] }
 0x8d2   :  { %4501 = vmatpush1.bf16.msra.mxu0 %v13139_v15  ;;  %v13146_v15 = vld [vmem:[#allocation208_spill] sm:$0xff] }
 0x8d3   :  { %4542 = vmatpush1.bf16.msra.mxu1 %v13140_v51  ;;  %4614 = vmatprep.subr.bf16.mxu0 %v10682_v9  ;;  %v13147_v9 = vld [vmem:[#allocation137_spill] sm:$0xff] }
 0x8d4   :  { %4655 = vmatprep.subr.bf16.mxu1 %v10685_v17  ;;  %v13148_v51 = vld [vmem:[#allocation169_spill] sm:$0xff]  ;;  %v13149_v17 = vld [vmem:[#allocation156_spill] sm:$0xff] }
 0x8d5   :  { %4503 = vmatmul.mubr.bf16.vlgmr.msra.gmra.mrb[92].mxu0 %v10440_v25 }
 0x8d6   :  { %4544 = vmatmul.mubr.bf16.vlgmr.msra.gmra.mrb[124].mxu1 %v10440_v25  ;;  %4615 = vmatpush1.bf16.msra.mxu0 %v13143_v5  ;;  %v13151_v25 = vld [vmem:[#allocation124_spill] sm:$0xff]  ;;  %v13152_v5 = vld [vmem:[#allocation125_spill] sm:$0xff] }
 0x8d7   :  { %4656 = vmatpush1.bf16.msra.mxu1 %v13144_v23  ;;  %4616 = vmatprep.subr.bf16.mxu0 %v13145_v30  ;;  %v13153_v23 = vld [vmem:[#allocation127_spill] sm:$0xff]  ;;  %v13154_v30 = vld [vmem:[#allocation128_spill] sm:$0xff] }
 0x8d8   :  { %4657 = vmatprep.subr.bf16.mxu1 %v13146_v15  ;;  %4646 = vmatprep.mubr.bf16.mxu0 %v12275_v47  ;;  %v13155_v15 = vld [vmem:[#allocation130_spill] sm:$0xff] }
 0x8d9   :  { %4687 = vmatprep.mubr.bf16.mxu1 %v12275_v47 }
 0x8da   :  { %4617 = vmatpush1.bf16.msra.mxu0 %v13147_v9  ;;  %v13158_v9 = vld [vmem:[#allocation134_spill] sm:$0xff] }
 0x8db   :  { %4658 = vmatpush1.bf16.msra.mxu1 %v13148_v51  ;;  %4618 = vmatprep.subr.bf16.mxu0 %v13149_v17  ;;  %v13159_v51 = vld [vmem:[#allocation135_spill] sm:$0xff]  ;;  %v13160_v17 = vld [vmem:[#allocation136_spill] sm:$0xff] }
 0x8dc   :  { %4659 = vmatprep.subr.bf16.mxu1 %v13150_v32  ;;  %v13161_v32 = vld [vmem:[#allocation138_spill] sm:$0xff] }
 0x8de   :  { %4619 = vmatpush1.bf16.msra.mxu0 %v13151_v25  ;;  %v13162_v25 = vld [vmem:[#allocation139_spill] sm:$0xff] }
 0x8df   :  { %4660 = vmatpush1.bf16.msra.mxu1 %v13152_v5  ;;  %4620 = vmatprep.subr.bf16.mxu0 %v13153_v23  ;;  %v13163_v5 = vld [vmem:[#allocation141_spill] sm:$0xff]  ;;  %v13164_v23 = vld [vmem:[#allocation142_spill] sm:$0xff] }
 0x8e0   :  { %4661 = vmatprep.subr.bf16.mxu1 %v13154_v30  ;;  %v13165_v30 = vld [vmem:[#allocation145_spill] sm:$0xff] }
 0x8e2   :  { %4621 = vmatpush1.bf16.msra.mxu0 %v13155_v15  ;;  %v13166_v15 = vld [vmem:[#allocation146_spill] sm:$0xff] }
 0x8e3   :  { %4662 = vmatpush1.bf16.msra.mxu1 %v13156_v34  ;;  %4622 = vmatprep.subr.bf16.mxu0 %v13157_v10  ;;  %v13167_v34 = vld [vmem:[#allocation147_spill] sm:$0xff]  ;;  %v13168_v10 = vld [vmem:[#allocation148_spill] sm:$0xff] }
 0x8e4   :  { %4663 = vmatprep.subr.bf16.mxu1 %v13158_v9  ;;  %v13169_v9 = vld [vmem:[#allocation150_spill] sm:$0xff] }
 0x8e6   :  { %4623 = vmatpush1.bf16.msra.mxu0 %v13159_v51  ;;  %v13170_v51 = vld [vmem:[#allocation151_spill] sm:$0xff] }
 0x8e7   :  { %4664 = vmatpush1.bf16.msra.mxu1 %v13160_v17  ;;  %4624 = vmatprep.subr.bf16.mxu0 %v13161_v32  ;;  %v13171_v17 = vld [vmem:[#allocation153_spill] sm:$0xff]  ;;  %v13172_v32 = vld [vmem:[#allocation154_spill] sm:$0xff] }
 0x8e8   :  { %4665 = vmatprep.subr.bf16.mxu1 %v13162_v25  ;;  %v13173_v25 = vld [vmem:[#allocation157_spill] sm:$0xff] }
 0x8ea   :  { %4625 = vmatpush1.bf16.msra.mxu0 %v13163_v5  ;;  %v13174_v5 = vld [vmem:[#allocation158_spill] sm:$0xff] }
 0x8eb   :  { %4666 = vmatpush1.bf16.msra.mxu1 %v13164_v23  ;;  %4626 = vmatprep.subr.bf16.mxu0 %v13165_v30  ;;  %v13175_v23 = vld [vmem:[#allocation152_spill] sm:$0xff] }
 0x8ec   :  { %4667 = vmatprep.subr.bf16.mxu1 %v13166_v15  ;;  %v4554_v30 = vunpack.c.l.bf16 %v13175_v23  ;;  %v4556_v15 = vunpack.c.l.bf16 %v13176_v59 }
 0x8ee   :  { %4627 = vmatpush1.bf16.msra.mxu0 %v13167_v34 }
 0x8ef   :  { %4668 = vmatpush1.bf16.msra.mxu1 %v13168_v10  ;;  %4628 = vmatprep.subr.bf16.mxu0 %v13169_v9  ;;  %v4555_v10 = vunpack.c.h.bf16 %v13175_v23  ;;  %v4557_v9 = vunpack.c.h.bf16 %v13176_v59 }
 0x8f0   :  { %4669 = vmatprep.subr.bf16.mxu1 %v13170_v51 }
 0x8f2   :  { %4629 = vmatpush1.bf16.msra.mxu0 %v13171_v17 }
 0x8f3   :  { %4670 = vmatpush1.bf16.msra.mxu1 %v13172_v32  ;;  %4708 = vmatprep.subr.bf16.mxu0 %v13173_v25 }
 0x8f4   :  { %4749 = vmatprep.subr.bf16.mxu1 %v13174_v5 }
 0x968   :  { %v4422_v61 = vpop.f32.mrb[88].mxu0  ;;  %v4463_v34 = vpop.f32.mrb[120].mxu1 }
 0x969   :  { %v4558_v43 = vadd.f32 %v4554_v30, %v4422_v61  ;;  %v4560_v51 = vadd.f32 %v4556_v15, %v4463_v34  ;;  %v4424_v21 = vpop.f32.mrb[89].mxu0  ;;  %v4465_v17 = vpop.f32.mrb[121].mxu1 }
 0x96a   :  { %v4559_v42 = vadd.f32 %v4555_v10, %v4424_v21  ;;  %v4561_v32 = vadd.f32 %v4557_v9, %v4465_v17  ;;  %v4426_v54 = vpop.f32.mrb[90].mxu0  ;;  %v4467_v25 = vpop.f32.mrb[122].mxu1  ;;  %v13181_v9 = vld [vmem:[#allocation165_spill] sm:$0xff]  ;;  %v13186_v17 = vld [vmem:[#allocation170_spill] sm:$0xff] }
 0x96b   :  { %v4572_v7 = vmul.f32 0.5, %v4558_v43  ;;  %v4427_v5 = vpop.f32.mrb[91].mxu0  ;;  %v4468_v55 = vpop.f32.mrb[123].mxu1  ;;  %v13188_v25 = vld [vmem:[#allocation168_spill] sm:$0xff] }
 0x96c   :  { %v4576_v37 = vmul.f32 0.5, %v4559_v42  ;;  %v4581_v46 = vmul.f32 0.5, %v4561_v32  ;;  %v13187_v32 = vld [vmem:[#allocation129_spill] sm:$0xff]  ;;  %v13189_v5 = vld [vmem:[#allocation184_spill] sm:$0xff] }
 0x96d   :  { %7809 = vtanh.f32 %v4572_v7 }
 0x96e   :  { %7811 = vtanh.f32 %v4576_v37 }
 0x96f   :  { %7813 = vtanh.f32 %v4560_v51  ;;  %v13182_v51 = vld [vmem:[#allocation166_spill] sm:$0xff] }
 0x970   :  { %7815 = vtanh.f32 %v4581_v46  ;;  %v13179_v46 = vld [vmem:[#allocation162_spill] sm:$0xff] }
 0x977   :  { %v7810_v3 = vpop.eup %7809 }
 0x978   :  { %v7812_v23 = vpop.eup %7811  ;;  %v4574_v49 = vmul.f32 0.5, %v7810_v3  ;;  %v13178_v3 = vld [vmem:[#allocation160_spill] sm:$0xff] }
 0x979   :  { %v4578_v59 = vmul.f32 0.5, %v7812_v23  ;;  %v7814_v30 = vpop.eup %7813  ;;  %v13190_v23 = vld [vmem:[#allocation185_spill] sm:$0xff] }
 0x97a   :  { %v4575_v61 = vadd.f32 0.5, %v4574_v49  ;;  %v7816_v55 = vpop.eup %7815  ;;  %v13177_v49 = vld [vmem:[#allocation159_spill] sm:$0xff] }
 0x97b   :  { %v4579_v15 = vadd.f32 0.5, %v4578_v59  ;;  %v4583_v7 = vmul.f32 0.5, %v7816_v55  ;;  %v13191_v59 = vld [vmem:[#allocation186_spill] sm:$0xff]  ;;  %v13197_v55 = vld [vmem:[#allocation192_spill] sm:$0xff] }
 0x97c   :  { %v4586_v21 = vmul.f32 %v7814_v30, %v4575_v61  ;;  %v13192_v61 = vld [vmem:[#allocation187_spill] sm:$0xff]  ;;  %v13193_v30 = vld [vmem:[#allocation188_spill] sm:$0xff] }
 0x97d   :  { %v4585_v54 = vmul.f32 %v4579_v15, %v10437_v26  ;;  %v4584_v37 = vadd.f32 0.5, %v4583_v7  ;;  %v13180_v26 = vld [vmem:[#allocation163_spill] sm:$0xff]  ;;  %v13194_v15 = vld [vmem:[#allocation189_spill] sm:$0xff] }
 0x97e   :  { %v13198_v7 = vld [vmem:[#allocation143_spill] sm:$0xff] }
 0x97f   :  { %v10729_v34 = vadd.f32 %v4586_v21, %v4585_v54  ;;  %v13195_v21 = vld [vmem:[#allocation190_spill] sm:$0xff]  ;;  %v13196_v54 = vld [vmem:[#allocation191_spill] sm:$0xff] }
 0x981   :  { %7817 = vtanh.f32 %v10729_v34 }
 0x98b   :  { %v7818_v42 = vpop.eup %7817 }
 0x98c   :  { %v4589_v43 = vmul.f32 %v7818_v42, %v4584_v37  ;;  %v4564_v37 = vunpack.c.l.bf16 %v13198_v7 }
 0x98e   :  { %v10732_v10 = vpack.c.bf16 %v4589_v43, %v4589_v43  ;;  %v13199_v43 = vld [vmem:[#allocation179_spill] sm:$0xff] }
 0x990   :  { %4647 = vmatmul.mubr.bf16.vlgmr.msra.gmra.mrb[60].mxu0 %v10732_v10  ;;  %4688 = vmatmul.mubr.bf16.vlgmr.msra.gmra.mrb[92].mxu1 %v10732_v10 }
 0x991   :  { %4709 = vmatpush1.bf16.msra.mxu0 %v10444_v36  ;;  %4750 = vmatpush1.bf16.msra.mxu1 %v10447_v38  ;;  %v13183_v36 = vld [vmem:[#allocation175_spill] sm:$0xff]  ;;  %v13184_v38 = vld [vmem:[#allocation176_spill] sm:$0xff] }
 0x992   :  { %4710 = vmatprep.subr.bf16.mxu0 %v10450_v13  ;;  %4751 = vmatprep.subr.bf16.mxu1 %v13177_v49  ;;  %v13185_v13 = vld [vmem:[#allocation140_spill] sm:$0xff]  ;;  %v4566_v49 = vunpack.c.l.bf16 %v13199_v43 }
 0x993   :  { %4740 = vmatprep.mubr.bf16.mxu0 %v12275_v47  ;;  %4781 = vmatprep.mubr.bf16.mxu1 %v12275_v47 }
 0x995   :  { %4711 = vmatpush1.bf16.msra.mxu0 %v13178_v3  ;;  %4752 = vmatpush1.bf16.msra.mxu1 %v13179_v46  ;;  %v4565_v3 = vunpack.c.h.bf16 %v13198_v7 }
 0x996   :  { %4712 = vmatprep.subr.bf16.mxu0 %v13180_v26  ;;  %4753 = vmatprep.subr.bf16.mxu1 %v13181_v9 }
 0x999   :  { %4713 = vmatpush1.bf16.msra.mxu0 %v13182_v51  ;;  %4754 = vmatpush1.bf16.msra.mxu1 %v13183_v36  ;;  %v4567_v51 = vunpack.c.h.bf16 %v13199_v43  ;;  %v13200_v36 = vld [vmem:[#allocation193_spill] sm:$0xff] }
 0x99a   :  { %4714 = vmatprep.subr.bf16.mxu0 %v13184_v38  ;;  %4755 = vmatprep.subr.bf16.mxu1 %v13185_v13  ;;  %v13201_v38 = vld [vmem:[#allocation194_spill] sm:$0xff] }
 0x99d   :  { %4715 = vmatpush1.bf16.msra.mxu0 %v13186_v17  ;;  %4756 = vmatpush1.bf16.msra.mxu1 %v13187_v32 }
 0x99e   :  { %4716 = vmatprep.subr.bf16.mxu0 %v13188_v25  ;;  %4757 = vmatprep.subr.bf16.mxu1 %v13189_v5 }
 0x9a1   :  { %4717 = vmatpush1.bf16.msra.mxu0 %v13190_v23  ;;  %4758 = vmatpush1.bf16.msra.mxu1 %v13191_v59 }
 0x9a2   :  { %4718 = vmatprep.subr.bf16.mxu0 %v13192_v61  ;;  %4759 = vmatprep.subr.bf16.mxu1 %v13193_v30 }
 0x9a5   :  { %4719 = vmatpush1.bf16.msra.mxu0 %v13194_v15  ;;  %4760 = vmatpush1.bf16.msra.mxu1 %v13195_v21  ;;  %v13202_v21 = vld [vmem:[#allocation26_spill] sm:$0xff] }
 0x9a6   :  { %4720 = vmatprep.subr.bf16.mxu0 %v13196_v54  ;;  %4761 = vmatprep.subr.bf16.mxu1 %v13197_v55  ;;  %v13203_v54 = vld [vmem:[#allocation42_spill] sm:$0xff] }
 0x9a8   :  { %v4504_v42 = vpop.f32.mrb[92].mxu0 }
 0x9a9   :  { %v4568_v46 = vadd.f32 %v4564_v37, %v4504_v42  ;;  %v4545_v26 = vpop.f32.mrb[124].mxu1  ;;  %v4506_v9 = vpop.f32.mrb[93].mxu0  ;;  %4721 = vmatpush1.bf16.msra.mxu0 %v13200_v36  ;;  %4762 = vmatpush1.bf16.msra.mxu1 %v13201_v38 }
 0x9aa   :  { %v4570_v13 = vadd.f32 %v4566_v49, %v4545_v26  ;;  %v4569_v17 = vadd.f32 %v4565_v3, %v4506_v9  ;;  %v4547_v32 = vpop.f32.mrb[125].mxu1  ;;  %v4508_v25 = vpop.f32.mrb[94].mxu0  ;;  %4722 = vmatprep.subr.bf16.mxu0 %v10528_v62  ;;  %4763 = vmatprep.subr.bf16.mxu1 %v10531_v53 }
 0x9ab   :  { %v4590_v5 = vmul.f32 0.5, %v4568_v46  ;;  %v4571_v23 = vadd.f32 %v4567_v51, %v4547_v32  ;;  %v4549_v59 = vpop.f32.mrb[126].mxu1  ;;  %v4509_v61 = vpop.f32.mrb[95].mxu0  ;;  %v13207_v32 = vld [vmem:[#allocation28_spill] sm:$0xff]  ;;  %v13208_v25 = vld [vmem:[#allocation63_spill] sm:$0xff] }
 0x9ac   :  { %v4594_v30 = vmul.f32 0.5, %v4569_v17  ;;  %v4550_v15 = vpop.f32.mrb[127].mxu1  ;;  %v13206_v17 = vld [vmem:[#allocation61_spill] sm:$0xff]  ;;  %v13211_v59 = vld [vmem:[#allocation30_spill] sm:$0xff]  ;;  %v13212_v61 = vld [vmem:[#allocation67_spill] sm:$0xff] }
 0x9ad   :  { %7819 = vtanh.f32 %v4590_v5  ;;  %4723 = vmatpush1.bf16.msra.mxu0 %v10534_v6  ;;  %4764 = vmatpush1.bf16.msra.mxu1 %v10537_v44  ;;  %v4599_v62 = vmul.f32 0.5, %v4571_v23  ;;  %v13209_v5 = vld [vmem:[#allocation29_spill] sm:$0xff] }
 0x9ae   :  { %7821 = vtanh.f32 %v4594_v30  ;;  %4798 = vmatprep.subr.bf16.mxu0 %v13202_v21  ;;  %4839 = vmatprep.subr.bf16.mxu1 %v13203_v54  ;;  %v13210_v23 = vld [vmem:[#allocation65_spill] sm:$0xff]  ;;  %v13213_v30 = vld [vmem:[#allocation31_spill] sm:$0xff] }
 0x9af   :  { %7823 = vtanh.f32 %v4570_v13  ;;  %v13205_v13 = vld [vmem:[#allocation27_spill] sm:$0xff]  ;;  %v13214_v15 = vld [vmem:[#allocation69_spill] sm:$0xff] }
 0x9b0   :  { %7825 = vtanh.f32 %v4599_v62  ;;  %v13215_v62 = vld [vmem:[#allocation32_spill] sm:$0xff] }
 0x9b7   :  { %v7820_v55 = vpop.eup %7819 }
 0x9b8   :  { %v7822_v53 = vpop.eup %7821  ;;  %v4592_v7 = vmul.f32 0.5, %v7820_v55  ;;  %v13216_v55 = vld [vmem:[#allocation71_spill] sm:$0xff] }
 0x9b9   :  { %v4596_v37 = vmul.f32 0.5, %v7822_v53  ;;  %v7824_v43 = vpop.eup %7823  ;;  %v13217_v53 = vld [vmem:[#allocation33_spill] sm:$0xff] }
 0x9ba   :  { %v4593_v42 = vadd.f32 0.5, %v4592_v7  ;;  %v7826_v44 = vpop.eup %7825  ;;  %v13218_v7 = vld [vmem:[#allocation73_spill] sm:$0xff] }
 0x9bb   :  { %v4597_v49 = vadd.f32 0.5, %v4596_v37  ;;  %v4601_v26 = vmul.f32 0.5, %v7826_v44  ;;  %v13219_v37 = vld [vmem:[#allocation34_spill] sm:$0xff]  ;;  %v13225_v44 = vld [vmem:[#allocation37_spill] sm:$0xff] }
 0x9bc   :  { %v4604_v3 = vmul.f32 %v7824_v43, %v4593_v42  ;;  %v13220_v42 = vld [vmem:[#allocation75_spill] sm:$0xff] }
 0x9bd   :  { %v4603_v6 = vmul.f32 %v4597_v49, %v10543_v60  ;;  %v4602_v9 = vadd.f32 0.5, %v4601_v26  ;;  %v13204_v60 = vld [vmem:[#allocation59_spill] sm:$0xff]  ;;  %v13222_v49 = vld [vmem:[#allocation77_spill] sm:$0xff] }
 0x9be   :  { %v13221_v43 = vld [vmem:[#allocation35_spill] sm:$0xff]  ;;  %v13226_v26 = vld [vmem:[#allocation81_spill] sm:$0xff] }
 0x9bf   :  { %v10775_v46 = vadd.f32 %v4604_v3, %v4603_v6  ;;  %v13223_v3 = vld [vmem:[#allocation36_spill] sm:$0xff]  ;;  %v13224_v6 = vld [vmem:[#allocation79_spill] sm:$0xff] }
 0x9c1   :  { %7827 = vtanh.f32 %v10775_v46 }
 0x9cb   :  { %v7828_v51 = vpop.eup %7827 }
 0x9cc   :  { %v4607_v36 = vmul.f32 %v7828_v51, %v4602_v9  ;;  %v13227_v9 = vld [vmem:[#allocation38_spill] sm:$0xff]  ;;  %v13228_v51 = vld [vmem:[#allocation83_spill] sm:$0xff] }
 0x9ce   :  { %v10778_v38 = vpack.c.bf16 %v4607_v36, %v4607_v36  ;;  %v13229_v36 = vld [vmem:[#allocation39_spill] sm:$0xff] }
 0x9d0   :  { %4741 = vmatmul.mubr.bf16.vlgmr.msra.gmra.mrb[56].mxu0 %v10778_v38  ;;  %4782 = vmatmul.mubr.bf16.vlgmr.msra.gmra.mrb[88].mxu1 %v10778_v38 }
 0x9d1   :  { %4799 = vmatpush1.bf16.msra.mxu0 %v8604_v14  ;;  %4840 = vmatpush1.bf16.msra.mxu1 %v8731_v63 }
 0x9d2   :  { %4830 = vmatprep.mubr.bf16.mxu0 %v10778_v38  ;;  %4871 = vmatprep.mubr.bf16.mxu1 %v10778_v38 }
 0x9d3   :  { %4800 = vmatprep.subr.bf16.mxu0 %v8607_v16  ;;  %4841 = vmatprep.subr.bf16.mxu1 %v8737_v8 }
 0x9d5   :  { %4801 = vmatpush1.bf16.msra.mxu0 %v8612_v22  ;;  %4842 = vmatpush1.bf16.msra.mxu1 %v8745_v19 }
 0x9d6   :  { %4802 = vmatprep.subr.bf16.mxu0 %v8616_v24  ;;  %4843 = vmatprep.subr.bf16.mxu1 %v8751_v28 }
 0x9d9   :  { %4803 = vmatpush1.bf16.msra.mxu0 %v8622_v31  ;;  %4844 = vmatpush1.bf16.msra.mxu1 %v8759_v35 }
 0x9da   :  { %4804 = vmatprep.subr.bf16.mxu0 %v8625_v33  ;;  %4845 = vmatprep.subr.bf16.mxu1 %v8765_v40 }
 0x9dd   :  { %4805 = vmatpush1.bf16.msra.mxu0 %v8630_v39  ;;  %4846 = vmatpush1.bf16.msra.mxu1 %v8772_v57 }
 0x9de   :  { %4806 = vmatprep.subr.bf16.mxu0 %v8633_v41  ;;  %4847 = vmatprep.subr.bf16.mxu1 %v8779_v1 }
 0x9e1   :  { %4807 = vmatpush1.bf16.msra.mxu0 %v8640_v48  ;;  %4848 = vmatpush1.bf16.msra.mxu1 %v8785_v20 }
 0x9e2   :  { %4808 = vmatprep.subr.bf16.mxu0 %v8643_v50  ;;  %4849 = vmatprep.subr.bf16.mxu1 %v8791_v29 }
 0x9e5   :  { %4809 = vmatpush1.bf16.msra.mxu0 %v8648_v56  ;;  %4850 = vmatpush1.bf16.msra.mxu1 %v8798_v45 }
 0x9e6   :  { %4810 = vmatprep.subr.bf16.mxu0 %v8651_v58  ;;  %4851 = vmatprep.subr.bf16.mxu1 %v8805_v52 }
 0x9e9   :  { %4811 = vmatpush1.bf16.msra.mxu0 %v8658_v2  ;;  %4852 = vmatpush1.bf16.msra.mxu1 %v8811_v11 }
 0x9ea   :  { %4812 = vmatprep.subr.bf16.mxu0 %v8661_v4  ;;  %4853 = vmatprep.subr.bf16.mxu1 %v8817_v27 }
 0x9ed   :  { %4813 = vmatpush1.bf16.msra.mxu0 %v8666_v12  ;;  %4854 = vmatpush1.bf16.msra.mxu1 %v8824_v0 }
 0x9ee   :  { %4814 = vmatprep.subr.bf16.mxu0 %v8669_v18  ;;  %4855 = vmatprep.subr.bf16.mxu1 %v13204_v60 }
 0x9f1   :  { %4815 = vmatpush1.bf16.msra.mxu0 %v13205_v13  ;;  %4856 = vmatpush1.bf16.msra.mxu1 %v13206_v17 }
 0x9f2   :  { %4816 = vmatprep.subr.bf16.mxu0 %v13207_v32  ;;  %4857 = vmatprep.subr.bf16.mxu1 %v13208_v25 }
 0x9f5   :  { %4817 = vmatpush1.bf16.msra.mxu0 %v13209_v5  ;;  %4858 = vmatpush1.bf16.msra.mxu1 %v13210_v23 }
 0x9f6   :  { %4818 = vmatprep.subr.bf16.mxu0 %v13211_v59  ;;  %4859 = vmatprep.subr.bf16.mxu1 %v13212_v61 }
 0x9f9   :  { %4819 = vmatpush1.bf16.msra.mxu0 %v13213_v30  ;;  %4860 = vmatpush1.bf16.msra.mxu1 %v13214_v15 }
 0x9fa   :  { %4820 = vmatprep.subr.bf16.mxu0 %v13215_v62  ;;  %4861 = vmatprep.subr.bf16.mxu1 %v13216_v55 }
 0x9fd   :  { %4821 = vmatpush1.bf16.msra.mxu0 %v13217_v53  ;;  %4862 = vmatpush1.bf16.msra.mxu1 %v13218_v7 }
 0x9fe   :  { %4822 = vmatprep.subr.bf16.mxu0 %v13219_v37  ;;  %4863 = vmatprep.subr.bf16.mxu1 %v13220_v42  ;;  %v13230_v37 = vld [vmem:[#allocation85_spill] sm:$0xff]  ;;  %v13231_v42 = vld [vmem:[#allocation40_spill] sm:$0xff] }
 0xa01   :  { %4823 = vmatpush1.bf16.msra.mxu0 %v13221_v43  ;;  %4864 = vmatpush1.bf16.msra.mxu1 %v13222_v49  ;;  %v13232_v43 = vld [vmem:[#allocation87_spill] sm:$0xff]  ;;  %v13233_v49 = vld [vmem:[#allocation41_spill] sm:$0xff] }
 0xa02   :  { %4824 = vmatprep.subr.bf16.mxu0 %v13223_v3  ;;  %4865 = vmatprep.subr.bf16.mxu1 %v13224_v6  ;;  %v13234_v3 = vld [vmem:[#allocation89_spill] sm:$0xff]  ;;  %v13235_v6 = vld [vmem:[#allocation43_spill] sm:$0xff] }
 0xa05   :  { %4825 = vmatpush1.bf16.msra.mxu0 %v13225_v44  ;;  %4866 = vmatpush1.bf16.msra.mxu1 %v13226_v26  ;;  %v13236_v44 = vld [vmem:[#allocation91_spill] sm:$0xff] }
 0xa06   :  { %4826 = vmatprep.subr.bf16.mxu0 %v13227_v9  ;;  %4867 = vmatprep.subr.bf16.mxu1 %v13228_v51  ;;  %v13237_v51 = vld [vmem:[#allocation44_spill] sm:$0xff]  ;;  %v13247_v9 = vld [vmem:[#allocation49_spill] sm:$0xff] }
 0xa09   :  { %4827 = vmatpush1.bf16.msra.mxu0 %v13229_v36  ;;  %4868 = vmatpush1.bf16.msra.mxu1 %v13230_v37  ;;  %v13238_v37 = vld [vmem:[#allocation92_spill] sm:$0xff] }
 0xa0a   :  { %4828 = vmatprep.subr.bf16.mxu0 %v13231_v42  ;;  %4869 = vmatprep.subr.bf16.mxu1 %v13232_v43  ;;  %v13239_v43 = vld [vmem:[#allocation45_spill] sm:$0xff]  ;;  %v13244_v42 = vld [vmem:[#allocation95_spill] sm:$0xff]  ;;  %v13245_v36 = vld [vmem:[#allocation48_spill] sm:$0xff] }
 0xa0d   :  { %4829 = vmatpush1.bf16.msra.mxu0 %v13233_v49  ;;  %4870 = vmatpush1.bf16.msra.mxu1 %v13234_v3  ;;  %v13240_v49 = vld [vmem:[#allocation93_spill] sm:$0xff]  ;;  %v13241_v3 = vld [vmem:[#allocation46_spill] sm:$0xff] }
 0xa0e   :  { %4880 = vmatprep.subr.bf16.mxu0 %v13235_v6  ;;  %4921 = vmatprep.subr.bf16.mxu1 %v13236_v44  ;;  %v13242_v6 = vld [vmem:[#allocation94_spill] sm:$0xff]  ;;  %v13243_v44 = vld [vmem:[#allocation47_spill] sm:$0xff] }
 0xa10   :  { %4831 = vmatmul.mubr.bf16.vlgmr.msra.gmra.mrb[96].mxu0 %v10732_v10  ;;  %4872 = vmatmul.mubr.bf16.vlgmr.msra.gmra.mrb[128].mxu1 %v10732_v10 }
 0xa11   :  { %4881 = vmatpush1.bf16.msra.mxu0 %v13237_v51  ;;  %4912 = vmatprep.mubr.bf16.mxu0 %v10778_v38  ;;  %v13246_v51 = vld [vmem:[#allocation96_spill] sm:$0xff] }
 0xa12   :  { %4922 = vmatpush1.bf16.msra.mxu1 %v13238_v37  ;;  %4953 = vmatprep.mubr.bf16.mxu1 %v10778_v38  ;;  %v13248_v37 = vld [vmem:[#allocation97_spill] sm:$0xff]  ;;  %v13249_v38 = vld [vmem:[#allocation50_spill] sm:$0xff] }
 0xa13   :  { %4882 = vmatprep.subr.bf16.mxu0 %v13239_v43  ;;  %4923 = vmatprep.subr.bf16.mxu1 %v13240_v49  ;;  %v13250_v43 = vld [vmem:[#allocation98_spill] sm:$0xff]  ;;  %v13251_v49 = vld [vmem:[#allocation51_spill] sm:$0xff] }
 0xa15   :  { %4883 = vmatpush1.bf16.msra.mxu0 %v13241_v3  ;;  %v13252_v3 = vld [vmem:[#allocation99_spill] sm:$0xff] }
 0xa16   :  { %4924 = vmatpush1.bf16.msra.mxu1 %v13242_v6  ;;  %4884 = vmatprep.subr.bf16.mxu0 %v13243_v44  ;;  %v13253_v6 = vld [vmem:[#allocation52_spill] sm:$0xff] }
 0xa17   :  { %4925 = vmatprep.subr.bf16.mxu1 %v13244_v42  ;;  %v13254_v44 = vld [vmem:[#allocation100_spill] sm:$0xff]  ;;  %v13255_v42 = vld [vmem:[#allocation53_spill] sm:$0xff] }
 0xa19   :  { %4885 = vmatpush1.bf16.msra.mxu0 %v13245_v36  ;;  %v13256_v36 = vld [vmem:[#allocation101_spill] sm:$0xff] }
 0xa1a   :  { %4926 = vmatpush1.bf16.msra.mxu1 %v13246_v51  ;;  %4886 = vmatprep.subr.bf16.mxu0 %v13247_v9  ;;  %v13257_v51 = vld [vmem:[#allocation54_spill] sm:$0xff] }
 0xa1b   :  { %4927 = vmatprep.subr.bf16.mxu1 %v13248_v37  ;;  %v13258_v9 = vld [vmem:[#allocation102_spill] sm:$0xff]  ;;  %v13259_v37 = vld [vmem:[#allocation55_spill] sm:$0xff] }
 0xa1d   :  { %4887 = vmatpush1.bf16.msra.mxu0 %v13249_v38  ;;  %v13260_v38 = vld [vmem:[#allocation103_spill] sm:$0xff] }
 0xa1e   :  { %4928 = vmatpush1.bf16.msra.mxu1 %v13250_v43  ;;  %4888 = vmatprep.subr.bf16.mxu0 %v13251_v49  ;;  %v13261_v43 = vld [vmem:[#allocation56_spill] sm:$0xff] }
 0xa1f   :  { %4929 = vmatprep.subr.bf16.mxu1 %v13252_v3  ;;  %v13262_v49 = vld [vmem:[#allocation104_spill] sm:$0xff]  ;;  %v13263_v3 = vld [vmem:[#allocation57_spill] sm:$0xff] }
 0xa21   :  { %4889 = vmatpush1.bf16.msra.mxu0 %v13253_v6  ;;  %v13264_v6 = vld [vmem:[#allocation105_spill] sm:$0xff] }
 0xa22   :  { %4930 = vmatpush1.bf16.msra.mxu1 %v13254_v44  ;;  %4890 = vmatprep.subr.bf16.mxu0 %v13255_v42  ;;  %v13265_v44 = vld [vmem:[#allocation58_spill] sm:$0xff] }
 0xa23   :  { %4931 = vmatprep.subr.bf16.mxu1 %v13256_v36  ;;  %v13266_v42 = vld [vmem:[#allocation106_spill] sm:$0xff]  ;;  %v13267_v36 = vld [vmem:[#allocation60_spill] sm:$0xff] }
 0xa25   :  { %4891 = vmatpush1.bf16.msra.mxu0 %v13257_v51  ;;  %v13268_v51 = vld [vmem:[#allocation107_spill] sm:$0xff] }
 0xa26   :  { %4932 = vmatpush1.bf16.msra.mxu1 %v13258_v9  ;;  %4892 = vmatprep.subr.bf16.mxu0 %v13259_v37  ;;  %v13269_v9 = vld [vmem:[#allocation62_spill] sm:$0xff]  ;;  %v13270_v37 = vld [vmem:[#allocation108_spill] sm:$0xff] }
 0xa27   :  { %4933 = vmatprep.subr.bf16.mxu1 %v13260_v38  ;;  %v13271_v38 = vld [vmem:[#allocation64_spill] sm:$0xff] }
 0xa29   :  { %4893 = vmatpush1.bf16.msra.mxu0 %v13261_v43  ;;  %v13272_v43 = vld [vmem:[#allocation109_spill] sm:$0xff] }
 0xa2a   :  { %4934 = vmatpush1.bf16.msra.mxu1 %v13262_v49  ;;  %4894 = vmatprep.subr.bf16.mxu0 %v13263_v3  ;;  %v13273_v49 = vld [vmem:[#allocation66_spill] sm:$0xff] }
 0xa2b   :  { %4935 = vmatprep.subr.bf16.mxu1 %v13264_v6  ;;  %v13274_v3 = vld [vmem:[#allocation110_spill] sm:$0xff]  ;;  %v13275_v6 = vld [vmem:[#allocation68_spill] sm:$0xff] }
 0xa2d   :  { %4895 = vmatpush1.bf16.msra.mxu0 %v13265_v44  ;;  %v13276_v44 = vld [vmem:[#allocation111_spill] sm:$0xff] }
 0xa2e   :  { %4936 = vmatpush1.bf16.msra.mxu1 %v13266_v42  ;;  %4896 = vmatprep.subr.bf16.mxu0 %v13267_v36  ;;  %v13277_v42 = vld [vmem:[#allocation70_spill] sm:$0xff]  ;;  %v13278_v36 = vld [vmem:[#allocation112_spill] sm:$0xff] }
 0xa2f   :  { %4937 = vmatprep.subr.bf16.mxu1 %v13268_v51  ;;  %v13279_v51 = vld [vmem:[#allocation72_spill] sm:$0xff] }
 0xa31   :  { %4897 = vmatpush1.bf16.msra.mxu0 %v13269_v9  ;;  %v13280_v9 = vld [vmem:[#allocation113_spill] sm:$0xff] }
 0xa32   :  { %4938 = vmatpush1.bf16.msra.mxu1 %v13270_v37  ;;  %4898 = vmatprep.subr.bf16.mxu0 %v13271_v38  ;;  %v13281_v37 = vld [vmem:[#allocation74_spill] sm:$0xff] }
 0xa33   :  { %4939 = vmatprep.subr.bf16.mxu1 %v13272_v43  ;;  %v13282_v38 = vld [vmem:[#allocation114_spill] sm:$0xff]  ;;  %v13283_v43 = vld [vmem:[#allocation76_spill] sm:$0xff] }
 0xa35   :  { %4899 = vmatpush1.bf16.msra.mxu0 %v13273_v49  ;;  %v13284_v49 = vld [vmem:[#allocation115_spill] sm:$0xff] }
 0xa36   :  { %4940 = vmatpush1.bf16.msra.mxu1 %v13274_v3  ;;  %4900 = vmatprep.subr.bf16.mxu0 %v13275_v6  ;;  %v13285_v3 = vld [vmem:[#allocation78_spill] sm:$0xff]  ;;  %v13286_v6 = vld [vmem:[#allocation116_spill] sm:$0xff] }
 0xa37   :  { %4941 = vmatprep.subr.bf16.mxu1 %v13276_v44  ;;  %v13287_v44 = vld [vmem:[#allocation80_spill] sm:$0xff] }
 0xa39   :  { %4901 = vmatpush1.bf16.msra.mxu0 %v13277_v42  ;;  %v13288_v42 = vld [vmem:[#allocation117_spill] sm:$0xff] }
 0xa3a   :  { %4942 = vmatpush1.bf16.msra.mxu1 %v13278_v36  ;;  %4902 = vmatprep.subr.bf16.mxu0 %v13279_v51  ;;  %v13289_v36 = vld [vmem:[#allocation82_spill] sm:$0xff] }
 0xa3b   :  { %4943 = vmatprep.subr.bf16.mxu1 %v13280_v9  ;;  %v13290_v51 = vld [vmem:[#allocation118_spill] sm:$0xff]  ;;  %v13291_v9 = vld [vmem:[#allocation84_spill] sm:$0xff] }
 0xa3d   :  { %4903 = vmatpush1.bf16.msra.mxu0 %v13281_v37  ;;  %v13292_v37 = vld [vmem:[#allocation119_spill] sm:$0xff] }
 0xa3e   :  { %4944 = vmatpush1.bf16.msra.mxu1 %v13282_v38  ;;  %4904 = vmatprep.subr.bf16.mxu0 %v13283_v43  ;;  %v13293_v38 = vld [vmem:[#allocation86_spill] sm:$0xff]  ;;  %v13294_v43 = vld [vmem:[#allocation120_spill] sm:$0xff] }
 0xa3f   :  { %4945 = vmatprep.subr.bf16.mxu1 %v13284_v49  ;;  %v13295_v49 = vld [vmem:[#allocation88_spill] sm:$0xff] }
 0xa41   :  { %4905 = vmatpush1.bf16.msra.mxu0 %v13285_v3  ;;  %v13296_v3 = vld [vmem:[#allocation121_spill] sm:$0xff] }
 0xa42   :  { %4946 = vmatpush1.bf16.msra.mxu1 %v13286_v6  ;;  %4906 = vmatprep.subr.bf16.mxu0 %v13287_v44  ;;  %v13297_v6 = vld [vmem:[#allocation90_spill] sm:$0xff] }
 0xa43   :  { %4947 = vmatprep.subr.bf16.mxu1 %v13288_v42  ;;  %v13298_v44 = vld [vmem:[#allocation122_spill] sm:$0xff]  ;;  %v13299_v42 = vld [vmem:[#allocation195_spill] sm:$0xff] }
 0xa45   :  { %4907 = vmatpush1.bf16.msra.mxu0 %v13289_v36  ;;  %v13300_v36 = vld [vmem:[#allocation196_spill] sm:$0xff] }
 0xa46   :  { %4948 = vmatpush1.bf16.msra.mxu1 %v13290_v51  ;;  %4908 = vmatprep.subr.bf16.mxu0 %v13291_v9 }
 0xa47   :  { %4949 = vmatprep.subr.bf16.mxu1 %v13292_v37  ;;  %v10918_v37 = vld [vmem:[#allocation13] ss:$16 sps:$4 sm:$0xff]  }
 0xa48   :  { %13301 = vst [vmem:[#allocation197_spill] sm:$0xff] %v10918_v37 }
 0xa49   :  { %4909 = vmatpush1.bf16.msra.mxu0 %v13293_v38 }
 0xa4a   :  { %4950 = vmatpush1.bf16.msra.mxu1 %v13294_v43  ;;  %4910 = vmatprep.subr.bf16.mxu0 %v13295_v49  ;;  %v10921_v43 = vld [vmem:[#allocation13 + $0x8] ss:$16 sps:$4 sm:$0xff]  }
 0xa4b   :  { %4951 = vmatprep.subr.bf16.mxu1 %v13296_v3  ;;  %13302 = vst [vmem:[#allocation198_spill] sm:$0xff] %v10921_v43  ;;  %v10924_v3 = vld [vmem:[#allocation13 + $0x24] ss:$16 sps:$4 sm:$0xff]  }
 0xa4c   :  { %13303 = vst [vmem:[#allocation199_spill] sm:$0xff] %v10924_v3 }
 0xa4d   :  { %4911 = vmatpush1.bf16.msra.mxu0 %v13297_v6  ;;  %v13334_v6 = vld [vmem:[#allocation173_spill] sm:$0xff] }
 0xa4e   :  { %4952 = vmatpush1.bf16.msra.mxu1 %v13298_v44  ;;  %5024 = vmatprep.subr.bf16.mxu0 %v13299_v42  ;;  %v10927_v44 = vld [vmem:[#allocation13 + $0x2c] ss:$16 sps:$4 sm:$0xff]   ;;  %v10935_v42 = vld [vmem:[#allocation13 + $0x28] ss:$16 sps:$4 sm:$0xff]   ;;  %v4967_v9 = vunpack.c.h.bf16 %v13334_v6 }
 0xa4f   :  { %5065 = vmatprep.subr.bf16.mxu1 %v13300_v36  ;;  %13304 = vst [vmem:[#allocation200_spill] sm:$0xff] %v10927_v44  ;;  %13306 = vst [vmem:[#allocation183_spill] sm:$0xff] %v10935_v42  ;;  %v10938_v36 = vld [vmem:[#allocation13 + $0x44] ss:$16 sps:$4 sm:$0xff]  }
 0xa50   :  { %4913 = vmatmul.mubr.bf16.vlgmr.msra.gmra.mrb[100].mxu0 %v10732_v10  ;;  %13307 = vst [vmem:[#allocation155_spill] sm:$0xff] %v10938_v36 }
 0xa51   :  { %4954 = vmatmul.mubr.bf16.vlgmr.msra.gmra.mrb[132].mxu1 %v10732_v10  ;;  %5025 = vmatpush1.bf16.msra.mxu0 %v10918_v37  ;;  %v10932_v10 = vld [vmem:[#allocation13 + $0x20] ss:$16 sps:$4 sm:$0xff]  }
 0xa52   :  { %5066 = vmatpush1.bf16.msra.mxu1 %v10921_v43  ;;  %5026 = vmatprep.subr.bf16.mxu0 %v10924_v3  ;;  %13305 = vst [vmem:[#allocation167_spill] sm:$0xff] %v10932_v10  ;;  %v10941_v3 = vld [vmem:[#allocation13 + $0x4c] ss:$16 sps:$4 sm:$0xff]   ;;  %v10947_v43 = vld [vmem:[#allocation13 + $0x48] ss:$16 sps:$4 sm:$0xff]  }
 0xa53   :  { %5067 = vmatprep.subr.bf16.mxu1 %v10927_v44  ;;  %5056 = vmatprep.mubr.bf16.mxu0 %v12275_v47  ;;  %13308 = vst [vmem:[#allocation181_spill] sm:$0xff] %v10941_v3  ;;  %v10944_v44 = vld [vmem:[#allocation13 + $0x40] ss:$16 sps:$4 sm:$0xff]   ;;  %13310 = vst [vmem:[#allocation202_spill] sm:$0xff] %v10947_v43 }
 0xa54   :  { %5097 = vmatprep.mubr.bf16.mxu1 %v12275_v47  ;;  %13309 = vst [vmem:[#allocation201_spill] sm:$0xff] %v10944_v44 }
 0xa55   :  { %5027 = vmatpush1.bf16.msra.mxu0 %v10932_v10  ;;  %v10950_v10 = vld [vmem:[#allocation13 + $0x64] ss:$16 sps:$4 sm:$0xff]  }
 0xa56   :  { %5068 = vmatpush1.bf16.msra.mxu1 %v10935_v42  ;;  %5028 = vmatprep.subr.bf16.mxu0 %v10938_v36  ;;  %13311 = vst [vmem:[#allocation203_spill] sm:$0xff] %v10950_v10  ;;  %v10953_v42 = vld [vmem:[#allocation13 + $0x6c] ss:$16 sps:$4 sm:$0xff]   ;;  %v10956_v36 = vld [vmem:[#allocation13 + $0x60] ss:$16 sps:$4 sm:$0xff]  }
 0xa57   :  { %5069 = vmatprep.subr.bf16.mxu1 %v10941_v3  ;;  %13312 = vst [vmem:[#allocation204_spill] sm:$0xff] %v10953_v42  ;;  %13313 = vst [vmem:[#allocation149_spill] sm:$0xff] %v10956_v36  ;;  %v10959_v3 = vld [vmem:[#allocation13 + $0x68] ss:$16 sps:$4 sm:$0xff]  }
 0xa58   :  { %13314 = vst [vmem:[#allocation171_spill] sm:$0xff] %v10959_v3 }
 0xa59   :  { %5029 = vmatpush1.bf16.msra.mxu0 %v10944_v44  ;;  %v10962_v44 = vld [vmem:[#allocation13 + $0x84] ss:$16 sps:$4 sm:$0xff]  }
 0xa5a   :  { %5070 = vmatpush1.bf16.msra.mxu1 %v10947_v43  ;;  %5030 = vmatprep.subr.bf16.mxu0 %v10950_v10  ;;  %13315 = vst [vmem:[#allocation144_spill] sm:$0xff] %v10962_v44  ;;  %v10965_v43 = vld [vmem:[#allocation13 + $0x8c] ss:$16 sps:$4 sm:$0xff]   ;;  %v10968_v10 = vld [vmem:[#allocation13 + $0x80] ss:$16 sps:$4 sm:$0xff]  }
 0xa5b   :  { %5071 = vmatprep.subr.bf16.mxu1 %v10953_v42  ;;  %13316 = vst [vmem:[#allocation180_spill] sm:$0xff] %v10965_v43  ;;  %13317 = vst [vmem:[#allocation205_spill] sm:$0xff] %v10968_v10  ;;  %v10971_v42 = vld [vmem:[#allocation13 + $0x88] ss:$16 sps:$4 sm:$0xff]  }
 0xa5c   :  { %13318 = vst [vmem:[#allocation206_spill] sm:$0xff] %v10971_v42 }
 0xa5d   :  { %5031 = vmatpush1.bf16.msra.mxu0 %v10956_v36  ;;  %v10974_v36 = vld [vmem:[#allocation13 + $0xa4] ss:$16 sps:$4 sm:$0xff]  }
 0xa5e   :  { %5072 = vmatpush1.bf16.msra.mxu1 %v10959_v3  ;;  %5032 = vmatprep.subr.bf16.mxu0 %v10962_v44  ;;  %13319 = vst [vmem:[#allocation207_spill] sm:$0xff] %v10974_v36  ;;  %v10977_v3 = vld [vmem:[#allocation13 + $0xac] ss:$16 sps:$4 sm:$0xff]   ;;  %v10980_v44 = vld [vmem:[#allocation13 + $0xa0] ss:$16 sps:$4 sm:$0xff]  }
 0xa5f   :  { %5073 = vmatprep.subr.bf16.mxu1 %v10965_v43  ;;  %13320 = vst [vmem:[#allocation208_spill] sm:$0xff] %v10977_v3  ;;  %13321 = vst [vmem:[#allocation137_spill] sm:$0xff] %v10980_v44  ;;  %v10983_v43 = vld [vmem:[#allocation13 + $0xa8] ss:$16 sps:$4 sm:$0xff]  }
 0xa60   :  { %13322 = vst [vmem:[#allocation169_spill] sm:$0xff] %v10983_v43 }
 0xa61   :  { %5033 = vmatpush1.bf16.msra.mxu0 %v10968_v10  ;;  %v10986_v10 = vld [vmem:[#allocation13 + $0xc4] ss:$16 sps:$4 sm:$0xff]  }
 0xa62   :  { %5074 = vmatpush1.bf16.msra.mxu1 %v10971_v42  ;;  %5034 = vmatprep.subr.bf16.mxu0 %v10974_v36  ;;  %13323 = vst [vmem:[#allocation156_spill] sm:$0xff] %v10986_v10  ;;  %v10989_v42 = vld [vmem:[#allocation13 + $0xcc] ss:$16 sps:$4 sm:$0xff]   ;;  %v10992_v36 = vld [vmem:[#allocation13 + $0xc0] ss:$16 sps:$4 sm:$0xff]  }
 0xa63   :  { %5075 = vmatprep.subr.bf16.mxu1 %v10977_v3  ;;  %13324 = vst [vmem:[#allocation182_spill] sm:$0xff] %v10989_v42  ;;  %13325 = vst [vmem:[#allocation124_spill] sm:$0xff] %v10992_v36  ;;  %v10995_v3 = vld [vmem:[#allocation13 + $0xc8] ss:$16 sps:$4 sm:$0xff]  }
 0xa64   :  { %13326 = vst [vmem:[#allocation125_spill] sm:$0xff] %v10995_v3 }
 0xa65   :  { %5035 = vmatpush1.bf16.msra.mxu0 %v10980_v44  ;;  %v10998_v44 = vld [vmem:[#allocation13 + $0xe4] ss:$16 sps:$4 sm:$0xff]  }
 0xa66   :  { %5076 = vmatpush1.bf16.msra.mxu1 %v10983_v43  ;;  %5036 = vmatprep.subr.bf16.mxu0 %v10986_v10  ;;  %13327 = vst [vmem:[#allocation127_spill] sm:$0xff] %v10998_v44  ;;  %v11001_v43 = vld [vmem:[#allocation13 + $0xec] ss:$16 sps:$4 sm:$0xff]   ;;  %v11004_v10 = vld [vmem:[#allocation13 + $0xe0] ss:$16 sps:$4 sm:$0xff]  }
 0xa67   :  { %5077 = vmatprep.subr.bf16.mxu1 %v10989_v42  ;;  %13328 = vst [vmem:[#allocation128_spill] sm:$0xff] %v11001_v43  ;;  %13329 = vst [vmem:[#allocation130_spill] sm:$0xff] %v11004_v10  ;;  %v11007_v42 = vld [vmem:[#allocation13 + $0xe8] ss:$16 sps:$4 sm:$0xff]  }
 0xa68   :  { %13330 = vst [vmem:[#allocation131_spill] sm:$0xff] %v11007_v42 }
 0xa69   :  { %5037 = vmatpush1.bf16.msra.mxu0 %v10992_v36  ;;  %v11010_v36 = vld [vmem:[#allocation14 + $0x4] ss:$16 sps:$4 sm:$0xff]  }
 0xa6a   :  { %5078 = vmatpush1.bf16.msra.mxu1 %v10995_v3  ;;  %5038 = vmatprep.subr.bf16.mxu0 %v10998_v44  ;;  %13331 = vst [vmem:[#allocation133_spill] sm:$0xff] %v11010_v36  ;;  %v11013_v3 = vld [vmem:[#allocation14 + $0xc] ss:$16 sps:$4 sm:$0xff]  }
 0xa6b   :  { %5079 = vmatprep.subr.bf16.mxu1 %v11001_v43  ;;  %13332 = vst [vmem:[#allocation134_spill] sm:$0xff] %v11013_v3  ;;  %v13333_v44 = vld [vmem:[#allocation161_spill] sm:$0xff]  ;;  %v4966_v43 = vunpack.c.l.bf16 %v13334_v6 }
 0xa6c   :  { %v4964_v37 = vunpack.c.l.bf16 %v13333_v44 }
 0xa6d   :  { %5039 = vmatpush1.bf16.msra.mxu0 %v11004_v10  ;;  %v4965_v10 = vunpack.c.h.bf16 %v13333_v44 }
 0xa6e   :  { %5080 = vmatpush1.bf16.msra.mxu1 %v11007_v42  ;;  %5118 = vmatprep.subr.bf16.mxu0 %v11010_v36 }
 0xa6f   :  { %5159 = vmatprep.subr.bf16.mxu1 %v11013_v3 }
 0xae3   :  { %v4832_v49 = vpop.f32.mrb[96].mxu0  ;;  %v4873_v38 = vpop.f32.mrb[128].mxu1 }
 0xae4   :  { %v4968_v51 = vadd.f32 %v4964_v37, %v4832_v49  ;;  %v4970_v42 = vadd.f32 %v4966_v43, %v4873_v38  ;;  %v4834_v26 = vpop.f32.mrb[97].mxu0  ;;  %v4875_v7 = vpop.f32.mrb[129].mxu1  ;;  %v11048_v38 = vld [vmem:[#allocation14 + $0x44] ss:$16 sps:$4 sm:$0xff]  }
 0xae5   :  { %v4969_v53 = vadd.f32 %v4965_v10, %v4834_v26  ;;  %v4971_v36 = vadd.f32 %v4967_v9, %v4875_v7  ;;  %v4836_v55 = vpop.f32.mrb[98].mxu0  ;;  %v4877_v62 = vpop.f32.mrb[130].mxu1  ;;  %v11042_v9 = vld [vmem:[#allocation14 + $0x20] ss:$16 sps:$4 sm:$0xff]   ;;  %13338 = vst [vmem:[#allocation139_spill] sm:$0xff] %v11048_v38 }
 0xae6   :  { %v4982_v15 = vmul.f32 0.5, %v4968_v51  ;;  %v4837_v3 = vpop.f32.mrb[99].mxu0  ;;  %v4878_v30 = vpop.f32.mrb[131].mxu1  ;;  %13336 = vst [vmem:[#allocation136_spill] sm:$0xff] %v11042_v9  ;;  %v11045_v51 = vld [vmem:[#allocation14 + $0x28] ss:$16 sps:$4 sm:$0xff]  }
 0xae7   :  { %v4986_v61 = vmul.f32 0.5, %v4969_v53  ;;  %v4991_v59 = vmul.f32 0.5, %v4971_v36  ;;  %13337 = vst [vmem:[#allocation138_spill] sm:$0xff] %v11045_v51  ;;  %v11051_v10 = vld [vmem:[#allocation14 + $0x4c] ss:$16 sps:$4 sm:$0xff]  }
 0xae8   :  { %7829 = vtanh.f32 %v4982_v15  ;;  %13339 = vst [vmem:[#allocation141_spill] sm:$0xff] %v11051_v10  ;;  %v11057_v36 = vld [vmem:[#allocation14 + $0x48] ss:$16 sps:$4 sm:$0xff]  }
 0xae9   :  { %7831 = vtanh.f32 %v4986_v61  ;;  %13341 = vst [vmem:[#allocation145_spill] sm:$0xff] %v11057_v36 }
 0xaea   :  { %7833 = vtanh.f32 %v4970_v42  ;;  %v11054_v42 = vld [vmem:[#allocation14 + $0x40] ss:$16 sps:$4 sm:$0xff]  }
 0xaeb   :  { %7835 = vtanh.f32 %v4991_v59  ;;  %v11037_v59 = vld [vmem:[#allocation14 + $0x2c] ss:$16 sps:$4 sm:$0xff]   ;;  %13340 = vst [vmem:[#allocation142_spill] sm:$0xff] %v11054_v42 }
 0xaec   :  { %13335 = vst [vmem:[#allocation135_spill] sm:$0xff] %v11037_v59 }
 0xaf2   :  { %v7830_v23 = vpop.eup %7829 }
 0xaf3   :  { %v7832_v44 = vpop.eup %7831  ;;  %v4984_v5 = vmul.f32 0.5, %v7830_v23  ;;  %v11034_v23 = vld [vmem:[#allocation14 + $0x24] ss:$16 sps:$4 sm:$0xff]  }
 0xaf4   :  { %v4988_v6 = vmul.f32 0.5, %v7832_v44  ;;  %v7834_v43 = vpop.eup %7833  ;;  %v11060_v44 = vld [vmem:[#allocation14 + $0x64] ss:$16 sps:$4 sm:$0xff]  }
 0xaf5   :  { %v4985_v37 = vadd.f32 0.5, %v4984_v5  ;;  %v7836_v30 = vpop.eup %7835  ;;  %v11028_v5 = vld [vmem:[#allocation14] ss:$16 sps:$4 sm:$0xff]   ;;  %13342 = vst [vmem:[#allocation146_spill] sm:$0xff] %v11060_v44 }
 0xaf6   :  { %v4989_v49 = vadd.f32 0.5, %v4988_v6  ;;  %v4993_v15 = vmul.f32 0.5, %v7836_v30  ;;  %v11063_v6 = vld [vmem:[#allocation14 + $0x6c] ss:$16 sps:$4 sm:$0xff]   ;;  %v11081_v30 = vld [vmem:[#allocation14 + $0x88] ss:$16 sps:$4 sm:$0xff]  }
 0xaf7   :  { %v4996_v26 = vmul.f32 %v7834_v43, %v4985_v37  ;;  %13343 = vst [vmem:[#allocation147_spill] sm:$0xff] %v11063_v6  ;;  %v11066_v37 = vld [vmem:[#allocation14 + $0x60] ss:$16 sps:$4 sm:$0xff]   ;;  %v11069_v43 = vld [vmem:[#allocation14 + $0x68] ss:$16 sps:$4 sm:$0xff]   ;;  %13349 = vst [vmem:[#allocation157_spill] sm:$0xff] %v11081_v30 }
 0xaf8   :  { %v4995_v55 = vmul.f32 %v4989_v49, %v10729_v34  ;;  %v4994_v61 = vadd.f32 0.5, %v4993_v15  ;;  %v11031_v34 = vld [vmem:[#allocation14 + $0x8] ss:$16 sps:$4 sm:$0xff]   ;;  %13344 = vst [vmem:[#allocation148_spill] sm:$0xff] %v11066_v37  ;;  %13345 = vst [vmem:[#allocation150_spill] sm:$0xff] %v11069_v43 }
 0xaf9   :  { %v11072_v49 = vld [vmem:[#allocation14 + $0x84] ss:$16 sps:$4 sm:$0xff]  }
 0xafa   :  { %v11021_v62 = vadd.f32 %v4996_v26, %v4995_v55  ;;  %13346 = vst [vmem:[#allocation151_spill] sm:$0xff] %v11072_v49  ;;  %v11075_v26 = vld [vmem:[#allocation14 + $0x8c] ss:$16 sps:$4 sm:$0xff]   ;;  %v11078_v55 = vld [vmem:[#allocation14 + $0x80] ss:$16 sps:$4 sm:$0xff]  }
 0xafb   :  { %13347 = vst [vmem:[#allocation153_spill] sm:$0xff] %v11075_v26  ;;  %13348 = vst [vmem:[#allocation154_spill] sm:$0xff] %v11078_v55  ;;  %v11084_v15 = vld [vmem:[#allocation14 + $0xa4] ss:$16 sps:$4 sm:$0xff]  }
 0xafc   :  { %7837 = vtanh.f32 %v11021_v62  ;;  %13350 = vst [vmem:[#allocation158_spill] sm:$0xff] %v11084_v15 }
 0xb06   :  { %v7838_v53 = vpop.eup %7837 }
 0xb07   :  { %v4999_v7 = vmul.f32 %v7838_v53, %v4994_v61  ;;  %v11087_v61 = vld [vmem:[#allocation14 + $0xac] ss:$16 sps:$4 sm:$0xff]   ;;  %v11090_v53 = vld [vmem:[#allocation14 + $0xa0] ss:$16 sps:$4 sm:$0xff]  }
 0xb08   :  { %13351 = vst [vmem:[#allocation152_spill] sm:$0xff] %v11087_v61  ;;  %13352 = vst [vmem:[#allocation172_spill] sm:$0xff] %v11090_v53 }
 0xb09   :  { %v11024_v3 = vpack.c.bf16 %v4999_v7, %v4999_v7  ;;  %v11093_v7 = vld [vmem:[#allocation14 + $0xa8] ss:$16 sps:$4 sm:$0xff]  }
 0xb0a   :  { %13353 = vst [vmem:[#allocation159_spill] sm:$0xff] %v11093_v7 }
 0xb0b   :  { %5057 = vmatmul.mubr.bf16.vlgmr.msra.gmra.mrb[44].mxu0 %v11024_v3  ;;  %5098 = vmatmul.mubr.bf16.vlgmr.msra.gmra.mrb[76].mxu1 %v11024_v3 }
 0xb0c   :  { %5119 = vmatpush1.bf16.msra.mxu0 %v11028_v5  ;;  %5160 = vmatpush1.bf16.msra.mxu1 %v11031_v34 }
 0xb0d   :  { %5120 = vmatprep.subr.bf16.mxu0 %v11034_v23  ;;  %5161 = vmatprep.subr.bf16.mxu1 %v11037_v59 }
 0xb0e   :  { %5150 = vmatprep.mubr.bf16.mxu0 %v12275_v47  ;;  %5191 = vmatprep.mubr.bf16.mxu1 %v12275_v47 }
 0xb10   :  { %5121 = vmatpush1.bf16.msra.mxu0 %v11042_v9  ;;  %5162 = vmatpush1.bf16.msra.mxu1 %v11045_v51  ;;  %v11112_v51 = vld [vmem:[#allocation14 + $0xe4] ss:$16 sps:$4 sm:$0xff]  }
 0xb11   :  { %5122 = vmatprep.subr.bf16.mxu0 %v11048_v38  ;;  %5163 = vmatprep.subr.bf16.mxu1 %v11051_v10 }
 0xb14   :  { %5123 = vmatpush1.bf16.msra.mxu0 %v11054_v42  ;;  %5164 = vmatpush1.bf16.msra.mxu1 %v11057_v36  ;;  %v11106_v36 = vld [vmem:[#allocation14 + $0xc0] ss:$16 sps:$4 sm:$0xff]  }
 0xb15   :  { %5124 = vmatprep.subr.bf16.mxu0 %v11060_v44  ;;  %5165 = vmatprep.subr.bf16.mxu1 %v11063_v6  ;;  %13358 = vst [vmem:[#allocation163_spill] sm:$0xff] %v11106_v36 }
 0xb18   :  { %5125 = vmatpush1.bf16.msra.mxu0 %v11066_v37  ;;  %5166 = vmatpush1.bf16.msra.mxu1 %v11069_v43 }
 0xb19   :  { %5126 = vmatprep.subr.bf16.mxu0 %v11072_v49  ;;  %5167 = vmatprep.subr.bf16.mxu1 %v11075_v26 }
 0xb1c   :  { %5127 = vmatpush1.bf16.msra.mxu0 %v11078_v55  ;;  %5168 = vmatpush1.bf16.msra.mxu1 %v11081_v30  ;;  %v11096_v55 = vld [vmem:[#allocation14 + $0xc4] ss:$16 sps:$4 sm:$0xff]   ;;  %v11099_v30 = vld [vmem:[#allocation14 + $0xcc] ss:$16 sps:$4 sm:$0xff]  }
 0xb1d   :  { %5128 = vmatprep.subr.bf16.mxu0 %v11084_v15  ;;  %5169 = vmatprep.subr.bf16.mxu1 %v11087_v61  ;;  %13354 = vst [vmem:[#allocation160_spill] sm:$0xff] %v11096_v55  ;;  %13355 = vst [vmem:[#allocation162_spill] sm:$0xff] %v11099_v30  ;;  %v13356_v15 = vld [vmem:[#allocation132_spill] sm:$0xff]  ;;  %v13357_v61 = vld [vmem:[#allocation178_spill] sm:$0xff] }
 0xb1e   :  { %v4974_v26 = vunpack.c.l.bf16 %v13356_v15  ;;  %v4976_v43 = vunpack.c.l.bf16 %v13357_v61  ;;  %v4975_v37 = vunpack.c.h.bf16 %v13356_v15 }
 0xb20   :  { %5129 = vmatpush1.bf16.msra.mxu0 %v11090_v53  ;;  %5170 = vmatpush1.bf16.msra.mxu1 %v11093_v7  ;;  %v4977_v7 = vunpack.c.h.bf16 %v13357_v61 }
 0xb21   :  { %5130 = vmatprep.subr.bf16.mxu0 %v11096_v55  ;;  %5171 = vmatprep.subr.bf16.mxu1 %v11099_v30  ;;  %v11109_v55 = vld [vmem:[#allocation14 + $0xc8] ss:$16 sps:$4 sm:$0xff]  }
 0xb22   :  { %13359 = vst [vmem:[#allocation165_spill] sm:$0xff] %v11109_v55 }
 0xb23   :  { %v4914_v49 = vpop.f32.mrb[100].mxu0 }
 0xb24   :  { %v4978_v53 = vadd.f32 %v4974_v26, %v4914_v49  ;;  %v4955_v6 = vpop.f32.mrb[132].mxu1  ;;  %v4916_v44 = vpop.f32.mrb[101].mxu0  ;;  %5131 = vmatpush1.bf16.msra.mxu0 %v11106_v36  ;;  %5172 = vmatpush1.bf16.msra.mxu1 %v11109_v55  ;;  %v11115_v49 = vld [vmem:[#allocation14 + $0xec] ss:$16 sps:$4 sm:$0xff]   ;;  %v11118_v55 = vld [vmem:[#allocation14 + $0xe0] ss:$16 sps:$4 sm:$0xff]  }
 0xb25   :  { %v4980_v30 = vadd.f32 %v4976_v43, %v4955_v6  ;;  %v4979_v42 = vadd.f32 %v4975_v37, %v4916_v44  ;;  %v4957_v10 = vpop.f32.mrb[133].mxu1  ;;  %v4918_v38 = vpop.f32.mrb[102].mxu0  ;;  %5132 = vmatprep.subr.bf16.mxu0 %v11112_v51  ;;  %5173 = vmatprep.subr.bf16.mxu1 %v11115_v49 }
 0xb26   :  { %v5000_v26 = vmul.f32 0.5, %v4978_v53  ;;  %v4981_v15 = vadd.f32 %v4977_v7, %v4957_v10  ;;  %v4959_v61 = vpop.f32.mrb[134].mxu1  ;;  %v4919_v36 = vpop.f32.mrb[103].mxu0  ;;  %v11121_v38 = vld [vmem:[#allocation14 + $0xe8] ss:$16 sps:$4 sm:$0xff]  }
 0xb27   :  { %v5004_v9 = vmul.f32 0.5, %v4979_v42  ;;  %v4960_v59 = vpop.f32.mrb[135].mxu1 }
 0xb28   :  { %7839 = vtanh.f32 %v5000_v26  ;;  %5133 = vmatpush1.bf16.msra.mxu0 %v11118_v55  ;;  %5174 = vmatpush1.bf16.msra.mxu1 %v11121_v38  ;;  %v5009_v10 = vmul.f32 0.5, %v4981_v15 }
 0xb29   :  { %7841 = vtanh.f32 %v5004_v9  ;;  %5208 = vmatprep.subr.bf16.mxu0 %v13202_v21  ;;  %5249 = vmatprep.subr.bf16.mxu1 %v13203_v54 }
 0xb2a   :  { %7843 = vtanh.f32 %v4980_v30 }
 0xb2b   :  { %7845 = vtanh.f32 %v5009_v10  ;;  %v13397_v10 = vld [vmem:[#allocation96_spill] sm:$0xff] }
 0xb32   :  { %v7840_v44 = vpop.eup %7839 }
 0xb33   :  { %v7842_v36 = vpop.eup %7841  ;;  %v5002_v42 = vmul.f32 0.5, %v7840_v44  ;;  %v13398_v44 = vld [vmem:[#allocation49_spill] sm:$0xff] }
 0xb34   :  { %v5006_v59 = vmul.f32 0.5, %v7842_v36  ;;  %v7844_v37 = vpop.eup %7843  ;;  %v13399_v36 = vld [vmem:[#allocation97_spill] sm:$0xff] }
 0xb35   :  { %v5003_v6 = vadd.f32 0.5, %v5002_v42  ;;  %v7846_v21 = vpop.eup %7845  ;;  %v13400_v42 = vld [vmem:[#allocation50_spill] sm:$0xff] }
 0xb36   :  { %v5007_v43 = vadd.f32 0.5, %v5006_v59  ;;  %v5011_v9 = vmul.f32 0.5, %v7846_v21  ;;  %v13401_v59 = vld [vmem:[#allocation98_spill] sm:$0xff]  ;;  %v13407_v21 = vld [vmem:[#allocation101_spill] sm:$0xff] }
 0xb37   :  { %v5014_v53 = vmul.f32 %v7844_v37, %v5003_v6  ;;  %v13402_v6 = vld [vmem:[#allocation51_spill] sm:$0xff] }
 0xb38   :  { %v5013_v7 = vmul.f32 %v5007_v43, %v10775_v46  ;;  %v5012_v54 = vadd.f32 0.5, %v5011_v9  ;;  %v13391_v46 = vld [vmem:[#allocation93_spill] sm:$0xff]  ;;  %v13403_v37 = vld [vmem:[#allocation99_spill] sm:$0xff]  ;;  %v13404_v43 = vld [vmem:[#allocation52_spill] sm:$0xff] }
 0xb39   :  { %v13408_v9 = vld [vmem:[#allocation54_spill] sm:$0xff] }
 0xb3a   :  { %v11127_v26 = vadd.f32 %v5014_v53, %v5013_v7  ;;  %v13405_v53 = vld [vmem:[#allocation100_spill] sm:$0xff]  ;;  %v13406_v7 = vld [vmem:[#allocation53_spill] sm:$0xff] }
 0xb3c   :  { %7847 = vtanh.f32 %v11127_v26 }
 0xb46   :  { %v7848_v30 = vpop.eup %7847 }
 0xb47   :  { %v5017_v15 = vmul.f32 %v7848_v30, %v5012_v54  ;;  %v13409_v54 = vld [vmem:[#allocation102_spill] sm:$0xff]  ;;  %v13410_v30 = vld [vmem:[#allocation55_spill] sm:$0xff] }
 0xb49   :  { %v11130_v61 = vpack.c.bf16 %v5017_v15, %v5017_v15  ;;  %v13411_v15 = vld [vmem:[#allocation103_spill] sm:$0xff] }
 0xb4b   :  { %5151 = vmatmul.mubr.bf16.vlgmr.msra.gmra.mrb[40].mxu0 %v11130_v61  ;;  %5192 = vmatmul.mubr.bf16.vlgmr.msra.gmra.mrb[72].mxu1 %v11130_v61 }
 0xb4c   :  { %5209 = vmatpush1.bf16.msra.mxu0 %v8604_v14  ;;  %5250 = vmatpush1.bf16.msra.mxu1 %v8731_v63  ;;  %v13360_v14 = vld [vmem:[#allocation29_spill] sm:$0xff] }
 0xb4d   :  { %5240 = vmatprep.mubr.bf16.mxu0 %v11130_v61  ;;  %5281 = vmatprep.mubr.bf16.mxu1 %v11130_v61  ;;  %v13376_v63 = vld [vmem:[#allocation37_spill] sm:$0xff] }
 0xb4e   :  { %5210 = vmatprep.subr.bf16.mxu0 %v8607_v16  ;;  %5251 = vmatprep.subr.bf16.mxu1 %v8737_v8  ;;  %v13361_v16 = vld [vmem:[#allocation65_spill] sm:$0xff] }
 0xb4f   :  { %v13377_v8 = vld [vmem:[#allocation81_spill] sm:$0xff] }
 0xb50   :  { %5211 = vmatpush1.bf16.msra.mxu0 %v8612_v22  ;;  %5252 = vmatpush1.bf16.msra.mxu1 %v8745_v19  ;;  %v13362_v22 = vld [vmem:[#allocation30_spill] sm:$0xff] }
 0xb51   :  { %5212 = vmatprep.subr.bf16.mxu0 %v8616_v24  ;;  %5253 = vmatprep.subr.bf16.mxu1 %v8751_v28  ;;  %v13363_v24 = vld [vmem:[#allocation67_spill] sm:$0xff]  ;;  %v13378_v19 = vld [vmem:[#allocation38_spill] sm:$0xff] }
 0xb52   :  { %v13379_v28 = vld [vmem:[#allocation83_spill] sm:$0xff] }
 0xb54   :  { %5213 = vmatpush1.bf16.msra.mxu0 %v8622_v31  ;;  %5254 = vmatpush1.bf16.msra.mxu1 %v8759_v35  ;;  %v13364_v31 = vld [vmem:[#allocation31_spill] sm:$0xff] }
 0xb55   :  { %5214 = vmatprep.subr.bf16.mxu0 %v8625_v33  ;;  %5255 = vmatprep.subr.bf16.mxu1 %v8765_v40  ;;  %v13365_v33 = vld [vmem:[#allocation69_spill] sm:$0xff]  ;;  %v13380_v35 = vld [vmem:[#allocation39_spill] sm:$0xff] }
 0xb56   :  { %v13381_v40 = vld [vmem:[#allocation85_spill] sm:$0xff] }
 0xb58   :  { %5215 = vmatpush1.bf16.msra.mxu0 %v8630_v39  ;;  %5256 = vmatpush1.bf16.msra.mxu1 %v8772_v57  ;;  %v13366_v39 = vld [vmem:[#allocation32_spill] sm:$0xff] }
 0xb59   :  { %5216 = vmatprep.subr.bf16.mxu0 %v8633_v41  ;;  %5257 = vmatprep.subr.bf16.mxu1 %v8779_v1  ;;  %v13367_v41 = vld [vmem:[#allocation71_spill] sm:$0xff]  ;;  %v13382_v57 = vld [vmem:[#allocation40_spill] sm:$0xff] }
 0xb5a   :  { %v13383_v1 = vld [vmem:[#allocation87_spill] sm:$0xff] }
 0xb5c   :  { %5217 = vmatpush1.bf16.msra.mxu0 %v8640_v48  ;;  %5258 = vmatpush1.bf16.msra.mxu1 %v8785_v20  ;;  %v13368_v48 = vld [vmem:[#allocation33_spill] sm:$0xff] }
 0xb5d   :  { %5218 = vmatprep.subr.bf16.mxu0 %v8643_v50  ;;  %5259 = vmatprep.subr.bf16.mxu1 %v8791_v29  ;;  %v13369_v50 = vld [vmem:[#allocation73_spill] sm:$0xff] }
 0xb5e   :  { %v13384_v20 = vld [vmem:[#allocation41_spill] sm:$0xff] }
 0xb5f   :  { %v13385_v29 = vld [vmem:[#allocation89_spill] sm:$0xff] }
 0xb60   :  { %5219 = vmatpush1.bf16.msra.mxu0 %v8648_v56  ;;  %5260 = vmatpush1.bf16.msra.mxu1 %v8798_v45  ;;  %v13370_v56 = vld [vmem:[#allocation34_spill] sm:$0xff]  ;;  %v13386_v45 = vld [vmem:[#allocation43_spill] sm:$0xff] }
 0xb61   :  { %5220 = vmatprep.subr.bf16.mxu0 %v8651_v58  ;;  %5261 = vmatprep.subr.bf16.mxu1 %v8805_v52  ;;  %v13371_v58 = vld [vmem:[#allocation75_spill] sm:$0xff] }
 0xb62   :  { %v13387_v52 = vld [vmem:[#allocation91_spill] sm:$0xff] }
 0xb64   :  { %5221 = vmatpush1.bf16.msra.mxu0 %v8658_v2  ;;  %5262 = vmatpush1.bf16.msra.mxu1 %v8811_v11  ;;  %v13372_v2 = vld [vmem:[#allocation35_spill] sm:$0xff]  ;;  %v13388_v11 = vld [vmem:[#allocation44_spill] sm:$0xff] }
 0xb65   :  { %5222 = vmatprep.subr.bf16.mxu0 %v8661_v4  ;;  %5263 = vmatprep.subr.bf16.mxu1 %v8817_v27  ;;  %v13373_v4 = vld [vmem:[#allocation77_spill] sm:$0xff]  ;;  %v13389_v27 = vld [vmem:[#allocation92_spill] sm:$0xff] }
 0xb68   :  { %5223 = vmatpush1.bf16.msra.mxu0 %v8666_v12  ;;  %5264 = vmatpush1.bf16.msra.mxu1 %v8824_v0  ;;  %v13374_v12 = vld [vmem:[#allocation36_spill] sm:$0xff]  ;;  %v13390_v0 = vld [vmem:[#allocation45_spill] sm:$0xff] }
 0xb69   :  { %5224 = vmatprep.subr.bf16.mxu0 %v8669_v18  ;;  %5265 = vmatprep.subr.bf16.mxu1 %v13204_v60  ;;  %v13375_v18 = vld [vmem:[#allocation79_spill] sm:$0xff]  ;;  %v13392_v60 = vld [vmem:[#allocation46_spill] sm:$0xff] }
 0xb6c   :  { %5225 = vmatpush1.bf16.msra.mxu0 %v13205_v13  ;;  %5266 = vmatpush1.bf16.msra.mxu1 %v13206_v17  ;;  %v13393_v13 = vld [vmem:[#allocation94_spill] sm:$0xff]  ;;  %v13394_v17 = vld [vmem:[#allocation47_spill] sm:$0xff] }
 0xb6d   :  { %5226 = vmatprep.subr.bf16.mxu0 %v13207_v32  ;;  %5267 = vmatprep.subr.bf16.mxu1 %v13208_v25  ;;  %v13395_v32 = vld [vmem:[#allocation95_spill] sm:$0xff]  ;;  %v13396_v25 = vld [vmem:[#allocation48_spill] sm:$0xff] }
 0xb70   :  { %5227 = vmatpush1.bf16.msra.mxu0 %v13360_v14  ;;  %5268 = vmatpush1.bf16.msra.mxu1 %v13361_v16  ;;  %v13413_v14 = vld [vmem:[#allocation104_spill] sm:$0xff]  ;;  %v13414_v16 = vld [vmem:[#allocation57_spill] sm:$0xff] }
 0xb71   :  { %5228 = vmatprep.subr.bf16.mxu0 %v13362_v22  ;;  %5269 = vmatprep.subr.bf16.mxu1 %v13363_v24  ;;  %v13415_v22 = vld [vmem:[#allocation105_spill] sm:$0xff]  ;;  %v13416_v24 = vld [vmem:[#allocation58_spill] sm:$0xff] }
 0xb74   :  { %5229 = vmatpush1.bf16.msra.mxu0 %v13364_v31  ;;  %5270 = vmatpush1.bf16.msra.mxu1 %v13365_v33  ;;  %v13417_v31 = vld [vmem:[#allocation106_spill] sm:$0xff]  ;;  %v13418_v33 = vld [vmem:[#allocation60_spill] sm:$0xff] }
 0xb75   :  { %5230 = vmatprep.subr.bf16.mxu0 %v13366_v39  ;;  %5271 = vmatprep.subr.bf16.mxu1 %v13367_v41  ;;  %v13419_v39 = vld [vmem:[#allocation107_spill] sm:$0xff]  ;;  %v13420_v41 = vld [vmem:[#allocation62_spill] sm:$0xff] }
 0xb78   :  { %5231 = vmatpush1.bf16.msra.mxu0 %v13368_v48  ;;  %5272 = vmatpush1.bf16.msra.mxu1 %v13369_v50  ;;  %v13421_v48 = vld [vmem:[#allocation108_spill] sm:$0xff] }
 0xb79   :  { %5232 = vmatprep.subr.bf16.mxu0 %v13370_v56  ;;  %5273 = vmatprep.subr.bf16.mxu1 %v13371_v58  ;;  %v13422_v50 = vld [vmem:[#allocation64_spill] sm:$0xff]  ;;  %v13423_v56 = vld [vmem:[#allocation109_spill] sm:$0xff]  ;;  %v13424_v58 = vld [vmem:[#allocation66_spill] sm:$0xff] }
 0xb7c   :  { %5233 = vmatpush1.bf16.msra.mxu0 %v13372_v2  ;;  %5274 = vmatpush1.bf16.msra.mxu1 %v13373_v4  ;;  %v13425_v2 = vld [vmem:[#allocation110_spill] sm:$0xff]  ;;  %v13426_v4 = vld [vmem:[#allocation68_spill] sm:$0xff] }
 0xb7d   :  { %5234 = vmatprep.subr.bf16.mxu0 %v13374_v12  ;;  %5275 = vmatprep.subr.bf16.mxu1 %v13375_v18  ;;  %v13427_v12 = vld [vmem:[#allocation111_spill] sm:$0xff]  ;;  %v13428_v18 = vld [vmem:[#allocation70_spill] sm:$0xff] }
 0xb80   :  { %5235 = vmatpush1.bf16.msra.mxu0 %v13376_v63  ;;  %5276 = vmatpush1.bf16.msra.mxu1 %v13377_v8  ;;  %v13429_v63 = vld [vmem:[#allocation112_spill] sm:$0xff] }
 0xb81   :  { %5236 = vmatprep.subr.bf16.mxu0 %v13378_v19  ;;  %5277 = vmatprep.subr.bf16.mxu1 %v13379_v28  ;;  %v13430_v8 = vld [vmem:[#allocation72_spill] sm:$0xff]  ;;  %v13431_v19 = vld [vmem:[#allocation113_spill] sm:$0xff]  ;;  %v13432_v28 = vld [vmem:[#allocation74_spill] sm:$0xff] }
 0xb84   :  { %5237 = vmatpush1.bf16.msra.mxu0 %v13380_v35  ;;  %5278 = vmatpush1.bf16.msra.mxu1 %v13381_v40  ;;  %v13433_v35 = vld [vmem:[#allocation114_spill] sm:$0xff]  ;;  %v13434_v40 = vld [vmem:[#allocation76_spill] sm:$0xff] }
 0xb85   :  { %5238 = vmatprep.subr.bf16.mxu0 %v13382_v57  ;;  %5279 = vmatprep.subr.bf16.mxu1 %v13383_v1  ;;  %v13435_v57 = vld [vmem:[#allocation115_spill] sm:$0xff]  ;;  %v13436_v1 = vld [vmem:[#allocation78_spill] sm:$0xff] }
 0xb88   :  { %5239 = vmatpush1.bf16.msra.mxu0 %v13384_v20  ;;  %5280 = vmatpush1.bf16.msra.mxu1 %v13385_v29  ;;  %v13437_v20 = vld [vmem:[#allocation116_spill] sm:$0xff] }
 0xb89   :  { %5290 = vmatprep.subr.bf16.mxu0 %v13386_v45  ;;  %5331 = vmatprep.subr.bf16.mxu1 %v13387_v52  ;;  %v13438_v29 = vld [vmem:[#allocation80_spill] sm:$0xff]  ;;  %v13439_v45 = vld [vmem:[#allocation117_spill] sm:$0xff]  ;;  %v13440_v52 = vld [vmem:[#allocation82_spill] sm:$0xff] }
 0xb8b   :  { %5241 = vmatmul.mubr.bf16.vlgmr.msra.gmra.mrb[104].mxu0 %v11024_v3  ;;  %5282 = vmatmul.mubr.bf16.vlgmr.msra.gmra.mrb[136].mxu1 %v11024_v3 }
 0xb8c   :  { %5291 = vmatpush1.bf16.msra.mxu0 %v13388_v11  ;;  %5322 = vmatprep.mubr.bf16.mxu0 %v11130_v61  ;;  %v13441_v11 = vld [vmem:[#allocation118_spill] sm:$0xff] }
 0xb8d   :  { %5332 = vmatpush1.bf16.msra.mxu1 %v13389_v27  ;;  %5363 = vmatprep.mubr.bf16.mxu1 %v11130_v61  ;;  %v13412_v61 = vld [vmem:[#allocation56_spill] sm:$0xff] }
 0xb8e   :  { %5292 = vmatprep.subr.bf16.mxu0 %v13390_v0  ;;  %5333 = vmatprep.subr.bf16.mxu1 %v13391_v46  ;;  %v13442_v27 = vld [vmem:[#allocation84_spill] sm:$0xff]  ;;  %v13443_v0 = vld [vmem:[#allocation119_spill] sm:$0xff]  ;;  %v13444_v46 = vld [vmem:[#allocation86_spill] sm:$0xff] }
 0xb90   :  { %5293 = vmatpush1.bf16.msra.mxu0 %v13392_v60  ;;  %v13445_v60 = vld [vmem:[#allocation120_spill] sm:$0xff] }
 0xb91   :  { %5334 = vmatpush1.bf16.msra.mxu1 %v13393_v13  ;;  %5294 = vmatprep.subr.bf16.mxu0 %v13394_v17  ;;  %v13446_v13 = vld [vmem:[#allocation88_spill] sm:$0xff]  ;;  %v13447_v17 = vld [vmem:[#allocation121_spill] sm:$0xff] }
 0xb92   :  { %5335 = vmatprep.subr.bf16.mxu1 %v13395_v32  ;;  %v13448_v32 = vld [vmem:[#allocation90_spill] sm:$0xff] }
 0xb94   :  { %5295 = vmatpush1.bf16.msra.mxu0 %v13396_v25  ;;  %v13449_v25 = vld [vmem:[#allocation122_spill] sm:$0xff] }
 0xb95   :  { %5336 = vmatpush1.bf16.msra.mxu1 %v13397_v10  ;;  %5296 = vmatprep.subr.bf16.mxu0 %v13398_v44  ;;  %v8173_v10 = vld [vmem:[#allocation13 + $0x4] ss:$16 sps:$4 sm:$0xff]   ;;  %v8174_v44 = vld [vmem:[#allocation13 + $0xc] ss:$16 sps:$4 sm:$0xff]  }
 0xb96   :  { %5337 = vmatprep.subr.bf16.mxu1 %v13399_v36  ;;  %v13450_v36 = vld [vmem:[#allocation197_spill] sm:$0xff] }
 0xb98   :  { %5297 = vmatpush1.bf16.msra.mxu0 %v13400_v42  ;;  %v13451_v42 = vld [vmem:[#allocation198_spill] sm:$0xff] }
 0xb99   :  { %5338 = vmatpush1.bf16.msra.mxu1 %v13401_v59  ;;  %5298 = vmatprep.subr.bf16.mxu0 %v13402_v6  ;;  %v13452_v59 = vld [vmem:[#allocation199_spill] sm:$0xff]  ;;  %v13453_v6 = vld [vmem:[#allocation200_spill] sm:$0xff] }
 0xb9a   :  { %5339 = vmatprep.subr.bf16.mxu1 %v13403_v37  ;;  %v13454_v37 = vld [vmem:[#allocation167_spill] sm:$0xff] }
 0xb9c   :  { %5299 = vmatpush1.bf16.msra.mxu0 %v13404_v43  ;;  %v13455_v43 = vld [vmem:[#allocation183_spill] sm:$0xff] }
 0xb9d   :  { %5340 = vmatpush1.bf16.msra.mxu1 %v13405_v53  ;;  %5300 = vmatprep.subr.bf16.mxu0 %v13406_v7  ;;  %v13456_v53 = vld [vmem:[#allocation155_spill] sm:$0xff]  ;;  %v13457_v7 = vld [vmem:[#allocation181_spill] sm:$0xff] }
 0xb9e   :  { %5341 = vmatprep.subr.bf16.mxu1 %v13407_v21  ;;  %v13459_v21 = vld [vmem:[#allocation202_spill] sm:$0xff] }
 0xba0   :  { %5301 = vmatpush1.bf16.msra.mxu0 %v13408_v9  ;;  %v13460_v9 = vld [vmem:[#allocation203_spill] sm:$0xff] }
 0xba1   :  { %5342 = vmatpush1.bf16.msra.mxu1 %v13409_v54  ;;  %5302 = vmatprep.subr.bf16.mxu0 %v13410_v30  ;;  %v13461_v54 = vld [vmem:[#allocation204_spill] sm:$0xff]  ;;  %v13462_v30 = vld [vmem:[#allocation149_spill] sm:$0xff] }
 0xba2   :  { %5343 = vmatprep.subr.bf16.mxu1 %v13411_v15  ;;  %v13463_v15 = vld [vmem:[#allocation171_spill] sm:$0xff] }
 0xba4   :  { %5303 = vmatpush1.bf16.msra.mxu0 %v13412_v61  ;;  %v13464_v61 = vld [vmem:[#allocation144_spill] sm:$0xff] }
 0xba5   :  { %5344 = vmatpush1.bf16.msra.mxu1 %v13413_v14  ;;  %5304 = vmatprep.subr.bf16.mxu0 %v13414_v16  ;;  %v13465_v14 = vld [vmem:[#allocation180_spill] sm:$0xff]  ;;  %v13466_v16 = vld [vmem:[#allocation205_spill] sm:$0xff] }
 0xba6   :  { %5345 = vmatprep.subr.bf16.mxu1 %v13415_v22  ;;  %v13467_v22 = vld [vmem:[#allocation206_spill] sm:$0xff] }
 0xba8   :  { %5305 = vmatpush1.bf16.msra.mxu0 %v13416_v24  ;;  %v13468_v24 = vld [vmem:[#allocation207_spill] sm:$0xff] }
 0xba9   :  { %5346 = vmatpush1.bf16.msra.mxu1 %v13417_v31  ;;  %5306 = vmatprep.subr.bf16.mxu0 %v13418_v33  ;;  %v13469_v31 = vld [vmem:[#allocation208_spill] sm:$0xff]  ;;  %v13470_v33 = vld [vmem:[#allocation137_spill] sm:$0xff] }
 0xbaa   :  { %5347 = vmatprep.subr.bf16.mxu1 %v13419_v39  ;;  %v13471_v39 = vld [vmem:[#allocation169_spill] sm:$0xff] }
 0xbac   :  { %5307 = vmatpush1.bf16.msra.mxu0 %v13420_v41  ;;  %v13472_v41 = vld [vmem:[#allocation156_spill] sm:$0xff] }
 0xbad   :  { %5348 = vmatpush1.bf16.msra.mxu1 %v13421_v48  ;;  %5308 = vmatprep.subr.bf16.mxu0 %v13422_v50  ;;  %v13473_v48 = vld [vmem:[#allocation182_spill] sm:$0xff]  ;;  %v13474_v50 = vld [vmem:[#allocation124_spill] sm:$0xff] }
 0xbae   :  { %5349 = vmatprep.subr.bf16.mxu1 %v13423_v56  ;;  %v13475_v56 = vld [vmem:[#allocation125_spill] sm:$0xff] }
 0xbb0   :  { %5309 = vmatpush1.bf16.msra.mxu0 %v13424_v58  ;;  %v13476_v58 = vld [vmem:[#allocation127_spill] sm:$0xff] }
 0xbb1   :  { %5350 = vmatpush1.bf16.msra.mxu1 %v13425_v2  ;;  %5310 = vmatprep.subr.bf16.mxu0 %v13426_v4  ;;  %v13477_v2 = vld [vmem:[#allocation128_spill] sm:$0xff]  ;;  %v13478_v4 = vld [vmem:[#allocation130_spill] sm:$0xff] }
 0xbb2   :  { %5351 = vmatprep.subr.bf16.mxu1 %v13427_v12  ;;  %v13479_v12 = vld [vmem:[#allocation131_spill] sm:$0xff] }
 0xbb4   :  { %5311 = vmatpush1.bf16.msra.mxu0 %v13428_v18  ;;  %v13480_v18 = vld [vmem:[#allocation133_spill] sm:$0xff] }
 0xbb5   :  { %5352 = vmatpush1.bf16.msra.mxu1 %v13429_v63  ;;  %5312 = vmatprep.subr.bf16.mxu0 %v13430_v8  ;;  %v13481_v63 = vld [vmem:[#allocation134_spill] sm:$0xff]  ;;  %v13482_v8 = vld [vmem:[#allocation164_spill] sm:$0xff] }
 0xbb6   :  { %5353 = vmatprep.subr.bf16.mxu1 %v13431_v19  ;;  %v5374_v19 = vunpack.c.l.bf16 %v13482_v8 }
 0xbb8   :  { %5313 = vmatpush1.bf16.msra.mxu0 %v13432_v28  ;;  %v13483_v28 = vld [vmem:[#allocation174_spill] sm:$0xff] }
 0xbb9   :  { %5354 = vmatpush1.bf16.msra.mxu1 %v13433_v35  ;;  %5314 = vmatprep.subr.bf16.mxu0 %v13434_v40  ;;  %v5376_v35 = vunpack.c.l.bf16 %v13483_v28 }
 0xbba   :  { %5355 = vmatprep.subr.bf16.mxu1 %v13435_v57 }
 0xbbc   :  { %5315 = vmatpush1.bf16.msra.mxu0 %v13436_v1  ;;  %v5375_v1 = vunpack.c.h.bf16 %v13482_v8  ;;  %v13505_v8 = vld [vmem:[#allocation126_spill] sm:$0xff] }
 0xbbd   :  { %5356 = vmatpush1.bf16.msra.mxu1 %v13437_v20  ;;  %5316 = vmatprep.subr.bf16.mxu0 %v13438_v29  ;;  %v5377_v20 = vunpack.c.h.bf16 %v13483_v28 }
 0xbbe   :  { %5357 = vmatprep.subr.bf16.mxu1 %v13439_v45 }
 0xbc0   :  { %5317 = vmatpush1.bf16.msra.mxu0 %v13440_v52 }
 0xbc1   :  { %5358 = vmatpush1.bf16.msra.mxu1 %v13441_v11  ;;  %5318 = vmatprep.subr.bf16.mxu0 %v13442_v27 }
 0xbc2   :  { %5359 = vmatprep.subr.bf16.mxu1 %v13443_v0 }
 0xbc4   :  { %5319 = vmatpush1.bf16.msra.mxu0 %v13444_v46 }
 0xbc5   :  { %5360 = vmatpush1.bf16.msra.mxu1 %v13445_v60  ;;  %5320 = vmatprep.subr.bf16.mxu0 %v13446_v13 }
 0xbc6   :  { %5361 = vmatprep.subr.bf16.mxu1 %v13447_v17 }
 0xbc8   :  { %5321 = vmatpush1.bf16.msra.mxu0 %v13448_v32 }
 0xbc9   :  { %5362 = vmatpush1.bf16.msra.mxu1 %v13449_v25  ;;  %5434 = vmatprep.subr.bf16.mxu0 %v8173_v10 }
 0xbca   :  { %5475 = vmatprep.subr.bf16.mxu1 %v8174_v44 }
 0xbcb   :  { %5323 = vmatmul.mubr.bf16.vlgmr.msra.gmra.mrb[108].mxu0 %v11024_v3 }
 0xbcc   :  { %5364 = vmatmul.mubr.bf16.vlgmr.msra.gmra.mrb[140].mxu1 %v11024_v3  ;;  %5435 = vmatpush1.bf16.msra.mxu0 %v13450_v36  ;;  %v13458_v3 = vld [vmem:[#allocation201_spill] sm:$0xff] }
 0xbcd   :  { %5476 = vmatpush1.bf16.msra.mxu1 %v13451_v42  ;;  %5436 = vmatprep.subr.bf16.mxu0 %v13452_v59 }
 0xbce   :  { %5477 = vmatprep.subr.bf16.mxu1 %v13453_v6  ;;  %5466 = vmatprep.mubr.bf16.mxu0 %v12275_v47 }
 0xbcf   :  { %5507 = vmatprep.mubr.bf16.mxu1 %v12275_v47 }
 0xbd0   :  { %5437 = vmatpush1.bf16.msra.mxu0 %v13454_v37 }
 0xbd1   :  { %5478 = vmatpush1.bf16.msra.mxu1 %v13455_v43  ;;  %5438 = vmatprep.subr.bf16.mxu0 %v13456_v53 }
 0xbd2   :  { %5479 = vmatprep.subr.bf16.mxu1 %v13457_v7 }
 0xbd4   :  { %5439 = vmatpush1.bf16.msra.mxu0 %v13458_v3 }
 0xbd5   :  { %5480 = vmatpush1.bf16.msra.mxu1 %v13459_v21  ;;  %5440 = vmatprep.subr.bf16.mxu0 %v13460_v9 }
 0xbd6   :  { %5481 = vmatprep.subr.bf16.mxu1 %v13461_v54 }
 0xbd8   :  { %5441 = vmatpush1.bf16.msra.mxu0 %v13462_v30 }
 0xbd9   :  { %5482 = vmatpush1.bf16.msra.mxu1 %v13463_v15  ;;  %5442 = vmatprep.subr.bf16.mxu0 %v13464_v61 }
 0xbda   :  { %5483 = vmatprep.subr.bf16.mxu1 %v13465_v14  ;;  %v13484_v14 = vld [vmem:[#allocation135_spill] sm:$0xff] }
 0xbdc   :  { %5443 = vmatpush1.bf16.msra.mxu0 %v13466_v16  ;;  %v13486_v16 = vld [vmem:[#allocation138_spill] sm:$0xff] }
 0xbdd   :  { %5484 = vmatpush1.bf16.msra.mxu1 %v13467_v22  ;;  %5444 = vmatprep.subr.bf16.mxu0 %v13468_v24  ;;  %v13487_v22 = vld [vmem:[#allocation139_spill] sm:$0xff]  ;;  %v13488_v24 = vld [vmem:[#allocation141_spill] sm:$0xff] }
 0xbde   :  { %5485 = vmatprep.subr.bf16.mxu1 %v13469_v31  ;;  %v13489_v31 = vld [vmem:[#allocation142_spill] sm:$0xff] }
 0xbe0   :  { %5445 = vmatpush1.bf16.msra.mxu0 %v13470_v33  ;;  %v13493_v33 = vld [vmem:[#allocation148_spill] sm:$0xff] }
 0xbe1   :  { %5486 = vmatpush1.bf16.msra.mxu1 %v13471_v39  ;;  %5446 = vmatprep.subr.bf16.mxu0 %v13472_v41  ;;  %v13494_v39 = vld [vmem:[#allocation150_spill] sm:$0xff]  ;;  %v13495_v41 = vld [vmem:[#allocation151_spill] sm:$0xff] }
 0xbe2   :  { %5487 = vmatprep.subr.bf16.mxu1 %v13473_v48  ;;  %v13496_v48 = vld [vmem:[#allocation153_spill] sm:$0xff] }
 0xbe4   :  { %5447 = vmatpush1.bf16.msra.mxu0 %v13474_v50  ;;  %v13497_v50 = vld [vmem:[#allocation154_spill] sm:$0xff] }
 0xbe5   :  { %5488 = vmatpush1.bf16.msra.mxu1 %v13475_v56  ;;  %5448 = vmatprep.subr.bf16.mxu0 %v13476_v58  ;;  %v13498_v56 = vld [vmem:[#allocation157_spill] sm:$0xff]  ;;  %v13499_v58 = vld [vmem:[#allocation158_spill] sm:$0xff] }
 0xbe6   :  { %5489 = vmatprep.subr.bf16.mxu1 %v13477_v2  ;;  %v13500_v2 = vld [vmem:[#allocation152_spill] sm:$0xff] }
 0xbe8   :  { %5449 = vmatpush1.bf16.msra.mxu0 %v13478_v4  ;;  %v13501_v4 = vld [vmem:[#allocation172_spill] sm:$0xff] }
 0xbe9   :  { %5490 = vmatpush1.bf16.msra.mxu1 %v13479_v12  ;;  %5528 = vmatprep.subr.bf16.mxu0 %v13480_v18  ;;  %v13502_v12 = vld [vmem:[#allocation159_spill] sm:$0xff]  ;;  %v13503_v18 = vld [vmem:[#allocation160_spill] sm:$0xff] }
 0xbea   :  { %5569 = vmatprep.subr.bf16.mxu1 %v13481_v63  ;;  %v13504_v63 = vld [vmem:[#allocation162_spill] sm:$0xff] }
 0xc5e   :  { %v5242_v40 = vpop.f32.mrb[104].mxu0  ;;  %v5283_v57 = vpop.f32.mrb[136].mxu1 }
 0xc5f   :  { %v5378_v29 = vadd.f32 %v5374_v19, %v5242_v40  ;;  %v5380_v45 = vadd.f32 %v5376_v35, %v5283_v57  ;;  %v5244_v52 = vpop.f32.mrb[105].mxu0  ;;  %v5285_v11 = vpop.f32.mrb[137].mxu1  ;;  %v5384_v19 = vunpack.c.l.bf16 %v13505_v8  ;;  %v13506_v35 = vld [vmem:[#allocation177_spill] sm:$0xff]  ;;  %v5385_v57 = vunpack.c.h.bf16 %v13505_v8  ;;  %v11416_v8 = vld [vmem:[#allocation16 + $0xc4] ss:$16 sps:$4 sm:$0xff]  }
 0xc60   :  { %v5379_v27 = vadd.f32 %v5375_v1, %v5244_v52  ;;  %v5381_v0 = vadd.f32 %v5377_v20, %v5285_v11  ;;  %v5246_v46 = vpop.f32.mrb[106].mxu0  ;;  %v5287_v60 = vpop.f32.mrb[138].mxu1  ;;  %v5386_v40 = vunpack.c.l.bf16 %v13506_v35  ;;  %v13507_v52 = vld [vmem:[#allocation163_spill] sm:$0xff]  ;;  %v13508_v11 = vld [vmem:[#allocation165_spill] sm:$0xff] }
 0xc61   :  { %v5392_v13 = vmul.f32 0.5, %v5378_v29  ;;  %v5247_v17 = vpop.f32.mrb[107].mxu0  ;;  %v5288_v32 = vpop.f32.mrb[139].mxu1 }
 0xc62   :  { %v5396_v25 = vmul.f32 0.5, %v5379_v27  ;;  %v5401_v10 = vmul.f32 0.5, %v5381_v0  ;;  %v11343_v17 = vld [vmem:[#allocation16 + $0xc] ss:$16 sps:$4 sm:$0xff]  }
 0xc63   :  { %7849 = vtanh.f32 %v5392_v13  ;;  %v11341_v13 = vld [vmem:[#allocation16 + $0x4] ss:$16 sps:$4 sm:$0xff]  }
 0xc64   :  { %7851 = vtanh.f32 %v5396_v25 }
 0xc65   :  { %7853 = vtanh.f32 %v5380_v45  ;;  %v5387_v45 = vunpack.c.h.bf16 %v13506_v35  ;;  %v11424_v35 = vld [vmem:[#allocation16 + $0xc8] ss:$16 sps:$4 sm:$0xff]  }
 0xc66   :  { %7855 = vtanh.f32 %v5401_v10 }
 0xc6d   :  { %v7850_v44 = vpop.eup %7849 }
 0xc6e   :  { %v7852_v36 = vpop.eup %7851  ;;  %v5394_v42 = vmul.f32 0.5, %v7850_v44 }
 0xc6f   :  { %v5398_v59 = vmul.f32 0.5, %v7852_v36  ;;  %v7854_v37 = vpop.eup %7853 }
 0xc70   :  { %v5395_v6 = vadd.f32 0.5, %v5394_v42  ;;  %v7856_v21 = vpop.eup %7855 }
 0xc71   :  { %v5399_v43 = vadd.f32 0.5, %v5398_v59  ;;  %v5403_v9 = vmul.f32 0.5, %v7856_v21 }
 0xc72   :  { %v5406_v53 = vmul.f32 %v7854_v37, %v5395_v6 }
 0xc73   :  { %v5405_v7 = vmul.f32 %v5399_v43, %v11021_v62  ;;  %v5404_v54 = vadd.f32 0.5, %v5403_v9  ;;  %v13485_v62 = vld [vmem:[#allocation136_spill] sm:$0xff] }
 0xc75   :  { %v5407_v3 = vadd.f32 %v5406_v53, %v5405_v7 }
 0xc77   :  { %7857 = vtanh.f32 %v5407_v3 }
 0xc81   :  { %v7858_v30 = vpop.eup %7857 }
 0xc82   :  { %v5409_v15 = vmul.f32 %v7858_v30, %v5404_v54 }
 0xc84   :  { %v5428_v61 = vpack.c.bf16 %v5409_v15, %v5409_v15 }
 0xc86   :  { %5467 = vmatmul.mubr.bf16.vlgmr.msra.gmra.mrb[28].mxu0 %v5428_v61  ;;  %5508 = vmatmul.mubr.bf16.vlgmr.msra.gmra.mrb[60].mxu1 %v5428_v61  ;;  %v11350_v61 = vld [vmem:[#allocation16] ss:$16 sps:$4 sm:$0xff]  }
 0xc87   :  { %5529 = vmatpush1.bf16.msra.mxu0 %v11028_v5  ;;  %5570 = vmatpush1.bf16.msra.mxu1 %v11031_v34  ;;  %v13490_v5 = vld [vmem:[#allocation145_spill] sm:$0xff]  ;;  %v13491_v34 = vld [vmem:[#allocation146_spill] sm:$0xff] }
 0xc88   :  { %5530 = vmatprep.subr.bf16.mxu0 %v11034_v23  ;;  %5571 = vmatprep.subr.bf16.mxu1 %v13484_v14  ;;  %v13492_v23 = vld [vmem:[#allocation147_spill] sm:$0xff] }
 0xc89   :  { %5560 = vmatprep.mubr.bf16.mxu0 %v12275_v47  ;;  %5601 = vmatprep.mubr.bf16.mxu1 %v12275_v47  ;;  %v11352_v14 = vld [vmem:[#allocation16 + $0x8] ss:$16 sps:$4 sm:$0xff]  }
 0xc8b   :  { %5531 = vmatpush1.bf16.msra.mxu0 %v13485_v62  ;;  %5572 = vmatpush1.bf16.msra.mxu1 %v13486_v16  ;;  %v11354_v16 = vld [vmem:[#allocation16 + $0x24] ss:$16 sps:$4 sm:$0xff]  }
 0xc8c   :  { %5532 = vmatprep.subr.bf16.mxu0 %v13487_v22  ;;  %5573 = vmatprep.subr.bf16.mxu1 %v13488_v24  ;;  %v11356_v22 = vld [vmem:[#allocation16 + $0x2c] ss:$16 sps:$4 sm:$0xff]   ;;  %v11362_v24 = vld [vmem:[#allocation16 + $0x28] ss:$16 sps:$4 sm:$0xff]  }
 0xc8f   :  { %5533 = vmatpush1.bf16.msra.mxu0 %v13489_v31  ;;  %5574 = vmatpush1.bf16.msra.mxu1 %v13490_v5  ;;  %v11366_v31 = vld [vmem:[#allocation16 + $0x44] ss:$16 sps:$4 sm:$0xff]   ;;  %v11368_v5 = vld [vmem:[#allocation16 + $0x4c] ss:$16 sps:$4 sm:$0xff]  }
 0xc90   :  { %5534 = vmatprep.subr.bf16.mxu0 %v13491_v34  ;;  %5575 = vmatprep.subr.bf16.mxu1 %v13492_v23  ;;  %v11374_v34 = vld [vmem:[#allocation16 + $0x40] ss:$16 sps:$4 sm:$0xff]   ;;  %v11376_v23 = vld [vmem:[#allocation16 + $0x48] ss:$16 sps:$4 sm:$0xff]  }
 0xc93   :  { %5535 = vmatpush1.bf16.msra.mxu0 %v13493_v33  ;;  %5576 = vmatpush1.bf16.msra.mxu1 %v13494_v39  ;;  %v11380_v33 = vld [vmem:[#allocation16 + $0x64] ss:$16 sps:$4 sm:$0xff]   ;;  %v11382_v39 = vld [vmem:[#allocation16 + $0x6c] ss:$16 sps:$4 sm:$0xff]  }
 0xc94   :  { %5536 = vmatprep.subr.bf16.mxu0 %v13495_v41  ;;  %5577 = vmatprep.subr.bf16.mxu1 %v13496_v48  ;;  %v11386_v41 = vld [vmem:[#allocation16 + $0x60] ss:$16 sps:$4 sm:$0xff]   ;;  %v11388_v48 = vld [vmem:[#allocation16 + $0x68] ss:$16 sps:$4 sm:$0xff]  }
 0xc97   :  { %5537 = vmatpush1.bf16.msra.mxu0 %v13497_v50  ;;  %5578 = vmatpush1.bf16.msra.mxu1 %v13498_v56  ;;  %v11392_v50 = vld [vmem:[#allocation16 + $0x84] ss:$16 sps:$4 sm:$0xff]   ;;  %v11394_v56 = vld [vmem:[#allocation16 + $0x8c] ss:$16 sps:$4 sm:$0xff]  }
 0xc98   :  { %5538 = vmatprep.subr.bf16.mxu0 %v13499_v58  ;;  %5579 = vmatprep.subr.bf16.mxu1 %v13500_v2  ;;  %v11398_v58 = vld [vmem:[#allocation16 + $0x80] ss:$16 sps:$4 sm:$0xff]   ;;  %v11400_v2 = vld [vmem:[#allocation16 + $0x88] ss:$16 sps:$4 sm:$0xff]  }
 0xc9b   :  { %5539 = vmatpush1.bf16.msra.mxu0 %v13501_v4  ;;  %5580 = vmatpush1.bf16.msra.mxu1 %v13502_v12  ;;  %v11404_v4 = vld [vmem:[#allocation16 + $0xa4] ss:$16 sps:$4 sm:$0xff]   ;;  %v11406_v12 = vld [vmem:[#allocation16 + $0xac] ss:$16 sps:$4 sm:$0xff]  }
 0xc9c   :  { %5540 = vmatprep.subr.bf16.mxu0 %v13503_v18  ;;  %5581 = vmatprep.subr.bf16.mxu1 %v13504_v63  ;;  %v11410_v18 = vld [vmem:[#allocation16 + $0xa0] ss:$16 sps:$4 sm:$0xff]   ;;  %v11412_v63 = vld [vmem:[#allocation16 + $0xa8] ss:$16 sps:$4 sm:$0xff]  }
 0xc9e   :  { %v5324_v28 = vpop.f32.mrb[108].mxu0 }
 0xc9f   :  { %v5388_v1 = vadd.f32 %v5384_v19, %v5324_v28  ;;  %v5365_v20 = vpop.f32.mrb[140].mxu1  ;;  %v5326_v29 = vpop.f32.mrb[109].mxu0  ;;  %5541 = vmatpush1.bf16.msra.mxu0 %v13507_v52  ;;  %5582 = vmatpush1.bf16.msra.mxu1 %v13508_v11  ;;  %v11418_v19 = vld [vmem:[#allocation16 + $0xcc] ss:$16 sps:$4 sm:$0xff]   ;;  %v11422_v28 = vld [vmem:[#allocation16 + $0xc0] ss:$16 sps:$4 sm:$0xff]  }
 0xca0   :  { %v5390_v27 = vadd.f32 %v5386_v40, %v5365_v20  ;;  %v5389_v0 = vadd.f32 %v5385_v57, %v5326_v29  ;;  %v5367_v46 = vpop.f32.mrb[141].mxu1  ;;  %v5328_v60 = vpop.f32.mrb[110].mxu0  ;;  %5542 = vmatprep.subr.bf16.mxu0 %v11112_v51  ;;  %5583 = vmatprep.subr.bf16.mxu1 %v11115_v49  ;;  %v11428_v40 = vld [vmem:[#allocation16 + $0xe4] ss:$16 sps:$4 sm:$0xff]   ;;  %v11430_v57 = vld [vmem:[#allocation16 + $0xec] ss:$16 sps:$4 sm:$0xff]  }
 0xca1   :  { %v5410_v32 = vmul.f32 0.5, %v5388_v1  ;;  %v5391_v25 = vadd.f32 %v5387_v45, %v5367_v46  ;;  %v5369_v10 = vpop.f32.mrb[142].mxu1  ;;  %v5329_v44 = vpop.f32.mrb[111].mxu0  ;;  %v11434_v1 = vld [vmem:[#allocation16 + $0xe0] ss:$16 sps:$4 sm:$0xff]   ;;  %v13509_v45 = vld [vmem:[#allocation123_spill] sm:$0xff] }
 0xca2   :  { %v5414_v36 = vmul.f32 0.5, %v5389_v0  ;;  %v5370_v42 = vpop.f32.mrb[143].mxu1  ;;  %v11436_v20 = vld [vmem:[#allocation16 + $0xe8] ss:$16 sps:$4 sm:$0xff]   ;;  %v13510_v52 = vsub.s32 0, %v13509_v45 }
 0xca3   :  { %7859 = vtanh.f32 %v5410_v32  ;;  %5543 = vmatpush1.bf16.msra.mxu0 %v11118_v55  ;;  %5584 = vmatpush1.bf16.msra.mxu1 %v11121_v38  ;;  %v5419_v51 = vmul.f32 0.5, %v5391_v25  ;;  %v1118_v29 = vld [vmem:[%s11775_s7] sm:$0xf]  ;;  %v13512_v25 = vsub.s32 2, %v13509_v45 }
 0xca4   :  { %7861 = vtanh.f32 %v5414_v36  ;;  %5814 = vmatprep.subr.bf16.mxu0 %v11341_v13  ;;  %5855 = vmatprep.subr.bf16.mxu1 %v11343_v17  ;;  %v11485_v11 = vrot.slane %v1118_v29, %v13510_v52 }
 0xca5   :  { %7863 = vtanh.f32 %v5390_v27  ;;  %v13511_v27 = vsub.s32 1, %v13509_v45  ;;  %v11494_v10 = vrot.slane %v1118_v29, %v13512_v25 }
 0xca6   :  { %7865 = vtanh.f32 %v5419_v51 }
 0xca7   :  { %v11489_v0 = vrot.slane %v1118_v29, %v13511_v27 }
 0xcad   :  { %v7860_v49 = vpop.eup %7859 }
 0xcae   :  { %v7862_v59 = vpop.eup %7861  ;;  %v5412_v6 = vmul.f32 0.5, %v7860_v49 }
 0xcaf   :  { %v5416_v37 = vmul.f32 0.5, %v7862_v59  ;;  %v7864_v53 = vpop.eup %7863 }
 0xcb0   :  { %v5413_v43 = vadd.f32 0.5, %v5412_v6  ;;  %v7866_v38 = vpop.eup %7865 }
 0xcb1   :  { %v5417_v7 = vadd.f32 0.5, %v5416_v37  ;;  %v5421_v9 = vmul.f32 0.5, %v7866_v38 }
 0xcb2   :  { %v5424_v3 = vmul.f32 %v7864_v53, %v5413_v43 }
 0xcb3   :  { %v5423_v55 = vmul.f32 %v5417_v7, %v11127_v26  ;;  %v5422_v54 = vadd.f32 0.5, %v5421_v9  ;;  %v11360_v26 = vld [vmem:[#allocation16 + $0x20] ss:$16 sps:$4 sm:$0xff]   ;;  %v13513_v7 = vsub.s32 3, %v13509_v45 }
 0xcb5   :  { %v5425_v21 = vadd.f32 %v5424_v3, %v5423_v55  ;;  %v11500_v3 = vrot.slane %v1118_v29, %v13513_v7 }
 0xcb7   :  { %7867 = vtanh.f32 %v5425_v21 }
 0xcc1   :  { %v7868_v30 = vpop.eup %7867 }
 0xcc2   :  { %v5427_v15 = vmul.f32 %v7868_v30, %v5422_v54 }
 0xcc4   :  { %v5429_v62 = vpack.c.bf16 %v5427_v15, %v5427_v15 }
 0xcc6   :  { %5561 = vmatmul.mubr.bf16.vlgmr.msra.gmra.mrb[24].mxu0 %v5429_v62  ;;  %5602 = vmatmul.mubr.bf16.vlgmr.msra.gmra.mrb[56].mxu1 %v5429_v62 }
 0xcc7   :  { %5815 = vmatpush1.bf16.msra.mxu0 %v11350_v61  ;;  %5856 = vmatpush1.bf16.msra.mxu1 %v11352_v14 }
 0xcc8   :  { %5816 = vmatprep.subr.bf16.mxu0 %v11354_v16  ;;  %5857 = vmatprep.subr.bf16.mxu1 %v11356_v22 }
 0xcc9   :  { %5846 = vmatprep.mubr.bf16.mxu0 %v12275_v47  ;;  %5887 = vmatprep.mubr.bf16.mxu1 %v12275_v47 }
 0xccb   :  { %5817 = vmatpush1.bf16.msra.mxu0 %v11360_v26  ;;  %5858 = vmatpush1.bf16.msra.mxu1 %v11362_v24 }
 0xccc   :  { %5818 = vmatprep.subr.bf16.mxu0 %v11366_v31  ;;  %5859 = vmatprep.subr.bf16.mxu1 %v11368_v5 }
 0xccf   :  { %5819 = vmatpush1.bf16.msra.mxu0 %v11374_v34  ;;  %5860 = vmatpush1.bf16.msra.mxu1 %v11376_v23 }
 0xcd0   :  { %5820 = vmatprep.subr.bf16.mxu0 %v11380_v33  ;;  %5861 = vmatprep.subr.bf16.mxu1 %v11382_v39 }
 0xcd3   :  { %5821 = vmatpush1.bf16.msra.mxu0 %v11386_v41  ;;  %5862 = vmatpush1.bf16.msra.mxu1 %v11388_v48 }
 0xcd4   :  { %5822 = vmatprep.subr.bf16.mxu0 %v11392_v50  ;;  %5863 = vmatprep.subr.bf16.mxu1 %v11394_v56 }
 0xcd7   :  { %5823 = vmatpush1.bf16.msra.mxu0 %v11398_v58  ;;  %5864 = vmatpush1.bf16.msra.mxu1 %v11400_v2 }
 0xcd8   :  { %5824 = vmatprep.subr.bf16.mxu0 %v11404_v4  ;;  %5865 = vmatprep.subr.bf16.mxu1 %v11406_v12 }
 0xcdb   :  { %5825 = vmatpush1.bf16.msra.mxu0 %v11410_v18  ;;  %5866 = vmatpush1.bf16.msra.mxu1 %v11412_v63 }
 0xcdc   :  { %5826 = vmatprep.subr.bf16.mxu0 %v11416_v8  ;;  %5867 = vmatprep.subr.bf16.mxu1 %v11418_v19 }
 0xcdf   :  { %5827 = vmatpush1.bf16.msra.mxu0 %v11422_v28  ;;  %5868 = vmatpush1.bf16.msra.mxu1 %v11424_v35 }
 0xce0   :  { %5828 = vmatprep.subr.bf16.mxu0 %v11428_v40  ;;  %5869 = vmatprep.subr.bf16.mxu1 %v11430_v57 }
 0xce3   :  { %5829 = vmatpush1.bf16.msra.mxu0 %v11434_v1  ;;  %5870 = vmatpush1.bf16.msra.mxu1 %v11436_v20 }
 0xce4   :  { %5924 = vmatprep.subr.bf16.mxu0 %v11341_v13  ;;  %5965 = vmatprep.subr.bf16.mxu1 %v11343_v17 }
 0xce6   :  { %5847 = vmatmul.mubr.bf16.vlgmr.msra.gmra.mrb[24].mxu0 %v12275_v47  ;;  %5888 = vmatmul.mubr.bf16.vlgmr.msra.gmra.mrb[56].mxu1 %v12275_v47 }
 0xce7   :  { %5925 = vmatpush1.bf16.msra.mxu0 %v11350_v61  ;;  %5966 = vmatpush1.bf16.msra.mxu1 %v11352_v14 }
 0xce8   :  { %5926 = vmatprep.subr.bf16.mxu0 %v11354_v16  ;;  %5967 = vmatprep.subr.bf16.mxu1 %v11356_v22 }
 0xce9   :  { %5956 = vmatprep.mubr.bf16.mxu0 %v12275_v47  ;;  %5997 = vmatprep.mubr.bf16.mxu1 %v12275_v47 }
 0xceb   :  { %5927 = vmatpush1.bf16.msra.mxu0 %v11360_v26  ;;  %5968 = vmatpush1.bf16.msra.mxu1 %v11362_v24 }
 0xcec   :  { %5928 = vmatprep.subr.bf16.mxu0 %v11366_v31  ;;  %5969 = vmatprep.subr.bf16.mxu1 %v11368_v5 }
 0xcef   :  { %5929 = vmatpush1.bf16.msra.mxu0 %v11374_v34  ;;  %5970 = vmatpush1.bf16.msra.mxu1 %v11376_v23 }
 0xcf0   :  { %5930 = vmatprep.subr.bf16.mxu0 %v11380_v33  ;;  %5971 = vmatprep.subr.bf16.mxu1 %v11382_v39 }
 0xcf3   :  { %5931 = vmatpush1.bf16.msra.mxu0 %v11386_v41  ;;  %5972 = vmatpush1.bf16.msra.mxu1 %v11388_v48 }
 0xcf4   :  { %5932 = vmatprep.subr.bf16.mxu0 %v11392_v50  ;;  %5973 = vmatprep.subr.bf16.mxu1 %v11394_v56 }
 0xcf7   :  { %5933 = vmatpush1.bf16.msra.mxu0 %v11398_v58  ;;  %5974 = vmatpush1.bf16.msra.mxu1 %v11400_v2 }
 0xcf8   :  { %5934 = vmatprep.subr.bf16.mxu0 %v11404_v4  ;;  %5975 = vmatprep.subr.bf16.mxu1 %v11406_v12 }
 0xcfb   :  { %5935 = vmatpush1.bf16.msra.mxu0 %v11410_v18  ;;  %5976 = vmatpush1.bf16.msra.mxu1 %v11412_v63 }
 0xcfc   :  { %5936 = vmatprep.subr.bf16.mxu0 %v11416_v8  ;;  %5977 = vmatprep.subr.bf16.mxu1 %v11418_v19 }
 0xcff   :  { %5937 = vmatpush1.bf16.msra.mxu0 %v11422_v28  ;;  %5978 = vmatpush1.bf16.msra.mxu1 %v11424_v35 }
 0xd00   :  { %5938 = vmatprep.subr.bf16.mxu0 %v11428_v40  ;;  %5979 = vmatprep.subr.bf16.mxu1 %v11430_v57 }
 0xd03   :  { %5939 = vmatpush1.bf16.msra.mxu0 %v11434_v1  ;;  %5980 = vmatpush1.bf16.msra.mxu1 %v11436_v20 }
 0xd04   :  { %6035 = vmatprep.subr.bf16.mxu0 %v11341_v13  ;;  %6076 = vmatprep.subr.bf16.mxu1 %v11343_v17 }
 0xdb9   :  { %v5848_v46 = vpop.f32.mrb[24].mxu0  ;;  %v5889_v60 = vpop.f32.mrb[56].mxu1 }
 0xdba   :  { %v7371_v32 = vadd.f32 %v5848_v46, %v11485_v11  ;;  %v5850_v44 = vpop.f32.mrb[25].mxu0  ;;  %v5891_v36 = vpop.f32.mrb[57].mxu1  ;;  %v7373_v53 = vadd.f32 %v5889_v60, %v11494_v10 }
 0xdbb   :  { %v7372_v42 = vadd.f32 %v5850_v44, %v11489_v0  ;;  %v5852_v51 = vpop.f32.mrb[26].mxu0  ;;  %v5893_v49 = vpop.f32.mrb[58].mxu1  ;;  %v7374_v55 = vadd.f32 %v5891_v36, %v11500_v3 }
 0xdbc   :  { %v5900_v59 = vmul.f32 0.5, %v7371_v32  ;;  %v5853_v6 = vpop.f32.mrb[27].mxu0  ;;  %v5894_v37 = vpop.f32.mrb[59].mxu1 }
 0xdbd   :  { %v5904_v43 = vmul.f32 0.5, %v7372_v42  ;;  %v5909_v21 = vmul.f32 0.5, %v7374_v55 }
 0xdbe   :  { %7869 = vtanh.f32 %v5900_v59 }
 0xdbf   :  { %7871 = vtanh.f32 %v5904_v43 }
 0xdc0   :  { %7873 = vtanh.f32 %v7373_v53 }
 0xdc1   :  { %7875 = vtanh.f32 %v5909_v21 }
 0xdc8   :  { %v7870_v38 = vpop.eup %7869 }
 0xdc9   :  { %v7872_v9 = vpop.eup %7871  ;;  %v5902_v54 = vmul.f32 0.5, %v7870_v38 }
 0xdca   :  { %v5906_v30 = vmul.f32 0.5, %v7872_v9  ;;  %v7874_v62 = vpop.eup %7873 }
 0xdcb   :  { %v5903_v15 = vadd.f32 0.5, %v5902_v54  ;;  %v7876_v29 = vpop.eup %7875 }
 0xdcc   :  { %v5907_v52 = vadd.f32 0.5, %v5906_v30  ;;  %v5911_v45 = vmul.f32 0.5, %v7876_v29 }
 0xdcd   :  { %v5914_v27 = vmul.f32 %v7874_v62, %v5903_v15 }
 0xdce   :  { %v5913_v46 = vmul.f32 0.0, %v5907_v52  ;;  %v5912_v32 = vadd.f32 0.5, %v5911_v45 }
 0xdd0   :  { %v11503_v60 = vadd.f32 %v5914_v27, %v5913_v46 }
 0xdd2   :  { %7877 = vtanh.f32 %v11503_v60 }
 0xddc   :  { %v7878_v25 = vpop.eup %7877 }
 0xddd   :  { %v5917_v44 = vmul.f32 %v7878_v25, %v5912_v32 }
 0xddf   :  { %v5918_v36 = vpack.c.bf16 %v5917_v44, %v5917_v44 }
 0xde1   :  { %5919 = vst [vmem:[#allocation4] sm:$0xf] %v5918_v36  ;;  %5957 = vmatmul.mubr.bf16.vlgmr.msra.gmra.mrb[40].mxu0 %v5918_v36  ;;  %5998 = vmatmul.mubr.bf16.vlgmr.msra.gmra.mrb[72].mxu1 %v5918_v36 }
 0xde2   :  { %6036 = vmatpush1.bf16.msra.mxu0 %v11350_v61  ;;  %6077 = vmatpush1.bf16.msra.mxu1 %v11352_v14 }
 0xde3   :  { %6037 = vmatprep.subr.bf16.mxu0 %v11354_v16  ;;  %6078 = vmatprep.subr.bf16.mxu1 %v11356_v22 }
 0xde4   :  { %6067 = vmatprep.mubr.bf16.mxu0 %v12275_v47  ;;  %6108 = vmatprep.mubr.bf16.mxu1 %v12275_v47 }
 0xde6   :  { %6038 = vmatpush1.bf16.msra.mxu0 %v11360_v26  ;;  %6079 = vmatpush1.bf16.msra.mxu1 %v11362_v24 }
 0xde7   :  { %6039 = vmatprep.subr.bf16.mxu0 %v11366_v31  ;;  %6080 = vmatprep.subr.bf16.mxu1 %v11368_v5 }
 0xdea   :  { %6040 = vmatpush1.bf16.msra.mxu0 %v11374_v34  ;;  %6081 = vmatpush1.bf16.msra.mxu1 %v11376_v23 }
 0xdeb   :  { %6041 = vmatprep.subr.bf16.mxu0 %v11380_v33  ;;  %6082 = vmatprep.subr.bf16.mxu1 %v11382_v39 }
 0xdee   :  { %6042 = vmatpush1.bf16.msra.mxu0 %v11386_v41  ;;  %6083 = vmatpush1.bf16.msra.mxu1 %v11388_v48 }
 0xdef   :  { %6043 = vmatprep.subr.bf16.mxu0 %v11392_v50  ;;  %6084 = vmatprep.subr.bf16.mxu1 %v11394_v56 }
 0xdf2   :  { %6044 = vmatpush1.bf16.msra.mxu0 %v11398_v58  ;;  %6085 = vmatpush1.bf16.msra.mxu1 %v11400_v2 }
 0xdf3   :  { %6045 = vmatprep.subr.bf16.mxu0 %v11404_v4  ;;  %6086 = vmatprep.subr.bf16.mxu1 %v11406_v12 }
 0xdf6   :  { %6046 = vmatpush1.bf16.msra.mxu0 %v11410_v18  ;;  %6087 = vmatpush1.bf16.msra.mxu1 %v11412_v63 }
 0xdf7   :  { %6047 = vmatprep.subr.bf16.mxu0 %v11416_v8  ;;  %6088 = vmatprep.subr.bf16.mxu1 %v11418_v19 }
 0xdfa   :  { %6048 = vmatpush1.bf16.msra.mxu0 %v11422_v28  ;;  %6089 = vmatpush1.bf16.msra.mxu1 %v11424_v35 }
 0xdfb   :  { %6049 = vmatprep.subr.bf16.mxu0 %v11428_v40  ;;  %6090 = vmatprep.subr.bf16.mxu1 %v11430_v57 }
 0xdfe   :  { %6050 = vmatpush1.bf16.msra.mxu0 %v11434_v1  ;;  %6091 = vmatpush1.bf16.msra.mxu1 %v11436_v20 }
 0xdff   :  { %6146 = vmatprep.subr.bf16.mxu0 %v11341_v13  ;;  %6187 = vmatprep.subr.bf16.mxu1 %v11343_v17 }
 0xeb4   :  { %v5958_v42 = vpop.f32.mrb[40].mxu0  ;;  %v5999_v51 = vpop.f32.mrb[72].mxu1 }
 0xeb5   :  { %v7379_v49 = vadd.f32 %v5958_v42, %v11485_v11  ;;  %v5960_v59 = vpop.f32.mrb[41].mxu0  ;;  %v6001_v6 = vpop.f32.mrb[73].mxu1  ;;  %v7381_v9 = vadd.f32 %v5999_v51, %v11494_v10 }
 0xeb6   :  { %v7380_v37 = vadd.f32 %v5960_v59, %v11489_v0  ;;  %v5962_v43 = vpop.f32.mrb[42].mxu0  ;;  %v6003_v53 = vpop.f32.mrb[74].mxu1  ;;  %v7382_v54 = vadd.f32 %v6001_v6, %v11500_v3 }
 0xeb7   :  { %v6010_v7 = vmul.f32 0.5, %v7379_v49  ;;  %v5963_v55 = vpop.f32.mrb[43].mxu0  ;;  %v6004_v21 = vpop.f32.mrb[75].mxu1 }
 0xeb8   :  { %v6014_v38 = vmul.f32 0.5, %v7380_v37  ;;  %v6019_v30 = vmul.f32 0.5, %v7382_v54 }
 0xeb9   :  { %7879 = vtanh.f32 %v6010_v7 }
 0xeba   :  { %7881 = vtanh.f32 %v6014_v38 }
 0xebb   :  { %7883 = vtanh.f32 %v7381_v9 }
 0xebc   :  { %7885 = vtanh.f32 %v6019_v30 }
 0xec3   :  { %v7880_v15 = vpop.eup %7879 }
 0xec4   :  { %v7882_v62 = vpop.eup %7881  ;;  %v6012_v52 = vmul.f32 0.5, %v7880_v15 }
 0xec5   :  { %v6016_v27 = vmul.f32 0.5, %v7882_v62  ;;  %v7884_v29 = vpop.eup %7883 }
 0xec6   :  { %v6013_v46 = vadd.f32 0.5, %v6012_v52  ;;  %v7886_v36 = vpop.eup %7885 }
 0xec7   :  { %v6017_v45 = vadd.f32 0.5, %v6016_v27  ;;  %v6021_v42 = vmul.f32 0.5, %v7886_v36 }
 0xec8   :  { %v6024_v32 = vmul.f32 %v7884_v29, %v6013_v46 }
 0xec9   :  { %v6023_v25 = vmul.f32 %v6017_v45, %v11503_v60  ;;  %v6022_v51 = vadd.f32 0.5, %v6021_v42 }
 0xecb   :  { %v11545_v44 = vadd.f32 %v6024_v32, %v6023_v25 }
 0xecd   :  { %7887 = vtanh.f32 %v11545_v44 }
 0xed7   :  { %v7888_v49 = vpop.eup %7887 }
 0xed8   :  { %v6027_v59 = vmul.f32 %v7888_v49, %v6022_v51 }
 0xeda   :  { %v6028_v6 = vpack.c.bf16 %v6027_v59, %v6027_v59 }
 0xedc   :  { %6030 = vst [vmem:[#allocation4 + $0x4] sm:$0xf] %v6028_v6  ;;  %6068 = vmatmul.mubr.bf16.vlgmr.msra.gmra.mrb[56].mxu0 %v6028_v6  ;;  %6109 = vmatmul.mubr.bf16.vlgmr.msra.gmra.mrb[88].mxu1 %v6028_v6 }
 0xedd   :  { %6147 = vmatpush1.bf16.msra.mxu0 %v11350_v61  ;;  %6188 = vmatpush1.bf16.msra.mxu1 %v11352_v14 }
 0xede   :  { %6148 = vmatprep.subr.bf16.mxu0 %v11354_v16  ;;  %6189 = vmatprep.subr.bf16.mxu1 %v11356_v22 }
 0xedf   :  { %6178 = vmatprep.mubr.bf16.mxu0 %v12275_v47  ;;  %6219 = vmatprep.mubr.bf16.mxu1 %v12275_v47 }
 0xee1   :  { %6149 = vmatpush1.bf16.msra.mxu0 %v11360_v26  ;;  %6190 = vmatpush1.bf16.msra.mxu1 %v11362_v24 }
 0xee2   :  { %6150 = vmatprep.subr.bf16.mxu0 %v11366_v31  ;;  %6191 = vmatprep.subr.bf16.mxu1 %v11368_v5 }
 0xee5   :  { %6151 = vmatpush1.bf16.msra.mxu0 %v11374_v34  ;;  %6192 = vmatpush1.bf16.msra.mxu1 %v11376_v23 }
 0xee6   :  { %6152 = vmatprep.subr.bf16.mxu0 %v11380_v33  ;;  %6193 = vmatprep.subr.bf16.mxu1 %v11382_v39 }
 0xee9   :  { %6153 = vmatpush1.bf16.msra.mxu0 %v11386_v41  ;;  %6194 = vmatpush1.bf16.msra.mxu1 %v11388_v48 }
 0xeea   :  { %6154 = vmatprep.subr.bf16.mxu0 %v11392_v50  ;;  %6195 = vmatprep.subr.bf16.mxu1 %v11394_v56 }
 0xeed   :  { %6155 = vmatpush1.bf16.msra.mxu0 %v11398_v58  ;;  %6196 = vmatpush1.bf16.msra.mxu1 %v11400_v2 }
 0xeee   :  { %6156 = vmatprep.subr.bf16.mxu0 %v11404_v4  ;;  %6197 = vmatprep.subr.bf16.mxu1 %v11406_v12 }
 0xef1   :  { %6157 = vmatpush1.bf16.msra.mxu0 %v11410_v18  ;;  %6198 = vmatpush1.bf16.msra.mxu1 %v11412_v63 }
 0xef2   :  { %6158 = vmatprep.subr.bf16.mxu0 %v11416_v8  ;;  %6199 = vmatprep.subr.bf16.mxu1 %v11418_v19 }
 0xef5   :  { %6159 = vmatpush1.bf16.msra.mxu0 %v11422_v28  ;;  %6200 = vmatpush1.bf16.msra.mxu1 %v11424_v35 }
 0xef6   :  { %6160 = vmatprep.subr.bf16.mxu0 %v11428_v40  ;;  %6201 = vmatprep.subr.bf16.mxu1 %v11430_v57 }
 0xef9   :  { %6161 = vmatpush1.bf16.msra.mxu0 %v11434_v1  ;;  %6202 = vmatpush1.bf16.msra.mxu1 %v11436_v20 }
 0xefa   :  { %6257 = vmatprep.subr.bf16.mxu0 %v11341_v13  ;;  %6298 = vmatprep.subr.bf16.mxu1 %v11343_v17 }
 0xfaf   :  { %v6069_v60 = vpop.f32.mrb[56].mxu0  ;;  %v6110_v37 = vpop.f32.mrb[88].mxu1 }
 0xfb0   :  { %v7387_v43 = vadd.f32 %v6069_v60, %v11485_v11  ;;  %v6071_v53 = vpop.f32.mrb[57].mxu0  ;;  %v6112_v7 = vpop.f32.mrb[89].mxu1  ;;  %v7389_v62 = vadd.f32 %v6110_v37, %v11494_v10 }
 0xfb1   :  { %v7388_v55 = vadd.f32 %v6071_v53, %v11489_v0  ;;  %v6073_v21 = vpop.f32.mrb[58].mxu0  ;;  %v6114_v38 = vpop.f32.mrb[90].mxu1  ;;  %v7390_v52 = vadd.f32 %v6112_v7, %v11500_v3 }
 0xfb2   :  { %v6121_v9 = vmul.f32 0.5, %v7387_v43  ;;  %v6074_v54 = vpop.f32.mrb[59].mxu0  ;;  %v6115_v30 = vpop.f32.mrb[91].mxu1 }
 0xfb3   :  { %v6125_v15 = vmul.f32 0.5, %v7388_v55  ;;  %v6130_v27 = vmul.f32 0.5, %v7390_v52 }
 0xfb4   :  { %7889 = vtanh.f32 %v6121_v9 }
 0xfb5   :  { %7891 = vtanh.f32 %v6125_v15 }
 0xfb6   :  { %7893 = vtanh.f32 %v7389_v62 }
 0xfb7   :  { %7895 = vtanh.f32 %v6130_v27 }
 0xfbe   :  { %v7890_v46 = vpop.eup %7889 }
 0xfbf   :  { %v7892_v29 = vpop.eup %7891  ;;  %v6123_v45 = vmul.f32 0.5, %v7890_v46 }
 0xfc0   :  { %v6127_v32 = vmul.f32 0.5, %v7892_v29  ;;  %v7894_v36 = vpop.eup %7893 }
 0xfc1   :  { %v6124_v25 = vadd.f32 0.5, %v6123_v45  ;;  %v7896_v6 = vpop.eup %7895 }
 0xfc2   :  { %v6128_v42 = vadd.f32 0.5, %v6127_v32  ;;  %v6132_v60 = vmul.f32 0.5, %v7896_v6 }
 0xfc3   :  { %v6135_v51 = vmul.f32 %v7894_v36, %v6124_v25 }
 0xfc4   :  { %v6134_v49 = vmul.f32 %v6128_v42, %v11545_v44  ;;  %v6133_v37 = vadd.f32 0.5, %v6132_v60 }
 0xfc6   :  { %v11587_v59 = vadd.f32 %v6135_v51, %v6134_v49 }
 0xfc8   :  { %7897 = vtanh.f32 %v11587_v59 }
 0xfd2   :  { %v7898_v43 = vpop.eup %7897 }
 0xfd3   :  { %v6138_v53 = vmul.f32 %v7898_v43, %v6133_v37 }
 0xfd5   :  { %v6139_v7 = vpack.c.bf16 %v6138_v53, %v6138_v53 }
 0xfd7   :  { %6141 = vst [vmem:[#allocation4 + $0x8] sm:$0xf] %v6139_v7  ;;  %6179 = vmatmul.mubr.bf16.vlgmr.msra.gmra.mrb[72].mxu0 %v6139_v7  ;;  %6220 = vmatmul.mubr.bf16.vlgmr.msra.gmra.mrb[104].mxu1 %v6139_v7 }
 0xfd8   :  { %6258 = vmatpush1.bf16.msra.mxu0 %v11350_v61  ;;  %6299 = vmatpush1.bf16.msra.mxu1 %v11352_v14 }
 0xfd9   :  { %6259 = vmatprep.subr.bf16.mxu0 %v11354_v16  ;;  %6300 = vmatprep.subr.bf16.mxu1 %v11356_v22 }
 0xfda   :  { %6289 = vmatprep.mubr.bf16.mxu0 %v12275_v47  ;;  %6330 = vmatprep.mubr.bf16.mxu1 %v12275_v47 }
 0xfdc   :  { %6260 = vmatpush1.bf16.msra.mxu0 %v11360_v26  ;;  %6301 = vmatpush1.bf16.msra.mxu1 %v11362_v24 }
 0xfdd   :  { %6261 = vmatprep.subr.bf16.mxu0 %v11366_v31  ;;  %6302 = vmatprep.subr.bf16.mxu1 %v11368_v5 }
 0xfe0   :  { %6262 = vmatpush1.bf16.msra.mxu0 %v11374_v34  ;;  %6303 = vmatpush1.bf16.msra.mxu1 %v11376_v23 }
 0xfe1   :  { %6263 = vmatprep.subr.bf16.mxu0 %v11380_v33  ;;  %6304 = vmatprep.subr.bf16.mxu1 %v11382_v39 }
 0xfe4   :  { %6264 = vmatpush1.bf16.msra.mxu0 %v11386_v41  ;;  %6305 = vmatpush1.bf16.msra.mxu1 %v11388_v48 }
 0xfe5   :  { %6265 = vmatprep.subr.bf16.mxu0 %v11392_v50  ;;  %6306 = vmatprep.subr.bf16.mxu1 %v11394_v56 }
 0xfe8   :  { %6266 = vmatpush1.bf16.msra.mxu0 %v11398_v58  ;;  %6307 = vmatpush1.bf16.msra.mxu1 %v11400_v2 }
 0xfe9   :  { %6267 = vmatprep.subr.bf16.mxu0 %v11404_v4  ;;  %6308 = vmatprep.subr.bf16.mxu1 %v11406_v12 }
 0xfec   :  { %6268 = vmatpush1.bf16.msra.mxu0 %v11410_v18  ;;  %6309 = vmatpush1.bf16.msra.mxu1 %v11412_v63 }
 0xfed   :  { %6269 = vmatprep.subr.bf16.mxu0 %v11416_v8  ;;  %6310 = vmatprep.subr.bf16.mxu1 %v11418_v19 }
 0xff0   :  { %6270 = vmatpush1.bf16.msra.mxu0 %v11422_v28  ;;  %6311 = vmatpush1.bf16.msra.mxu1 %v11424_v35 }
 0xff1   :  { %6271 = vmatprep.subr.bf16.mxu0 %v11428_v40  ;;  %6312 = vmatprep.subr.bf16.mxu1 %v11430_v57 }
 0xff4   :  { %6272 = vmatpush1.bf16.msra.mxu0 %v11434_v1  ;;  %6313 = vmatpush1.bf16.msra.mxu1 %v11436_v20 }
 0xff5   :  { %6368 = vmatprep.subr.bf16.mxu0 %v11341_v13  ;;  %6409 = vmatprep.subr.bf16.mxu1 %v11343_v17 }
0x10aa   :  { %v6180_v44 = vpop.f32.mrb[72].mxu0  ;;  %v6221_v55 = vpop.f32.mrb[104].mxu1 }
0x10ab   :  { %v7395_v21 = vadd.f32 %v6180_v44, %v11485_v11  ;;  %v6182_v38 = vpop.f32.mrb[73].mxu0  ;;  %v6223_v9 = vpop.f32.mrb[105].mxu1  ;;  %v7397_v29 = vadd.f32 %v6221_v55, %v11494_v10 }
0x10ac   :  { %v7396_v54 = vadd.f32 %v6182_v38, %v11489_v0  ;;  %v6184_v30 = vpop.f32.mrb[74].mxu0  ;;  %v6225_v15 = vpop.f32.mrb[106].mxu1  ;;  %v7398_v45 = vadd.f32 %v6223_v9, %v11500_v3 }
0x10ad   :  { %v6232_v62 = vmul.f32 0.5, %v7395_v21  ;;  %v6185_v52 = vpop.f32.mrb[75].mxu0  ;;  %v6226_v27 = vpop.f32.mrb[107].mxu1 }
0x10ae   :  { %v6236_v46 = vmul.f32 0.5, %v7396_v54  ;;  %v6241_v32 = vmul.f32 0.5, %v7398_v45 }
0x10af   :  { %7899 = vtanh.f32 %v6232_v62 }
0x10b0   :  { %7901 = vtanh.f32 %v6236_v46 }
0x10b1   :  { %7903 = vtanh.f32 %v7397_v29 }
0x10b2   :  { %7905 = vtanh.f32 %v6241_v32 }
0x10b9   :  { %v7900_v25 = vpop.eup %7899 }
0x10ba   :  { %v7902_v36 = vpop.eup %7901  ;;  %v6234_v42 = vmul.f32 0.5, %v7900_v25 }
0x10bb   :  { %v6238_v51 = vmul.f32 0.5, %v7902_v36  ;;  %v7904_v6 = vpop.eup %7903 }
0x10bc   :  { %v6235_v49 = vadd.f32 0.5, %v6234_v42  ;;  %v7906_v7 = vpop.eup %7905 }
0x10bd   :  { %v6239_v60 = vadd.f32 0.5, %v6238_v51  ;;  %v6243_v44 = vmul.f32 0.5, %v7906_v7 }
0x10be   :  { %v6246_v37 = vmul.f32 %v7904_v6, %v6235_v49 }
0x10bf   :  { %v6245_v43 = vmul.f32 %v6239_v60, %v11587_v59  ;;  %v6244_v55 = vadd.f32 0.5, %v6243_v44 }
0x10c1   :  { %v11629_v53 = vadd.f32 %v6246_v37, %v6245_v43 }
0x10c3   :  { %7907 = vtanh.f32 %v11629_v53 }
0x10cd   :  { %v7908_v21 = vpop.eup %7907 }
0x10ce   :  { %v6249_v38 = vmul.f32 %v7908_v21, %v6244_v55 }
0x10d0   :  { %v6250_v9 = vpack.c.bf16 %v6249_v38, %v6249_v38 }
0x10d2   :  { %6252 = vst [vmem:[#allocation4 + $0xc] sm:$0xf] %v6250_v9  ;;  %6290 = vmatmul.mubr.bf16.vlgmr.msra.gmra.mrb[76].mxu0 %v6250_v9  ;;  %6331 = vmatmul.mubr.bf16.vlgmr.msra.gmra.mrb[108].mxu1 %v6250_v9 }
0x10d3   :  { %6369 = vmatpush1.bf16.msra.mxu0 %v11350_v61  ;;  %6410 = vmatpush1.bf16.msra.mxu1 %v11352_v14 }
0x10d4   :  { %6370 = vmatprep.subr.bf16.mxu0 %v11354_v16  ;;  %6411 = vmatprep.subr.bf16.mxu1 %v11356_v22 }
0x10d5   :  { %6400 = vmatprep.mubr.bf16.mxu0 %v12275_v47  ;;  %6441 = vmatprep.mubr.bf16.mxu1 %v12275_v47 }
0x10d7   :  { %6371 = vmatpush1.bf16.msra.mxu0 %v11360_v26  ;;  %6412 = vmatpush1.bf16.msra.mxu1 %v11362_v24 }
0x10d8   :  { %6372 = vmatprep.subr.bf16.mxu0 %v11366_v31  ;;  %6413 = vmatprep.subr.bf16.mxu1 %v11368_v5 }
0x10db   :  { %6373 = vmatpush1.bf16.msra.mxu0 %v11374_v34  ;;  %6414 = vmatpush1.bf16.msra.mxu1 %v11376_v23 }
0x10dc   :  { %6374 = vmatprep.subr.bf16.mxu0 %v11380_v33  ;;  %6415 = vmatprep.subr.bf16.mxu1 %v11382_v39 }
0x10df   :  { %6375 = vmatpush1.bf16.msra.mxu0 %v11386_v41  ;;  %6416 = vmatpush1.bf16.msra.mxu1 %v11388_v48 }
0x10e0   :  { %6376 = vmatprep.subr.bf16.mxu0 %v11392_v50  ;;  %6417 = vmatprep.subr.bf16.mxu1 %v11394_v56 }
0x10e3   :  { %6377 = vmatpush1.bf16.msra.mxu0 %v11398_v58  ;;  %6418 = vmatpush1.bf16.msra.mxu1 %v11400_v2 }
0x10e4   :  { %6378 = vmatprep.subr.bf16.mxu0 %v11404_v4  ;;  %6419 = vmatprep.subr.bf16.mxu1 %v11406_v12 }
0x10e7   :  { %6379 = vmatpush1.bf16.msra.mxu0 %v11410_v18  ;;  %6420 = vmatpush1.bf16.msra.mxu1 %v11412_v63 }
0x10e8   :  { %6380 = vmatprep.subr.bf16.mxu0 %v11416_v8  ;;  %6421 = vmatprep.subr.bf16.mxu1 %v11418_v19 }
0x10eb   :  { %6381 = vmatpush1.bf16.msra.mxu0 %v11422_v28  ;;  %6422 = vmatpush1.bf16.msra.mxu1 %v11424_v35 }
0x10ec   :  { %6382 = vmatprep.subr.bf16.mxu0 %v11428_v40  ;;  %6423 = vmatprep.subr.bf16.mxu1 %v11430_v57 }
0x10ef   :  { %6383 = vmatpush1.bf16.msra.mxu0 %v11434_v1  ;;  %6424 = vmatpush1.bf16.msra.mxu1 %v11436_v20 }
0x10f0   :  { %6479 = vmatprep.subr.bf16.mxu0 %v11341_v13  ;;  %6520 = vmatprep.subr.bf16.mxu1 %v11343_v17 }
0x11a5   :  { %v6291_v59 = vpop.f32.mrb[76].mxu0  ;;  %v6332_v54 = vpop.f32.mrb[108].mxu1 }
0x11a6   :  { %v7399_v30 = vadd.f32 %v6291_v59, %v11485_v11  ;;  %v6293_v15 = vpop.f32.mrb[77].mxu0  ;;  %v6334_v62 = vpop.f32.mrb[109].mxu1  ;;  %v7401_v36 = vadd.f32 %v6332_v54, %v11494_v10 }
0x11a7   :  { %v7400_v52 = vadd.f32 %v6293_v15, %v11489_v0  ;;  %v6295_v27 = vpop.f32.mrb[78].mxu0  ;;  %v6336_v46 = vpop.f32.mrb[110].mxu1  ;;  %v7402_v42 = vadd.f32 %v6334_v62, %v11500_v3 }
0x11a8   :  { %v6343_v29 = vmul.f32 0.5, %v7399_v30  ;;  %v6296_v45 = vpop.f32.mrb[79].mxu0  ;;  %v6337_v32 = vpop.f32.mrb[111].mxu1 }
0x11a9   :  { %v6347_v25 = vmul.f32 0.5, %v7400_v52  ;;  %v6352_v51 = vmul.f32 0.5, %v7402_v42 }
0x11aa   :  { %7909 = vtanh.f32 %v6343_v29 }
0x11ab   :  { %7911 = vtanh.f32 %v6347_v25 }
0x11ac   :  { %7913 = vtanh.f32 %v7401_v36 }
0x11ad   :  { %7915 = vtanh.f32 %v6352_v51 }
0x11b4   :  { %v7910_v49 = vpop.eup %7909 }
0x11b5   :  { %v7912_v6 = vpop.eup %7911  ;;  %v6345_v60 = vmul.f32 0.5, %v7910_v49 }
0x11b6   :  { %v6349_v37 = vmul.f32 0.5, %v7912_v6  ;;  %v7914_v7 = vpop.eup %7913 }
0x11b7   :  { %v6346_v43 = vadd.f32 0.5, %v6345_v60  ;;  %v7916_v9 = vpop.eup %7915 }
0x11b8   :  { %v6350_v44 = vadd.f32 0.5, %v6349_v37  ;;  %v6354_v59 = vmul.f32 0.5, %v7916_v9 }
0x11b9   :  { %v6357_v55 = vmul.f32 %v7914_v7, %v6346_v43 }
0x11ba   :  { %v6356_v21 = vmul.f32 %v6350_v44, %v11629_v53  ;;  %v6355_v54 = vadd.f32 0.5, %v6354_v59  ;;  %v8175_v59 = vld [vmem:[#allocation16] ss:$16 sps:$4 sm:$0xff]  }
0x11bc   :  { %v11671_v38 = vadd.f32 %v6357_v55, %v6356_v21 }
0x11be   :  { %7917 = vtanh.f32 %v11671_v38 }
0x11c8   :  { %v7918_v30 = vpop.eup %7917 }
0x11c9   :  { %v6360_v15 = vmul.f32 %v7918_v30, %v6355_v54  ;;  %v8176_v54 = vld [vmem:[#allocation16 + $0x8] ss:$16 sps:$4 sm:$0xff]   ;;  %v8177_v30 = vld [vmem:[#allocation16 + $0x24] ss:$16 sps:$4 sm:$0xff]  }
0x11cb   :  { %v6361_v62 = vpack.c.bf16 %v6360_v15, %v6360_v15  ;;  %v8179_v15 = vld [vmem:[#allocation16 + $0x20] ss:$16 sps:$4 sm:$0xff]  }
0x11cd   :  { %6363 = vst [vmem:[#allocation4 + $0x10] sm:$0xf] %v6361_v62  ;;  %6401 = vmatmul.mubr.bf16.vlgmr.msra.gmra.mrb[60].mxu0 %v6361_v62  ;;  %6442 = vmatmul.mubr.bf16.vlgmr.msra.gmra.mrb[92].mxu1 %v6361_v62  ;;  %v8180_v62 = vld [vmem:[#allocation16 + $0x28] ss:$16 sps:$4 sm:$0xff]  }
0x11ce   :  { %6480 = vmatpush1.bf16.msra.mxu0 %v11350_v61  ;;  %6521 = vmatpush1.bf16.msra.mxu1 %v11352_v14 }
0x11cf   :  { %6481 = vmatprep.subr.bf16.mxu0 %v11354_v16  ;;  %6522 = vmatprep.subr.bf16.mxu1 %v11356_v22 }
0x11d0   :  { %6511 = vmatprep.mubr.bf16.mxu0 %v12275_v47  ;;  %6552 = vmatprep.mubr.bf16.mxu1 %v12275_v47 }
0x11d2   :  { %6482 = vmatpush1.bf16.msra.mxu0 %v11360_v26  ;;  %6523 = vmatpush1.bf16.msra.mxu1 %v11362_v24 }
0x11d3   :  { %6483 = vmatprep.subr.bf16.mxu0 %v11366_v31  ;;  %6524 = vmatprep.subr.bf16.mxu1 %v11368_v5 }
0x11d6   :  { %6484 = vmatpush1.bf16.msra.mxu0 %v11374_v34  ;;  %6525 = vmatpush1.bf16.msra.mxu1 %v11376_v23 }
0x11d7   :  { %6485 = vmatprep.subr.bf16.mxu0 %v11380_v33  ;;  %6526 = vmatprep.subr.bf16.mxu1 %v11382_v39 }
0x11da   :  { %6486 = vmatpush1.bf16.msra.mxu0 %v11386_v41  ;;  %6527 = vmatpush1.bf16.msra.mxu1 %v11388_v48 }
0x11db   :  { %6487 = vmatprep.subr.bf16.mxu0 %v11392_v50  ;;  %6528 = vmatprep.subr.bf16.mxu1 %v11394_v56 }
0x11de   :  { %6488 = vmatpush1.bf16.msra.mxu0 %v11398_v58  ;;  %6529 = vmatpush1.bf16.msra.mxu1 %v11400_v2 }
0x11df   :  { %6489 = vmatprep.subr.bf16.mxu0 %v11404_v4  ;;  %6530 = vmatprep.subr.bf16.mxu1 %v11406_v12 }
0x11e2   :  { %6490 = vmatpush1.bf16.msra.mxu0 %v11410_v18  ;;  %6531 = vmatpush1.bf16.msra.mxu1 %v11412_v63 }
0x11e3   :  { %6491 = vmatprep.subr.bf16.mxu0 %v11416_v8  ;;  %6532 = vmatprep.subr.bf16.mxu1 %v11418_v19 }
0x11e6   :  { %6492 = vmatpush1.bf16.msra.mxu0 %v11422_v28  ;;  %6533 = vmatpush1.bf16.msra.mxu1 %v11424_v35 }
0x11e7   :  { %6493 = vmatprep.subr.bf16.mxu0 %v11428_v40  ;;  %6534 = vmatprep.subr.bf16.mxu1 %v11430_v57 }
0x11ea   :  { %6494 = vmatpush1.bf16.msra.mxu0 %v11434_v1  ;;  %6535 = vmatpush1.bf16.msra.mxu1 %v11436_v20 }
0x11eb   :  { %6590 = vmatprep.subr.bf16.mxu0 %v11341_v13  ;;  %6631 = vmatprep.subr.bf16.mxu1 %v11343_v17 }
0x12a0   :  { %v6402_v61 = vpop.f32.mrb[60].mxu0  ;;  %v6443_v14 = vpop.f32.mrb[92].mxu1 }
0x12a1   :  { %v7391_v16 = vadd.f32 %v6402_v61, %v11485_v11  ;;  %v6404_v22 = vpop.f32.mrb[61].mxu0  ;;  %v6445_v26 = vpop.f32.mrb[93].mxu1  ;;  %v7393_v29 = vadd.f32 %v6443_v14, %v11494_v10  ;;  %v8181_v61 = vld [vmem:[#allocation16 + $0x44] ss:$16 sps:$4 sm:$0xff]   ;;  %v8182_v14 = vld [vmem:[#allocation16 + $0x4c] ss:$16 sps:$4 sm:$0xff]  }
0x12a2   :  { %v7392_v24 = vadd.f32 %v6404_v22, %v11489_v0  ;;  %v6406_v31 = vpop.f32.mrb[62].mxu0  ;;  %v6447_v5 = vpop.f32.mrb[94].mxu1  ;;  %v7394_v13 = vadd.f32 %v6445_v26, %v11500_v3 }
0x12a3   :  { %v6454_v53 = vmul.f32 0.5, %v7391_v16  ;;  %v6407_v52 = vpop.f32.mrb[63].mxu0  ;;  %v6448_v27 = vpop.f32.mrb[95].mxu1 }
0x12a4   :  { %v6458_v46 = vmul.f32 0.5, %v7392_v24  ;;  %v6463_v17 = vmul.f32 0.5, %v7394_v13  ;;  %v7700_v13 = vld [vmem:[#allocation17 + $0x10] sm:$0xff]  }
0x12a5   :  { %7919 = vtanh.f32 %v6454_v53 }
0x12a6   :  { %7921 = vtanh.f32 %v6458_v46  ;;  %v7699_v46 = vld [vmem:[#allocation17 + $0x8] sm:$0xff]  }
0x12a7   :  { %7923 = vtanh.f32 %v7393_v29  ;;  %v7698_v29 = vld [vmem:[#allocation4] sm:$0xff]  }
0x12a8   :  { %7925 = vtanh.f32 %v6463_v17  ;;  %v7701_v17 = vld [vmem:[#allocation17 + $0x18] sm:$0xff]  }
0x12af   :  { %v7920_v45 = vpop.eup %7919 }
0x12b0   :  { %v7922_v32 = vpop.eup %7921  ;;  %v6456_v25 = vmul.f32 0.5, %v7920_v45  ;;  %v7702_v45 = vld [vmem:[#allocation17 + $0x20] sm:$0xff]  }
0x12b1   :  { %v6460_v36 = vmul.f32 0.5, %v7922_v32  ;;  %v7924_v51 = vpop.eup %7923  ;;  %v7703_v32 = vld [vmem:[#allocation17 + $0x28] sm:$0xff]  }
0x12b2   :  { %v6457_v42 = vadd.f32 0.5, %v6456_v25  ;;  %v7926_v43 = vpop.eup %7925  ;;  %v7704_v25 = vld [vmem:[#allocation17 + $0x30] sm:$0xff]  }
0x12b3   :  { %v6461_v49 = vadd.f32 0.5, %v6460_v36  ;;  %v6465_v7 = vmul.f32 0.5, %v7926_v43  ;;  %v7705_v36 = vld [vmem:[#allocation17 + $0x38] sm:$0xff]  }
0x12b4   :  { %v6468_v6 = vmul.f32 %v7924_v51, %v6457_v42  ;;  %v7706_v42 = vld [vmem:[#allocation4 + $0x8] sm:$0xff]  }
0x12b5   :  { %v6467_v60 = vmul.f32 %v6461_v49, %v11671_v38  ;;  %v6466_v44 = vadd.f32 0.5, %v6465_v7  ;;  %v8178_v38 = vld [vmem:[#allocation16 + $0x2c] ss:$16 sps:$4 sm:$0xff]  }
0x12b7   :  { %v11713_v37 = vadd.f32 %v6468_v6, %v6467_v60 }
0x12b9   :  { %7927 = vtanh.f32 %v11713_v37 }
0x12c3   :  { %v7928_v55 = vpop.eup %7927 }
0x12c4   :  { %v6471_v21 = vmul.f32 %v7928_v55, %v6466_v44 }
0x12c6   :  { %v6472_v9 = vpack.c.bf16 %v6471_v21, %v6471_v21 }
0x12c8   :  { %6474 = vst [vmem:[#allocation4 + $0x14] sm:$0xf] %v6472_v9  ;;  %6512 = vmatmul.mubr.bf16.vlgmr.msra.gmra.mrb[44].mxu0 %v6472_v9  ;;  %6553 = vmatmul.mubr.bf16.vlgmr.msra.gmra.mrb[76].mxu1 %v6472_v9 }
0x12c9   :  { %6591 = vmatpush1.bf16.msra.mxu0 %v8175_v59  ;;  %6632 = vmatpush1.bf16.msra.mxu1 %v8176_v54 }
0x12ca   :  { %6592 = vmatprep.subr.bf16.mxu0 %v8177_v30  ;;  %6633 = vmatprep.subr.bf16.mxu1 %v8178_v38 }
0x12cb   :  { %6622 = vmatprep.mubr.bf16.mxu0 %v12275_v47  ;;  %6663 = vmatprep.mubr.bf16.mxu1 %v12275_v47  ;;  %v7697_v47 = vld [vmem:[#allocation17] sm:$0xff]  }
0x12cd   :  { %6593 = vmatpush1.bf16.msra.mxu0 %v8179_v15  ;;  %6634 = vmatpush1.bf16.msra.mxu1 %v8180_v62 }
0x12ce   :  { %6594 = vmatprep.subr.bf16.mxu0 %v8181_v61  ;;  %6635 = vmatprep.subr.bf16.mxu1 %v8182_v14 }
0x12cf   :  { %v7707_v51 = vld [vmem:[#allocation4 + $0x10] sm:$0xff]  }
0x12d1   :  { %6595 = vmatpush1.bf16.msra.mxu0 %v11374_v34  ;;  %6636 = vmatpush1.bf16.msra.mxu1 %v11376_v23 }
0x12d2   :  { %6596 = vmatprep.subr.bf16.mxu0 %v11380_v33  ;;  %6637 = vmatprep.subr.bf16.mxu1 %v11382_v39 }
0x12d5   :  { %6597 = vmatpush1.bf16.msra.mxu0 %v11386_v41  ;;  %6638 = vmatpush1.bf16.msra.mxu1 %v11388_v48 }
0x12d6   :  { %6598 = vmatprep.subr.bf16.mxu0 %v11392_v50  ;;  %6639 = vmatprep.subr.bf16.mxu1 %v11394_v56 }
0x12d9   :  { %6599 = vmatpush1.bf16.msra.mxu0 %v11398_v58  ;;  %6640 = vmatpush1.bf16.msra.mxu1 %v11400_v2 }
0x12da   :  { %6600 = vmatprep.subr.bf16.mxu0 %v11404_v4  ;;  %6641 = vmatprep.subr.bf16.mxu1 %v11406_v12 }
0x12dd   :  { %6601 = vmatpush1.bf16.msra.mxu0 %v11410_v18  ;;  %6642 = vmatpush1.bf16.msra.mxu1 %v11412_v63 }
0x12de   :  { %6602 = vmatprep.subr.bf16.mxu0 %v11416_v8  ;;  %6643 = vmatprep.subr.bf16.mxu1 %v11418_v19 }
0x12e1   :  { %6603 = vmatpush1.bf16.msra.mxu0 %v11422_v28  ;;  %6644 = vmatpush1.bf16.msra.mxu1 %v11424_v35 }
0x12e2   :  { %6604 = vmatprep.subr.bf16.mxu0 %v11428_v40  ;;  %6645 = vmatprep.subr.bf16.mxu1 %v11430_v57 }
0x12e5   :  { %6605 = vmatpush1.bf16.msra.mxu0 %v11434_v1  ;;  %6646 = vmatpush1.bf16.msra.mxu1 %v11436_v20 }
0x12e6   :  { %7347 = vmatprep.subr.bf16.mxu0 %v7697_v47 }
0x139b   :  { %v6513_v34 = vpop.f32.mrb[44].mxu0  ;;  %v6554_v23 = vpop.f32.mrb[76].mxu1 }
0x139c   :  { %v7383_v33 = vadd.f32 %v6513_v34, %v11485_v11  ;;  %v6515_v39 = vpop.f32.mrb[45].mxu0  ;;  %v6556_v41 = vpop.f32.mrb[77].mxu1  ;;  %v7385_v18 = vadd.f32 %v6554_v23, %v11494_v10 }
0x139d   :  { %v7384_v48 = vadd.f32 %v6515_v39, %v11489_v0  ;;  %v6517_v50 = vpop.f32.mrb[46].mxu0  ;;  %v6558_v56 = vpop.f32.mrb[78].mxu1  ;;  %v7386_v63 = vadd.f32 %v6556_v41, %v11500_v3 }
0x139e   :  { %v6565_v58 = vmul.f32 0.5, %v7383_v33  ;;  %v6518_v2 = vpop.f32.mrb[47].mxu0  ;;  %v6559_v4 = vpop.f32.mrb[79].mxu1 }
0x139f   :  { %v6569_v12 = vmul.f32 0.5, %v7384_v48  ;;  %v6574_v8 = vmul.f32 0.5, %v7386_v63 }
0x13a0   :  { %7929 = vtanh.f32 %v6565_v58 }
0x13a1   :  { %7931 = vtanh.f32 %v6569_v12 }
0x13a2   :  { %7933 = vtanh.f32 %v7385_v18 }
0x13a3   :  { %7935 = vtanh.f32 %v6574_v8 }
0x13aa   :  { %v7930_v19 = vpop.eup %7929 }
0x13ab   :  { %v7932_v28 = vpop.eup %7931  ;;  %v6567_v35 = vmul.f32 0.5, %v7930_v19 }
0x13ac   :  { %v6571_v40 = vmul.f32 0.5, %v7932_v28  ;;  %v7934_v1 = vpop.eup %7933 }
0x13ad   :  { %v6568_v57 = vadd.f32 0.5, %v6567_v35  ;;  %v7936_v24 = vpop.eup %7935 }
0x13ae   :  { %v6572_v20 = vadd.f32 0.5, %v6571_v40  ;;  %v6576_v31 = vmul.f32 0.5, %v7936_v24 }
0x13af   :  { %v6579_v16 = vmul.f32 %v7934_v1, %v6568_v57 }
0x13b0   :  { %v6578_v22 = vmul.f32 %v6572_v20, %v11713_v37  ;;  %v6577_v5 = vadd.f32 0.5, %v6576_v31 }
0x13b2   :  { %v11745_v26 = vadd.f32 %v6579_v16, %v6578_v22 }
0x13b4   :  { %7937 = vtanh.f32 %v11745_v26 }
0x13be   :  { %v7938_v53 = vpop.eup %7937 }
0x13bf   :  { %v6582_v52 = vmul.f32 %v7938_v53, %v6577_v5 }
0x13c1   :  { %v6583_v27 = vpack.c.bf16 %v6582_v52, %v6582_v52 }
0x13c3   :  { %6585 = vst [vmem:[#allocation4 + $0x18] sm:$0xf] %v6583_v27  ;;  %6623 = vmatmul.mubr.bf16.vlgmr.msra.gmra.mrb[28].mxu0 %v6583_v27  ;;  %6664 = vmatmul.mubr.bf16.vlgmr.msra.gmra.mrb[60].mxu1 %v6583_v27 }
0x13c4   :  { %7348 = vmatpush3.bf16.msra.mxu0 %v7697_v47  ;;  %7363 = vmatprep.mubr.bf16.mxu0 %v7698_v29 }
0x13c5   :  { %7349 = vmatprep.subr.bf16.mxu0 %v7699_v46 }
0x13c8   :  { %7350 = vmatpush3.bf16.msra.mxu0 %v7699_v46 }
0x13c9   :  { %7351 = vmatprep.subr.bf16.mxu0 %v7700_v13 }
0x13cc   :  { %7352 = vmatpush3.bf16.msra.mxu0 %v7700_v13 }
0x13cd   :  { %7353 = vmatprep.subr.bf16.mxu0 %v7701_v17 }
0x13d0   :  { %7354 = vmatpush3.bf16.msra.mxu0 %v7701_v17 }
0x13d1   :  { %7355 = vmatprep.subr.bf16.mxu0 %v7702_v45 }
0x13d4   :  { %7356 = vmatpush3.bf16.msra.mxu0 %v7702_v45 }
0x13d5   :  { %7357 = vmatprep.subr.bf16.mxu0 %v7703_v32 }
0x13d8   :  { %7358 = vmatpush3.bf16.msra.mxu0 %v7703_v32 }
0x13d9   :  { %7359 = vmatprep.subr.bf16.mxu0 %v7704_v25 }
0x13dc   :  { %7360 = vmatpush3.bf16.msra.mxu0 %v7704_v25 }
0x13dd   :  { %7361 = vmatprep.subr.bf16.mxu0 %v7705_v36 }
0x13e0   :  { %7362 = vmatpush3.bf16.msra.mxu0 %v7705_v36 }
0x13e3   :  { %7364 = vmatmul.mubr.bf16.vlgmr.msra.gmra.mrb[112].mxu0 %v7706_v42 }
0x13e4   :  { %7367 = vmatprep.mubr.bf16.mxu0 %v7707_v51 }
0x1496   :  { %v6624_v49 = vpop.f32.mrb[28].mxu0  ;;  %v6665_v6 = vpop.f32.mrb[60].mxu1 }
0x1497   :  { %v7375_v60 = vadd.f32 %v6624_v49, %v11485_v11  ;;  %v6626_v37 = vpop.f32.mrb[29].mxu0  ;;  %v6667_v43 = vpop.f32.mrb[61].mxu1  ;;  %v7377_v30 = vadd.f32 %v6665_v6, %v11494_v10 }
0x1498   :  { %v7376_v7 = vadd.f32 %v6626_v37, %v11489_v0  ;;  %v6628_v44 = vpop.f32.mrb[30].mxu0  ;;  %v6669_v55 = vpop.f32.mrb[62].mxu1  ;;  %v7378_v38 = vadd.f32 %v6667_v43, %v11500_v3  ;;  %v7290_v3 = vld [vmem:[%s11777_s9] ss:$0 sm:$0xff]  ;;  %s8408_s9 = smov [#allocation19]  }
0x1499   :  { %v6676_v21 = vmul.f32 0.5, %v7375_v60  ;;  %v6629_v9 = vpop.f32.mrb[31].mxu0  ;;  %v6670_v59 = vpop.f32.mrb[63].mxu1  ;;  %s6950_s19 = sshll.u32 %s8408_s9, 4  ;;  %s6951_s19 = int_to_ptr.vmem [resolvable:$true] %s6950_s19 }
0x149a   :  { %v6680_v54 = vmul.f32 0.5, %v7376_v7  ;;  %v6685_v15 = vmul.f32 0.5, %v7378_v38  ;;  %s8359_s11 = scalar_lea.vmem %s6951_s19, 1024  ;;  %p8364_p9 = scmp.lt.s32.totalorder %s6951_s19, %s6951_s19 }
0x149b   :  { %7939 = vtanh.f32 %v6676_v21  ;;  %p8360_p8 = scmp.ne.s32.totalorder %s6951_s19, %s8359_s11  ;;  %p8365_p10 = scmp.lt.s32.totalorder %s8359_s11, %s8359_s11 }
0x149c   :  { %7941 = vtanh.f32 %v6680_v54 }
0x149d   :  { %7943 = vtanh.f32 %v7377_v30  ;;  %p8366_p11 = por %p8365_p10, %p8364_p9 }
0x149e   :  { %7945 = vtanh.f32 %v6685_v15 }
0x149f   :  { %p8367_p12 = pnand %p8366_p11, %p8360_p8 }
0x14a5   :  { %v7940_v62 = vpop.eup %7939 }
0x14a6   :  { %v7942_v11 = vpop.eup %7941  ;;  %v6678_v61 = vmul.f32 0.5, %v7940_v62 }
0x14a7   :  { %v6682_v14 = vmul.f32 0.5, %v7942_v11  ;;  %v7944_v47 = vpop.eup %7943 }
0x14a8   :  { %v6679_v0 = vadd.f32 0.5, %v6678_v61  ;;  %v7946_v41 = vpop.eup %7945 }
0x14a9   :  { %v6683_v34 = vadd.f32 0.5, %v6682_v14  ;;  %v6687_v10 = vmul.f32 0.5, %v7946_v41 }
0x14aa   :  { %v6690_v23 = vmul.f32 %v7944_v47, %v6679_v0 }
0x14ab   :  { %v6689_v33 = vmul.f32 %v6683_v34, %v11745_v26  ;;  %v6688_v58 = vadd.f32 0.5, %v6687_v10 }
0x14ad   :  { %v6691_v39 = vadd.f32 %v6690_v23, %v6689_v33 }
0x14af   :  { %7947 = vtanh.f32 %v6691_v39 }
0x14b6   :  { %v7365_v48 = vpop.f32.mrb[112].mxu0 }
0x14b7   :  { %v6843_v50 = vadd.f32 %v7365_v48, %v7290_v3  ;;  %v6834_v56 = vpop.f32.mrb[113].mxu0 }
0x14b8   :  { %v6835_v2 = vadd.f32 %v7290_v3, %v6834_v56  ;;  %v7366_v4 = vpop.f32.mrb[114].mxu0 }
0x14b9   :  { %v7948_v12 = vpop.eup %7947  ;;  %6869 = vmax.xlane.f32.xlu1 %v6843_v50  ;;  %v6837_v18 = vpop.f32.mrb[115].mxu0  ;;  %v6846_v8 = vadd.f32 %v7366_v4, %v7290_v3 }
0x14ba   :  { %v6693_v63 = vmul.f32 %v7948_v12, %v6688_v58  ;;  %6865 = vmax.xlane.f32.xlu0 %v6835_v2  ;;  %v6838_v28 = vadd.f32 %v7290_v3, %v6837_v18 }
0x14bc   :  { %v6694_v19 = vpack.c.bf16 %v6693_v63, %v6693_v63 }
0x14bd   :  { %6871 = vmax.xlane.f32.xlu1 %v6846_v8 }
0x14be   :  { %6696 = vst [vmem:[#allocation4 + $0x1c] sm:$0xf] %v6694_v19  ;;  %6867 = vmax.xlane.f32.xlu0 %v6838_v28 }
0x14c5   :  { %v7708_v35 = vld [vmem:[#allocation4 + $0x18] sm:$0xff]  }
0x14c6   :  { %7368 = vmatmul.mubr.bf16.gmra.mrb[116].mxu0 %v7708_v35 }
0x1546   :  { %v6870_v57 = vpop.xlane.xlu1 %6869 }
0x1547   :  { %v6866_v40 = vpop.xlane.xlu0 %6865  ;;  %v6883_v26 = vsub.f32 %v6843_v50, %v6870_v57 }
0x1548   :  { %v6881_v20 = vsub.f32 %v6835_v2, %v6866_v40 }
0x1549   :  { %v6893_v52 = vmul.f32 1.442695, %v6883_v26 }
0x154a   :  { %v6872_v22 = vpop.xlane.xlu1 %6871  ;;  %v6889_v24 = vmul.f32 1.442695, %v6881_v20 }
0x154b   :  { %v6868_v1 = vpop.xlane.xlu0 %6867  ;;  %v6884_v31 = vsub.f32 %v6846_v8, %v6872_v22 }
0x154c   :  { %v6882_v16 = vsub.f32 %v6838_v28, %v6868_v1  ;;  %7949 = vpow2.f32 %v6889_v24 }
0x154d   :  { %v6895_v13 = vmul.f32 1.442695, %v6884_v31 }
0x154e   :  { %v6891_v5 = vmul.f32 1.442695, %v6882_v16 }
0x1550   :  { %7951 = vpow2.f32 %v6891_v5 }
0x1551   :  { %7953 = vpow2.f32 %v6893_v52 }
0x1552   :  { %7955 = vpow2.f32 %v6895_v13 }
0x1556   :  { %v7950_v36 = vpop.eup %7949 }
0x155a   :  { %v7952_v42 = vpop.eup %7951 }
0x155b   :  { %v7954_v51 = vpop.eup %7953 }
0x155c   :  { %v7956_v49 = vpop.eup %7955 }
0x1599   :  { %v7369_v53 = vpop.f32.mrb[116].mxu0 }
0x159a   :  { %v6850_v27 = vpop.f32.mrb[117].mxu0  ;;  %v6859_v32 = vadd.f32 %v7369_v53, %v7290_v3 }
0x159b   :  { %v6851_v46 = vadd.f32 %v7290_v3, %v6850_v27  ;;  %v7370_v29 = vpop.f32.mrb[118].mxu0 }
0x159c   :  { %v6853_v17 = vpop.f32.mrb[119].mxu0  ;;  %v6862_v25 = vadd.f32 %v7370_v29, %v7290_v3 }
0x159d   :  { %v6854_v45 = vadd.f32 %v7290_v3, %v6853_v17  ;;  %6873 = vmax.xlane.f32.xlu0 %v6851_v46 }
0x159f   :  { %6875 = vmax.xlane.f32.xlu1 %v6854_v45 }
0x15a1   :  { %6877 = vmax.xlane.f32.xlu0 %v6859_v32 }
0x15a3   :  { %6879 = vmax.xlane.f32.xlu1 %v6862_v25 }
0x15a5   :  { %6905 = vadd.xlane.f32.xlu0 %v7950_v36 }
0x15a7   :  { %6907 = vadd.xlane.f32.xlu1 %v7952_v42 }
0x15a9   :  { %6909 = vadd.xlane.f32.xlu0 %v7954_v51 }
0x15ab   :  { %6911 = vadd.xlane.f32.xlu1 %v7956_v49 }
0x162a   :  { %v6874_v6 = vpop.xlane.xlu0 %6873 }
0x162b   :  { %v6885_v60 = vsub.f32 %v6851_v46, %v6874_v6 }
0x162c   :  { %v6876_v37 = vpop.xlane.xlu1 %6875 }
0x162d   :  { %v6897_v43 = vmul.f32 1.442695, %v6885_v60  ;;  %v6886_v7 = vsub.f32 %v6854_v45, %v6876_v37 }
0x162e   :  { %v6878_v44 = vpop.xlane.xlu0 %6877 }
0x162f   :  { %7957 = vpow2.f32 %v6897_v43  ;;  %v6899_v55 = vmul.f32 1.442695, %v6886_v7  ;;  %v6887_v21 = vsub.f32 %v6859_v32, %v6878_v44 }
0x1630   :  { %v6880_v9 = vpop.xlane.xlu1 %6879 }
0x1631   :  { %7959 = vpow2.f32 %v6899_v55  ;;  %v6901_v59 = vmul.f32 1.442695, %v6887_v21  ;;  %v6888_v54 = vsub.f32 %v6862_v25, %v6880_v9 }
0x1632   :  { %v6906_v30 = vpop.xlane.xlu0 %6905 }
0x1633   :  { %7961 = vpow2.f32 %v6901_v59  ;;  %v6903_v38 = vmul.f32 1.442695, %v6888_v54 }
0x1634   :  { %7963 = vrcp.f32 %v6906_v30  ;;  %v6908_v15 = vpop.xlane.xlu1 %6907 }
0x1635   :  { %7965 = vpow2.f32 %v6903_v38 }
0x1636   :  { %7967 = vrcp.f32 %v6908_v15  ;;  %v6910_v62 = vpop.xlane.xlu0 %6909 }
0x1637   :  { %7969 = vrcp.f32 %v6910_v62 }
0x1638   :  { %v6912_v11 = vpop.xlane.xlu1 %6911 }
0x1639   :  { %v7958_v61 = vpop.eup %7957  ;;  %7971 = vrcp.f32 %v6912_v11 }
0x163a   :  { %6913 = vadd.xlane.f32.xlu0 %v7958_v61 }
0x163b   :  { %v7960_v14 = vpop.eup %7959 }
0x163c   :  { %6915 = vadd.xlane.f32.xlu1 %v7960_v14 }
0x163d   :  { %v7962_v0 = vpop.eup %7961 }
0x163e   :  { %v7964_v47 = vpop.eup %7963  ;;  %6917 = vadd.xlane.f32.xlu0 %v7962_v0 }
0x163f   :  { %v7966_v34 = vpop.eup %7965  ;;  %v6929_v23 = vmul.f32 %v7964_v47, %v7950_v36 }
0x1640   :  { %v7968_v33 = vpop.eup %7967  ;;  %6919 = vadd.xlane.f32.xlu1 %v7966_v34 }
0x1641   :  { %v7970_v39 = vpop.eup %7969  ;;  %6937 = vst [vmem:[#allocation19] sm:$0xff] %v6929_v23  ;;  %v6930_v41 = vmul.f32 %v7968_v33, %v7952_v42 }
0x1642   :  { %v6931_v10 = vmul.f32 %v7970_v39, %v7954_v51 }
0x1643   :  { %v7972_v3 = vpop.eup %7971  ;;  %6938 = vst [vmem:[#allocation19 + $0x8] sm:$0xff] %v6930_v41 }
0x1644   :  { %6939 = vst [vmem:[#allocation19 + $0x10] sm:$0xff] %v6931_v10  ;;  %v6932_v48 = vmul.f32 %v7972_v3, %v7956_v49 }
0x1646   :  { %6940 = vst [vmem:[#allocation19 + $0x18] sm:$0xff] %v6932_v48 }
0x16c7   :  { %v6914_v50 = vpop.xlane.xlu0 %6913 }
0x16c8   :  { %7973 = vrcp.f32 %v6914_v50 }
0x16c9   :  { %v6916_v56 = vpop.xlane.xlu1 %6915 }
0x16ca   :  { %7975 = vrcp.f32 %v6916_v56 }
0x16cb   :  { %v6918_v58 = vpop.xlane.xlu0 %6917 }
0x16cc   :  { %7977 = vrcp.f32 %v6918_v58 }
0x16cd   :  { %v6920_v2 = vpop.xlane.xlu1 %6919 }
0x16ce   :  { %7979 = vrcp.f32 %v6920_v2 }
0x16d2   :  { %v7974_v4 = vpop.eup %7973 }
0x16d3   :  { %v6933_v12 = vmul.f32 %v7974_v4, %v7958_v61 }
0x16d4   :  { %v7976_v18 = vpop.eup %7975 }
0x16d5   :  { %6941 = vst [vmem:[#allocation19 + $0x20] sm:$0xff] %v6933_v12  ;;  %v6934_v63 = vmul.f32 %v7976_v18, %v7960_v14 }
0x16d6   :  { %v7978_v8 = vpop.eup %7977 }
0x16d7   :  { %6942 = vst [vmem:[#allocation19 + $0x28] sm:$0xff] %v6934_v63  ;;  %v6935_v19 = vmul.f32 %v7978_v8, %v7962_v0 }
0x16d8   :  { %v7980_v28 = vpop.eup %7979 }
0x16d9   :  { %6943 = vst [vmem:[#allocation19 + $0x30] sm:$0xff] %v6935_v19  ;;  %v6936_v35 = vmul.f32 %v7980_v28, %v7966_v34 }
0x16db   :  { %6944 = vst [vmem:[#allocation19 + $0x38] sm:$0xff] %v6936_v35 }
0x16dc   :  { %8370 = shalt.err (!%p8367_p12)
}
0x16dd   :  { %s8371_s12 = scalar_lea.hbm %s11778_s10, 1024 }
0x16de   :  { %p8372_p13 = scmp.ne.s32.totalorder %s11778_s10, %s8371_s12  ;;  %p8375_p0 = scmp.lt.u32.totalorder %s8371_s12, %s11778_s10 }
0x16e0   :  { %p8377_p1 = pnand %p8375_p0, %p8372_p13 }
0x16e2   :  { %8380 = shalt.err (!%p8377_p1)
}
0x16e3   :  { %s8409_s21 = smov 128   ;;  %s8410_s17 = smov 8  }
0x16e4   :  { %6956 = dma.vmem_to_hbm [thread:$0]  %s6951_s19, 1024, %s11778_s10, [#allocation7], %s8409_s21, %s8409_s21, %s8410_s17  }
0x16e5   :  { %8391 = dma.done.wait [#allocation7], 1024  }
0x16e6   :  { %8392 = vsyncadd [#allocation7], 4294966272 }
0x16e7   :  { %6960 = vsyncpa [#allocation6], 1 }
0x16e8   :  { %6961 = vsyncpa [#allocation9], 1 }
0x16e9   :  { %6962 = vsyncpa [#allocation12], 1 }
0x16ea   :  { %6963 = vsyncpa [#allocation15], 1 }
0x16eb   :  { %6964 = vsyncpa [#allocation18], 1 }
0x16ec   :  { %6965 = vsyncpa [#allocation7], 1 }

</bundles_post_ra>
